<compile_context>
chip_gen: v7x
topology: tpu7x:2x2x1
jax: 0.10.0
libtpu: 0.0.40
codegen_flags: <defaults>
</compile_context>

<pallas_src>
import functools

import numpy as np
import jax
import jax.numpy as jnp
from jax.experimental import pallas as pl
from jax.experimental.pallas import tpu as pltpu

LANE = 128
BN_EPS = 1e-4
LEAKINESS = 0.333                      # SparseConvNet default leakiness


def _round_up(x, m):
    return (x + m - 1) // m * m


def _vmem_limit_bytes():
    # Per-generation scoped-VMEM budget: ~3/4 of physical, capped at 96 MiB
    # (v5e/v6e: 128 MiB physical -> 96 MiB; v7x: 64 MiB -> 48 MiB).  Fallback 32 MiB.
    try:
        info = pltpu.get_tpu_info()
        cap = int(getattr(info, "vmem_capacity_bytes", 0) or 0)
        if cap > 0:
            return int(min(cap * 3 // 4, 96 * 1024 * 1024))
    except Exception:
        pass
    return 32 * 1024 * 1024


_VMEM_LIMIT = _vmem_limit_bytes()


def _compiler_params():
    return pltpu.CompilerParams(dimension_semantics=("parallel",),
                                vmem_limit_bytes=_VMEM_LIMIT)


# --------------------------------------------------------------------------- kernels

def _conv1x1_head_kernel(x_ref, w_ref, h1_ref, stats_ref):
    """First-block 1x1 submanifold conv + partial BN sums.

    x_ref : (1,h,w,Cin_pad) bf16 (already masked: inactive rows exactly zero)
    w_ref : (Cin_pad, Cout_pad) bf16, VMEM resident (constant index_map)
    h1_ref: (1,h,w,Cout_pad) bf16 ; stats_ref: (1,2,Cout_pad) f32 [sum, sum_sq]
    """
    _, h, w, cin = x_ref.shape
    cout = h1_ref.shape[-1]
    a = x_ref[...].reshape(h * w, cin)
    acc = jnp.dot(a, w_ref[...], preferred_element_type=jnp.float32)   # (h*w, Cout)
    h1_ref[...] = acc.reshape(1, h, w, cout).astype(h1_ref.dtype)
    s0 = jnp.sum(acc, axis=0, keepdims=True)
    s1 = jnp.sum(acc * acc, axis=0, keepdims=True)
    stats_ref[...] = jnp.concatenate([s0, s1], axis=0)[None]


def _fused_tail_conv1x1_kernel(hprev_ref, res_ref, scale_ref, shift_ref, mask_ref,
                               w_ref, xout_ref, h1_ref, stats_ref, *, leakiness):
    """Finalize previous block (BN2 affine + residual add + LeakyReLU + mask) fused with
    this block's 1x1 submanifold conv + partial BN sums.  The post-activation is computed
    in-register, written once (needed later as this block's residual) and fed straight to
    the 1x1 matmul -- no extra HBM read of the activation.
    """
    _, h, w, cpad = hprev_ref.shape
    cout = h1_ref.shape[-1]
    scale = scale_ref[...].reshape(1, 1, 1, -1)
    shift = shift_ref[...].reshape(1, 1, 1, -1)
    y = hprev_ref[...].astype(jnp.float32) * scale + shift            # BN2 affine
    y = y + res_ref[...].astype(jnp.float32)                          # AddTable
    y = jnp.where(y > 0, y, leakiness * y)                            # LeakyReLU
    y = y * mask_ref[...].astype(jnp.float32)                         # sparsity preserved
    yb = y.astype(jnp.bfloat16)
    xout_ref[...] = yb                                                 # block output x_i

    a = yb.reshape(h * w, cpad)
    acc = jnp.dot(a, w_ref[...], preferred_element_type=jnp.float32)  # 1x1 conv (MXU)
    h1_ref[...] = acc.reshape(1, h, w, cout).astype(h1_ref.dtype)
    s0 = jnp.sum(acc, axis=0, keepdims=True)
    s1 = jnp.sum(acc * acc, axis=0, keepdims=True)
    stats_ref[...] = jnp.concatenate([s0, s1], axis=0)[None]


def _convkxk_kernel(*refs, k, pre_bn, leakiness):
    """Optional fused BN affine + LeakyReLU + mask of the incoming activation, then
    in-kernel halo padding (VMEM scratch), folded-tap kxk submanifold conv as ONE matmul
    over K = k*k*Cin_pad, masking, and partial BN sums from the 2-D accumulator.
    """
    if pre_bn:
        x_ref, scale_ref, shift_ref, mask_ref, w_ref, y_ref, stats_ref, pad_ref = refs
    else:
        x_ref, mask_ref, w_ref, y_ref, stats_ref, pad_ref = refs
        scale_ref = shift_ref = None

    _, h, w, cin = x_ref.shape
    cout = y_ref.shape[-1]
    p = k // 2
    hw = h * w

    if pre_bn:
        y = (x_ref[...].astype(jnp.float32) * scale_ref[...].reshape(1, 1, 1, -1)
             + shift_ref[...].reshape(1, 1, 1, -1))
        y = jnp.where(y > 0, y, leakiness * y)
        y = y * mask_ref[...].astype(jnp.float32)
        a = y.reshape(h, w, cin).astype(jnp.bfloat16)
    else:
        a = x_ref[...].reshape(h, w, cin)          # already masked bf16

    # In-kernel halo padding: zero the VMEM scratch, copy the tile into its interior.
    pad_ref[...] = jnp.zeros(pad_ref.shape, pad_ref.dtype)
    pad_ref[p:p + h, p:p + w, :] = a
    xp = pad_ref[...]                              # (h+2p, w+2p, cin)

    # Fold the k*k taps into a single MXU matmul (K = k*k*cin >= 256 for k=3, cin=128).
    cols = [xp[dy:dy + h, dx:dx + w, :].reshape(hw, cin)
            for dy in range(k) for dx in range(k)]
    im2col = cols[0] if len(cols) == 1 else jnp.concatenate(cols, axis=-1)
    acc = jnp.dot(im2col, w_ref[...], preferred_element_type=jnp.float32)   # (hw, cout)

    m2 = mask_ref[...].astype(jnp.float32).reshape(hw, 1)
    accm = acc * m2                                # zero inactive sites
    y_ref[...] = accm.reshape(1, h, w, cout).astype(y_ref.dtype)
    s0 = jnp.sum(accm, axis=0, keepdims=True)
    s1 = jnp.sum(accm * accm, axis=0, keepdims=True)
    stats_ref[...] = jnp.concatenate([s0, s1], axis=0)[None]


def _bn_act_kernel(*refs, add_residual, leakiness):
    """Standalone finalize (only after the LAST block): BN affine + optional residual add
    + LeakyReLU + re-mask."""
    if add_residual:
        x_ref, res_ref, mask_ref, scale_ref, shift_ref, o_ref = refs
    else:
        x_ref, mask_ref, scale_ref, shift_ref, o_ref = refs
        res_ref = None
    y = (x_ref[...].astype(jnp.float32) * scale_ref[...].reshape(1, 1, 1, -1)
         + shift_ref[...].reshape(1, 1, 1, -1))
    if add_residual:
        y = y + res_ref[...].astype(jnp.float32)
    y = jnp.where(y > 0, y, leakiness * y)
    y = y * mask_ref[...].astype(jnp.float32)
    o_ref[...] = y.astype(o_ref.dtype)


# --------------------------------------------------------------------- pallas wrappers

def _conv1x1_head(x, wfold):
    n, h, w, cin = x.shape
    cout = wfold.shape[-1]
    return pl.pallas_call(
        _conv1x1_head_kernel,
        out_shape=(jax.ShapeDtypeStruct((n, h, w, cout), jnp.bfloat16),
                   jax.ShapeDtypeStruct((n, 2, cout), jnp.float32)),
        grid_spec=pltpu.PrefetchScalarGridSpec(
            num_scalar_prefetch=0, grid=(n,),
            in_specs=[pl.BlockSpec((1, h, w, cin), lambda i: (i, 0, 0, 0)),
                      pl.BlockSpec((cin, cout), lambda i: (0, 0))],
            out_specs=[pl.BlockSpec((1, h, w, cout), lambda i: (i, 0, 0, 0)),
                       pl.BlockSpec((1, 2, cout), lambda i: (i, 0, 0))]),
        compiler_params=_compiler_params(),
    )(x, wfold)


def _fused_tail_conv1x1(hprev, res, scale, shift, mask, wfold, *, leakiness):
    n, h, w, cpad = hprev.shape
    cout = wfold.shape[-1]
    kern = functools.partial(_fused_tail_conv1x1_kernel, leakiness=leakiness)
    return pl.pallas_call(
        kern,
        out_shape=(jax.ShapeDtypeStruct((n, h, w, cpad), jnp.bfloat16),    # x_i
                   jax.ShapeDtypeStruct((n, h, w, cout), jnp.bfloat16),    # h1
                   jax.ShapeDtypeStruct((n, 2, cout), jnp.float32)),       # stats1
        grid_spec=pltpu.PrefetchScalarGridSpec(
            num_scalar_prefetch=0, grid=(n,),
            in_specs=[pl.BlockSpec((1, h, w, cpad), lambda i: (i, 0, 0, 0)),
                      pl.BlockSpec((1, h, w, cpad), lambda i: (i, 0, 0, 0)),
                      pl.BlockSpec((1, cpad), lambda i: (0, 0)),
                      pl.BlockSpec((1, cpad), lambda i: (0, 0)),
                      pl.BlockSpec((1, h, w, 1), lambda i: (i, 0, 0, 0)),
                      pl.BlockSpec((cpad, cout), lambda i: (0, 0))],
            out_specs=[pl.BlockSpec((1, h, w, cpad), lambda i: (i, 0, 0, 0)),
                       pl.BlockSpec((1, h, w, cout), lambda i: (i, 0, 0, 0)),
                       pl.BlockSpec((1, 2, cout), lambda i: (i, 0, 0))]),
        compiler_params=_compiler_params(),
    )(hprev, res, scale, shift, mask, wfold)


def _convkxk(xin, scale, shift, mask, wfold, *, k, pre_bn, leakiness):
    n, h, w, cin = xin.shape
    cout = wfold.shape[-1]
    p = k // 2
    kern = functools.partial(_convkxk_kernel, k=k, pre_bn=pre_bn, leakiness=leakiness)
    in_arrays = [xin] + ([scale, shift] if pre_bn else []) + [mask, wfold]
    in_specs = [pl.BlockSpec((1, h, w, cin), lambda i: (i, 0, 0, 0))]
    if pre_bn:
        in_specs += [pl.BlockSpec((1, cin), lambda i: (0, 0)),
                     pl.BlockSpec((1, cin), lambda i: (0, 0))]
    in_specs += [pl.BlockSpec((1, h, w, 1), lambda i: (i, 0, 0, 0)),
                 pl.BlockSpec((k * k * cin, cout), lambda i: (0, 0))]
    return pl.pallas_call(
        kern,
        out_shape=(jax.ShapeDtypeStruct((n, h, w, cout), jnp.bfloat16),
                   jax.ShapeDtypeStruct((n, 2, cout), jnp.float32)),
        grid_spec=pltpu.PrefetchScalarGridSpec(
            num_scalar_prefetch=0, grid=(n,),
            in_specs=in_specs,
            out_specs=[pl.BlockSpec((1, h, w, cout), lambda i: (i, 0, 0, 0)),
                       pl.BlockSpec((1, 2, cout), lambda i: (i, 0, 0))],
            scratch_shapes=[pltpu.VMEM((h + 2 * p, w + 2 * p, cin), jnp.bfloat16)]),
        compiler_params=_compiler_params(),
    )(*in_arrays)


def _bn_act(x, res, mask, scale, shift, *, add_residual, leakiness):
    n, h, w, cpad = x.shape
    kern = functools.partial(_bn_act_kernel, add_residual=add_residual,
                             leakiness=leakiness)
    in_arrays = [x] + ([res] if add_residual else []) + [mask, scale, shift]
    in_specs = [pl.BlockSpec((1, h, w, cpad), lambda i: (i, 0, 0, 0))]
    if add_residual:
        in_specs.append(pl.BlockSpec((1, h, w, cpad), lambda i: (i, 0, 0, 0)))
    in_specs += [pl.BlockSpec((1, h, w, 1), lambda i: (i, 0, 0, 0)),
                 pl.BlockSpec((1, cpad), lambda i: (0, 0)),
                 pl.BlockSpec((1, cpad), lambda i: (0, 0))]
    return pl.pallas_call(
        kern,
        out_shape=jax.ShapeDtypeStruct((n, h, w, cpad), jnp.bfloat16),
        grid_spec=pltpu.PrefetchScalarGridSpec(
            num_scalar_prefetch=0, grid=(n,),
            in_specs=in_specs,
            out_specs=pl.BlockSpec((1, h, w, cpad), lambda i: (i, 0, 0, 0))),
        compiler_params=_compiler_params(),
    )(*in_arrays)


# ------------------------------------------------------------------- block-level glue

def _bn_scale_shift(stats, count, gamma_pad, beta_pad):
    s = jnp.sum(stats, axis=0)                    # (2, Cpad) tiny XLA reduce
    mean = s[0] / count
    var = s[1] / count - mean * mean              # biased variance over active rows
    inv = jax.lax.rsqrt(var + BN_EPS)
    scale = gamma_pad * inv
    shift = beta_pad - mean * scale
    return scale[None, :].astype(jnp.float32), shift[None, :].astype(jnp.float32)


def _identity_scale_shift(cpad):
    return jnp.ones((1, cpad), jnp.float32), jnp.zeros((1, cpad), jnp.float32)


def sparse_block_series_forward(x_nchw, params_list, *, kernel, out_channels,
                                residual=True, batch_norm=True, activation='leaky'):
    """Forward of SparseBlockSeries on a densified NCHW input.  Returns dense NCHW f32."""
    leakiness = LEAKINESS if activation == 'leaky' else 0.0
    n, cin, h, w = x_nchw.shape
    x = jnp.transpose(x_nchw, (0, 2, 3, 1)).astype(jnp.float32)        # NHWC
    # Active-site mask from the ORIGINAL input (shared by every block / layer).
    mask_f32 = (jnp.max(jnp.abs(x), axis=-1, keepdims=True) > 0).astype(jnp.float32)
    count = jnp.maximum(jnp.sum(mask_f32), 1.0)
    mask = mask_f32.astype(jnp.bfloat16)                               # 0/1 exact in bf16

    cin_pad = _round_up(cin, LANE)
    xb = jnp.pad(x, ((0, 0), (0, 0), (0, 0), (0, cin_pad - cin))).astype(jnp.bfloat16)

    def fold_w(wp):                                # (k*k, Cin_pad, Cout_pad) -> 2-D
        kk, ci, co = wp.shape
        return wp.reshape(kk * ci, co)

    def sc_sh(stats, gpad, bpad, cpad):
        if batch_norm:
            return _bn_scale_shift(stats, count, gpad, bpad)
        return _identity_scale_shift(cpad)

    if residual:
        pending = None                             # (h2, sc2, sh2, residual)
        for prm in params_list:
            w1 = fold_w(prm['w1'])
            w2 = fold_w(prm['w2'])
            if pending is None:
                h1, st1 = _conv1x1_head(xb, w1)
                res_i = xb
            else:
                h2p, sc2p, sh2p, resp = pending
                # finalize previous block fused with this block's 1x1 conv
                res_i, h1, st1 = _fused_tail_conv1x1(h2p, resp, sc2p, sh2p, mask, w1,
                                                     leakiness=leakiness)
            sc1, sh1 = sc_sh(st1, prm.get('g1'), prm.get('b1'), h1.shape[-1])
            # BN1 affine + LeakyReLU + mask fused into the kxk conv kernel
            h2, st2 = _convkxk(h1, sc1, sh1, mask, w2, k=kernel, pre_bn=True,
                               leakiness=leakiness)
            sc2, sh2 = sc_sh(st2, prm.get('g2'), prm.get('b2'), h2.shape[-1])
            pending = (h2, sc2, sh2, res_i)
        h2, sc2, sh2, res = pending
        xb = _bn_act(h2, res, mask, sc2, sh2, add_residual=True, leakiness=leakiness)
    else:
        pending = None                             # (h, sc, sh)
        for prm in params_list:
            w1 = fold_w(prm['w1'])
            if pending is None:
                h1, st1 = _convkxk(xb, None, None, mask, w1, k=kernel, pre_bn=False,
                                   leakiness=leakiness)
            else:
                hp, scp, shp = pending
                h1, st1 = _convkxk(hp, scp, shp, mask, w1, k=kernel, pre_bn=True,
                                   leakiness=leakiness)
            sc1, sh1 = sc_sh(st1, prm.get('g1'), prm.get('b1'), h1.shape[-1])
            pending = (h1, sc1, sh1)
        hp, scp, shp = pending
        xb = _bn_act(hp, None, mask, scp, shp, add_residual=False, leakiness=leakiness)

    out = xb[..., :out_channels].astype(jnp.float32)
    return jnp.transpose(out, (0, 3, 1, 2))                            # back to NCHW


# ------------------------------------------------------------------- params / reference

def init_block_params(key, infilters, outfilters1, outfilters2, kernel, residual=True):
    ks = jax.random.split(key, 6)
    if residual:
        w1 = jax.random.normal(ks[0], (1, infilters, outfilters1),
                               jnp.float32) / np.sqrt(infilters)
        w2 = jax.random.normal(ks[1], (kernel * kernel, outfilters1, outfilters2),
                               jnp.float32) / np.sqrt(kernel * kernel * outfilters1)
        g1 = 1.0 + 0.1 * jax.random.normal(ks[2], (outfilters1,), jnp.float32)
        b1 = 0.1 * jax.random.normal(ks[3], (outfilters1,), jnp.float32)
        g2 = 1.0 + 0.1 * jax.random.normal(ks[4], (outfilters2,), jnp.float32)
        b2 = 0.1 * jax.random.normal(ks[5], (outfilters2,), jnp.float32)
        return dict(w1=w1, g1=g1, b1=b1, w2=w2, g2=g2, b2=b2)
    w1 = jax.random.normal(ks[0], (kernel * kernel, infilters, outfilters1),
                           jnp.float32) / np.sqrt(kernel * kernel * infilters)
    g1 = 1.0 + 0.1 * jax.random.normal(ks[2], (outfilters1,), jnp.float32)
    b1 = 0.1 * jax.random.normal(ks[3], (outfilters1,), jnp.float32)
    return dict(w1=w1, g1=g1, b1=b1)


def pad_block_params(p):
    def pad_w(wgt):
        return jnp.pad(wgt, ((0, 0),
                             (0, _round_up(wgt.shape[1], LANE) - wgt.shape[1]),
                             (0, _round_up(wgt.shape[2], LANE) - wgt.shape[2]))
                       ).astype(jnp.bfloat16)

    def pad_v(v):
        return jnp.pad(v, (0, _round_up(v.shape[0], LANE) - v.shape[0])
                       ).astype(jnp.float32)

    out = {}
    for name, val in p.items():
        out[name] = pad_w(val) if name.startswith('w') else pad_v(val)
    return out


def reference_forward(x_nchw, raw_params_list, *, kernel, residual=True,
                      batch_norm=True, activation='leaky'):
    """Pure-JAX reference mirroring the kernel path's dtype behaviour (bf16 activations)."""
    leak = LEAKINESS if activation == 'leaky' else 0.0
    x = jnp.transpose(x_nchw, (0, 2, 3, 1)).astype(jnp.float32)
    n, h, w, _ = x.shape
    mask = (jnp.max(jnp.abs(x), axis=-1, keepdims=True) > 0).astype(jnp.float32)
    count = jnp.maximum(jnp.sum(mask), 1.0)
    xb = x.astype(jnp.bfloat16)

    def conv(a_bf16, w_f32, k):
        wb = w_f32.astype(jnp.bfloat16)
        p = k // 2
        ap = jnp.pad(a_bf16, ((0, 0), (p, p), (p, p), (0, 0)))
        out = jnp.zeros((n, h, w, w_f32.shape[-1]), jnp.float32)
        for dy in range(k):
            for dx in range(k):
                out = out + jax.lax.dot_general(
                    ap[:, dy:dy + h, dx:dx + w, :], wb[dy * k + dx],
                    (((3,), (0,)), ((), ())), preferred_element_type=jnp.float32)
        return out * mask

    def bn_act(hconv, g, b, res, do_bn):
        if do_bn:
            s0 = jnp.sum(hconv, axis=(0, 1, 2))
            s1 = jnp.sum(hconv * hconv, axis=(0, 1, 2))
            mean = s0 / count
            var = s1 / count - mean * mean
            scale = g * jax.lax.rsqrt(var + BN_EPS)
            shift = b - mean * scale
        else:
            scale = jnp.ones((hconv.shape[-1],), jnp.float32)
            shift = jnp.zeros((hconv.shape[-1],), jnp.float32)
        xq = hconv.astype(jnp.bfloat16).astype(jnp.float32)
        y = xq * scale + shift
        if res is not None:
            y = y + res.astype(jnp.float32)
        y = jnp.where(y > 0, y, leak * y)
        return (y * mask).astype(jnp.bfloat16)

    for p in raw_params_list:
        if residual:
            h1 = conv(xb, p['w1'], 1)
            a1 = bn_act(h1, p['g1'], p['b1'], None, batch_norm)
            h2 = conv(a1, p['w2'], kernel)
            xb = bn_act(h2, p['g2'], p['b2'], xb, batch_norm)
        else:
            h1 = conv(xb, p['w1'], kernel)
            xb = bn_act(h1, p['g1'], p['b1'], None, batch_norm)
    return jnp.transpose(xb.astype(jnp.float32), (0, 3, 1, 2))


# ------------------------------------------------------------------------------- main

if __name__ == "__main__":
    N, C_IN, H, W = 2, 4, 16, 16
    C1, C2 = 8, 4                    # residual add requires C2 == C_IN
    KERNEL = 3
    N_BLOCKS = 2

    key = jax.random.PRNGKey(0)
    kx, km, kp = jax.random.split(key, 3)

    x = jax.random.normal(kx, (N, C_IN, H, W), jnp.float32)
    active = jax.random.bernoulli(km, 0.35, (N, 1, H, W)).astype(jnp.float32)
    x = x * active                   # densified sparse input: ~65% of sites fully zero

    block_keys = jax.random.split(kp, N_BLOCKS)
    raw_params = [init_block_params(block_keys[i], C_IN, C1, C2, KERNEL, residual=True)
                  for i in range(N_BLOCKS)]
    padded_params = [pad_block_params(p) for p in raw_params]

    fwd = jax.jit(functools.partial(
        sparse_block_series_forward, kernel=KERNEL, out_channels=C2,
        residual=True, batch_norm=True, activation='leaky'))
    out = jax.block_until_ready(fwd(x, padded_params))

    ref = jax.block_until_ready(reference_forward(
        x, raw_params, kernel=KERNEL, residual=True,
        batch_norm=True, activation='leaky'))

    # sparsity pattern must be preserved exactly (inactive sites stay exactly zero)
    inactive = np.asarray(active[:, 0] == 0)
    out_nhwc = np.asarray(jnp.transpose(out, (0, 2, 3, 1)))
    assert float(np.max(np.abs(out_nhwc[inactive]))) == 0.0, "sparsity pattern not preserved"

    max_err = float(jnp.max(jnp.abs(out - ref)))
    assert max_err < 0.1, f"max abs error vs reference: {max_err}"

    print("KERNEL_OK")
</pallas_src>

<mosaic_0001>
module attributes {stable_mosaic.version = 11 : i64} {
  func.func @_conv1x1_head_kernel(%arg0: i32, %arg1: memref<1x16x16x128xbf16, #tpu.memory_space<vmem>>, %arg2: memref<128x128xbf16, #tpu.memory_space<vmem>>, %arg3: memref<1x16x16x128xbf16, #tpu.memory_space<vmem>>, %arg4: memref<1x2x128xf32, #tpu.memory_space<vmem>>) attributes {dimension_semantics = [#tpu.dimension_semantics<parallel>], iteration_bounds = array<i64: 2>, scalar_prefetch = 0 : i64, scratch_operands = 0 : i64, tpu.core_type = #tpu.core_type<tc>, window_params = [{transform_indices = @transform_0, window_bounds = array<i64: 1, 16, 16, 128>}, {pipeline_mode = #tpu.pipeline_mode<synchronous>, transform_indices = @transform_1, window_bounds = array<i64: 128, 128>}, {transform_indices = @transform_2, window_bounds = array<i64: 1, 16, 16, 128>}, {transform_indices = @transform_3, window_bounds = array<i64: 1, 2, 128>}]} {
    %c0 = arith.constant 0 : index
    %c0_0 = arith.constant 0 : index
    %c0_1 = arith.constant 0 : index
    %c0_2 = arith.constant 0 : index
    %0 = vector.load %arg1[%c0, %c0_0, %c0_1, %c0_2] : memref<1x16x16x128xbf16, #tpu.memory_space<vmem>>, vector<1x16x16x128xbf16>
    %1 = vector.shape_cast %0 : vector<1x16x16x128xbf16> to vector<256x128xbf16>
    %c0_3 = arith.constant 0 : index
    %c0_4 = arith.constant 0 : index
    %2 = vector.load %arg2[%c0_3, %c0_4] : memref<128x128xbf16, #tpu.memory_space<vmem>>, vector<128x128xbf16>
    %cst = arith.constant dense<0.000000e+00> : vector<256x128xf32>
    %3 = tpu.matmul %1, %2, %cst {dimension_numbers = #tpu.dot_dimension_numbers<[1], [0], [0], [1], [0, 0, 1, 1], [], []>} : vector<256x128xbf16>, vector<128x128xbf16>, vector<256x128xf32> -> vector<256x128xf32>
    %4 = vector.shape_cast %3 : vector<256x128xf32> to vector<1x16x16x128xf32>
    %5 = arith.truncf %4 : vector<1x16x16x128xf32> to vector<1x16x16x128xbf16>
    %c0_5 = arith.constant 0 : index
    %c0_6 = arith.constant 0 : index
    %c0_7 = arith.constant 0 : index
    %c0_8 = arith.constant 0 : index
    %6 = vector.load %arg3[%c0_5, %c0_6, %c0_7, %c0_8] : memref<1x16x16x128xbf16, #tpu.memory_space<vmem>>, vector<1x16x16x128xbf16>
    tpu.vector_store %arg3[%c0_5, %c0_6, %c0_7, %c0_8], %5 {strides = array<i32>} : memref<1x16x16x128xbf16, #tpu.memory_space<vmem>>, vector<1x16x16x128xbf16>,
    %cst_9 = arith.constant dense<0.000000e+00> : vector<128xf32>
    %7 = vector.multi_reduction <add>, %3, %cst_9 [0] : vector<256x128xf32> to vector<128xf32>
    %8 = vector.shape_cast %7 : vector<128xf32> to vector<1x128xf32>
    %9 = arith.mulf %3, %3 : vector<256x128xf32>
    %cst_10 = arith.constant dense<0.000000e+00> : vector<128xf32>
    %10 = vector.multi_reduction <add>, %9, %cst_10 [0] : vector<256x128xf32> to vector<128xf32>
    %11 = vector.shape_cast %10 : vector<128xf32> to vector<1x128xf32>
    %12 = tpu.concatenate %8, %11 in 0 : vector<1x128xf32>, vector<1x128xf32> -> vector<2x128xf32>
    %13 = vector.shape_cast %12 : vector<2x128xf32> to vector<1x2x128xf32>
    %c0_11 = arith.constant 0 : index
    %c0_12 = arith.constant 0 : index
    %c0_13 = arith.constant 0 : index
    %14 = vector.load %arg4[%c0_11, %c0_12, %c0_13] : memref<1x2x128xf32, #tpu.memory_space<vmem>>, vector<1x2x128xf32>
    tpu.vector_store %arg4[%c0_11, %c0_12, %c0_13], %13 {strides = array<i32>} : memref<1x2x128xf32, #tpu.memory_space<vmem>>, vector<1x2x128xf32>,
    return
  }
  func.func @transform_0(%arg0: i32) -> (i32, i32, i32, i32) {
    %c0_i32 = arith.constant 0 : i32
    %c0_i32_0 = arith.constant 0 : i32
    %c0_i32_1 = arith.constant 0 : i32
    %c0_i32_2 = arith.constant 0 : i32
    return %arg0, %c0_i32, %c0_i32_0, %c0_i32_1 : i32, i32, i32, i32
  }
  func.func @transform_1(%arg0: i32) -> (i32, i32) {
    %c0_i32 = arith.constant 0 : i32
    %c0_i32_0 = arith.constant 0 : i32
    %c0_i32_1 = arith.constant 0 : i32
    return %c0_i32, %c0_i32_0 : i32, i32
  }
  func.func @transform_2(%arg0: i32) -> (i32, i32, i32, i32) {
    %c0_i32 = arith.constant 0 : i32
    %c0_i32_0 = arith.constant 0 : i32
    %c0_i32_1 = arith.constant 0 : i32
    %c0_i32_2 = arith.constant 0 : i32
    return %arg0, %c0_i32, %c0_i32_0, %c0_i32_1 : i32, i32, i32, i32
  }
  func.func @transform_3(%arg0: i32) -> (i32, i32, i32) {
    %c0_i32 = arith.constant 0 : i32
    %c0_i32_0 = arith.constant 0 : i32
    %c0_i32_1 = arith.constant 0 : i32
    return %arg0, %c0_i32, %c0_i32_0 : i32, i32, i32
  }
}

module attributes {stable_mosaic.version = 11 : i64} {
  func.func @_convkxk_kernel(%arg0: i32, %arg1: memref<1x16x16x128xbf16, #tpu.memory_space<vmem>>, %arg2: memref<1x128xf32, #tpu.memory_space<vmem>>, %arg3: memref<1x128xf32, #tpu.memory_space<vmem>>, %arg4: memref<1x16x16x1xbf16, #tpu.memory_space<vmem>>, %arg5: memref<1152x128xbf16, #tpu.memory_space<vmem>>, %arg6: memref<1x16x16x128xbf16, #tpu.memory_space<vmem>>, %arg7: memref<1x2x128xf32, #tpu.memory_space<vmem>>, %arg8: memref<18x18x128xbf16, #tpu.memory_space<vmem>>) attributes {dimension_semantics = [#tpu.dimension_semantics<parallel>], iteration_bounds = array<i64: 2>, scalar_prefetch = 0 : i64, scratch_operands = 1 : i64, tpu.core_type = #tpu.core_type<tc>, window_params = [{transform_indices = @transform_0, window_bounds = array<i64: 1, 16, 16, 128>}, {pipeline_mode = #tpu.pipeline_mode<synchronous>, transform_indices = @transform_1, window_bounds = array<i64: 1, 128>}, {pipeline_mode = #tpu.pipeline_mode<synchronous>, transform_indices = @transform_2, window_bounds = array<i64: 1, 128>}, {transform_indices = @transform_3, window_bounds = array<i64: 1, 16, 16, 1>}, {pipeline_mode = #tpu.pipeline_mode<synchronous>, transform_indices = @transform_4, window_bounds = array<i64: 1152, 128>}, {transform_indices = @transform_5, window_bounds = array<i64: 1, 16, 16, 128>}, {transform_indices = @transform_6, window_bounds = array<i64: 1, 2, 128>}]} {
    %c0 = arith.constant 0 : index
    %c0_0 = arith.constant 0 : index
    %c0_1 = arith.constant 0 : index
    %c0_2 = arith.constant 0 : index
    %0 = vector.load %arg1[%c0, %c0_0, %c0_1, %c0_2] : memref<1x16x16x128xbf16, #tpu.memory_space<vmem>>, vector<1x16x16x128xbf16>
    %1 = arith.extf %0 : vector<1x16x16x128xbf16> to vector<1x16x16x128xf32>
    %c0_3 = arith.constant 0 : index
    %c0_4 = arith.constant 0 : index
    %2 = vector.load %arg2[%c0_3, %c0_4] : memref<1x128xf32, #tpu.memory_space<vmem>>, vector<1x128xf32>
    %3 = vector.shape_cast %2 : vector<1x128xf32> to vector<1x1x1x128xf32>
    %4 = vector.broadcast %3 : vector<1x1x1x128xf32> to vector<1x16x16x128xf32>
    %5 = arith.mulf %1, %4 : vector<1x16x16x128xf32>
    %c0_5 = arith.constant 0 : index
    %c0_6 = arith.constant 0 : index
    %6 = vector.load %arg3[%c0_5, %c0_6] : memref<1x128xf32, #tpu.memory_space<vmem>>, vector<1x128xf32>
    %7 = vector.shape_cast %6 : vector<1x128xf32> to vector<1x1x1x128xf32>
    %8 = vector.broadcast %7 : vector<1x1x1x128xf32> to vector<1x16x16x128xf32>
    %9 = arith.addf %5, %8 : vector<1x16x16x128xf32>
    %cst = arith.constant 0.000000e+00 : f32
    %10 = vector.broadcast %cst : f32 to vector<1x16x16x128xf32>
    %11 = arith.cmpf ogt, %9, %10 : vector<1x16x16x128xf32>
    %cst_7 = arith.constant 3.330000e-01 : f32
    %12 = vector.broadcast %cst_7 : f32 to vector<1x16x16x128xf32>
    %13 = arith.mulf %12, %9 : vector<1x16x16x128xf32>
    %14 = arith.select %11, %9, %13 : vector<1x16x16x128xi1>, vector<1x16x16x128xf32>
    %c0_8 = arith.constant 0 : index
    %c0_9 = arith.constant 0 : index
    %c0_10 = arith.constant 0 : index
    %c0_11 = arith.constant 0 : index
    %15 = vector.load %arg4[%c0_8, %c0_9, %c0_10, %c0_11] : memref<1x16x16x1xbf16, #tpu.memory_space<vmem>>, vector<1x16x16x1xbf16>
    %16 = arith.extf %15 : vector<1x16x16x1xbf16> to vector<1x16x16x1xf32>
    %17 = vector.broadcast %16 : vector<1x16x16x1xf32> to vector<1x16x16x128xf32>
    %18 = arith.mulf %14, %17 : vector<1x16x16x128xf32>
    %19 = vector.shape_cast %18 : vector<1x16x16x128xf32> to vector<16x16x128xf32>
    %20 = arith.truncf %19 : vector<16x16x128xf32> to vector<16x16x128xbf16>
    %cst_12 = arith.constant 0.000000e+00 : bf16
    %21 = vector.broadcast %cst_12 : bf16 to vector<18x18x128xbf16>
    %c0_13 = arith.constant 0 : index
    %c0_14 = arith.constant 0 : index
    %c0_15 = arith.constant 0 : index
    %22 = vector.load %arg8[%c0_13, %c0_14, %c0_15] : memref<18x18x128xbf16, #tpu.memory_space<vmem>>, vector<18x18x128xbf16>
    tpu.vector_store %arg8[%c0_13, %c0_14, %c0_15], %21 {strides = array<i32>} : memref<18x18x128xbf16, #tpu.memory_space<vmem>>, vector<18x18x128xbf16>,
    %c1 = arith.constant 1 : index
    %c1_16 = arith.constant 1 : index
    %c0_17 = arith.constant 0 : index
    %23 = vector.load %arg8[%c1, %c1_16, %c0_17] : memref<18x18x128xbf16, #tpu.memory_space<vmem>>, vector<16x16x128xbf16>
    tpu.vector_store %arg8[%c1, %c1_16, %c0_17], %20 {strides = array<i32>} : memref<18x18x128xbf16, #tpu.memory_space<vmem>>, vector<16x16x128xbf16>,
    %c0_18 = arith.constant 0 : index
    %c0_19 = arith.constant 0 : index
    %c0_20 = arith.constant 0 : index
    %24 = vector.load %arg8[%c0_18, %c0_19, %c0_20] : memref<18x18x128xbf16, #tpu.memory_space<vmem>>, vector<18x18x128xbf16>
    %25 = vector.extract_strided_slice %24 {offsets = [0, 0, 0], sizes = [16, 16, 128], strides = [1, 1, 1]} : vector<18x18x128xbf16> to vector<16x16x128xbf16>
    %26 = vector.shape_cast %25 : vector<16x16x128xbf16> to vector<256x128xbf16>
    %27 = vector.extract_strided_slice %24 {offsets = [0, 1, 0], sizes = [16, 16, 128], strides = [1, 1, 1]} : vector<18x18x128xbf16> to vector<16x16x128xbf16>
    %28 = vector.shape_cast %27 : vector<16x16x128xbf16> to vector<256x128xbf16>
    %29 = vector.extract_strided_slice %24 {offsets = [0, 2, 0], sizes = [16, 16, 128], strides = [1, 1, 1]} : vector<18x18x128xbf16> to vector<16x16x128xbf16>
    %30 = vector.shape_cast %29 : vector<16x16x128xbf16> to vector<256x128xbf16>
    %31 = vector.extract_strided_slice %24 {offsets = [1, 0, 0], sizes = [16, 16, 128], strides = [1, 1, 1]} : vector<18x18x128xbf16> to vector<16x16x128xbf16>
    %32 = vector.shape_cast %31 : vector<16x16x128xbf16> to vector<256x128xbf16>
    %33 = vector.extract_strided_slice %24 {offsets = [1, 1, 0], sizes = [16, 16, 128], strides = [1, 1, 1]} : vector<18x18x128xbf16> to vector<16x16x128xbf16>
    %34 = vector.shape_cast %33 : vector<16x16x128xbf16> to vector<256x128xbf16>
    %35 = vector.extract_strided_slice %24 {offsets = [1, 2, 0], sizes = [16, 16, 128], strides = [1, 1, 1]} : vector<18x18x128xbf16> to vector<16x16x128xbf16>
    %36 = vector.shape_cast %35 : vector<16x16x128xbf16> to vector<256x128xbf16>
    %37 = vector.extract_strided_slice %24 {offsets = [2, 0, 0], sizes = [16, 16, 128], strides = [1, 1, 1]} : vector<18x18x128xbf16> to vector<16x16x128xbf16>
    %38 = vector.shape_cast %37 : vector<16x16x128xbf16> to vector<256x128xbf16>
    %39 = vector.extract_strided_slice %24 {offsets = [2, 1, 0], sizes = [16, 16, 128], strides = [1, 1, 1]} : vector<18x18x128xbf16> to vector<16x16x128xbf16>
    %40 = vector.shape_cast %39 : vector<16x16x128xbf16> to vector<256x128xbf16>
    %41 = vector.extract_strided_slice %24 {offsets = [2, 2, 0], sizes = [16, 16, 128], strides = [1, 1, 1]} : vector<18x18x128xbf16> to vector<16x16x128xbf16>
    %42 = vector.shape_cast %41 : vector<16x16x128xbf16> to vector<256x128xbf16>
    %43 = tpu.concatenate %26, %28, %30, %32, %34, %36, %38, %40, %42 in 1 : vector<256x128xbf16>, vector<256x128xbf16>, vector<256x128xbf16>, vector<256x128xbf16>, vector<256x128xbf16>, vector<256x128xbf16>, vector<256x128xbf16>, vector<256x128xbf16>, vector<256x128xbf16> -> vector<256x1152xbf16>
    %c0_21 = arith.constant 0 : index
    %c0_22 = arith.constant 0 : index
    %44 = vector.load %arg5[%c0_21, %c0_22] : memref<1152x128xbf16, #tpu.memory_space<vmem>>, vector<1152x128xbf16>
    %cst_23 = arith.constant dense<0.000000e+00> : vector<256x128xf32>
    %45 = tpu.matmul %43, %44, %cst_23 {dimension_numbers = #tpu.dot_dimension_numbers<[1], [0], [0], [1], [0, 0, 1, 1], [], []>} : vector<256x1152xbf16>, vector<1152x128xbf16>, vector<256x128xf32> -> vector<256x128xf32>
    %c0_24 = arith.constant 0 : index
    %c0_25 = arith.constant 0 : index
    %c0_26 = arith.constant 0 : index
    %c0_27 = arith.constant 0 : index
    %46 = vector.load %arg4[%c0_24, %c0_25, %c0_26, %c0_27] : memref<1x16x16x1xbf16, #tpu.memory_space<vmem>>, vector<1x16x16x1xbf16>
    %47 = arith.extf %46 : vector<1x16x16x1xbf16> to vector<1x16x16x1xf32>
    %48 = vector.shape_cast %47 : vector<1x16x16x1xf32> to vector<256x1xf32>
    %49 = vector.broadcast %48 : vector<256x1xf32> to vector<256x128xf32>
    %50 = arith.mulf %45, %49 : vector<256x128xf32>
    %51 = vector.shape_cast %50 : vector<256x128xf32> to vector<1x16x16x128xf32>
    %52 = arith.truncf %51 : vector<1x16x16x128xf32> to vector<1x16x16x128xbf16>
    %c0_28 = arith.constant 0 : index
    %c0_29 = arith.constant 0 : index
    %c0_30 = arith.constant 0 : index
    %c0_31 = arith.constant 0 : index
    %53 = vector.load %arg6[%c0_28, %c0_29, %c0_30, %c0_31] : memref<1x16x16x128xbf16, #tpu.memory_space<vmem>>, vector<1x16x16x128xbf16>
    tpu.vector_store %arg6[%c0_28, %c0_29, %c0_30, %c0_31], %52 {strides = array<i32>} : memref<1x16x16x128xbf16, #tpu.memory_space<vmem>>, vector<1x16x16x128xbf16>,
    %cst_32 = arith.constant dense<0.000000e+00> : vector<128xf32>
    %54 = vector.multi_reduction <add>, %50, %cst_32 [0] : vector<256x128xf32> to vector<128xf32>
    %55 = vector.shape_cast %54 : vector<128xf32> to vector<1x128xf32>
    %56 = arith.mulf %50, %50 : vector<256x128xf32>
    %cst_33 = arith.constant dense<0.000000e+00> : vector<128xf32>
    %57 = vector.multi_reduction <add>, %56, %cst_33 [0] : vector<256x128xf32> to vector<128xf32>
    %58 = vector.shape_cast %57 : vector<128xf32> to vector<1x128xf32>
    %59 = tpu.concatenate %55, %58 in 0 : vector<1x128xf32>, vector<1x128xf32> -> vector<2x128xf32>
    %60 = vector.shape_cast %59 : vector<2x128xf32> to vector<1x2x128xf32>
    %c0_34 = arith.constant 0 : index
    %c0_35 = arith.constant 0 : index
    %c0_36 = arith.constant 0 : index
    %61 = vector.load %arg7[%c0_34, %c0_35, %c0_36] : memref<1x2x128xf32, #tpu.memory_space<vmem>>, vector<1x2x128xf32>
    tpu.vector_store %arg7[%c0_34, %c0_35, %c0_36], %60 {strides = array<i32>} : memref<1x2x128xf32, #tpu.memory_space<vmem>>, vector<1x2x128xf32>,
    return
  }
  func.func @transform_0(%arg0: i32) -> (i32, i32, i32, i32) {
    %c0_i32 = arith.constant 0 : i32
    %c0_i32_0 = arith.constant 0 : i32
    %c0_i32_1 = arith.constant 0 : i32
    %c0_i32_2 = arith.constant 0 : i32
    return %arg0, %c0_i32, %c0_i32_0, %c0_i32_1 : i32, i32, i32, i32
  }
  func.func @transform_1(%arg0: i32) -> (i32, i32) {
    %c0_i32 = arith.constant 0 : i32
    %c0_i32_0 = arith.constant 0 : i32
    %c0_i32_1 = arith.constant 0 : i32
    return %c0_i32, %c0_i32_0 : i32, i32
  }
  func.func @transform_2(%arg0: i32) -> (i32, i32) {
    %c0_i32 = arith.constant 0 : i32
    %c0_i32_0 = arith.constant 0 : i32
    %c0_i32_1 = arith.constant 0 : i32
    return %c0_i32, %c0_i32_0 : i32, i32
  }
  func.func @transform_3(%arg0: i32) -> (i32, i32, i32, i32) {
    %c0_i32 = arith.constant 0 : i32
    %c0_i32_0 = arith.constant 0 : i32
    %c0_i32_1 = arith.constant 0 : i32
    %c0_i32_2 = arith.constant 0 : i32
    return %arg0, %c0_i32, %c0_i32_0, %c0_i32_1 : i32, i32, i32, i32
  }
  func.func @transform_4(%arg0: i32) -> (i32, i32) {
    %c0_i32 = arith.constant 0 : i32
    %c0_i32_0 = arith.constant 0 : i32
    %c0_i32_1 = arith.constant 0 : i32
    return %c0_i32, %c0_i32_0 : i32, i32
  }
  func.func @transform_5(%arg0: i32) -> (i32, i32, i32, i32) {
    %c0_i32 = arith.constant 0 : i32
    %c0_i32_0 = arith.constant 0 : i32
    %c0_i32_1 = arith.constant 0 : i32
    %c0_i32_2 = arith.constant 0 : i32
    return %arg0, %c0_i32, %c0_i32_0, %c0_i32_1 : i32, i32, i32, i32
  }
  func.func @transform_6(%arg0: i32) -> (i32, i32, i32) {
    %c0_i32 = arith.constant 0 : i32
    %c0_i32_0 = arith.constant 0 : i32
    %c0_i32_1 = arith.constant 0 : i32
    return %arg0, %c0_i32, %c0_i32_0 : i32, i32, i32
  }
}

module attributes {stable_mosaic.version = 11 : i64} {
  func.func @_fused_tail_conv1x1_kernel(%arg0: i32, %arg1: memref<1x16x16x128xbf16, #tpu.memory_space<vmem>>, %arg2: memref<1x16x16x128xbf16, #tpu.memory_space<vmem>>, %arg3: memref<1x128xf32, #tpu.memory_space<vmem>>, %arg4: memref<1x128xf32, #tpu.memory_space<vmem>>, %arg5: memref<1x16x16x1xbf16, #tpu.memory_space<vmem>>, %arg6: memref<128x128xbf16, #tpu.memory_space<vmem>>, %arg7: memref<1x16x16x128xbf16, #tpu.memory_space<vmem>>, %arg8: memref<1x16x16x128xbf16, #tpu.memory_space<vmem>>, %arg9: memref<1x2x128xf32, #tpu.memory_space<vmem>>) attributes {dimension_semantics = [#tpu.dimension_semantics<parallel>], iteration_bounds = array<i64: 2>, scalar_prefetch = 0 : i64, scratch_operands = 0 : i64, tpu.core_type = #tpu.core_type<tc>, window_params = [{transform_indices = @transform_0, window_bounds = array<i64: 1, 16, 16, 128>}, {transform_indices = @transform_1, window_bounds = array<i64: 1, 16, 16, 128>}, {pipeline_mode = #tpu.pipeline_mode<synchronous>, transform_indices = @transform_2, window_bounds = array<i64: 1, 128>}, {pipeline_mode = #tpu.pipeline_mode<synchronous>, transform_indices = @transform_3, window_bounds = array<i64: 1, 128>}, {transform_indices = @transform_4, window_bounds = array<i64: 1, 16, 16, 1>}, {pipeline_mode = #tpu.pipeline_mode<synchronous>, transform_indices = @transform_5, window_bounds = array<i64: 128, 128>}, {transform_indices = @transform_6, window_bounds = array<i64: 1, 16, 16, 128>}, {transform_indices = @transform_7, window_bounds = array<i64: 1, 16, 16, 128>}, {transform_indices = @transform_8, window_bounds = array<i64: 1, 2, 128>}]} {
    %c0 = arith.constant 0 : index
    %c0_0 = arith.constant 0 : index
    %0 = vector.load %arg3[%c0, %c0_0] : memref<1x128xf32, #tpu.memory_space<vmem>>, vector<1x128xf32>
    %1 = vector.shape_cast %0 : vector<1x128xf32> to vector<1x1x1x128xf32>
    %c0_1 = arith.constant 0 : index
    %c0_2 = arith.constant 0 : index
    %2 = vector.load %arg4[%c0_1, %c0_2] : memref<1x128xf32, #tpu.memory_space<vmem>>, vector<1x128xf32>
    %3 = vector.shape_cast %2 : vector<1x128xf32> to vector<1x1x1x128xf32>
    %c0_3 = arith.constant 0 : index
    %c0_4 = arith.constant 0 : index
    %c0_5 = arith.constant 0 : index
    %c0_6 = arith.constant 0 : index
    %4 = vector.load %arg1[%c0_3, %c0_4, %c0_5, %c0_6] : memref<1x16x16x128xbf16, #tpu.memory_space<vmem>>, vector<1x16x16x128xbf16>
    %5 = arith.extf %4 : vector<1x16x16x128xbf16> to vector<1x16x16x128xf32>
    %6 = vector.broadcast %1 : vector<1x1x1x128xf32> to vector<1x16x16x128xf32>
    %7 = arith.mulf %5, %6 : vector<1x16x16x128xf32>
    %8 = vector.broadcast %3 : vector<1x1x1x128xf32> to vector<1x16x16x128xf32>
    %9 = arith.addf %7, %8 : vector<1x16x16x128xf32>
    %c0_7 = arith.constant 0 : index
    %c0_8 = arith.constant 0 : index
    %c0_9 = arith.constant 0 : index
    %c0_10 = arith.constant 0 : index
    %10 = vector.load %arg2[%c0_7, %c0_8, %c0_9, %c0_10] : memref<1x16x16x128xbf16, #tpu.memory_space<vmem>>, vector<1x16x16x128xbf16>
    %11 = arith.extf %10 : vector<1x16x16x128xbf16> to vector<1x16x16x128xf32>
    %12 = arith.addf %9, %11 : vector<1x16x16x128xf32>
    %cst = arith.constant 0.000000e+00 : f32
    %13 = vector.broadcast %cst : f32 to vector<1x16x16x128xf32>
    %14 = arith.cmpf ogt, %12, %13 : vector<1x16x16x128xf32>
    %cst_11 = arith.constant 3.330000e-01 : f32
    %15 = vector.broadcast %cst_11 : f32 to vector<1x16x16x128xf32>
    %16 = arith.mulf %15, %12 : vector<1x16x16x128xf32>
    %17 = arith.select %14, %12, %16 : vector<1x16x16x128xi1>, vector<1x16x16x128xf32>
    %c0_12 = arith.constant 0 : index
    %c0_13 = arith.constant 0 : index
    %c0_14 = arith.constant 0 : index
    %c0_15 = arith.constant 0 : index
    %18 = vector.load %arg5[%c0_12, %c0_13, %c0_14, %c0_15] : memref<1x16x16x1xbf16, #tpu.memory_space<vmem>>, vector<1x16x16x1xbf16>
    %19 = arith.extf %18 : vector<1x16x16x1xbf16> to vector<1x16x16x1xf32>
    %20 = vector.broadcast %19 : vector<1x16x16x1xf32> to vector<1x16x16x128xf32>
    %21 = arith.mulf %17, %20 : vector<1x16x16x128xf32>
    %22 = arith.truncf %21 : vector<1x16x16x128xf32> to vector<1x16x16x128xbf16>
    %c0_16 = arith.constant 0 : index
    %c0_17 = arith.constant 0 : index
    %c0_18 = arith.constant 0 : index
    %c0_19 = arith.constant 0 : index
    %23 = vector.load %arg7[%c0_16, %c0_17, %c0_18, %c0_19] : memref<1x16x16x128xbf16, #tpu.memory_space<vmem>>, vector<1x16x16x128xbf16>
    tpu.vector_store %arg7[%c0_16, %c0_17, %c0_18, %c0_19], %22 {strides = array<i32>} : memref<1x16x16x128xbf16, #tpu.memory_space<vmem>>, vector<1x16x16x128xbf16>,
    %24 = vector.shape_cast %22 : vector<1x16x16x128xbf16> to vector<256x128xbf16>
    %c0_20 = arith.constant 0 : index
    %c0_21 = arith.constant 0 : index
    %25 = vector.load %arg6[%c0_20, %c0_21] : memref<128x128xbf16, #tpu.memory_space<vmem>>, vector<128x128xbf16>
    %cst_22 = arith.constant dense<0.000000e+00> : vector<256x128xf32>
    %26 = tpu.matmul %24, %25, %cst_22 {dimension_numbers = #tpu.dot_dimension_numbers<[1], [0], [0], [1], [0, 0, 1, 1], [], []>} : vector<256x128xbf16>, vector<128x128xbf16>, vector<256x128xf32> -> vector<256x128xf32>
    %27 = vector.shape_cast %26 : vector<256x128xf32> to vector<1x16x16x128xf32>
    %28 = arith.truncf %27 : vector<1x16x16x128xf32> to vector<1x16x16x128xbf16>
    %c0_23 = arith.constant 0 : index
    %c0_24 = arith.constant 0 : index
    %c0_25 = arith.constant 0 : index
    %c0_26 = arith.constant 0 : index
    %29 = vector.load %arg8[%c0_23, %c0_24, %c0_25, %c0_26] : memref<1x16x16x128xbf16, #tpu.memory_space<vmem>>, vector<1x16x16x128xbf16>
    tpu.vector_store %arg8[%c0_23, %c0_24, %c0_25, %c0_26], %28 {strides = array<i32>} : memref<1x16x16x128xbf16, #tpu.memory_space<vmem>>, vector<1x16x16x128xbf16>,
    %cst_27 = arith.constant dense<0.000000e+00> : vector<128xf32>
    %30 = vector.multi_reduction <add>, %26, %cst_27 [0] : vector<256x128xf32> to vector<128xf32>
    %31 = vector.shape_cast %30 : vector<128xf32> to vector<1x128xf32>
    %32 = arith.mulf %26, %26 : vector<256x128xf32>
    %cst_28 = arith.constant dense<0.000000e+00> : vector<128xf32>
    %33 = vector.multi_reduction <add>, %32, %cst_28 [0] : vector<256x128xf32> to vector<128xf32>
    %34 = vector.shape_cast %33 : vector<128xf32> to vector<1x128xf32>
    %35 = tpu.concatenate %31, %34 in 0 : vector<1x128xf32>, vector<1x128xf32> -> vector<2x128xf32>
    %36 = vector.shape_cast %35 : vector<2x128xf32> to vector<1x2x128xf32>
    %c0_29 = arith.constant 0 : index
    %c0_30 = arith.constant 0 : index
    %c0_31 = arith.constant 0 : index
    %37 = vector.load %arg9[%c0_29, %c0_30, %c0_31] : memref<1x2x128xf32, #tpu.memory_space<vmem>>, vector<1x2x128xf32>
    tpu.vector_store %arg9[%c0_29, %c0_30, %c0_31], %36 {strides = array<i32>} : memref<1x2x128xf32, #tpu.memory_space<vmem>>, vector<1x2x128xf32>,
    return
  }
  func.func @transform_0(%arg0: i32) -> (i32, i32, i32, i32) {
    %c0_i32 = arith.constant 0 : i32
    %c0_i32_0 = arith.constant 0 : i32
    %c0_i32_1 = arith.constant 0 : i32
    %c0_i32_2 = arith.constant 0 : i32
    return %arg0, %c0_i32, %c0_i32_0, %c0_i32_1 : i32, i32, i32, i32
  }
  func.func @transform_1(%arg0: i32) -> (i32, i32, i32, i32) {
    %c0_i32 = arith.constant 0 : i32
    %c0_i32_0 = arith.constant 0 : i32
    %c0_i32_1 = arith.constant 0 : i32
    %c0_i32_2 = arith.constant 0 : i32
    return %arg0, %c0_i32, %c0_i32_0, %c0_i32_1 : i32, i32, i32, i32
  }
  func.func @transform_2(%arg0: i32) -> (i32, i32) {
    %c0_i32 = arith.constant 0 : i32
    %c0_i32_0 = arith.constant 0 : i32
    %c0_i32_1 = arith.constant 0 : i32
    return %c0_i32, %c0_i32_0 : i32, i32
  }
  func.func @transform_3(%arg0: i32) -> (i32, i32) {
    %c0_i32 = arith.constant 0 : i32
    %c0_i32_0 = arith.constant 0 : i32
    %c0_i32_1 = arith.constant 0 : i32
    return %c0_i32, %c0_i32_0 : i32, i32
  }
  func.func @transform_4(%arg0: i32) -> (i32, i32, i32, i32) {
    %c0_i32 = arith.constant 0 : i32
    %c0_i32_0 = arith.constant 0 : i32
    %c0_i32_1 = arith.constant 0 : i32
    %c0_i32_2 = arith.constant 0 : i32
    return %arg0, %c0_i32, %c0_i32_0, %c0_i32_1 : i32, i32, i32, i32
  }
  func.func @transform_5(%arg0: i32) -> (i32, i32) {
    %c0_i32 = arith.constant 0 : i32
    %c0_i32_0 = arith.constant 0 : i32
    %c0_i32_1 = arith.constant 0 : i32
    return %c0_i32, %c0_i32_0 : i32, i32
  }
  func.func @transform_6(%arg0: i32) -> (i32, i32, i32, i32) {
    %c0_i32 = arith.constant 0 : i32
    %c0_i32_0 = arith.constant 0 : i32
    %c0_i32_1 = arith.constant 0 : i32
    %c0_i32_2 = arith.constant 0 : i32
    return %arg0, %c0_i32, %c0_i32_0, %c0_i32_1 : i32, i32, i32, i32
  }
  func.func @transform_7(%arg0: i32) -> (i32, i32, i32, i32) {
    %c0_i32 = arith.constant 0 : i32
    %c0_i32_0 = arith.constant 0 : i32
    %c0_i32_1 = arith.constant 0 : i32
    %c0_i32_2 = arith.constant 0 : i32
    return %arg0, %c0_i32, %c0_i32_0, %c0_i32_1 : i32, i32, i32, i32
  }
  func.func @transform_8(%arg0: i32) -> (i32, i32, i32) {
    %c0_i32 = arith.constant 0 : i32
    %c0_i32_0 = arith.constant 0 : i32
    %c0_i32_1 = arith.constant 0 : i32
    return %arg0, %c0_i32, %c0_i32_0 : i32, i32, i32
  }
}

module attributes {stable_mosaic.version = 11 : i64} {
  func.func @_bn_act_kernel(%arg0: i32, %arg1: memref<1x16x16x128xbf16, #tpu.memory_space<vmem>>, %arg2: memref<1x16x16x128xbf16, #tpu.memory_space<vmem>>, %arg3: memref<1x16x16x1xbf16, #tpu.memory_space<vmem>>, %arg4: memref<1x128xf32, #tpu.memory_space<vmem>>, %arg5: memref<1x128xf32, #tpu.memory_space<vmem>>, %arg6: memref<1x16x16x128xbf16, #tpu.memory_space<vmem>>) attributes {dimension_semantics = [#tpu.dimension_semantics<parallel>], iteration_bounds = array<i64: 2>, scalar_prefetch = 0 : i64, scratch_operands = 0 : i64, tpu.core_type = #tpu.core_type<tc>, window_params = [{transform_indices = @transform_0, window_bounds = array<i64: 1, 16, 16, 128>}, {transform_indices = @transform_1, window_bounds = array<i64: 1, 16, 16, 128>}, {transform_indices = @transform_2, window_bounds = array<i64: 1, 16, 16, 1>}, {pipeline_mode = #tpu.pipeline_mode<synchronous>, transform_indices = @transform_3, window_bounds = array<i64: 1, 128>}, {pipeline_mode = #tpu.pipeline_mode<synchronous>, transform_indices = @transform_4, window_bounds = array<i64: 1, 128>}, {transform_indices = @transform_5, window_bounds = array<i64: 1, 16, 16, 128>}]} {
    %c0 = arith.constant 0 : index
    %c0_0 = arith.constant 0 : index
    %c0_1 = arith.constant 0 : index
    %c0_2 = arith.constant 0 : index
    %0 = vector.load %arg1[%c0, %c0_0, %c0_1, %c0_2] : memref<1x16x16x128xbf16, #tpu.memory_space<vmem>>, vector<1x16x16x128xbf16>
    %1 = arith.extf %0 : vector<1x16x16x128xbf16> to vector<1x16x16x128xf32>
    %c0_3 = arith.constant 0 : index
    %c0_4 = arith.constant 0 : index
    %2 = vector.load %arg4[%c0_3, %c0_4] : memref<1x128xf32, #tpu.memory_space<vmem>>, vector<1x128xf32>
    %3 = vector.shape_cast %2 : vector<1x128xf32> to vector<1x1x1x128xf32>
    %4 = vector.broadcast %3 : vector<1x1x1x128xf32> to vector<1x16x16x128xf32>
    %5 = arith.mulf %1, %4 : vector<1x16x16x128xf32>
    %c0_5 = arith.constant 0 : index
    %c0_6 = arith.constant 0 : index
    %6 = vector.load %arg5[%c0_5, %c0_6] : memref<1x128xf32, #tpu.memory_space<vmem>>, vector<1x128xf32>
    %7 = vector.shape_cast %6 : vector<1x128xf32> to vector<1x1x1x128xf32>
    %8 = vector.broadcast %7 : vector<1x1x1x128xf32> to vector<1x16x16x128xf32>
    %9 = arith.addf %5, %8 : vector<1x16x16x128xf32>
    %c0_7 = arith.constant 0 : index
    %c0_8 = arith.constant 0 : index
    %c0_9 = arith.constant 0 : index
    %c0_10 = arith.constant 0 : index
    %10 = vector.load %arg2[%c0_7, %c0_8, %c0_9, %c0_10] : memref<1x16x16x128xbf16, #tpu.memory_space<vmem>>, vector<1x16x16x128xbf16>
    %11 = arith.extf %10 : vector<1x16x16x128xbf16> to vector<1x16x16x128xf32>
    %12 = arith.addf %9, %11 : vector<1x16x16x128xf32>
    %cst = arith.constant 0.000000e+00 : f32
    %13 = vector.broadcast %cst : f32 to vector<1x16x16x128xf32>
    %14 = arith.cmpf ogt, %12, %13 : vector<1x16x16x128xf32>
    %cst_11 = arith.constant 3.330000e-01 : f32
    %15 = vector.broadcast %cst_11 : f32 to vector<1x16x16x128xf32>
    %16 = arith.mulf %15, %12 : vector<1x16x16x128xf32>
    %17 = arith.select %14, %12, %16 : vector<1x16x16x128xi1>, vector<1x16x16x128xf32>
    %c0_12 = arith.constant 0 : index
    %c0_13 = arith.constant 0 : index
    %c0_14 = arith.constant 0 : index
    %c0_15 = arith.constant 0 : index
    %18 = vector.load %arg3[%c0_12, %c0_13, %c0_14, %c0_15] : memref<1x16x16x1xbf16, #tpu.memory_space<vmem>>, vector<1x16x16x1xbf16>
    %19 = arith.extf %18 : vector<1x16x16x1xbf16> to vector<1x16x16x1xf32>
    %20 = vector.broadcast %19 : vector<1x16x16x1xf32> to vector<1x16x16x128xf32>
    %21 = arith.mulf %17, %20 : vector<1x16x16x128xf32>
    %22 = arith.truncf %21 : vector<1x16x16x128xf32> to vector<1x16x16x128xbf16>
    %c0_16 = arith.constant 0 : index
    %c0_17 = arith.constant 0 : index
    %c0_18 = arith.constant 0 : index
    %c0_19 = arith.constant 0 : index
    %23 = vector.load %arg6[%c0_16, %c0_17, %c0_18, %c0_19] : memref<1x16x16x128xbf16, #tpu.memory_space<vmem>>, vector<1x16x16x128xbf16>
    tpu.vector_store %arg6[%c0_16, %c0_17, %c0_18, %c0_19], %22 {strides = array<i32>} : memref<1x16x16x128xbf16, #tpu.memory_space<vmem>>, vector<1x16x16x128xbf16>,
    return
  }
  func.func @transform_0(%arg0: i32) -> (i32, i32, i32, i32) {
    %c0_i32 = arith.constant 0 : i32
    %c0_i32_0 = arith.constant 0 : i32
    %c0_i32_1 = arith.constant 0 : i32
    %c0_i32_2 = arith.constant 0 : i32
    return %arg0, %c0_i32, %c0_i32_0, %c0_i32_1 : i32, i32, i32, i32
  }
  func.func @transform_1(%arg0: i32) -> (i32, i32, i32, i32) {
    %c0_i32 = arith.constant 0 : i32
    %c0_i32_0 = arith.constant 0 : i32
    %c0_i32_1 = arith.constant 0 : i32
    %c0_i32_2 = arith.constant 0 : i32
    return %arg0, %c0_i32, %c0_i32_0, %c0_i32_1 : i32, i32, i32, i32
  }
  func.func @transform_2(%arg0: i32) -> (i32, i32, i32, i32) {
    %c0_i32 = arith.constant 0 : i32
    %c0_i32_0 = arith.constant 0 : i32
    %c0_i32_1 = arith.constant 0 : i32
    %c0_i32_2 = arith.constant 0 : i32
    return %arg0, %c0_i32, %c0_i32_0, %c0_i32_1 : i32, i32, i32, i32
  }
  func.func @transform_3(%arg0: i32) -> (i32, i32) {
    %c0_i32 = arith.constant 0 : i32
    %c0_i32_0 = arith.constant 0 : i32
    %c0_i32_1 = arith.constant 0 : i32
    return %c0_i32, %c0_i32_0 : i32, i32
  }
  func.func @transform_4(%arg0: i32) -> (i32, i32) {
    %c0_i32 = arith.constant 0 : i32
    %c0_i32_0 = arith.constant 0 : i32
    %c0_i32_1 = arith.constant 0 : i32
    return %c0_i32, %c0_i32_0 : i32, i32
  }
  func.func @transform_5(%arg0: i32) -> (i32, i32, i32, i32) {
    %c0_i32 = arith.constant 0 : i32
    %c0_i32_0 = arith.constant 0 : i32
    %c0_i32_1 = arith.constant 0 : i32
    %c0_i32_2 = arith.constant 0 : i32
    return %arg0, %c0_i32, %c0_i32_0, %c0_i32_1 : i32, i32, i32, i32
  }
}

</mosaic_0001>

<bundles_post_ra>
// kernel: sparse_block_series_forward.5
= control target key start
LH: loop header
LB: loop body
LE: loop exit
PB: predicated region body
PF: predicated region fallthrough
CT: control target
= control target key end

     0   :  { %s1236_s12 = smov 0   ;;  %s1408_s0 = inlined_call_operand.vmem [shape: bf16[2,16,16,128], index: 0, kind: input, shape index: {}]   ;;  %s1409_s1 = inlined_call_operand.vmem [shape: bf16[128,128], index: 1, kind: input, shape index: {}]   ;;  %s1410_s2 = inlined_call_operand.vmem [shape: bf16[2,16,16,128], index: 2, kind: output, shape index: {0}]   ;;  %s1411_s3 = inlined_call_operand.vmem [shape: f32[2,2,128], index: 3, kind: output, shape index: {1}]  }
   0x1 LB: > { %s891_s13 = sadd.s32 4294967295, %s1214_s12   ;;  %p895_p0 = scmp.ge.s32.totalorder %s1214_s12, 1  ;;  %s1214_s12 = sphi %s1236_s12, %s14_s12  }
   0x2   : > { %p140_p1 = scmp.lt.s32.totalorder %s1214_s12, 3 }
   0x4   : > { %p141_p2 = pnand %p895_p0, %p140_p1 }
   0x5   : > { %v1184_v0 = vld [vmem:[%s1409_s1] sm:$0xff] (!%p141_p2)   ;;  %p168_p3 = scmp.lt.s32.totalorder (!%p141_p2), %s891_s13, 1  ;;  %v1185_v1 = vld [vmem:[%s1409_s1 + $0x8] sm:$0xff] (!%p141_p2)   ;;  %v1186_v2 = vld [vmem:[%s1409_s1 + $0x10] sm:$0xff] (!%p141_p2)   ;;  %vm802_vm0 = vcmask (!%p141_p2), 1040384  }
   0x6   : > { %144 = sbr.rel (%p141_p2) target bundleno = 331 (0x14b), region = 28  ;;  %1112 = vmatprep.subr.bf16.mxu0 (!%p141_p2), %v1184_v0  ;;  %1160 = vmatprep.subr.bf16.mxu1 (!%p141_p2), %v1184_v0  ;;  %v1187_v3 = vld [vmem:[%s1409_s1 + $0x18] sm:$0xff] (!%p141_p2)   ;;  %v1188_v5 = vld [vmem:[%s1409_s1 + $0x20] sm:$0xff] (!%p141_p2)   ;;  %v1189_v6 = vld [vmem:[%s1409_s1 + $0x28] sm:$0xff] (!%p141_p2)  }
   0x7   : > { %1113 = vmatpush3.bf16.msra.mxu0 (!%p141_p2), %v1184_v0  ;;  %1168 = vmatpush3.bf16.msra.mxu1 (!%p141_p2), %v1184_v0  ;;  %v1190_v8 = vld [vmem:[%s1409_s1 + $0x30] sm:$0xff] (!%p141_p2)   ;;  %v1191_v9 = vld [vmem:[%s1409_s1 + $0x38] sm:$0xff] (!%p141_p2)  }
   0x8   : > { %1114 = vmatprep.subr.bf16.mxu0 (!%p141_p2), %v1185_v1  ;;  %1161 = vmatprep.subr.bf16.mxu1 (!%p141_p2), %v1185_v1 }
   0xb   : > { %1115 = vmatpush3.bf16.msra.mxu0 (!%p141_p2), %v1185_v1  ;;  %1169 = vmatpush3.bf16.msra.mxu1 (!%p141_p2), %v1185_v1 }
   0xc   : > { %1116 = vmatprep.subr.bf16.mxu0 (!%p141_p2), %v1186_v2  ;;  %1162 = vmatprep.subr.bf16.mxu1 (!%p141_p2), %v1186_v2 }
   0xd   : > { %s1413_s13 = smov (!%p168_p3, %s891_s13), 1 }
   0xe   : > { %s959_s20 = sshll.u32 %s1413_s13, 7  ;;  %s900_s10 = sshll.u32 %s1413_s13, 1 }
   0xf   : > { %s1261_s23 = scalar_lea.vmem %s1408_s0, %s959_s20  ;;  %1117 = vmatpush3.bf16.msra.mxu0 %v1186_v2  ;;  %1170 = vmatpush3.bf16.msra.mxu1 %v1186_v2  ;;  %s1303_s9 = scalar_lea.vmem %s1410_s2, %s959_s20 }
  0x10   : > { %v1192_v4 = vld [vmem:[%s1261_s23] sm:$0xff]   ;;  %1118 = vmatprep.subr.bf16.mxu0 %v1187_v3  ;;  %1163 = vmatprep.subr.bf16.mxu1 %v1187_v3  ;;  %v1193_v10 = vld [vmem:[%s1261_s23 + $0x8] sm:$0xff]   ;;  %v1194_v12 = vld [vmem:[%s1261_s23 + $0x10] sm:$0xff]   ;;  %s181_s15 = scalar_lea.vmem %s1411_s3, %s900_s10 }
  0x11   : > { %1128 = vmatprep.mubr.bf16.mxu0 %v1192_v4  ;;  %v1200_v7 = vld [vmem:[%s1261_s23 + $0x40] sm:$0xff]   ;;  %v1201_v11 = vld [vmem:[%s1261_s23 + $0x48] sm:$0xff]   ;;  %v1202_v13 = vld [vmem:[%s1261_s23 + $0x50] sm:$0xff]  }
  0x12   : > { %1144 = vmatprep.mubr.bf16.mxu1 %v1200_v7  ;;  %v1195_v14 = vld [vmem:[%s1261_s23 + $0x18] sm:$0xff]   ;;  %v1196_v16 = vld [vmem:[%s1261_s23 + $0x20] sm:$0xff]   ;;  %v1197_v18 = vld [vmem:[%s1261_s23 + $0x28] sm:$0xff]  }
  0x13   : > { %1119 = vmatpush3.bf16.msra.mxu0 %v1187_v3  ;;  %1171 = vmatpush3.bf16.msra.mxu1 %v1187_v3  ;;  %v1203_v15 = vld [vmem:[%s1261_s23 + $0x58] sm:$0xff]   ;;  %v1204_v17 = vld [vmem:[%s1261_s23 + $0x60] sm:$0xff]   ;;  %v1205_v19 = vld [vmem:[%s1261_s23 + $0x68] sm:$0xff]  }
  0x14   : > { %1120 = vmatprep.subr.bf16.mxu0 %v1188_v5  ;;  %1164 = vmatprep.subr.bf16.mxu1 %v1188_v5  ;;  %v1198_v20 = vld [vmem:[%s1261_s23 + $0x30] sm:$0xff]   ;;  %v1199_v22 = vld [vmem:[%s1261_s23 + $0x38] sm:$0xff]  }
  0x15   : > { %v1206_v21 = vld [vmem:[%s1261_s23 + $0x70] sm:$0xff]   ;;  %v1207_v23 = vld [vmem:[%s1261_s23 + $0x78] sm:$0xff]  }
  0x17   : > { %1121 = vmatpush3.bf16.msra.mxu0 %v1188_v5  ;;  %1172 = vmatpush3.bf16.msra.mxu1 %v1188_v5 }
  0x18   : > { %1122 = vmatprep.subr.bf16.mxu0 %v1189_v6  ;;  %1165 = vmatprep.subr.bf16.mxu1 %v1189_v6 }
  0x1b   : > { %1123 = vmatpush3.bf16.msra.mxu0 %v1189_v6  ;;  %1173 = vmatpush3.bf16.msra.mxu1 %v1189_v6 }
  0x1c   : > { %1124 = vmatprep.subr.bf16.mxu0 %v1190_v8  ;;  %1166 = vmatprep.subr.bf16.mxu1 %v1190_v8 }
  0x1f   : > { %1125 = vmatpush3.bf16.msra.mxu0 %v1190_v8  ;;  %1174 = vmatpush3.bf16.msra.mxu1 %v1190_v8 }
  0x20   : > { %1126 = vmatprep.subr.bf16.mxu0 %v1191_v9  ;;  %1167 = vmatprep.subr.bf16.mxu1 %v1191_v9 }
  0x23   : > { %1127 = vmatpush3.bf16.msra.mxu0 %v1191_v9  ;;  %1175 = vmatpush3.bf16.msra.mxu1 %v1191_v9 }
  0x26   : > { %1129 = vmatmul.mubr.bf16.vlgmr.msra.gmra.mrb[0].mxu0 %v1193_v10  ;;  %1145 = vmatmul.mubr.bf16.vlgmr.msra.gmra.mrb[0].mxu1 %v1201_v11 }
  0x27   : > { %1132 = vmatprep.mubr.bf16.mxu0 %v1194_v12  ;;  %1148 = vmatprep.mubr.bf16.mxu1 %v1202_v13 }
  0x2e   : > { %1133 = vmatmul.mubr.bf16.gmra.mrb[4].mxu0 %v1195_v14  ;;  %1149 = vmatmul.mubr.bf16.gmra.mrb[4].mxu1 %v1203_v15 }
  0x2f   : > { %1136 = vmatprep.mubr.bf16.mxu0 %v1196_v16  ;;  %1152 = vmatprep.mubr.bf16.mxu1 %v1204_v17 }
  0x36   : > { %1137 = vmatmul.mubr.bf16.gmra.mrb[8].mxu0 %v1197_v18  ;;  %1153 = vmatmul.mubr.bf16.gmra.mrb[8].mxu1 %v1205_v19 }
  0x37   : > { %1140 = vmatprep.mubr.bf16.mxu0 %v1198_v20  ;;  %1156 = vmatprep.mubr.bf16.mxu1 %v1206_v21 }
  0x3e   : > { %1141 = vmatmul.mubr.bf16.gmra.mrb[12].mxu0 %v1199_v22  ;;  %1157 = vmatmul.mubr.bf16.gmra.mrb[12].mxu1 %v1207_v23 }
  0xf9   : > { %v1130_v24 = vpop.f32.mrb[0].mxu0  ;;  %v1294_v25 = vpop.f32.mrb[0].mxu1 }
  0xfa   : > { %v409_v26 = vpop.f32.mrb[1].mxu0  ;;  %v1296_v27 = vpop.f32.mrb[1].mxu1  ;;  %v735_v39 = vmul.f32 %v1130_v24, %v1130_v24 }
  0xfb   : > { %v1131_v28 = vpop.f32.mrb[2].mxu0  ;;  %v1305_v29 = vpop.f32.mrb[2].mxu1  ;;  %v733_v30 = vmul.f32 %v409_v26, %v409_v26 }
  0xfc   : > { %v1001_v31 = vpack.c.bf16 %v1131_v28, %v1130_v24  ;;  %v412_v32 = vpop.f32.mrb[3].mxu0  ;;  %v1041_v33 = vpack.c.bf16 %v1305_v29, %v1294_v25  ;;  %v1309_v34 = vpop.f32.mrb[3].mxu1  ;;  %v736_v42 = vmul.f32 %v1131_v28, %v1131_v28 }
  0xfd   : > { %v996_v35 = vpack.c.bf16 %v412_v32, %v409_v26  ;;  %v696_v36 = vadd.f32 %v412_v32, %v409_v26  ;;  %v734_v37 = vmul.f32 %v412_v32, %v412_v32  ;;  %v1036_v38 = vpack.c.bf16 %v1309_v34, %v1296_v27 }
  0xfe   : > { %1073 = vst [vmem:[%s1303_s9 + $0x8] sm:$0xff] %v1001_v31   ;;  %1081 = vst [vmem:[%s1303_s9 + $0x48] sm:$0xff] %v1041_v33  }
  0xff   : > { %997 = vst [vmem:[%s1303_s9] sm:$0xff] %v996_v35   ;;  %v697_v40 = vadd.f32 %v1130_v24, %v696_v36  ;;  %v765_v41 = vadd.f32 %v734_v37, %v733_v30  ;;  %1080 = vst [vmem:[%s1303_s9 + $0x40] sm:$0xff] %v1036_v38  }
 0x101   : > { %v766_v43 = vadd.f32 %v765_v41, %v735_v39  ;;  %v1134_v44 = vpop.f32.mrb[4].mxu0  ;;  %v698_v45 = vadd.f32 %v1131_v28, %v697_v40  ;;  %v1317_v46 = vpop.f32.mrb[4].mxu1 }
 0x102   : > { %v425_v47 = vpop.f32.mrb[5].mxu0  ;;  %v1319_v48 = vpop.f32.mrb[5].mxu1  ;;  %v739_v63 = vmul.f32 %v1134_v44, %v1134_v44 }
 0x103   : > { %v699_v49 = vadd.f32 %v698_v45, %v425_v47  ;;  %v737_v50 = vmul.f32 %v425_v47, %v425_v47  ;;  %v767_v51 = vadd.f32 %v766_v43, %v736_v42  ;;  %v1135_v52 = vpop.f32.mrb[6].mxu0  ;;  %v1321_v53 = vpop.f32.mrb[6].mxu1 }
 0x104   : > { %v1011_v54 = vpack.c.bf16 %v1135_v52, %v1134_v44  ;;  %v428_v55 = vpop.f32.mrb[7].mxu0  ;;  %v1051_v56 = vpack.c.bf16 %v1321_v53, %v1317_v46  ;;  %v1325_v57 = vpop.f32.mrb[7].mxu1  ;;  %v740_v2 = vmul.f32 %v1135_v52, %v1135_v52 }
 0x105   : > { %v768_v58 = vadd.f32 %v767_v51, %v737_v50  ;;  %v1006_v59 = vpack.c.bf16 %v428_v55, %v425_v47  ;;  %v700_v60 = vadd.f32 %v699_v49, %v428_v55  ;;  %v738_v61 = vmul.f32 %v428_v55, %v428_v55 }
 0x106   : > { %1075 = vst [vmem:[%s1303_s9 + $0x18] sm:$0xff] %v1011_v54   ;;  %1083 = vst [vmem:[%s1303_s9 + $0x58] sm:$0xff] %v1051_v56   ;;  %v1046_v62 = vpack.c.bf16 %v1325_v57, %v1319_v48 }
 0x107   : > { %1074 = vst [vmem:[%s1303_s9 + $0x10] sm:$0xff] %v1006_v59   ;;  %v701_v0 = vadd.f32 %v1134_v44, %v700_v60  ;;  %v769_v1 = vadd.f32 %v768_v58, %v738_v61  ;;  %v749_v61 = vmul.f32 %v1296_v27, %v1296_v27 }
 0x108   : > { %1082 = vst [vmem:[%s1303_s9 + $0x50] sm:$0xff] %v1046_v62  }
 0x109   : > { %v770_v3 = vadd.f32 %v769_v1, %v739_v63  ;;  %v1138_v4 = vpop.f32.mrb[8].mxu0  ;;  %v702_v5 = vadd.f32 %v1135_v52, %v701_v0  ;;  %v1333_v6 = vpop.f32.mrb[8].mxu1 }
 0x10a   : > { %v441_v7 = vpop.f32.mrb[9].mxu0  ;;  %v1335_v8 = vpop.f32.mrb[9].mxu1  ;;  %v743_v23 = vmul.f32 %v1138_v4, %v1138_v4 }
 0x10b   : > { %v703_v9 = vadd.f32 %v702_v5, %v441_v7  ;;  %v741_v10 = vmul.f32 %v441_v7, %v441_v7  ;;  %v771_v11 = vadd.f32 %v770_v3, %v740_v2  ;;  %v1139_v12 = vpop.f32.mrb[10].mxu0  ;;  %v1337_v13 = vpop.f32.mrb[10].mxu1  ;;  %v750_v2 = vmul.f32 %v1309_v34, %v1309_v34 }
 0x10c   : > { %v1021_v14 = vpack.c.bf16 %v1139_v12, %v1138_v4  ;;  %v444_v15 = vpop.f32.mrb[11].mxu0  ;;  %v1061_v16 = vpack.c.bf16 %v1337_v13, %v1333_v6  ;;  %v1341_v17 = vpop.f32.mrb[11].mxu1  ;;  %v744_v28 = vmul.f32 %v1139_v12, %v1139_v12  ;;  %v751_v3 = vmul.f32 %v1294_v25, %v1294_v25 }
 0x10d   : > { %v772_v18 = vadd.f32 %v771_v11, %v741_v10  ;;  %v1016_v19 = vpack.c.bf16 %v444_v15, %v441_v7  ;;  %v704_v20 = vadd.f32 %v703_v9, %v444_v15  ;;  %v742_v21 = vmul.f32 %v444_v15, %v444_v15 }
 0x10e   : > { %1077 = vst [vmem:[%s1303_s9 + $0x28] sm:$0xff] %v1021_v14   ;;  %1085 = vst [vmem:[%s1303_s9 + $0x68] sm:$0xff] %v1061_v16   ;;  %v1056_v22 = vpack.c.bf16 %v1341_v17, %v1335_v8  ;;  %v752_v7 = vmul.f32 %v1305_v29, %v1305_v29  ;;  %v754_v15 = vmul.f32 %v1325_v57, %v1325_v57 }
 0x10f   : > { %1076 = vst [vmem:[%s1303_s9 + $0x20] sm:$0xff] %v1016_v19   ;;  %v705_v24 = vadd.f32 %v1138_v4, %v704_v20  ;;  %v773_v26 = vadd.f32 %v772_v18, %v742_v21 }
 0x110   : > { %1084 = vst [vmem:[%s1303_s9 + $0x60] sm:$0xff] %v1056_v22  }
 0x111   : > { %v774_v30 = vadd.f32 %v773_v26, %v743_v23  ;;  %v1142_v31 = vpop.f32.mrb[12].mxu0  ;;  %v706_v32 = vadd.f32 %v1139_v12, %v705_v24  ;;  %v1349_v33 = vpop.f32.mrb[12].mxu1  ;;  %v758_v24 = vmul.f32 %v1341_v17, %v1341_v17 }
 0x112   : > { %v457_v35 = vpop.f32.mrb[13].mxu0  ;;  %v521_v36 = vpop.f32.mrb[13].mxu1  ;;  %v747_v54 = vmul.f32 %v1142_v31, %v1142_v31 }
 0x113   : > { %v707_v37 = vadd.f32 %v706_v32, %v457_v35  ;;  %v745_v38 = vmul.f32 %v457_v35, %v457_v35  ;;  %v775_v39 = vadd.f32 %v774_v30, %v744_v28  ;;  %v1143_v40 = vpop.f32.mrb[14].mxu0  ;;  %v1351_v41 = vpop.f32.mrb[14].mxu1 }
 0x114   : > { %v1031_v42 = vpack.c.bf16 %v1143_v40, %v1142_v31  ;;  %v460_v43 = vpop.f32.mrb[15].mxu0  ;;  %v1071_v44 = vpack.c.bf16 %v1351_v41, %v1349_v33  ;;  %v524_v45 = vpop.f32.mrb[15].mxu1  ;;  %v748_v58 = vmul.f32 %v1143_v40, %v1143_v40 }
 0x115   : > { %v776_v47 = vadd.f32 %v775_v39, %v745_v38  ;;  %v1026_v49 = vpack.c.bf16 %v460_v43, %v457_v35  ;;  %v708_v50 = vadd.f32 %v707_v37, %v460_v43  ;;  %v746_v51 = vmul.f32 %v460_v43, %v460_v43 }
 0x116   : > { %1079 = vst [vmem:[%s1303_s9 + $0x38] sm:$0xff] %v1031_v42   ;;  %1087 = vst [vmem:[%s1303_s9 + $0x78] sm:$0xff] %v1071_v44   ;;  %v1066_v52 = vpack.c.bf16 %v524_v45, %v521_v36  ;;  %v762_v39 = vmul.f32 %v524_v45, %v524_v45  ;;  %v764_v42 = vmul.f32 %v1351_v41, %v1351_v41 }
 0x117   : > { %1078 = vst [vmem:[%s1303_s9 + $0x30] sm:$0xff] %v1026_v49   ;;  %v709_v55 = vadd.f32 %v1142_v31, %v708_v50  ;;  %v777_v56 = vadd.f32 %v776_v47, %v746_v51 }
 0x118   : > { %1086 = vst [vmem:[%s1303_s9 + $0x70] sm:$0xff] %v1066_v52  }
 0x119   : > { %v778_v59 = vadd.f32 %v777_v56, %v747_v54  ;;  %v710_v60 = vadd.f32 %v1143_v40, %v709_v55 }
 0x11b   : > { %v711_v62 = vadd.f32 %v710_v60, %v1296_v27  ;;  %v779_v63 = vadd.f32 %v778_v59, %v748_v58  ;;  %v753_v27 = vmul.f32 %v1319_v48, %v1319_v48 }
 0x11d   : > { %v780_v0 = vadd.f32 %v779_v63, %v749_v61  ;;  %v712_v1 = vadd.f32 %v711_v62, %v1309_v34 }
 0x11f   : > { %v713_v4 = vadd.f32 %v1294_v25, %v712_v1  ;;  %v781_v5 = vadd.f32 %v780_v0, %v750_v2  ;;  %v755_v25 = vmul.f32 %v1317_v46, %v1317_v46 }
 0x121   : > { %v782_v9 = vadd.f32 %v781_v5, %v751_v3  ;;  %v714_v10 = vadd.f32 %v1305_v29, %v713_v4  ;;  %v756_v29 = vmul.f32 %v1321_v53, %v1321_v53 }
 0x123   : > { %v715_v11 = vadd.f32 %v714_v10, %v1319_v48  ;;  %v783_v12 = vadd.f32 %v782_v9, %v752_v7  ;;  %v757_v48 = vmul.f32 %v1335_v8, %v1335_v8 }
 0x125   : > { %v784_v14 = vadd.f32 %v783_v12, %v753_v27  ;;  %v716_v34 = vadd.f32 %v715_v11, %v1325_v57 }
 0x127   : > { %v717_v16 = vadd.f32 %v1317_v46, %v716_v34  ;;  %v785_v18 = vadd.f32 %v784_v14, %v754_v15  ;;  %v759_v46 = vmul.f32 %v1333_v6, %v1333_v6 }
 0x129   : > { %v786_v19 = vadd.f32 %v785_v18, %v755_v25  ;;  %v718_v20 = vadd.f32 %v1321_v53, %v717_v16  ;;  %v760_v53 = vmul.f32 %v1337_v13, %v1337_v13 }
 0x12b   : > { %v719_v21 = vadd.f32 %v718_v20, %v1335_v8  ;;  %v787_v22 = vadd.f32 %v786_v19, %v756_v29  ;;  %v761_v8 = vmul.f32 %v521_v36, %v521_v36 }
 0x12d   : > { %v788_v23 = vadd.f32 %v787_v22, %v757_v48  ;;  %v720_v57 = vadd.f32 %v719_v21, %v1341_v17  ;;  %v763_v17 = vmul.f32 %v1349_v33, %v1349_v33 }
 0x12f   : > { %v721_v26 = vadd.f32 %v1333_v6, %v720_v57  ;;  %v789_v28 = vadd.f32 %v788_v23, %v758_v24 }
 0x131   : > { %v790_v30 = vadd.f32 %v789_v28, %v759_v46  ;;  %v722_v31 = vadd.f32 %v1337_v13, %v721_v26 }
 0x133   : > { %v723_v32 = vadd.f32 %v722_v31, %v521_v36  ;;  %v791_v35 = vadd.f32 %v790_v30, %v760_v53 }
 0x135   : > { %v792_v37 = vadd.f32 %v791_v35, %v761_v8  ;;  %v724_v38 = vadd.f32 %v723_v32, %v524_v45 }
 0x137   : > { %v725_v40 = vadd.f32 %v1349_v33, %v724_v38  ;;  %v793_v6 = vadd.f32 %v792_v37, %v762_v39 }
 0x139   : > { %v726_v43 = vadd.f32 %v1351_v41, %v725_v40  ;;  %v794_v44 = vadd.f32 %v793_v6, %v763_v17 }
 0x13b   : > { %v727_v13 = vrot.slane %v726_v43, 4  ;;  %v795_v47 = vadd.f32 %v794_v44, %v764_v42 }
 0x13d   : > { %v728_v36 = vadd.f32 %v727_v13, %v726_v43  ;;  %v796_v49 = vrot.slane %v795_v47, 4 }
 0x13f   : > { %v729_v50 = vrot.slane %v728_v36, 2  ;;  %v797_v51 = vadd.f32 %v796_v49, %v795_v47 }
 0x141   : > { %v730_v45 = vadd.f32 %v729_v50, %v728_v36  ;;  %v798_v52 = vrot.slane %v797_v51, 2 }
 0x143   : > { %v731_v54 = vrot.slane %v730_v45, 1  ;;  %v799_v55 = vadd.f32 %v798_v52, %v797_v51 }
 0x145   : > { %v800_v56 = vrot.slane %v799_v55, 1  ;;  %v732_v33 = vadd.f32 %v731_v54, %v730_v45 }
 0x147   : > { %v801_v41 = vadd.f32 %v800_v56, %v799_v55 }
 0x149   : > { %v803_v58 = vsel %vm802_vm0, %v732_v33, %v801_v41 }
 0x14a   : > { %804 = vst [vmem:[%s181_s15] sm:$0x3] %v803_v58 }
 0x14b PF: > { %s14_s12 = sadd.s32 1, %s1214_s12  }
 0x14c   : > { %p11_p4 = scmp.ge.s32.totalorder %s14_s12, 4  }
 0x14e   :  { %13 = sbr.rel (!%p11_p4) target bundleno = 1 (0x1), region = 70 }

// kernel: sparse_block_series_forward.9
= control target key start
LH: loop header
LB: loop body
LE: loop exit
PB: predicated region body
PF: predicated region fallthrough
CT: control target
= control target key end

     0   :  { %s1641_s18 = smov 0   ;;  %s1943_s0 = inlined_call_operand.vmem [shape: bf16[2,16,16,128], index: 0, kind: input, shape index: {}]   ;;  %s1944_s1 = inlined_call_operand.vmem [shape: bf16[2,16,16,128], index: 1, kind: input, shape index: {}]   ;;  %s1945_s2 = inlined_call_operand.vmem [shape: bf16[2,16,16,1], index: 2, kind: input, shape index: {}]   ;;  %s1946_s3 = inlined_call_operand.vmem [shape: f32[1,128], index: 3, kind: input, shape index: {}]   ;;  %s1947_s4 = inlined_call_operand.vmem [shape: f32[1,128], index: 4, kind: input, shape index: {}]   ;;  %s1948_s5 = inlined_call_operand.vmem [shape: bf16[2,16,16,128], index: 5, kind: output, shape index: {}]  }
   0x1 LB: > { %s1094_s19 = sadd.s32 4294967295, %s1608_s18   ;;  %p1098_p0 = scmp.ge.s32.totalorder %s1608_s18, 1  ;;  %s1608_s18 = sphi %s1641_s18, %s15_s18  }
   0x2   : > { %p207_p1 = scmp.lt.s32.totalorder %s1608_s18, 3 }
   0x4   : > { %p208_p2 = pnand %p1098_p0, %p207_p1 }
   0x5   : > { %p245_p3 = scmp.lt.s32.totalorder (!%p208_p2), %s1094_s19, 1  ;;  %v1610_v0 = vmov (!%p208_p2), 0  }
   0x6   : > { %211 = sbr.rel (%p208_p2) target bundleno = 185 (0xb9), region = 40  ;;  %1531 = vset.pattern.permute.xlu1 (!%p208_p2), %v1610_v0  ;;  %1520 = vset.pattern.permute.xlu0 (!%p208_p2), %v1610_v0 }
   0xd   : > { %s1950_s19 = smov (!%p245_p3, %s1094_s19), 1 }
   0xe   : > { %s1649_s20 = sshll.u32 %s1950_s19, 7 }
   0xf   : > { %s1655_s23 = scalar_lea.vmem %s1945_s2, %s1649_s20  ;;  %s1677_s26 = scalar_lea.vmem %s1943_s0, %s1649_s20 }
  0x10   : > { %v1482_v1 = vld [vmem:[%s1655_s23 + $0x10] sm:$0xff]   ;;  %v1308_v2 = vld [vmem:[%s1655_s23] sm:$0xff]   ;;  %v1483_v3 = vld [vmem:[%s1655_s23 + $0x18] sm:$0xff]   ;;  %s1690_s6 = scalar_lea.vmem %s1944_s1, %s1649_s20  ;;  %s1862_s11 = scalar_lea.vmem %s1948_s5, %s1649_s20 }
  0x11   : > { %v1317_v4 = vunpack.c.l.bf16 %v1482_v1  ;;  %v1318_v5 = vunpack.c.h.bf16 %v1482_v1  ;;  %v1309_v6 = vunpack.c.l.bf16 %v1308_v2  ;;  %v1310_v7 = vunpack.c.h.bf16 %v1308_v2  ;;  %v1481_v8 = vld [vmem:[%s1655_s23 + $0x8] sm:$0xff]   ;;  %v1484_v14 = vld [vmem:[%s1655_s23 + $0x20] sm:$0xff]   ;;  %v1487_v23 = vld [vmem:[%s1655_s23 + $0x38] sm:$0xff]  }
  0x12   : > { %v1485_v9 = vld [vmem:[%s1655_s23 + $0x28] sm:$0xff]   ;;  %v1321_v10 = vunpack.c.l.bf16 %v1483_v3  ;;  %v1322_v11 = vunpack.c.h.bf16 %v1483_v3  ;;  %v1313_v12 = vunpack.c.l.bf16 %v1481_v8  ;;  %v1314_v13 = vunpack.c.h.bf16 %v1481_v8  ;;  %v1486_v24 = vld [vmem:[%s1655_s23 + $0x30] sm:$0xff]   ;;  %v1488_v32 = vld [vmem:[%s1655_s23 + $0x40] sm:$0xff]  }
  0x13   : > { %v1532_v15 = vpack.i.bf16 %v1318_v5, %v1317_v4  ;;  %v1521_v16 = vpack.i.bf16 %v1310_v7, %v1309_v6  ;;  %v1329_v17 = vunpack.c.l.bf16 %v1485_v9  ;;  %v1330_v18 = vunpack.c.h.bf16 %v1485_v9  ;;  %v1489_v31 = vld [vmem:[%s1655_s23 + $0x48] sm:$0xff]   ;;  %v1491_v39 = vld [vmem:[%s1655_s23 + $0x58] sm:$0xff]   ;;  %v1490_v40 = vld [vmem:[%s1655_s23 + $0x50] sm:$0xff]  }
  0x14   : > { %v1537_v19 = vpack.i.bf16 %v1322_v11, %v1321_v10  ;;  %v1526_v20 = vpack.i.bf16 %v1314_v13, %v1313_v12  ;;  %v1325_v21 = vunpack.c.l.bf16 %v1484_v14  ;;  %v1326_v22 = vunpack.c.h.bf16 %v1484_v14  ;;  %v1493_v47 = vld [vmem:[%s1655_s23 + $0x68] sm:$0xff]   ;;  %v1492_v48 = vld [vmem:[%s1655_s23 + $0x60] sm:$0xff]   ;;  %v1495_v55 = vld [vmem:[%s1655_s23 + $0x78] sm:$0xff]  }
  0x15   : > { %1533 = vperm.xlu1 %1531, %v1532_v15   ;;  %1522 = vperm.xlu0 %1520, %v1521_v16   ;;  %v1547_v25 = vpack.i.bf16 %v1330_v18, %v1329_v17  ;;  %v1337_v26 = vunpack.c.l.bf16 %v1487_v23  ;;  %v1338_v28 = vunpack.c.h.bf16 %v1487_v23  ;;  %v1333_v29 = vunpack.c.l.bf16 %v1486_v24  ;;  %v1494_v56 = vld [vmem:[%s1655_s23 + $0x70] sm:$0xff]   ;;  %v1180_v2 = vld [vmem:[%s1677_s26] sm:$0xff]   ;;  %v1453_v9 = vld [vmem:[%s1677_s26 + $0x18] sm:$0xff]  }
  0x16   : > { %v1542_v27 = vpack.i.bf16 %v1326_v22, %v1325_v21  ;;  %v1334_v30 = vunpack.c.h.bf16 %v1486_v24  ;;  %v1345_v33 = vunpack.c.l.bf16 %v1489_v31  ;;  %v1346_v34 = vunpack.c.h.bf16 %v1489_v31  ;;  %v1452_v1 = vld [vmem:[%s1677_s26 + $0x10] sm:$0xff]   ;;  %v1684_v5 = vld [vmem:[%s1946_s3] ss:$0 sm:$0xff] }
  0x17   : > { %v1557_v35 = vpack.i.bf16 %v1338_v28, %v1337_v26  ;;  %v1341_v37 = vunpack.c.l.bf16 %v1488_v32  ;;  %v1342_v38 = vunpack.c.h.bf16 %v1488_v32  ;;  %v1353_v42 = vunpack.c.l.bf16 %v1491_v39  ;;  %v1698_v10 = vld [vmem:[%s1947_s4] ss:$0 sm:$0xff]  ;;  %v1467_v11 = vld [vmem:[%s1690_s6 + $0x10] sm:$0xff]  }
  0x18   : > { %v1552_v36 = vpack.i.bf16 %v1334_v30, %v1333_v29  ;;  %v1567_v41 = vpack.i.bf16 %v1346_v34, %v1345_v33  ;;  %v1354_v44 = vunpack.c.h.bf16 %v1491_v39  ;;  %v1349_v45 = vunpack.c.l.bf16 %v1490_v40  ;;  %v1244_v14 = vld [vmem:[%s1690_s6] sm:$0xff]   ;;  %v1468_v30 = vld [vmem:[%s1690_s6 + $0x18] sm:$0xff]  }
  0x19   : > { %1538 = vperm.xlu1 %1531, %v1537_v19   ;;  %1527 = vperm.xlu0 %1520, %v1526_v20   ;;  %v1562_v43 = vpack.i.bf16 %v1342_v38, %v1341_v37  ;;  %v1350_v46 = vunpack.c.h.bf16 %v1490_v40  ;;  %v1361_v49 = vunpack.c.l.bf16 %v1493_v47  ;;  %v1362_v50 = vunpack.c.h.bf16 %v1493_v47  ;;  %v1451_v20 = vld [vmem:[%s1677_s26 + $0x8] sm:$0xff]   ;;  %v1454_v34 = vld [vmem:[%s1677_s26 + $0x20] sm:$0xff]  }
  0x1a   : > { %v1577_v51 = vpack.i.bf16 %v1354_v44, %v1353_v42  ;;  %v1357_v53 = vunpack.c.l.bf16 %v1492_v48  ;;  %v1358_v54 = vunpack.c.h.bf16 %v1492_v48  ;;  %v1369_v58 = vunpack.c.l.bf16 %v1495_v55  ;;  %v1466_v44 = vld [vmem:[%s1690_s6 + $0x8] sm:$0xff]  }
  0x1b   : > { %v1572_v52 = vpack.i.bf16 %v1350_v46, %v1349_v45  ;;  %v1587_v57 = vpack.i.bf16 %v1362_v50, %v1361_v49  ;;  %v1370_v60 = vunpack.c.h.bf16 %v1495_v55  ;;  %v1365_v61 = vunpack.c.l.bf16 %v1494_v56 }
  0x1c   : > { %v1582_v59 = vpack.i.bf16 %v1358_v54, %v1357_v53  ;;  %v1366_v62 = vunpack.c.h.bf16 %v1494_v56  ;;  %v1189_v3 = vunpack.c.l.bf16 %v1452_v1  ;;  %v1190_v4 = vunpack.c.h.bf16 %v1452_v1  ;;  %v1470_v56 = vld [vmem:[%s1690_s6 + $0x28] sm:$0xff]  }
  0x1d   : > { %1548 = vperm.xlu1 %1531, %v1547_v25   ;;  %1543 = vperm.xlu0 %1520, %v1542_v27   ;;  %v1597_v63 = vpack.i.bf16 %v1370_v60, %v1369_v58  ;;  %v1181_v6 = vunpack.c.l.bf16 %v1180_v2  ;;  %v1182_v12 = vunpack.c.h.bf16 %v1180_v2  ;;  %v1193_v15 = vunpack.c.l.bf16 %v1453_v9  ;;  %v1455_v27 = vld [vmem:[%s1677_s26 + $0x28] sm:$0xff]  }
  0x1e   : > { %v1592_v0 = vpack.i.bf16 %v1366_v62, %v1365_v61  ;;  %v340_v7 = vmul.f32 %v1189_v3, %v1684_v5  ;;  %v341_v8 = vmul.f32 %v1190_v4, %v1684_v5  ;;  %v1253_v18 = vunpack.c.l.bf16 %v1467_v11 }
  0x1f   : > { %v336_v13 = vmul.f32 %v1181_v6, %v1684_v5  ;;  %v1254_v19 = vunpack.c.h.bf16 %v1467_v11  ;;  %v337_v21 = vmul.f32 %v1182_v12, %v1684_v5  ;;  %v1194_v22 = vunpack.c.h.bf16 %v1453_v9 }
  0x20   : > { %v379_v16 = vadd.f32 %v1698_v10, %v340_v7  ;;  %v380_v17 = vadd.f32 %v1698_v10, %v341_v8  ;;  %v1245_v24 = vunpack.c.l.bf16 %v1244_v14  ;;  %v342_v25 = vmul.f32 %v1193_v15, %v1684_v5 }
  0x21   : > { %1558 = vperm.xlu1 %1531, %v1557_v35   ;;  %1553 = vperm.xlu0 %1520, %v1552_v36   ;;  %v375_v23 = vadd.f32 %v1698_v10, %v336_v13  ;;  %v1185_v26 = vunpack.c.l.bf16 %v1451_v20  ;;  %v376_v31 = vadd.f32 %v1698_v10, %v337_v21  ;;  %v1246_v32 = vunpack.c.h.bf16 %v1244_v14 }
  0x22   : > { %v475_v28 = vadd.f32 %v1253_v18, %v379_v16  ;;  %v476_v29 = vadd.f32 %v1254_v19, %v380_v17  ;;  %v343_v33 = vmul.f32 %v1194_v22, %v1684_v5  ;;  %v1186_v36 = vunpack.c.h.bf16 %v1451_v20  ;;  %v1456_v16 = vld [vmem:[%s1677_s26 + $0x30] sm:$0xff]  }
  0x23   : > { %v471_v35 = vadd.f32 %v1245_v24, %v375_v23  ;;  %v1201_v37 = vunpack.c.l.bf16 %v1455_v27  ;;  %v381_v38 = vadd.f32 %v1698_v10, %v342_v25  ;;  %v1257_v39 = vunpack.c.l.bf16 %v1468_v30  ;;  %v1472_v23 = vld [vmem:[%s1690_s6 + $0x38] sm:$0xff]  }
  0x24   : > { %v1258_v40 = vunpack.c.h.bf16 %v1468_v30  ;;  %v539_v42 = vmul.f32 0.333, %v475_v28  ;;  %v1202_v45 = vunpack.c.h.bf16 %v1455_v27  ;;  %v1197_v46 = vunpack.c.l.bf16 %v1454_v34 }
  0x25   : > { %1568 = vperm.xlu1 %1531, %v1567_v41   ;;  %1563 = vperm.xlu0 %1520, %v1562_v43   ;;  %v338_v41 = vmul.f32 %v1185_v26, %v1684_v5  ;;  %v540_v43 = vmul.f32 0.333, %v476_v29  ;;  %vm507_vm0 = vcmp.gt.f32.partialorder %v475_v28, 0.0  ;;  %vm508_vm1 = vcmp.gt.f32.partialorder %v476_v29, 0.0 }
  0x26   : > { %v472_v47 = vadd.f32 %v1246_v32, %v376_v31  ;;  %v382_v48 = vadd.f32 %v1698_v10, %v343_v33  ;;  %vm503_vm2 = vcmp.gt.f32.partialorder %v471_v35, 0.0  ;;  %v535_v49 = vmul.f32 0.333, %v471_v35 }
  0x27   : > { %v339_v50 = vmul.f32 %v1186_v36, %v1684_v5  ;;  %v477_v53 = vadd.f32 %v1257_v39, %v381_v38  ;;  %v377_v54 = vadd.f32 %v1698_v10, %v338_v41  ;;  %v1249_v55 = vunpack.c.l.bf16 %v1466_v44 }
  0x28   : > { %v1723_v58 = vsel %vm507_vm0, %v475_v28, %v539_v42  ;;  %v347_v60 = vmul.f32 %v1202_v45, %v1684_v5  ;;  %v344_v61 = vmul.f32 %v1197_v46, %v1684_v5  ;;  %vm504_vm3 = vcmp.gt.f32.partialorder %v472_v47, 0.0  ;;  %v1471_v45 = vld [vmem:[%s1690_s6 + $0x30] sm:$0xff]  }
  0x29   : > { %1578 = vperm.xlu1 %1531, %v1577_v51   ;;  %1573 = vperm.xlu0 %1520, %v1572_v52   ;;  %v346_v51 = vmul.f32 %v1201_v37, %v1684_v5  ;;  %v1457_v52 = vld [vmem:[%s1677_s26 + $0x38] sm:$0xff]   ;;  %v536_v62 = vmul.f32 0.333, %v472_v47  ;;  %v378_v2 = vadd.f32 %v1698_v10, %v339_v50  ;;  %v1250_v3 = vunpack.c.h.bf16 %v1466_v44 }
  0x2a   : > { %v1209_v1 = vunpack.c.l.bf16 %v1457_v52  ;;  %v1265_v6 = vunpack.c.l.bf16 %v1470_v56  ;;  %v541_v7 = vmul.f32 0.333, %v477_v53  ;;  %v473_v8 = vadd.f32 %v1249_v55, %v377_v54 }
  0x2b   : > { %v385_v4 = vadd.f32 %v1698_v10, %v346_v51  ;;  %v1210_v11 = vunpack.c.h.bf16 %v1457_v52  ;;  %v386_v12 = vadd.f32 %v1698_v10, %v347_v60  ;;  %v1266_v13 = vunpack.c.h.bf16 %v1470_v56  ;;  %v1461_v60 = vld [vmem:[%s1677_s26 + $0x58] sm:$0xff]  }
  0x2c   : > { %v383_v14 = vadd.f32 %v1698_v10, %v344_v61  ;;  %v1737_v17 = vsel %vm503_vm2, %v471_v35, %v535_v49  ;;  %v1740_v18 = vsel %vm504_vm3, %v472_v47, %v536_v62  ;;  %vm509_vm4 = vcmp.gt.f32.partialorder %v477_v53, 0.0  ;;  %v1459_v35 = vld [vmem:[%s1677_s26 + $0x48] sm:$0xff]  }
  0x2d   : > { %1588 = vperm.xlu1 %1531, %v1587_v57   ;;  %1583 = vperm.xlu0 %1520, %v1582_v59   ;;  %v1198_v57 = vunpack.c.h.bf16 %v1454_v34  ;;  %v1725_v59 = vsel %vm508_vm1, %v476_v29, %v540_v43  ;;  %v350_v19 = vmul.f32 %v1209_v1, %v1684_v5  ;;  %v474_v21 = vadd.f32 %v1250_v3, %v378_v2  ;;  %v1474_v3 = vld [vmem:[%s1690_s6 + $0x48] sm:$0xff]  }
  0x2e   : > { %v481_v22 = vadd.f32 %v1265_v6, %v385_v4  ;;  %v351_v26 = vmul.f32 %v1210_v11, %v1684_v5  ;;  %v1205_v27 = vunpack.c.l.bf16 %v1456_v16  ;;  %v1746_v28 = vsel %vm509_vm4, %v477_v53, %v541_v7  ;;  %v1458_v53 = vld [vmem:[%s1677_s26 + $0x40] sm:$0xff]   ;;  %v1460_v6 = vld [vmem:[%s1677_s26 + $0x50] sm:$0xff]  }
  0x2f   : > { %v345_v9 = vmul.f32 %v1198_v57, %v1684_v5  ;;  %vm505_vm6 = vcmp.gt.f32.partialorder %v473_v8, 0.0  ;;  %v482_v29 = vadd.f32 %v1266_v13, %v386_v12  ;;  %v537_v31 = vmul.f32 0.333, %v473_v8 }
  0x30   : > { %v389_v32 = vadd.f32 %v1698_v10, %v350_v19  ;;  %v1273_v33 = vunpack.c.l.bf16 %v1472_v23  ;;  %v1206_v34 = vunpack.c.h.bf16 %v1456_v16  ;;  %vm506_vm7 = vcmp.gt.f32.partialorder %v474_v21, 0.0 }
  0x31   : > { %1598 = vperm.xlu1 %1531, %v1597_v63   ;;  %1593 = vperm.xlu0 %1520, %v1592_v0   ;;  %v478_v63 = vadd.f32 %v1258_v40, %v382_v48  ;;  %v1469_v0 = vld [vmem:[%s1690_s6 + $0x20] sm:$0xff]   ;;  %v384_v24 = vadd.f32 %v1698_v10, %v345_v9  ;;  %v538_v36 = vmul.f32 0.333, %v474_v21  ;;  %vm513_vm8 = vcmp.gt.f32.partialorder %v481_v22, 0.0 }
  0x32   : > { %v1261_v15 = vunpack.c.l.bf16 %v1469_v0  ;;  %v1262_v25 = vunpack.c.h.bf16 %v1469_v0  ;;  %v545_v37 = vmul.f32 0.333, %v481_v22  ;;  %v390_v39 = vadd.f32 %v1698_v10, %v351_v26 }
  0x33   : > { %vm510_vm5 = vcmp.gt.f32.partialorder %v478_v63, 0.0  ;;  %v542_v20 = vmul.f32 0.333, %v478_v63  ;;  %v1274_v40 = vunpack.c.h.bf16 %v1472_v23  ;;  %v348_v41 = vmul.f32 %v1205_v27, %v1684_v5 }
  0x34   : > { %v479_v30 = vadd.f32 %v1261_v15, %v383_v14  ;;  %v480_v38 = vadd.f32 %v1262_v25, %v384_v24  ;;  %v546_v43 = vmul.f32 0.333, %v482_v29  ;;  %v1217_v46 = vunpack.c.l.bf16 %v1459_v35  ;;  %v1473_v25 = vld [vmem:[%s1690_s6 + $0x40] sm:$0xff]  }
  0x35   : > { %v1753_v42 = vsel %vm510_vm5, %v478_v63, %v542_v20  ;;  %vm514_vm9 = vcmp.gt.f32.partialorder %v482_v29, 0.0  ;;  %v485_v47 = vadd.f32 %v1273_v33, %v389_v32  ;;  %v349_v48 = vmul.f32 %v1206_v34, %v1684_v5  ;;  %v1463_v20 = vld [vmem:[%s1677_s26 + $0x68] sm:$0xff]   ;;  %v1476_v33 = vld [vmem:[%s1690_s6 + $0x58] sm:$0xff]  }
  0x36   : > { %v543_v44 = vmul.f32 0.333, %v479_v30  ;;  %vm511_vm10 = vcmp.gt.f32.partialorder %v479_v30, 0.0  ;;  %v1758_v49 = vsel %vm505_vm6, %v473_v8, %v537_v31  ;;  %v1761_v50 = vsel %vm506_vm7, %v474_v21, %v538_v36 }
  0x37   : > { %v1764_v51 = vsel %vm513_vm8, %v481_v22, %v545_v37  ;;  %v1218_v52 = vunpack.c.h.bf16 %v1459_v35  ;;  %v544_v54 = vmul.f32 0.333, %v480_v38  ;;  %v1767_v55 = vadd.f32 %v1274_v40, %v390_v39 }
  0x38   : > { %v387_v56 = vadd.f32 %v1698_v10, %v348_v41  ;;  %v1269_v57 = vunpack.c.l.bf16 %v1471_v45  ;;  %v1771_v61 = vsel %vm514_vm9, %v482_v29, %v546_v43  ;;  %vm512_vm11 = vcmp.gt.f32.partialorder %v480_v38, 0.0  ;;  %v1475_v41 = vld [vmem:[%s1690_s6 + $0x50] sm:$0xff]  }
  0x39   : > { %v1773_v62 = vsel %vm511_vm10, %v479_v30, %v543_v44  ;;  %v354_v63 = vmul.f32 %v1217_v46, %v1684_v5  ;;  %v549_v0 = vmul.f32 0.333, %v485_v47  ;;  %v388_v1 = vadd.f32 %v1698_v10, %v349_v48 }
  0x3a   : > { %v1270_v2 = vunpack.c.h.bf16 %v1471_v45  ;;  %v1213_v4 = vunpack.c.l.bf16 %v1458_v53  ;;  %vm517_vm12 = vcmp.gt.f32.partialorder %v485_v47, 0.0  ;;  %v355_v7 = vmul.f32 %v1218_v52, %v1684_v5 }
  0x3b   : > { %v1214_v8 = vunpack.c.h.bf16 %v1458_v53  ;;  %v1225_v9 = vunpack.c.l.bf16 %v1461_v60  ;;  %v1780_v11 = vsel %vm512_vm11, %v480_v38, %v544_v54  ;;  %vm518_vm13 = vcmp.gt.f32.partialorder %v1767_v55, 0.0 }
  0x3c   : > { %v483_v12 = vadd.f32 %v1269_v57, %v387_v56  ;;  %v1226_v13 = vunpack.c.h.bf16 %v1461_v60  ;;  %v393_v14 = vadd.f32 %v1698_v10, %v354_v63  ;;  %v1281_v15 = vunpack.c.l.bf16 %v1474_v3 }
  0x3d   : > { %v1221_v16 = vunpack.c.l.bf16 %v1460_v6  ;;  %v1222_v19 = vunpack.c.h.bf16 %v1460_v6  ;;  %v550_v21 = vmul.f32 0.333, %v1767_v55  ;;  %v1786_v22 = vsel %vm517_vm12, %v485_v47, %v549_v0  ;;  %v1478_v0 = vld [vmem:[%s1690_s6 + $0x68] sm:$0xff]  }
  0x3e   : > { %v484_v23 = vadd.f32 %v1270_v2, %v388_v1  ;;  %v352_v24 = vmul.f32 %v1213_v4, %v1684_v5  ;;  %v394_v26 = vadd.f32 %v1698_v10, %v355_v7  ;;  %v1282_v27 = vunpack.c.h.bf16 %v1474_v3 }
  0x3f   : > { %v353_v29 = vmul.f32 %v1214_v8, %v1684_v5  ;;  %v358_v30 = vmul.f32 %v1225_v9, %v1684_v5  ;;  %vm515_vm14 = vcmp.gt.f32.partialorder %v483_v12, 0.0  ;;  %v547_v31 = vmul.f32 0.333, %v483_v12  ;;  %v1462_v9 = vld [vmem:[%s1677_s26 + $0x60] sm:$0xff]  }
  0x40   : > { %v359_v32 = vmul.f32 %v1226_v13, %v1684_v5  ;;  %v1233_v34 = vunpack.c.l.bf16 %v1463_v20  ;;  %v489_v35 = vadd.f32 %v1281_v15, %v393_v14  ;;  %v1277_v36 = vunpack.c.l.bf16 %v1473_v25 }
  0x41   : > { %v356_v37 = vmul.f32 %v1221_v16, %v1684_v5  ;;  %v357_v38 = vmul.f32 %v1222_v19, %v1684_v5  ;;  %vm516_vm15 = vcmp.gt.f32.partialorder %v484_v23, 0.0  ;;  %v548_v39 = vmul.f32 0.333, %v484_v23 }
  0x42   : > { %v391_v40 = vadd.f32 %v1698_v10, %v352_v24  ;;  %v1234_v43 = vunpack.c.h.bf16 %v1463_v20  ;;  %v392_v44 = vadd.f32 %v1698_v10, %v353_v29  ;;  %v1278_v45 = vunpack.c.h.bf16 %v1473_v25 }
  0x43   : > { %v397_v46 = vadd.f32 %v1698_v10, %v358_v30  ;;  %v1289_v47 = vunpack.c.l.bf16 %v1476_v33  ;;  %v490_v48 = vadd.f32 %v1282_v27, %v394_v26  ;;  %v398_v52 = vadd.f32 %v1698_v10, %v359_v32 }
  0x44   : > { %v1290_v53 = vunpack.c.h.bf16 %v1476_v33  ;;  %v362_v54 = vmul.f32 %v1233_v34, %v1684_v5  ;;  %v395_v56 = vadd.f32 %v1698_v10, %v356_v37  ;;  %v396_v57 = vadd.f32 %v1698_v10, %v357_v38  ;;  %v1465_v34 = vld [vmem:[%s1677_s26 + $0x78] sm:$0xff]   ;;  %v1477_v38 = vld [vmem:[%s1690_s6 + $0x60] sm:$0xff]  }
  0x45   : > { %v1285_v60 = vunpack.c.l.bf16 %v1475_v41  ;;  %v1286_v63 = vunpack.c.h.bf16 %v1475_v41  ;;  %v1809_v1 = vsel %vm518_vm13, %v1767_v55, %v550_v21  ;;  %v1812_v2 = vsel %vm515_vm14, %v483_v12, %v547_v31 }
  0x46   : > { %v487_v3 = vadd.f32 %v1277_v36, %v391_v40  ;;  %v363_v4 = vmul.f32 %v1234_v43, %v1684_v5  ;;  %vm521_vm0 = vcmp.gt.f32.partialorder %v489_v35, 0.0  ;;  %v553_v6 = vmul.f32 0.333, %v489_v35 }
  0x47   : > { %v488_v7 = vadd.f32 %v1278_v45, %v392_v44  ;;  %v493_v8 = vadd.f32 %v1289_v47, %v397_v46  ;;  %v1817_v13 = vsel %vm516_vm15, %v484_v23, %v548_v39  ;;  %v494_v14 = vadd.f32 %v1290_v53, %v398_v52 }
  0x48   : > { %v401_v15 = vadd.f32 %v1698_v10, %v362_v54  ;;  %v1297_v16 = vunpack.c.l.bf16 %v1478_v0  ;;  %vm522_vm1 = vcmp.gt.f32.partialorder %v490_v48, 0.0  ;;  %v554_v55 = vmul.f32 0.333, %v490_v48 }
  0x49   : > { %v491_v19 = vadd.f32 %v1285_v60, %v395_v56  ;;  %v492_v12 = vadd.f32 %v1286_v63, %v396_v57  ;;  %v551_v20 = vmul.f32 0.333, %v487_v3  ;;  %v402_v21 = vadd.f32 %v1698_v10, %v363_v4 }
  0x4a   : > { %v1298_v24 = vunpack.c.h.bf16 %v1478_v0  ;;  %v1229_v25 = vunpack.c.l.bf16 %v1462_v9  ;;  %vm519_vm2 = vcmp.gt.f32.partialorder %v487_v3, 0.0  ;;  %vm520_vm3 = vcmp.gt.f32.partialorder %v488_v7, 0.0 }
  0x4b   : > { %v552_v26 = vmul.f32 0.333, %v488_v7  ;;  %v557_v23 = vmul.f32 0.333, %v493_v8  ;;  %vm525_vm4 = vcmp.gt.f32.partialorder %v493_v8, 0.0  ;;  %v497_v29 = vadd.f32 %v1297_v16, %v401_v15 }
  0x4c   : > { %v558_v27 = vmul.f32 0.333, %v494_v14  ;;  %v1230_v30 = vunpack.c.h.bf16 %v1462_v9  ;;  %v1822_v31 = vsel %vm521_vm0, %v489_v35, %v553_v6  ;;  %vm526_vm5 = vcmp.gt.f32.partialorder %v494_v14, 0.0  ;;  %v1848_v6 = vld [vmem:[%s1690_s6 + $0x78] sm:$0xff]  }
  0x4d   : > { %v555_v32 = vmul.f32 0.333, %v491_v19  ;;  %v556_v33 = vmul.f32 0.333, %v492_v12  ;;  %vm523_vm6 = vcmp.gt.f32.partialorder %v491_v19, 0.0  ;;  %vm524_vm7 = vcmp.gt.f32.partialorder %v492_v12, 0.0 }
  0x4e   : > { %v498_v36 = vadd.f32 %v1298_v24, %v402_v21  ;;  %v360_v37 = vmul.f32 %v1229_v25, %v1684_v5  ;;  %v1828_v39 = vsel %vm522_vm1, %v490_v48, %v554_v55  ;;  %v1831_v40 = vsel %vm519_vm2, %v487_v3, %v551_v20 }
  0x4f   : > { %v1834_v41 = vsel %vm520_vm3, %v488_v7, %v552_v26  ;;  %v1837_v35 = vsel %vm525_vm4, %v493_v8, %v557_v23  ;;  %v1839_v43 = vsel %vm526_vm5, %v494_v14, %v558_v27  ;;  %v561_v44 = vmul.f32 0.333, %v497_v29 }
  0x50   : > { %v361_v45 = vmul.f32 %v1230_v30, %v1684_v5  ;;  %v1241_v46 = vunpack.c.l.bf16 %v1465_v34  ;;  %v1842_v47 = vsel %vm523_vm6, %v491_v19, %v555_v32  ;;  %v1844_v48 = vsel %vm524_vm7, %v492_v12, %v556_v33 }
  0x51   : > { %vm529_vm8 = vcmp.gt.f32.partialorder %v497_v29, 0.0  ;;  %v1293_v52 = vunpack.c.l.bf16 %v1477_v38  ;;  %vm530_vm9 = vcmp.gt.f32.partialorder %v498_v36, 0.0  ;;  %v562_v56 = vmul.f32 0.333, %v498_v36 }
  0x52   : > { %v399_v57 = vadd.f32 %v1698_v10, %v360_v37  ;;  %v1242_v60 = vunpack.c.h.bf16 %v1465_v34  ;;  %v1850_v7 = vsel %vm529_vm8, %v497_v29, %v561_v44  ;;  %v400_v8 = vadd.f32 %v1698_v10, %v361_v45 }
  0x53   : > { %v1294_v9 = vunpack.c.h.bf16 %v1477_v38  ;;  %v366_v14 = vmul.f32 %v1241_v46, %v1684_v5  ;;  %v1865_v21 = vsel %vm530_vm9, %v498_v36, %v562_v56  ;;  %v1306_v32 = vunpack.c.h.bf16 %v1848_v6 }
  0x54   : > { %v1867_v24 = vadd.f32 %v1293_v52, %v399_v57 }
  0x55   : > { %v405_v30 = vadd.f32 %v1698_v10, %v366_v14  ;;  %v1878_v36 = vadd.f32 %v1294_v9, %v400_v8 }
  0x56   : > { %vm527_vm10 = vcmp.gt.f32.partialorder %v1867_v24, 0.0 }
  0x57   : > { %vm528_vm11 = vcmp.gt.f32.partialorder %v1878_v36, 0.0 }
  0x94   : > { %v1534_v53 = vpop.permute.xlu1 %1533  ;;  %v1523_v54 = vpop.permute.xlu0 %1522 }
  0x95   : > { %v1536_v63 = vunpack.i.h.bf16 %v1534_v53  ;;  %v1535_v0 = vunpack.i.l.bf16 %v1534_v53  ;;  %v1525_v3 = vunpack.i.h.bf16 %v1523_v54  ;;  %v1524_v4 = vunpack.i.l.bf16 %v1523_v54 }
  0x97   : > { %v827_v15 = vmul.f32 %v1535_v0, %v1723_v58  ;;  %v828_v16 = vmul.f32 %v1536_v63, %v1725_v59  ;;  %v823_v55 = vmul.f32 %v1524_v4, %v1737_v17  ;;  %v824_v19 = vmul.f32 %v1525_v3, %v1740_v18  ;;  %v1464_v17 = vld [vmem:[%s1677_s26 + $0x70] sm:$0xff]  }
  0x98   : > { %v1539_v12 = vpop.permute.xlu1 %1538  ;;  %v1528_v20 = vpop.permute.xlu0 %1527  ;;  %v367_v58 = vmul.f32 %v1242_v60, %v1684_v5  ;;  %v1305_v59 = vunpack.c.l.bf16 %v1848_v6  ;;  %v1237_v37 = vunpack.c.l.bf16 %v1464_v17  ;;  %v1238_v53 = vunpack.c.h.bf16 %v1464_v17  ;;  %v1479_v60 = vld [vmem:[%s1690_s6 + $0x70] sm:$0xff]  }
  0x99   : > { %v1384_v18 = vpack.c.bf16 %v828_v16, %v827_v15  ;;  %v1374_v25 = vpack.c.bf16 %v824_v19, %v823_v55  ;;  %v1541_v26 = vunpack.i.h.bf16 %v1539_v12  ;;  %v1540_v23 = vunpack.i.l.bf16 %v1539_v12 }
  0x9a   : > { %v1530_v27 = vunpack.i.h.bf16 %v1528_v20  ;;  %v1529_v29 = vunpack.i.l.bf16 %v1528_v20  ;;  %v406_v52 = vadd.f32 %v1698_v10, %v367_v58  ;;  %v559_v0 = vmul.f32 0.333, %v1867_v24 }
  0x9b   : > { %1497 = vst [vmem:[%s1862_s11 + $0x10] sm:$0xff] %v1384_v18   ;;  %1375 = vst [vmem:[%s1862_s11] sm:$0xff] %v1374_v25   ;;  %v829_v33 = vmul.f32 %v1540_v23, %v1746_v28  ;;  %v830_v34 = vmul.f32 %v1541_v26, %v1753_v42  ;;  %v364_v4 = vmul.f32 %v1237_v37, %v1684_v5  ;;  %v1301_v16 = vunpack.c.l.bf16 %v1479_v60 }
  0x9c   : > { %v825_v38 = vmul.f32 %v1529_v29, %v1758_v49  ;;  %v826_v44 = vmul.f32 %v1530_v27, %v1761_v50  ;;  %v1549_v45 = vpop.permute.xlu1 %1548  ;;  %v1544_v46 = vpop.permute.xlu0 %1543  ;;  %v1893_v14 = vadd.f32 %v1305_v59, %v405_v30  ;;  %v365_v15 = vmul.f32 %v1238_v53, %v1684_v5 }
  0x9d   : > { %v1389_v54 = vpack.c.bf16 %v830_v34, %v829_v33  ;;  %v1551_v56 = vunpack.i.h.bf16 %v1549_v45  ;;  %v1550_v57 = vunpack.i.l.bf16 %v1549_v45  ;;  %v1546_v28 = vunpack.i.h.bf16 %v1544_v46 }
  0x9e   : > { %v1379_v42 = vpack.c.bf16 %v826_v44, %v825_v38  ;;  %v1545_v63 = vunpack.i.l.bf16 %v1544_v46  ;;  %v560_v20 = vmul.f32 0.333, %v1878_v36  ;;  %v403_v5 = vadd.f32 %v1698_v10, %v364_v4 }
  0x9f   : > { %1498 = vst [vmem:[%s1862_s11 + $0x18] sm:$0xff] %v1389_v54   ;;  %v833_v49 = vmul.f32 %v1550_v57, %v1764_v51  ;;  %v834_v50 = vmul.f32 %v1551_v56, %v1771_v61  ;;  %v832_v3 = vmul.f32 %v1546_v28, %v1780_v11  ;;  %v502_v26 = vadd.f32 %v1306_v32, %v406_v52 }
  0xa0   : > { %1496 = vst [vmem:[%s1862_s11 + $0x8] sm:$0xff] %v1379_v42   ;;  %v831_v6 = vmul.f32 %v1545_v63, %v1773_v62  ;;  %v1559_v8 = vpop.permute.xlu1 %1558  ;;  %v1554_v9 = vpop.permute.xlu0 %1553  ;;  %v404_v23 = vadd.f32 %v1698_v10, %v365_v15  ;;  %v1302_v27 = vunpack.c.h.bf16 %v1479_v60  ;;  %vm533_vm12 = vcmp.gt.f32.partialorder %v1893_v14, 0.0 }
  0xa1   : > { %v1399_v55 = vpack.c.bf16 %v834_v50, %v833_v49  ;;  %v1561_v51 = vunpack.i.h.bf16 %v1559_v8  ;;  %v1560_v19 = vunpack.i.l.bf16 %v1559_v8  ;;  %v1556_v61 = vunpack.i.h.bf16 %v1554_v9 }
  0xa2   : > { %v1394_v12 = vpack.c.bf16 %v832_v3, %v831_v6  ;;  %v1555_v11 = vunpack.i.l.bf16 %v1554_v9  ;;  %v499_v37 = vadd.f32 %v1301_v16, %v403_v5  ;;  %v565_v46 = vmul.f32 0.333, %v1893_v14 }
  0xa3   : > { %1500 = vst [vmem:[%s1862_s11 + $0x28] sm:$0xff] %v1399_v55   ;;  %v837_v62 = vmul.f32 %v1560_v19, %v1786_v22  ;;  %v838_v58 = vmul.f32 %v1561_v51, %v1809_v1  ;;  %v836_v59 = vmul.f32 %v1556_v61, %v1817_v13  ;;  %v591_v13 = vsel %vm527_vm10, %v1867_v24, %v559_v0 }
  0xa4   : > { %1499 = vst [vmem:[%s1862_s11 + $0x20] sm:$0xff] %v1394_v12   ;;  %v835_v17 = vmul.f32 %v1555_v11, %v1812_v2  ;;  %v1569_v18 = vpop.permute.xlu1 %1568  ;;  %v1564_v25 = vpop.permute.xlu0 %1563  ;;  %v592_v24 = vsel %vm528_vm11, %v1878_v36, %v560_v20  ;;  %v500_v52 = vadd.f32 %v1302_v27, %v404_v23  ;;  %vm534_vm13 = vcmp.gt.f32.partialorder %v502_v26, 0.0 }
  0xa5   : > { %v1409_v29 = vpack.c.bf16 %v838_v58, %v837_v62  ;;  %v1571_v30 = vunpack.i.h.bf16 %v1569_v18  ;;  %v1570_v22 = vunpack.i.l.bf16 %v1569_v18  ;;  %v1566_v33 = vunpack.i.h.bf16 %v1564_v25 }
  0xa6   : > { %v1404_v1 = vpack.c.bf16 %v836_v59, %v835_v17  ;;  %v1565_v34 = vunpack.i.l.bf16 %v1564_v25  ;;  %v566_v57 = vmul.f32 0.333, %v502_v26  ;;  %vm531_vm14 = vcmp.gt.f32.partialorder %v499_v37, 0.0 }
  0xa7   : > { %1502 = vst [vmem:[%s1862_s11 + $0x38] sm:$0xff] %v1409_v29   ;;  %v841_v2 = vmul.f32 %v1570_v22, %v1822_v31  ;;  %v842_v32 = vmul.f32 %v1571_v30, %v1828_v39  ;;  %v840_v10 = vmul.f32 %v1566_v33, %v1834_v41  ;;  %vm532_vm15 = vcmp.gt.f32.partialorder %v500_v52, 0.0 }
  0xa8   : > { %1501 = vst [vmem:[%s1862_s11 + $0x30] sm:$0xff] %v1404_v1   ;;  %v839_v38 = vmul.f32 %v1565_v34, %v1831_v40  ;;  %v1579_v44 = vpop.permute.xlu1 %1578  ;;  %v1574_v45 = vpop.permute.xlu0 %1573  ;;  %v563_v0 = vmul.f32 0.333, %v499_v37  ;;  %v564_v49 = vmul.f32 0.333, %v500_v52  ;;  %v598_v55 = vsel %vm534_vm13, %v502_v26, %v566_v57 }
  0xa9   : > { %v1419_v31 = vpack.c.bf16 %v842_v32, %v841_v2  ;;  %v1581_v53 = vunpack.i.h.bf16 %v1579_v44  ;;  %v1580_v39 = vunpack.i.l.bf16 %v1579_v44  ;;  %v1576_v54 = vunpack.i.h.bf16 %v1574_v45 }
  0xaa   : > { %v1414_v41 = vpack.c.bf16 %v840_v10, %v839_v38  ;;  %v1575_v56 = vunpack.i.l.bf16 %v1574_v45  ;;  %v595_v19 = vsel %vm531_vm14, %v499_v37, %v563_v0 }
  0xab   : > { %1504 = vst [vmem:[%s1862_s11 + $0x48] sm:$0xff] %v1419_v31   ;;  %v845_v40 = vmul.f32 %v1580_v39, %v1837_v35  ;;  %v846_v28 = vmul.f32 %v1581_v53, %v1839_v43  ;;  %v844_v36 = vmul.f32 %v1576_v54, %v1844_v48 }
  0xac   : > { %1503 = vst [vmem:[%s1862_s11 + $0x40] sm:$0xff] %v1414_v41   ;;  %v843_v60 = vmul.f32 %v1575_v56, %v1842_v47  ;;  %v1589_v42 = vpop.permute.xlu1 %1588  ;;  %v1584_v63 = vpop.permute.xlu0 %1583  ;;  %v597_v47 = vsel %vm533_vm12, %v1893_v14, %v565_v46 }
  0xad   : > { %v1429_v50 = vpack.c.bf16 %v846_v28, %v845_v40  ;;  %v1591_v3 = vunpack.i.h.bf16 %v1589_v42  ;;  %v1590_v4 = vunpack.i.l.bf16 %v1589_v42  ;;  %v1586_v6 = vunpack.i.h.bf16 %v1584_v63 }
  0xae   : > { %v1424_v35 = vpack.c.bf16 %v844_v36, %v843_v60  ;;  %v1585_v8 = vunpack.i.l.bf16 %v1584_v63 }
  0xaf   : > { %1506 = vst [vmem:[%s1862_s11 + $0x58] sm:$0xff] %v1429_v50   ;;  %v849_v43 = vmul.f32 %v1590_v4, %v1850_v7  ;;  %v850_v48 = vmul.f32 %v1591_v3, %v1865_v21  ;;  %v848_v9 = vmul.f32 %v1586_v6, %v592_v24  ;;  %v596_v7 = vsel %vm532_vm15, %v500_v52, %v564_v49 }
  0xb0   : > { %1505 = vst [vmem:[%s1862_s11 + $0x50] sm:$0xff] %v1424_v35   ;;  %v847_v15 = vmul.f32 %v1585_v8, %v591_v13  ;;  %v1599_v16 = vpop.permute.xlu1 %1598  ;;  %v1594_v51 = vpop.permute.xlu0 %1593 }
  0xb1   : > { %v1439_v21 = vpack.c.bf16 %v850_v48, %v849_v43  ;;  %v1601_v61 = vunpack.i.h.bf16 %v1599_v16  ;;  %v1600_v12 = vunpack.i.l.bf16 %v1599_v16  ;;  %v1596_v11 = vunpack.i.h.bf16 %v1594_v51 }
  0xb2   : > { %v1434_v20 = vpack.c.bf16 %v848_v9, %v847_v15  ;;  %v1595_v62 = vunpack.i.l.bf16 %v1594_v51 }
  0xb3   : > { %1508 = vst [vmem:[%s1862_s11 + $0x68] sm:$0xff] %v1439_v21   ;;  %v853_v14 = vmul.f32 %v1600_v12, %v597_v47  ;;  %v854_v58 = vmul.f32 %v1601_v61, %v598_v55  ;;  %v852_v59 = vmul.f32 %v1596_v11, %v596_v7 }
  0xb4   : > { %1507 = vst [vmem:[%s1862_s11 + $0x60] sm:$0xff] %v1434_v20   ;;  %v851_v5 = vmul.f32 %v1595_v62, %v595_v19 }
  0xb5   : > { %v1449_v17 = vpack.c.bf16 %v854_v58, %v853_v14 }
  0xb6   : > { %v1444_v18 = vpack.c.bf16 %v852_v59, %v851_v5 }
  0xb7   : > { %1510 = vst [vmem:[%s1862_s11 + $0x78] sm:$0xff] %v1449_v17  }
  0xb8   : > { %1509 = vst [vmem:[%s1862_s11 + $0x70] sm:$0xff] %v1444_v18  }
  0xb9 PF: > { %s15_s18 = sadd.s32 1, %s1608_s18  }
  0xba   : > { %p12_p4 = scmp.ge.s32.totalorder %s15_s18, 4  }
  0xbc   :  { %14 = sbr.rel (!%p12_p4) target bundleno = 1 (0x1), region = 76 }

// kernel: sparse_block_series_forward.7
= control target key start
LH: loop header
LB: loop body
LE: loop exit
PB: predicated region body
PF: predicated region fallthrough
CT: control target
= control target key end

     0   :  { %s2586_s27 = smov 0   ;;  %s2991_s0 = inlined_call_operand.vmem [shape: bf16[2,16,16,128], index: 0, kind: input, shape index: {}]   ;;  %s2992_s1 = inlined_call_operand.vmem [shape: bf16[2,16,16,128], index: 1, kind: input, shape index: {}]   ;;  %s2993_s2 = inlined_call_operand.vmem [shape: f32[1,128], index: 2, kind: input, shape index: {}]   ;;  %s2994_s3 = inlined_call_operand.vmem [shape: f32[1,128], index: 3, kind: input, shape index: {}]   ;;  %s2995_s4 = inlined_call_operand.vmem [shape: bf16[2,16,16,1], index: 4, kind: input, shape index: {}]   ;;  %s2996_s5 = inlined_call_operand.vmem [shape: bf16[128,128], index: 5, kind: input, shape index: {}]   ;;  %s2997_s6 = inlined_call_operand.vmem [shape: bf16[2,16,16,128], index: 6, kind: output, shape index: {0}]   ;;  %s2998_s7 = inlined_call_operand.vmem [shape: bf16[2,16,16,128], index: 7, kind: output, shape index: {1}]   ;;  %s2999_s8 = inlined_call_operand.vmem [shape: f32[2,2,128], index: 8, kind: output, shape index: {2}]  }
   0x1 LB: > { %s1757_s28 = sadd.s32 4294967295, %s2538_s27   ;;  %p1761_p0 = scmp.ge.s32.totalorder %s2538_s27, 1  ;;  %s2538_s27 = sphi %s2586_s27, %s19_s27  }
   0x2   : > { %p287_p1 = scmp.lt.s32.totalorder %s2538_s27, 3 }
   0x4   : > { %p288_p2 = pnand %p1761_p0, %p287_p1 }
   0x5   : > { %p340_p3 = scmp.lt.s32.totalorder (!%p288_p2), %s1757_s28, 1  ;;  %v2540_v0 = vmov (!%p288_p2), 0   ;;  %v2524_v1 = vld [vmem:[%s2996_s5] sm:$0xff] (!%p288_p2)   ;;  %v2525_v2 = vld [vmem:[%s2996_s5 + $0x8] sm:$0xff] (!%p288_p2)   ;;  %v2526_v3 = vld [vmem:[%s2996_s5 + $0x10] sm:$0xff] (!%p288_p2)  }
   0x6   : > { %291 = sbr.rel (%p288_p2) target bundleno = 453 (0x1c5), region = 44  ;;  %2453 = vset.pattern.permute.xlu1 (!%p288_p2), %v2540_v0  ;;  %2442 = vset.pattern.permute.xlu0 (!%p288_p2), %v2540_v0  ;;  %v2527_v20 = vld [vmem:[%s2996_s5 + $0x18] sm:$0xff] (!%p288_p2)   ;;  %v2528_v29 = vld [vmem:[%s2996_s5 + $0x20] sm:$0xff] (!%p288_p2)   ;;  %v2529_v38 = vld [vmem:[%s2996_s5 + $0x28] sm:$0xff] (!%p288_p2)  }
   0x7   : > { %2369 = vmatprep.subr.bf16.mxu0 (!%p288_p2), %v2524_v1  ;;  %2417 = vmatprep.subr.bf16.mxu1 (!%p288_p2), %v2524_v1  ;;  %v2530_v47 = vld [vmem:[%s2996_s5 + $0x30] sm:$0xff] (!%p288_p2)   ;;  %v2531_v56 = vld [vmem:[%s2996_s5 + $0x38] sm:$0xff] (!%p288_p2)  }
   0x8   : > { %2370 = vmatpush3.bf16.msra.mxu0 (!%p288_p2), %v2524_v1  ;;  %2425 = vmatpush3.bf16.msra.mxu1 (!%p288_p2), %v2524_v1 }
   0x9   : > { %2371 = vmatprep.subr.bf16.mxu0 (!%p288_p2), %v2525_v2  ;;  %2418 = vmatprep.subr.bf16.mxu1 (!%p288_p2), %v2525_v2 }
   0xc   : > { %2372 = vmatpush3.bf16.msra.mxu0 (!%p288_p2), %v2525_v2  ;;  %2426 = vmatpush3.bf16.msra.mxu1 (!%p288_p2), %v2525_v2 }
   0xd   : > { %s3001_s28 = smov (!%p340_p3, %s1757_s28), 1  ;;  %2373 = vmatprep.subr.bf16.mxu0 %v2526_v3  ;;  %2419 = vmatprep.subr.bf16.mxu1 %v2526_v3 }
   0xe   : > { %s2603_s11 = sshll.u32 %s3001_s28, 7 }
   0xf   : > { %s2609_s14 = scalar_lea.vmem %s2995_s4, %s2603_s11  ;;  %s2649_s9 = scalar_lea.vmem %s2991_s0, %s2603_s11 }
  0x10   : > { %v2301_v4 = vld [vmem:[%s2609_s14 + $0x10] sm:$0xff]   ;;  %v2047_v5 = vld [vmem:[%s2609_s14] sm:$0xff]   ;;  %v2302_v6 = vld [vmem:[%s2609_s14 + $0x18] sm:$0xff]   ;;  %2374 = vmatpush3.bf16.msra.mxu0 %v2526_v3  ;;  %2427 = vmatpush3.bf16.msra.mxu1 %v2526_v3  ;;  %s2662_s15 = scalar_lea.vmem %s2992_s1, %s2603_s11  ;;  %s2841_s20 = scalar_lea.vmem %s2997_s6, %s2603_s11 }
  0x11   : > { %v2056_v7 = vunpack.c.l.bf16 %v2301_v4  ;;  %v2057_v8 = vunpack.c.h.bf16 %v2301_v4  ;;  %v2048_v9 = vunpack.c.l.bf16 %v2047_v5  ;;  %v2049_v10 = vunpack.c.h.bf16 %v2047_v5  ;;  %v2300_v11 = vld [vmem:[%s2609_s14 + $0x8] sm:$0xff]   ;;  %v2303_v17 = vld [vmem:[%s2609_s14 + $0x20] sm:$0xff]   ;;  %v2306_v27 = vld [vmem:[%s2609_s14 + $0x38] sm:$0xff]   ;;  %2375 = vmatprep.subr.bf16.mxu0 %v2527_v20  ;;  %2420 = vmatprep.subr.bf16.mxu1 %v2527_v20  ;;  %s2930_s23 = scalar_lea.vmem %s2998_s7, %s2603_s11  ;;  %s1772_s11 = sshll.u32 %s3001_s28, 1 }
  0x12   : > { %v2304_v12 = vld [vmem:[%s2609_s14 + $0x28] sm:$0xff]   ;;  %v2060_v13 = vunpack.c.l.bf16 %v2302_v6  ;;  %v2061_v14 = vunpack.c.h.bf16 %v2302_v6  ;;  %v2052_v15 = vunpack.c.l.bf16 %v2300_v11  ;;  %v2053_v16 = vunpack.c.h.bf16 %v2300_v11  ;;  %v2305_v28 = vld [vmem:[%s2609_s14 + $0x30] sm:$0xff]   ;;  %v2307_v37 = vld [vmem:[%s2609_s14 + $0x40] sm:$0xff]   ;;  %s368_s26 = scalar_lea.vmem %s2999_s8, %s1772_s11 }
  0x13   : > { %v2454_v18 = vpack.i.bf16 %v2057_v8, %v2056_v7  ;;  %v2443_v19 = vpack.i.bf16 %v2049_v10, %v2048_v9  ;;  %v2068_v21 = vunpack.c.l.bf16 %v2304_v12  ;;  %v2069_v22 = vunpack.c.h.bf16 %v2304_v12  ;;  %v2308_v36 = vld [vmem:[%s2609_s14 + $0x48] sm:$0xff]   ;;  %v2310_v45 = vld [vmem:[%s2609_s14 + $0x58] sm:$0xff]   ;;  %v2309_v46 = vld [vmem:[%s2609_s14 + $0x50] sm:$0xff]  }
  0x14   : > { %v2459_v23 = vpack.i.bf16 %v2061_v14, %v2060_v13  ;;  %v2448_v24 = vpack.i.bf16 %v2053_v16, %v2052_v15  ;;  %v2064_v25 = vunpack.c.l.bf16 %v2303_v17  ;;  %v2065_v26 = vunpack.c.h.bf16 %v2303_v17  ;;  %2376 = vmatpush3.bf16.msra.mxu0 %v2527_v20  ;;  %2428 = vmatpush3.bf16.msra.mxu1 %v2527_v20  ;;  %v2312_v54 = vld [vmem:[%s2609_s14 + $0x68] sm:$0xff]   ;;  %v2311_v55 = vld [vmem:[%s2609_s14 + $0x60] sm:$0xff]   ;;  %v2314_v63 = vld [vmem:[%s2609_s14 + $0x78] sm:$0xff]  }
  0x15   : > { %2455 = vperm.xlu1 %2453, %v2454_v18   ;;  %2444 = vperm.xlu0 %2442, %v2443_v19   ;;  %v2469_v30 = vpack.i.bf16 %v2069_v22, %v2068_v21  ;;  %v2076_v31 = vunpack.c.l.bf16 %v2306_v27  ;;  %v2077_v33 = vunpack.c.h.bf16 %v2306_v27  ;;  %v2072_v34 = vunpack.c.l.bf16 %v2305_v28  ;;  %v2313_v0 = vld [vmem:[%s2609_s14 + $0x70] sm:$0xff]   ;;  %v2272_v10 = vld [vmem:[%s2649_s9 + $0x18] sm:$0xff]   ;;  %v2656_v14 = vld [vmem:[%s2993_s2] ss:$0 sm:$0xff] }
  0x16   : > { %v2464_v32 = vpack.i.bf16 %v2065_v26, %v2064_v25  ;;  %v2073_v35 = vunpack.c.h.bf16 %v2305_v28  ;;  %2377 = vmatprep.subr.bf16.mxu0 %v2528_v29  ;;  %2421 = vmatprep.subr.bf16.mxu1 %v2528_v29  ;;  %v2084_v39 = vunpack.c.l.bf16 %v2308_v36  ;;  %v2085_v40 = vunpack.c.h.bf16 %v2308_v36  ;;  %v2271_v9 = vld [vmem:[%s2649_s9 + $0x10] sm:$0xff]   ;;  %v2270_v17 = vld [vmem:[%s2649_s9 + $0x8] sm:$0xff]   ;;  %v2672_v21 = vld [vmem:[%s2994_s3] ss:$0 sm:$0xff] }
  0x17   : > { %v2479_v41 = vpack.i.bf16 %v2077_v33, %v2076_v31  ;;  %v2080_v43 = vunpack.c.l.bf16 %v2307_v37  ;;  %v2081_v44 = vunpack.c.h.bf16 %v2307_v37  ;;  %v2092_v49 = vunpack.c.l.bf16 %v2310_v45  ;;  %v2286_v18 = vld [vmem:[%s2662_s15 + $0x10] sm:$0xff]   ;;  %v2287_v22 = vld [vmem:[%s2662_s15 + $0x18] sm:$0xff]   ;;  %v1919_v28 = vld [vmem:[%s2649_s9] sm:$0xff]  }
  0x18   : > { %v2474_v42 = vpack.i.bf16 %v2073_v35, %v2072_v34  ;;  %2378 = vmatpush3.bf16.msra.mxu0 %v2528_v29  ;;  %2429 = vmatpush3.bf16.msra.mxu1 %v2528_v29  ;;  %v2489_v48 = vpack.i.bf16 %v2085_v40, %v2084_v39  ;;  %v2093_v51 = vunpack.c.h.bf16 %v2310_v45  ;;  %v2088_v52 = vunpack.c.l.bf16 %v2309_v46  ;;  %v2274_v35 = vld [vmem:[%s2649_s9 + $0x28] sm:$0xff]  }
  0x19   : > { %2460 = vperm.xlu1 %2453, %v2459_v23   ;;  %2449 = vperm.xlu0 %2442, %v2448_v24   ;;  %v2484_v50 = vpack.i.bf16 %v2081_v44, %v2080_v43  ;;  %v2089_v53 = vunpack.c.h.bf16 %v2309_v46  ;;  %v2100_v57 = vunpack.c.l.bf16 %v2312_v54  ;;  %v2101_v58 = vunpack.c.h.bf16 %v2312_v54 }
  0x1a   : > { %2379 = vmatprep.subr.bf16.mxu0 %v2529_v38  ;;  %2422 = vmatprep.subr.bf16.mxu1 %v2529_v38  ;;  %v2499_v59 = vpack.i.bf16 %v2093_v51, %v2092_v49  ;;  %v2096_v61 = vunpack.c.l.bf16 %v2311_v55  ;;  %v2097_v62 = vunpack.c.h.bf16 %v2311_v55  ;;  %v2108_v2 = vunpack.c.l.bf16 %v2314_v63 }
  0x1b   : > { %v2494_v60 = vpack.i.bf16 %v2089_v53, %v2088_v52  ;;  %v2509_v1 = vpack.i.bf16 %v2101_v58, %v2100_v57  ;;  %v2109_v4 = vunpack.c.h.bf16 %v2314_v63  ;;  %v2104_v5 = vunpack.c.l.bf16 %v2313_v0  ;;  %v1983_v52 = vld [vmem:[%s2662_s15] sm:$0xff]  }
  0x1c   : > { %2380 = vmatpush3.bf16.msra.mxu0 %v2529_v38  ;;  %2430 = vmatpush3.bf16.msra.mxu1 %v2529_v38  ;;  %v2504_v3 = vpack.i.bf16 %v2097_v62, %v2096_v61  ;;  %v2105_v6 = vunpack.c.h.bf16 %v2313_v0  ;;  %v1928_v11 = vunpack.c.l.bf16 %v2271_v9  ;;  %v1929_v12 = vunpack.c.h.bf16 %v2271_v9  ;;  %v2285_v38 = vld [vmem:[%s2662_s15 + $0x8] sm:$0xff]  }
  0x1d   : > { %2470 = vperm.xlu1 %2453, %v2469_v30   ;;  %2465 = vperm.xlu0 %2442, %v2464_v32   ;;  %v2519_v7 = vpack.i.bf16 %v2109_v4, %v2108_v2  ;;  %v1932_v13 = vunpack.c.l.bf16 %v2272_v10  ;;  %v1933_v19 = vunpack.c.h.bf16 %v2272_v10  ;;  %v1924_v23 = vunpack.c.l.bf16 %v2270_v17  ;;  %v2289_v0 = vld [vmem:[%s2662_s15 + $0x28] sm:$0xff]  }
  0x1e   : > { %2381 = vmatprep.subr.bf16.mxu0 %v2530_v47  ;;  %2423 = vmatprep.subr.bf16.mxu1 %v2530_v47  ;;  %v2514_v8 = vpack.i.bf16 %v2105_v6, %v2104_v5  ;;  %v446_v15 = vmul.f32 %v1928_v11, %v2656_v14  ;;  %v447_v16 = vmul.f32 %v1929_v12, %v2656_v14  ;;  %v1992_v26 = vunpack.c.l.bf16 %v2286_v18 }
  0x1f   : > { %v448_v20 = vmul.f32 %v1932_v13, %v2656_v14  ;;  %v1993_v27 = vunpack.c.h.bf16 %v2286_v18  ;;  %v449_v29 = vmul.f32 %v1933_v19, %v2656_v14  ;;  %v1925_v30 = vunpack.c.h.bf16 %v2270_v17 }
  0x20   : > { %2382 = vmatpush3.bf16.msra.mxu0 %v2530_v47  ;;  %2431 = vmatpush3.bf16.msra.mxu1 %v2530_v47  ;;  %v484_v24 = vadd.f32 %v2672_v21, %v446_v15  ;;  %v485_v25 = vadd.f32 %v2672_v21, %v447_v16  ;;  %v1996_v32 = vunpack.c.l.bf16 %v2287_v22  ;;  %v444_v33 = vmul.f32 %v1924_v23, %v2656_v14 }
  0x21   : > { %2480 = vperm.xlu1 %2453, %v2479_v41   ;;  %2475 = vperm.xlu0 %2442, %v2474_v42   ;;  %v486_v31 = vadd.f32 %v2672_v21, %v448_v20  ;;  %v1920_v34 = vunpack.c.l.bf16 %v1919_v28  ;;  %v487_v39 = vadd.f32 %v2672_v21, %v449_v29  ;;  %v1997_v40 = vunpack.c.h.bf16 %v2287_v22  ;;  %v2273_v42 = vld [vmem:[%s2649_s9 + $0x20] sm:$0xff]  }
  0x22   : > { %2383 = vmatprep.subr.bf16.mxu0 %v2531_v56  ;;  %2424 = vmatprep.subr.bf16.mxu1 %v2531_v56  ;;  %v580_v36 = vadd.f32 %v1992_v26, %v484_v24  ;;  %v581_v37 = vadd.f32 %v1993_v27, %v485_v25  ;;  %v445_v41 = vmul.f32 %v1925_v30, %v2656_v14  ;;  %v1921_v44 = vunpack.c.h.bf16 %v1919_v28  ;;  %v2275_v24 = vld [vmem:[%s2649_s9 + $0x30] sm:$0xff]  }
  0x23   : > { %v582_v43 = vadd.f32 %v1996_v32, %v486_v31  ;;  %v1940_v45 = vunpack.c.l.bf16 %v2274_v35  ;;  %v482_v46 = vadd.f32 %v2672_v21, %v444_v33  ;;  %v1988_v47 = vunpack.c.l.bf16 %v2285_v38  ;;  %v2291_v31 = vld [vmem:[%s2662_s15 + $0x38] sm:$0xff]  }
  0x24   : > { %2384 = vmatpush3.bf16.msra.mxu0 %v2531_v56  ;;  %2432 = vmatpush3.bf16.msra.mxu1 %v2531_v56  ;;  %v442_v49 = vmul.f32 %v1920_v34, %v2656_v14  ;;  %v645_v51 = vmul.f32 0.333, %v581_v37  ;;  %v1941_v53 = vunpack.c.h.bf16 %v2274_v35  ;;  %v1936_v54 = vunpack.c.l.bf16 %v2273_v42 }
  0x25   : > { %2490 = vperm.xlu1 %2453, %v2489_v48   ;;  %2485 = vperm.xlu0 %2442, %v2484_v50   ;;  %v1989_v48 = vunpack.c.h.bf16 %v2285_v38  ;;  %v644_v50 = vmul.f32 0.333, %v580_v36  ;;  %vm612_vm0 = vcmp.gt.f32.partialorder %v580_v36, 0.0  ;;  %vm613_vm1 = vcmp.gt.f32.partialorder %v581_v37, 0.0 }
  0x26   : > { %v583_v55 = vadd.f32 %v1997_v40, %v487_v39  ;;  %v483_v56 = vadd.f32 %v2672_v21, %v445_v41  ;;  %vm614_vm2 = vcmp.gt.f32.partialorder %v582_v43, 0.0  ;;  %v646_v57 = vmul.f32 0.333, %v582_v43 }
  0x27   : > { %v443_v58 = vmul.f32 %v1921_v44, %v2656_v14  ;;  %v578_v61 = vadd.f32 %v1988_v47, %v482_v46  ;;  %v480_v62 = vadd.f32 %v2672_v21, %v442_v49  ;;  %v1984_v63 = vunpack.c.l.bf16 %v1983_v52 }
  0x28   : > { %v2695_v2 = vsel %vm612_vm0, %v580_v36, %v644_v50  ;;  %v453_v4 = vmul.f32 %v1941_v53, %v2656_v14  ;;  %v450_v5 = vmul.f32 %v1936_v54, %v2656_v14  ;;  %vm615_vm3 = vcmp.gt.f32.partialorder %v583_v55, 0.0  ;;  %v2290_v53 = vld [vmem:[%s2662_s15 + $0x30] sm:$0xff]  }
  0x29   : > { %2500 = vperm.xlu1 %2453, %v2499_v59   ;;  %2495 = vperm.xlu0 %2442, %v2494_v60   ;;  %v452_v59 = vmul.f32 %v1940_v45, %v2656_v14  ;;  %v2276_v60 = vld [vmem:[%s2649_s9 + $0x38] sm:$0xff]   ;;  %v647_v6 = vmul.f32 0.333, %v583_v55  ;;  %v481_v10 = vadd.f32 %v2672_v21, %v443_v58  ;;  %v1985_v11 = vunpack.c.h.bf16 %v1983_v52 }
  0x2a   : > { %v1948_v9 = vunpack.c.l.bf16 %v2276_v60  ;;  %v2004_v13 = vunpack.c.l.bf16 %v2289_v0  ;;  %v642_v15 = vmul.f32 0.333, %v578_v61  ;;  %v576_v16 = vadd.f32 %v1984_v63, %v480_v62 }
  0x2b   : > { %v490_v12 = vadd.f32 %v2672_v21, %v452_v59  ;;  %v1949_v18 = vunpack.c.h.bf16 %v2276_v60  ;;  %v491_v19 = vadd.f32 %v2672_v21, %v453_v4  ;;  %v2005_v20 = vunpack.c.h.bf16 %v2289_v0  ;;  %v2279_v4 = vld [vmem:[%s2649_s9 + $0x50] sm:$0xff]  }
  0x2c   : > { %v488_v22 = vadd.f32 %v2672_v21, %v450_v5  ;;  %v2709_v25 = vsel %vm614_vm2, %v582_v43, %v646_v57  ;;  %v2712_v26 = vsel %vm615_vm3, %v583_v55, %v647_v6  ;;  %vm610_vm4 = vcmp.gt.f32.partialorder %v578_v61, 0.0  ;;  %v2278_v43 = vld [vmem:[%s2649_s9 + $0x48] sm:$0xff]  }
  0x2d   : > { %2510 = vperm.xlu1 %2453, %v2509_v1   ;;  %2505 = vperm.xlu0 %2442, %v2504_v3   ;;  %v1937_v1 = vunpack.c.h.bf16 %v2273_v42  ;;  %v2697_v3 = vsel %vm613_vm1, %v581_v37, %v645_v51  ;;  %v456_v27 = vmul.f32 %v1948_v9, %v2656_v14  ;;  %v577_v29 = vadd.f32 %v1985_v11, %v481_v10  ;;  %v2293_v11 = vld [vmem:[%s2662_s15 + $0x48] sm:$0xff]  }
  0x2e   : > { %v586_v30 = vadd.f32 %v2004_v13, %v490_v12  ;;  %v457_v34 = vmul.f32 %v1949_v18, %v2656_v14  ;;  %v1944_v35 = vunpack.c.l.bf16 %v2275_v24  ;;  %v2718_v36 = vsel %vm610_vm4, %v578_v61, %v642_v15  ;;  %v2280_v61 = vld [vmem:[%s2649_s9 + $0x58] sm:$0xff]   ;;  %v2277_v13 = vld [vmem:[%s2649_s9 + $0x40] sm:$0xff]  }
  0x2f   : > { %v451_v17 = vmul.f32 %v1937_v1, %v2656_v14  ;;  %vm608_vm6 = vcmp.gt.f32.partialorder %v576_v16, 0.0  ;;  %v587_v37 = vadd.f32 %v2005_v20, %v491_v19  ;;  %v640_v39 = vmul.f32 0.333, %v576_v16 }
  0x30   : > { %v494_v40 = vadd.f32 %v2672_v21, %v456_v27  ;;  %v2012_v41 = vunpack.c.l.bf16 %v2291_v31  ;;  %v1945_v42 = vunpack.c.h.bf16 %v2275_v24  ;;  %vm609_vm7 = vcmp.gt.f32.partialorder %v577_v29, 0.0 }
  0x31   : > { %2520 = vperm.xlu1 %2453, %v2519_v7   ;;  %2515 = vperm.xlu0 %2442, %v2514_v8   ;;  %v579_v7 = vadd.f32 %v1989_v48, %v483_v56  ;;  %v2288_v8 = vld [vmem:[%s2662_s15 + $0x20] sm:$0xff]   ;;  %v489_v32 = vadd.f32 %v2672_v21, %v451_v17  ;;  %v641_v44 = vmul.f32 0.333, %v577_v29  ;;  %vm618_vm8 = vcmp.gt.f32.partialorder %v586_v30, 0.0 }
  0x32   : > { %v2000_v23 = vunpack.c.l.bf16 %v2288_v8  ;;  %v2001_v33 = vunpack.c.h.bf16 %v2288_v8  ;;  %v650_v45 = vmul.f32 0.333, %v586_v30  ;;  %v495_v47 = vadd.f32 %v2672_v21, %v457_v34 }
  0x33   : > { %vm611_vm5 = vcmp.gt.f32.partialorder %v579_v7, 0.0  ;;  %v643_v28 = vmul.f32 0.333, %v579_v7  ;;  %v2013_v48 = vunpack.c.h.bf16 %v2291_v31  ;;  %v454_v49 = vmul.f32 %v1944_v35, %v2656_v14 }
  0x34   : > { %v584_v38 = vadd.f32 %v2000_v23, %v488_v22  ;;  %v585_v46 = vadd.f32 %v2001_v33, %v489_v32  ;;  %v651_v51 = vmul.f32 0.333, %v587_v37  ;;  %v1956_v54 = vunpack.c.l.bf16 %v2278_v43  ;;  %v2295_v33 = vld [vmem:[%s2662_s15 + $0x58] sm:$0xff]  }
  0x35   : > { %v2725_v50 = vsel %vm611_vm5, %v579_v7, %v643_v28  ;;  %vm619_vm9 = vcmp.gt.f32.partialorder %v587_v37, 0.0  ;;  %v590_v55 = vadd.f32 %v2012_v41, %v494_v40  ;;  %v455_v56 = vmul.f32 %v1945_v42, %v2656_v14  ;;  %v2282_v28 = vld [vmem:[%s2649_s9 + $0x68] sm:$0xff]   ;;  %v2294_v41 = vld [vmem:[%s2662_s15 + $0x50] sm:$0xff]  }
  0x36   : > { %v648_v52 = vmul.f32 0.333, %v584_v38  ;;  %vm616_vm10 = vcmp.gt.f32.partialorder %v584_v38, 0.0  ;;  %v2730_v57 = vsel %vm608_vm6, %v576_v16, %v640_v39  ;;  %v2733_v58 = vsel %vm609_vm7, %v577_v29, %v641_v44 }
  0x37   : > { %v2736_v59 = vsel %vm618_vm8, %v586_v30, %v650_v45  ;;  %v1957_v60 = vunpack.c.h.bf16 %v2278_v43  ;;  %v649_v62 = vmul.f32 0.333, %v585_v46  ;;  %v2739_v63 = vadd.f32 %v2013_v48, %v495_v47 }
  0x38   : > { %v492_v0 = vadd.f32 %v2672_v21, %v454_v49  ;;  %v2008_v1 = vunpack.c.l.bf16 %v2290_v53  ;;  %v2743_v5 = vsel %vm619_vm9, %v587_v37, %v651_v51  ;;  %vm617_vm11 = vcmp.gt.f32.partialorder %v585_v46, 0.0  ;;  %v2292_v49 = vld [vmem:[%s2662_s15 + $0x40] sm:$0xff]  }
  0x39   : > { %v2745_v6 = vsel %vm616_vm10, %v584_v38, %v648_v52  ;;  %v460_v7 = vmul.f32 %v1956_v54, %v2656_v14  ;;  %v654_v8 = vmul.f32 0.333, %v590_v55  ;;  %v493_v9 = vadd.f32 %v2672_v21, %v455_v56 }
  0x3a   : > { %v2009_v10 = vunpack.c.h.bf16 %v2290_v53  ;;  %v1964_v12 = vunpack.c.l.bf16 %v2280_v61  ;;  %vm622_vm12 = vcmp.gt.f32.partialorder %v590_v55, 0.0  ;;  %v461_v15 = vmul.f32 %v1957_v60, %v2656_v14 }
  0x3b   : > { %v1965_v16 = vunpack.c.h.bf16 %v2280_v61  ;;  %v1960_v17 = vunpack.c.l.bf16 %v2279_v4  ;;  %v2752_v18 = vsel %vm617_vm11, %v585_v46, %v649_v62  ;;  %vm623_vm13 = vcmp.gt.f32.partialorder %v2739_v63, 0.0 }
  0x3c   : > { %v588_v19 = vadd.f32 %v2008_v1, %v492_v0  ;;  %v1961_v20 = vunpack.c.h.bf16 %v2279_v4  ;;  %v498_v22 = vadd.f32 %v2672_v21, %v460_v7  ;;  %v2020_v23 = vunpack.c.l.bf16 %v2293_v11 }
  0x3d   : > { %v1952_v24 = vunpack.c.l.bf16 %v2277_v13  ;;  %v1953_v27 = vunpack.c.h.bf16 %v2277_v13  ;;  %v655_v29 = vmul.f32 0.333, %v2739_v63  ;;  %v2758_v30 = vsel %vm622_vm12, %v590_v55, %v654_v8  ;;  %v2297_v8 = vld [vmem:[%s2662_s15 + $0x68] sm:$0xff]  }
  0x3e   : > { %v589_v31 = vadd.f32 %v2009_v10, %v493_v9  ;;  %v464_v32 = vmul.f32 %v1964_v12, %v2656_v14  ;;  %v499_v34 = vadd.f32 %v2672_v21, %v461_v15  ;;  %v2021_v35 = vunpack.c.h.bf16 %v2293_v11 }
  0x3f   : > { %v465_v37 = vmul.f32 %v1965_v16, %v2656_v14  ;;  %v462_v38 = vmul.f32 %v1960_v17, %v2656_v14  ;;  %vm620_vm14 = vcmp.gt.f32.partialorder %v588_v19, 0.0  ;;  %v652_v39 = vmul.f32 0.333, %v588_v19  ;;  %v2281_v17 = vld [vmem:[%s2649_s9 + $0x60] sm:$0xff]  }
  0x40   : > { %v463_v40 = vmul.f32 %v1961_v20, %v2656_v14  ;;  %v1972_v42 = vunpack.c.l.bf16 %v2282_v28  ;;  %v594_v43 = vadd.f32 %v2020_v23, %v498_v22  ;;  %v2028_v44 = vunpack.c.l.bf16 %v2295_v33 }
  0x41   : > { %v458_v45 = vmul.f32 %v1952_v24, %v2656_v14  ;;  %v459_v46 = vmul.f32 %v1953_v27, %v2656_v14  ;;  %vm621_vm15 = vcmp.gt.f32.partialorder %v589_v31, 0.0  ;;  %v653_v47 = vmul.f32 0.333, %v589_v31 }
  0x42   : > { %v502_v48 = vadd.f32 %v2672_v21, %v464_v32  ;;  %v1973_v51 = vunpack.c.h.bf16 %v2282_v28  ;;  %v503_v52 = vadd.f32 %v2672_v21, %v465_v37  ;;  %v2029_v53 = vunpack.c.h.bf16 %v2295_v33 }
  0x43   : > { %v500_v54 = vadd.f32 %v2672_v21, %v462_v38  ;;  %v2024_v55 = vunpack.c.l.bf16 %v2294_v41  ;;  %v595_v56 = vadd.f32 %v2021_v35, %v499_v34  ;;  %v501_v60 = vadd.f32 %v2672_v21, %v463_v40 }
  0x44   : > { %v2025_v61 = vunpack.c.h.bf16 %v2294_v41  ;;  %v468_v62 = vmul.f32 %v1972_v42, %v2656_v14  ;;  %v496_v0 = vadd.f32 %v2672_v21, %v458_v45  ;;  %v497_v1 = vadd.f32 %v2672_v21, %v459_v46  ;;  %v2284_v42 = vld [vmem:[%s2649_s9 + $0x78] sm:$0xff]   ;;  %v2296_v46 = vld [vmem:[%s2662_s15 + $0x60] sm:$0xff]  }
  0x45   : > { %v2016_v4 = vunpack.c.l.bf16 %v2292_v49  ;;  %v2017_v7 = vunpack.c.h.bf16 %v2292_v49  ;;  %v2781_v9 = vsel %vm623_vm13, %v2739_v63, %v655_v29  ;;  %v2784_v10 = vsel %vm620_vm14, %v588_v19, %v652_v39 }
  0x46   : > { %v598_v11 = vadd.f32 %v2028_v44, %v502_v48  ;;  %v469_v12 = vmul.f32 %v1973_v51, %v2656_v14  ;;  %vm626_vm0 = vcmp.gt.f32.partialorder %v594_v43, 0.0  ;;  %v658_v13 = vmul.f32 0.333, %v594_v43 }
  0x47   : > { %v599_v15 = vadd.f32 %v2029_v53, %v503_v52  ;;  %v596_v16 = vadd.f32 %v2024_v55, %v500_v54  ;;  %v2789_v20 = vsel %vm621_vm15, %v589_v31, %v653_v47  ;;  %v597_v22 = vadd.f32 %v2025_v61, %v501_v60 }
  0x48   : > { %v506_v23 = vadd.f32 %v2672_v21, %v468_v62  ;;  %v2036_v24 = vunpack.c.l.bf16 %v2297_v8  ;;  %vm627_vm1 = vcmp.gt.f32.partialorder %v595_v56, 0.0  ;;  %v659_v63 = vmul.f32 0.333, %v595_v56 }
  0x49   : > { %v592_v27 = vadd.f32 %v2016_v4, %v496_v0  ;;  %v593_v19 = vadd.f32 %v2017_v7, %v497_v1  ;;  %v662_v28 = vmul.f32 0.333, %v598_v11  ;;  %v507_v29 = vadd.f32 %v2672_v21, %v469_v12 }
  0x4a   : > { %v2037_v32 = vunpack.c.h.bf16 %v2297_v8  ;;  %v1968_v33 = vunpack.c.l.bf16 %v2281_v17  ;;  %vm630_vm2 = vcmp.gt.f32.partialorder %v598_v11, 0.0  ;;  %vm631_vm3 = vcmp.gt.f32.partialorder %v599_v15, 0.0 }
  0x4b   : > { %v663_v34 = vmul.f32 0.333, %v599_v15  ;;  %v660_v31 = vmul.f32 0.333, %v596_v16  ;;  %vm628_vm4 = vcmp.gt.f32.partialorder %v596_v16, 0.0  ;;  %v602_v37 = vadd.f32 %v2036_v24, %v506_v23 }
  0x4c   : > { %v661_v35 = vmul.f32 0.333, %v597_v22  ;;  %v1969_v38 = vunpack.c.h.bf16 %v2281_v17  ;;  %v2794_v39 = vsel %vm626_vm0, %v594_v43, %v658_v13  ;;  %vm629_vm5 = vcmp.gt.f32.partialorder %v597_v22, 0.0  ;;  %v2820_v13 = vld [vmem:[%s2662_s15 + $0x78] sm:$0xff]  }
  0x4d   : > { %v656_v40 = vmul.f32 0.333, %v592_v27  ;;  %v657_v41 = vmul.f32 0.333, %v593_v19  ;;  %vm624_vm6 = vcmp.gt.f32.partialorder %v592_v27, 0.0  ;;  %vm625_vm7 = vcmp.gt.f32.partialorder %v593_v19, 0.0 }
  0x4e   : > { %v603_v44 = vadd.f32 %v2037_v32, %v507_v29  ;;  %v466_v45 = vmul.f32 %v1968_v33, %v2656_v14  ;;  %v2800_v47 = vsel %vm627_vm1, %v595_v56, %v659_v63  ;;  %v2803_v48 = vsel %vm630_vm2, %v598_v11, %v662_v28 }
  0x4f   : > { %v2806_v49 = vsel %vm631_vm3, %v599_v15, %v663_v34  ;;  %v2809_v43 = vsel %vm628_vm4, %v596_v16, %v660_v31  ;;  %v2811_v51 = vsel %vm629_vm5, %v597_v22, %v661_v35  ;;  %v666_v52 = vmul.f32 0.333, %v602_v37 }
  0x50   : > { %v467_v53 = vmul.f32 %v1969_v38, %v2656_v14  ;;  %v1980_v54 = vunpack.c.l.bf16 %v2284_v42  ;;  %v2814_v55 = vsel %vm624_vm6, %v592_v27, %v656_v40  ;;  %v2816_v56 = vsel %vm625_vm7, %v593_v19, %v657_v41 }
  0x51   : > { %vm634_vm8 = vcmp.gt.f32.partialorder %v602_v37, 0.0  ;;  %v2032_v60 = vunpack.c.l.bf16 %v2296_v46  ;;  %vm635_vm9 = vcmp.gt.f32.partialorder %v603_v44, 0.0  ;;  %v667_v0 = vmul.f32 0.333, %v603_v44 }
  0x52   : > { %v504_v1 = vadd.f32 %v2672_v21, %v466_v45  ;;  %v1981_v4 = vunpack.c.h.bf16 %v2284_v42  ;;  %v2822_v15 = vsel %vm634_vm8, %v602_v37, %v666_v52  ;;  %v505_v16 = vadd.f32 %v2672_v21, %v467_v53 }
  0x53   : > { %v2033_v17 = vunpack.c.h.bf16 %v2296_v46  ;;  %v472_v22 = vmul.f32 %v1980_v54, %v2656_v14  ;;  %v2831_v29 = vsel %vm635_vm9, %v603_v44, %v667_v0  ;;  %v2044_v34 = vunpack.c.l.bf16 %v2820_v13 }
  0x54   : > { %v2833_v32 = vadd.f32 %v2032_v60, %v504_v1  ;;  %v473_v33 = vmul.f32 %v1981_v4, %v2656_v14  ;;  %v2045_v40 = vunpack.c.h.bf16 %v2820_v13  ;;  %vm1611_vm0 = vcmask 1040384  }
  0x55   : > { %v510_v38 = vadd.f32 %v2672_v21, %v472_v22  ;;  %v2852_v53 = vadd.f32 %v2033_v17, %v505_v16 }
  0x56   : > { %v511_v54 = vadd.f32 %v2672_v21, %v473_v33  ;;  %vm632_vm10 = vcmp.gt.f32.partialorder %v2833_v32, 0.0  ;;  %v664_v4 = vmul.f32 0.333, %v2833_v32 }
  0x57   : > { %v2864_v17 = vadd.f32 %v2044_v34, %v510_v38  ;;  %vm633_vm11 = vcmp.gt.f32.partialorder %v2852_v53, 0.0 }
  0x59   : > { %vm638_vm12 = vcmp.gt.f32.partialorder %v2864_v17, 0.0 }
  0x94   : > { %v2456_v61 = vpop.permute.xlu1 %2455  ;;  %v2445_v62 = vpop.permute.xlu0 %2444 }
  0x95   : > { %v2458_v7 = vunpack.i.h.bf16 %v2456_v61  ;;  %v2457_v8 = vunpack.i.l.bf16 %v2456_v61  ;;  %v2447_v11 = vunpack.i.h.bf16 %v2445_v62  ;;  %v2446_v12 = vunpack.i.l.bf16 %v2445_v62 }
  0x97   : > { %v932_v23 = vmul.f32 %v2457_v8, %v2695_v2  ;;  %v933_v24 = vmul.f32 %v2458_v7, %v2697_v3  ;;  %v928_v63 = vmul.f32 %v2446_v12, %v2730_v57  ;;  %v929_v27 = vmul.f32 %v2447_v11, %v2733_v58  ;;  %v2283_v3 = vld [vmem:[%s2649_s9 + $0x70] sm:$0xff]  }
  0x98   : > { %v2461_v19 = vpop.permute.xlu1 %2460  ;;  %v2450_v28 = vpop.permute.xlu0 %2449  ;;  %v1976_v60 = vunpack.c.l.bf16 %v2283_v3  ;;  %v1977_v61 = vunpack.c.h.bf16 %v2283_v3 }
  0x99   : > { %v2463_v31 = vunpack.i.h.bf16 %v2461_v19  ;;  %v2462_v35 = vunpack.i.l.bf16 %v2461_v19  ;;  %v2452_v2 = vunpack.i.h.bf16 %v2450_v28  ;;  %v2451_v37 = vunpack.i.l.bf16 %v2450_v28 }
  0x9a   : > { %v960_v57 = vpack.c.bf16 %v929_v27, %v928_v63  ;;  %v962_v58 = vpack.c.bf16 %v933_v24, %v932_v23  ;;  %v470_v22 = vmul.f32 %v1976_v60, %v2656_v14  ;;  %v471_v23 = vmul.f32 %v1977_v61, %v2656_v14 }
  0x9b   : > { %v934_v41 = vmul.f32 %v2462_v35, %v2709_v25  ;;  %v935_v42 = vmul.f32 %v2463_v31, %v2712_v26  ;;  %v930_v44 = vmul.f32 %v2451_v37, %v2718_v36  ;;  %v931_v45 = vmul.f32 %v2452_v2, %v2725_v50  ;;  %v2298_v36 = vld [vmem:[%s2662_s15 + $0x70] sm:$0xff]  }
  0x9c   : > { %2114 = vst [vmem:[%s2841_s20] sm:$0xff] %v960_v57   ;;  %2385 = vmatprep.mubr.bf16.mxu0 %v960_v57  ;;  %v2471_v46 = vpop.permute.xlu1 %2470  ;;  %v2466_v52 = vpop.permute.xlu0 %2465  ;;  %2316 = vst [vmem:[%s2841_s20 + $0x10] sm:$0xff] %v962_v58   ;;  %v2040_v24 = vunpack.c.l.bf16 %v2298_v36  ;;  %v665_v27 = vmul.f32 0.333, %v2852_v53  ;;  %v2879_v2 = vadd.f32 %v2045_v40, %v511_v54  ;;  %v508_v37 = vadd.f32 %v2672_v21, %v470_v22 }
  0x9d   : > { %v2473_v25 = vunpack.i.h.bf16 %v2471_v46  ;;  %v2472_v62 = vunpack.i.l.bf16 %v2471_v46  ;;  %v2468_v26 = vunpack.i.h.bf16 %v2466_v52  ;;  %v2467_v0 = vunpack.i.l.bf16 %v2466_v52 }
  0x9e   : > { %v961_v1 = vpack.c.bf16 %v931_v45, %v930_v44  ;;  %v963_v50 = vpack.c.bf16 %v935_v42, %v934_v41  ;;  %v509_v3 = vadd.f32 %v2672_v21, %v471_v23  ;;  %v2041_v57 = vunpack.c.h.bf16 %v2298_v36 }
  0x9f   : > { %v938_v7 = vmul.f32 %v2472_v62, %v2736_v59  ;;  %v939_v8 = vmul.f32 %v2473_v25, %v2743_v5  ;;  %v936_v11 = vmul.f32 %v2467_v0, %v2745_v6  ;;  %v937_v12 = vmul.f32 %v2468_v26, %v2752_v18 }
  0xa0   : > { %2315 = vst [vmem:[%s2841_s20 + $0x8] sm:$0xff] %v961_v1   ;;  %2386 = vmatmul.mubr.bf16.vlgmr.msra.gmra.mrb[0].mxu0 %v961_v1  ;;  %v2481_v13 = vpop.permute.xlu1 %2480  ;;  %v2476_v16 = vpop.permute.xlu0 %2475  ;;  %2317 = vst [vmem:[%s2841_s20 + $0x18] sm:$0xff] %v963_v50   ;;  %v670_v52 = vmul.f32 0.333, %v2864_v17  ;;  %v604_v54 = vadd.f32 %v2040_v24, %v508_v37  ;;  %v605_v60 = vadd.f32 %v2041_v57, %v509_v3  ;;  %vm639_vm13 = vcmp.gt.f32.partialorder %v2879_v2, 0.0 }
  0xa1   : > { %v2483_v59 = vunpack.i.h.bf16 %v2481_v13  ;;  %v2482_v5 = vunpack.i.l.bf16 %v2481_v13  ;;  %v2478_v63 = vunpack.i.h.bf16 %v2476_v16  ;;  %v2477_v6 = vunpack.i.l.bf16 %v2476_v16  ;;  %2389 = vmatprep.mubr.bf16.mxu0 %v962_v58 }
  0xa2   : > { %v964_v18 = vpack.c.bf16 %v937_v12, %v936_v11  ;;  %v2870_v19 = vpack.c.bf16 %v939_v8, %v938_v7  ;;  %vm636_vm14 = vcmp.gt.f32.partialorder %v604_v54, 0.0  ;;  %vm637_vm15 = vcmp.gt.f32.partialorder %v605_v60, 0.0 }
  0xa3   : > { %v942_v28 = vmul.f32 %v2482_v5, %v2758_v30  ;;  %v943_v33 = vmul.f32 %v2483_v59, %v2781_v9  ;;  %v940_v14 = vmul.f32 %v2477_v6, %v2784_v10  ;;  %v941_v34 = vmul.f32 %v2478_v63, %v2789_v20 }
  0xa4   : > { %v2491_v31 = vpop.permute.xlu1 %2490  ;;  %v2486_v35 = vpop.permute.xlu0 %2485  ;;  %2318 = vst [vmem:[%s2841_s20 + $0x20] sm:$0xff] %v964_v18   ;;  %2319 = vst [vmem:[%s2841_s20 + $0x28] sm:$0xff] %v2870_v19   ;;  %v696_v10 = vsel %vm632_vm10, %v2833_v32, %v664_v4  ;;  %v697_v32 = vsel %vm633_vm11, %v2852_v53, %v665_v27  ;;  %v671_v53 = vmul.f32 0.333, %v2879_v2  ;;  %v668_v4 = vmul.f32 0.333, %v604_v54 }
  0xa5   : > { %v2493_v58 = vunpack.i.h.bf16 %v2491_v31  ;;  %v2492_v30 = vunpack.i.l.bf16 %v2491_v31  ;;  %v2488_v38 = vunpack.i.h.bf16 %v2486_v35  ;;  %v2487_v9 = vunpack.i.l.bf16 %v2486_v35 }
  0xa6   : > { %v966_v20 = vpack.c.bf16 %v941_v34, %v940_v14  ;;  %v2887_v40 = vpack.c.bf16 %v943_v33, %v942_v28  ;;  %v669_v7 = vmul.f32 0.333, %v605_v60  ;;  %v703_v59 = vsel %vm639_vm13, %v2879_v2, %v671_v53 }
  0xa7   : > { %v946_v41 = vmul.f32 %v2492_v30, %v2794_v39  ;;  %v947_v21 = vmul.f32 %v2493_v58, %v2800_v47  ;;  %v944_v42 = vmul.f32 %v2487_v9, %v2814_v55  ;;  %v945_v44 = vmul.f32 %v2488_v38, %v2816_v56 }
  0xa8   : > { %2390 = vmatmul.mubr.bf16.gmra.mrb[4].mxu0 %v963_v50  ;;  %v2501_v45 = vpop.permute.xlu1 %2500  ;;  %v2496_v46 = vpop.permute.xlu0 %2495  ;;  %2320 = vst [vmem:[%s2841_s20 + $0x30] sm:$0xff] %v966_v20   ;;  %2321 = vst [vmem:[%s2841_s20 + $0x38] sm:$0xff] %v2887_v40  }
  0xa9   : > { %v2503_v39 = vunpack.i.h.bf16 %v2501_v45  ;;  %v2502_v47 = vunpack.i.l.bf16 %v2501_v45  ;;  %v2498_v55 = vunpack.i.h.bf16 %v2496_v46  ;;  %v2497_v56 = vunpack.i.l.bf16 %v2496_v46  ;;  %2393 = vmatprep.mubr.bf16.mxu0 %v964_v18 }
  0xaa   : > { %v968_v61 = vpack.c.bf16 %v945_v44, %v944_v42  ;;  %v969_v25 = vpack.c.bf16 %v947_v21, %v946_v41 }
  0xab   : > { %v950_v62 = vmul.f32 %v2502_v47, %v2803_v48  ;;  %v951_v26 = vmul.f32 %v2503_v39, %v2806_v49  ;;  %v948_v0 = vmul.f32 %v2497_v56, %v2809_v43  ;;  %v949_v36 = vmul.f32 %v2498_v55, %v2811_v51 }
  0xac   : > { %2322 = vst [vmem:[%s2841_s20 + $0x40] sm:$0xff] %v968_v61   ;;  %2401 = vmatprep.mubr.bf16.mxu1 %v968_v61  ;;  %v2511_v1 = vpop.permute.xlu1 %2510  ;;  %v2506_v50 = vpop.permute.xlu0 %2505  ;;  %2323 = vst [vmem:[%s2841_s20 + $0x48] sm:$0xff] %v969_v25   ;;  %v702_v43 = vsel %vm638_vm12, %v2864_v17, %v670_v52  ;;  %v700_v17 = vsel %vm636_vm14, %v604_v54, %v668_v4 }
  0xad   : > { %v2513_v8 = vunpack.i.h.bf16 %v2511_v1  ;;  %v2512_v11 = vunpack.i.l.bf16 %v2511_v1  ;;  %v2508_v12 = vunpack.i.h.bf16 %v2506_v50  ;;  %v2507_v48 = vunpack.i.l.bf16 %v2506_v50  ;;  %2402 = vmatmul.mubr.bf16.vlgmr.msra.gmra.mrb[0].mxu1 %v969_v25 }
  0xae   : > { %v970_v49 = vpack.c.bf16 %v949_v36, %v948_v0  ;;  %v971_v51 = vpack.c.bf16 %v951_v26, %v950_v62 }
  0xaf   : > { %v954_v13 = vmul.f32 %v2512_v11, %v2822_v15  ;;  %v955_v16 = vmul.f32 %v2513_v8, %v2831_v29  ;;  %v952_v22 = vmul.f32 %v2507_v48, %v696_v10  ;;  %v953_v23 = vmul.f32 %v2508_v12, %v697_v32 }
  0xb0   : > { %2394 = vmatmul.mubr.bf16.gmra.mrb[8].mxu0 %v2870_v19  ;;  %2324 = vst [vmem:[%s2841_s20 + $0x50] sm:$0xff] %v970_v49   ;;  %2405 = vmatprep.mubr.bf16.mxu1 %v970_v49  ;;  %v2521_v24 = vpop.permute.xlu1 %2520  ;;  %v2516_v5 = vpop.permute.xlu0 %2515  ;;  %v701_v15 = vsel %vm637_vm15, %v605_v60, %v669_v7  ;;  %2325 = vst [vmem:[%s2841_s20 + $0x58] sm:$0xff] %v971_v51  }
  0xb1   : > { %v2523_v29 = vunpack.i.h.bf16 %v2521_v24  ;;  %v2522_v63 = vunpack.i.l.bf16 %v2521_v24  ;;  %v2518_v6 = vunpack.i.h.bf16 %v2516_v5  ;;  %v2517_v18 = vunpack.i.l.bf16 %v2516_v5  ;;  %2397 = vmatprep.mubr.bf16.mxu0 %v966_v20 }
  0xb2   : > { %v972_v27 = vpack.c.bf16 %v953_v23, %v952_v22  ;;  %v973_v19 = vpack.c.bf16 %v955_v16, %v954_v13 }
  0xb3   : > { %v958_v28 = vmul.f32 %v2522_v63, %v702_v43  ;;  %v959_v33 = vmul.f32 %v2523_v29, %v703_v59  ;;  %v956_v14 = vmul.f32 %v2517_v18, %v700_v17  ;;  %v957_v34 = vmul.f32 %v2518_v6, %v701_v15 }
  0xb4   : > { %2326 = vst [vmem:[%s2841_s20 + $0x60] sm:$0xff] %v972_v27   ;;  %2327 = vst [vmem:[%s2841_s20 + $0x68] sm:$0xff] %v973_v19  }
  0xb5   : > { %2406 = vmatmul.mubr.bf16.gmra.mrb[4].mxu1 %v971_v51  ;;  %v974_v31 = vpack.c.bf16 %v957_v34, %v956_v14  ;;  %v975_v35 = vpack.c.bf16 %v959_v33, %v958_v28 }
  0xb6   : > { %2409 = vmatprep.mubr.bf16.mxu1 %v972_v27 }
  0xb7   : > { %2328 = vst [vmem:[%s2841_s20 + $0x70] sm:$0xff] %v974_v31   ;;  %2329 = vst [vmem:[%s2841_s20 + $0x78] sm:$0xff] %v975_v35  }
  0xb8   : > { %2398 = vmatmul.mubr.bf16.gmra.mrb[12].mxu0 %v2887_v40 }
  0xbd   : > { %2410 = vmatmul.mubr.bf16.gmra.mrb[8].mxu1 %v973_v19 }
  0xbe   : > { %2413 = vmatprep.mubr.bf16.mxu1 %v974_v31 }
  0xc5   : > { %2414 = vmatmul.mubr.bf16.gmra.mrb[12].mxu1 %v975_v35 }
 0x173   : > { %v2387_v2 = vpop.f32.mrb[0].mxu0 }
 0x174   : > { %v1218_v37 = vpop.f32.mrb[1].mxu0  ;;  %v1544_v20 = vmul.f32 %v2387_v2, %v2387_v2 }
 0x175   : > { %v2388_v3 = vpop.f32.mrb[2].mxu0  ;;  %v1542_v30 = vmul.f32 %v1218_v37, %v1218_v37 }
 0x176   : > { %v2198_v57 = vpack.c.bf16 %v2388_v3, %v2387_v2  ;;  %v1221_v58 = vpop.f32.mrb[3].mxu0  ;;  %v1545_v21 = vmul.f32 %v2388_v3, %v2388_v3 }
 0x177   : > { %v2193_v38 = vpack.c.bf16 %v1221_v58, %v1218_v37  ;;  %v1505_v9 = vadd.f32 %v1221_v58, %v1218_v37  ;;  %v1543_v10 = vmul.f32 %v1221_v58, %v1221_v58 }
 0x178   : > { %2330 = vst [vmem:[%s2930_s23 + $0x8] sm:$0xff] %v2198_v57  }
 0x179   : > { %2194 = vst [vmem:[%s2930_s23] sm:$0xff] %v2193_v38   ;;  %v1506_v40 = vadd.f32 %v2387_v2, %v1505_v9  ;;  %v1574_v41 = vadd.f32 %v1543_v10, %v1542_v30 }
 0x17b   : > { %v1575_v42 = vadd.f32 %v1574_v41, %v1544_v20  ;;  %v2391_v44 = vpop.f32.mrb[4].mxu0  ;;  %v1507_v45 = vadd.f32 %v2388_v3, %v1506_v40 }
 0x17c   : > { %v1234_v46 = vpop.f32.mrb[5].mxu0  ;;  %v1548_v62 = vmul.f32 %v2391_v44, %v2391_v44 }
 0x17d   : > { %v1508_v32 = vadd.f32 %v1507_v45, %v1234_v46  ;;  %v1546_v52 = vmul.f32 %v1234_v46, %v1234_v46  ;;  %v1576_v54 = vadd.f32 %v1575_v42, %v1545_v21  ;;  %v2392_v60 = vpop.f32.mrb[6].mxu0 }
 0x17e   : > { %v2208_v39 = vpack.c.bf16 %v2392_v60, %v2391_v44  ;;  %v1237_v47 = vpop.f32.mrb[7].mxu0  ;;  %v1549_v50 = vmul.f32 %v2392_v60, %v2392_v60 }
 0x17f   : > { %v1577_v55 = vadd.f32 %v1576_v54, %v1546_v52  ;;  %v2203_v56 = vpack.c.bf16 %v1237_v47, %v1234_v46  ;;  %v1509_v61 = vadd.f32 %v1508_v32, %v1237_v47  ;;  %v1547_v25 = vmul.f32 %v1237_v47, %v1237_v47 }
 0x180   : > { %2332 = vst [vmem:[%s2930_s23 + $0x18] sm:$0xff] %v2208_v39   ;;  %v2935_v53 = vpop.f32.mrb[0].mxu1 }
 0x181   : > { %2331 = vst [vmem:[%s2930_s23 + $0x10] sm:$0xff] %v2203_v56   ;;  %v1510_v26 = vadd.f32 %v2391_v44, %v1509_v61  ;;  %v1578_v0 = vadd.f32 %v1577_v55, %v1547_v25  ;;  %v2938_v36 = vpop.f32.mrb[1].mxu1 }
 0x182   : > { %v2940_v1 = vpop.f32.mrb[2].mxu1  ;;  %v1558_v55 = vmul.f32 %v2938_v36, %v2938_v36 }
 0x183   : > { %v1579_v4 = vadd.f32 %v1578_v0, %v1548_v62  ;;  %v2238_v7 = vpack.c.bf16 %v2940_v1, %v2935_v53  ;;  %v2395_v8 = vpop.f32.mrb[8].mxu0  ;;  %v2944_v11 = vpop.f32.mrb[3].mxu1  ;;  %v1511_v12 = vadd.f32 %v2392_v60, %v1510_v26 }
 0x184   : > { %v2233_v48 = vpack.c.bf16 %v2944_v11, %v2938_v36  ;;  %v1250_v49 = vpop.f32.mrb[9].mxu0  ;;  %v1552_v29 = vmul.f32 %v2395_v8, %v2395_v8  ;;  %v1559_v25 = vmul.f32 %v2944_v11, %v2944_v11 }
 0x185   : > { %2338 = vst [vmem:[%s2930_s23 + $0x48] sm:$0xff] %v2238_v7   ;;  %v1512_v43 = vadd.f32 %v1511_v12, %v1250_v49  ;;  %v1550_v51 = vmul.f32 %v1250_v49, %v1250_v49  ;;  %v1580_v13 = vadd.f32 %v1579_v4, %v1549_v50  ;;  %v2396_v16 = vpop.f32.mrb[10].mxu0  ;;  %v1560_v50 = vmul.f32 %v2935_v53, %v2935_v53 }
 0x186   : > { %2337 = vst [vmem:[%s2930_s23 + $0x40] sm:$0xff] %v2233_v48   ;;  %v2218_v22 = vpack.c.bf16 %v2396_v16, %v2395_v8  ;;  %v1253_v23 = vpop.f32.mrb[11].mxu0  ;;  %v1553_v19 = vmul.f32 %v2396_v16, %v2396_v16  ;;  %v1561_v12 = vmul.f32 %v2940_v1, %v2940_v1 }
 0x187   : > { %v1581_v24 = vadd.f32 %v1580_v13, %v1550_v51  ;;  %v2213_v59 = vpack.c.bf16 %v1253_v23, %v1250_v49  ;;  %v1513_v5 = vadd.f32 %v1512_v43, %v1253_v23  ;;  %v1551_v17 = vmul.f32 %v1253_v23, %v1253_v23 }
 0x188   : > { %2334 = vst [vmem:[%s2930_s23 + $0x28] sm:$0xff] %v2218_v22   ;;  %v2951_v15 = vpop.f32.mrb[4].mxu1 }
 0x189   : > { %2333 = vst [vmem:[%s2930_s23 + $0x20] sm:$0xff] %v2213_v59   ;;  %v1514_v63 = vadd.f32 %v2395_v8, %v1513_v5  ;;  %v1582_v6 = vadd.f32 %v1581_v24, %v1551_v17  ;;  %v1298_v18 = vpop.f32.mrb[5].mxu1  ;;  %v1564_v59 = vmul.f32 %v2951_v15, %v2951_v15 }
 0x18a   : > { %v2954_v27 = vpop.f32.mrb[6].mxu1  ;;  %v1562_v13 = vmul.f32 %v1298_v18, %v1298_v18 }
 0x18b   : > { %v1583_v28 = vadd.f32 %v1582_v6, %v1552_v29  ;;  %v2248_v33 = vpack.c.bf16 %v2954_v27, %v2951_v15  ;;  %v2399_v14 = vpop.f32.mrb[12].mxu0  ;;  %v1301_v34 = vpop.f32.mrb[7].mxu1  ;;  %v1515_v31 = vadd.f32 %v2396_v16, %v1514_v63 }
 0x18c   : > { %v2243_v35 = vpack.c.bf16 %v1301_v34, %v1298_v18  ;;  %v1266_v2 = vpop.f32.mrb[13].mxu0  ;;  %v1556_v21 = vmul.f32 %v2399_v14, %v2399_v14  ;;  %v1563_v23 = vmul.f32 %v1301_v34, %v1301_v34 }
 0x18d   : > { %2340 = vst [vmem:[%s2930_s23 + $0x58] sm:$0xff] %v2248_v33   ;;  %v1516_v37 = vadd.f32 %v1515_v31, %v1266_v2  ;;  %v1554_v3 = vmul.f32 %v1266_v2, %v1266_v2  ;;  %v1584_v57 = vadd.f32 %v1583_v28, %v1553_v19  ;;  %v2400_v58 = vpop.f32.mrb[14].mxu0 }
 0x18e   : > { %2339 = vst [vmem:[%s2930_s23 + $0x50] sm:$0xff] %v2243_v35   ;;  %v2228_v30 = vpack.c.bf16 %v2400_v58, %v2399_v14  ;;  %v1269_v38 = vpop.f32.mrb[15].mxu0  ;;  %v1557_v32 = vmul.f32 %v2400_v58, %v2400_v58 }
 0x18f   : > { %v1585_v9 = vadd.f32 %v1584_v57, %v1554_v3  ;;  %v2223_v10 = vpack.c.bf16 %v1269_v38, %v1266_v2  ;;  %v1517_v20 = vadd.f32 %v1516_v37, %v1269_v38  ;;  %v1555_v40 = vmul.f32 %v1269_v38, %v1269_v38 }
 0x190   : > { %2336 = vst [vmem:[%s2930_s23 + $0x38] sm:$0xff] %v2228_v30   ;;  %v2411_v41 = vpop.f32.mrb[8].mxu1 }
 0x191   : > { %2335 = vst [vmem:[%s2930_s23 + $0x30] sm:$0xff] %v2223_v10   ;;  %v1518_v42 = vadd.f32 %v2399_v14, %v1517_v20  ;;  %v1586_v44 = vadd.f32 %v1585_v9, %v1555_v40  ;;  %v1314_v45 = vpop.f32.mrb[9].mxu1 }
 0x192   : > { %v2412_v46 = vpop.f32.mrb[10].mxu1 }
 0x193   : > { %v1519_v52 = vadd.f32 %v2400_v58, %v1518_v42  ;;  %v1587_v54 = vadd.f32 %v1586_v44, %v1556_v21  ;;  %v2258_v60 = vpack.c.bf16 %v2412_v46, %v2411_v41  ;;  %v1317_v39 = vpop.f32.mrb[11].mxu1  ;;  %v1569_v2 = vmul.f32 %v2412_v46, %v2412_v46 }
 0x194   : > { %v2253_v47 = vpack.c.bf16 %v1317_v39, %v1314_v45  ;;  %v1567_v14 = vmul.f32 %v1317_v39, %v1317_v39 }
 0x195   : > { %v1520_v56 = vadd.f32 %v1519_v52, %v2938_v36  ;;  %v1588_v61 = vadd.f32 %v1587_v54, %v1557_v32  ;;  %2342 = vst [vmem:[%s2930_s23 + $0x68] sm:$0xff] %v2258_v60  }
 0x196   : > { %2341 = vst [vmem:[%s2930_s23 + $0x60] sm:$0xff] %v2253_v47  }
 0x197   : > { %v1521_v62 = vadd.f32 %v1520_v56, %v2944_v11  ;;  %v1589_v26 = vadd.f32 %v1588_v61, %v1558_v55 }
 0x198   : > { %v2415_v0 = vpop.f32.mrb[12].mxu1 }
 0x199   : > { %v1522_v4 = vadd.f32 %v2935_v53, %v1521_v62  ;;  %v1590_v7 = vadd.f32 %v1589_v26, %v1559_v25  ;;  %v1330_v8 = vpop.f32.mrb[13].mxu1 }
 0x19a   : > { %v2416_v36 = vpop.f32.mrb[14].mxu1  ;;  %v1570_v57 = vmul.f32 %v1330_v8, %v1330_v8 }
 0x19b   : > { %v1591_v48 = vadd.f32 %v1590_v7, %v1560_v50  ;;  %v1523_v49 = vadd.f32 %v2940_v1, %v1522_v4  ;;  %v2268_v43 = vpack.c.bf16 %v2416_v36, %v2415_v0  ;;  %v1333_v11 = vpop.f32.mrb[15].mxu1  ;;  %v1565_v1 = vmul.f32 %v2954_v27, %v2954_v27 }
 0x19c   : > { %v2263_v51 = vpack.c.bf16 %v1333_v11, %v1330_v8  ;;  %v1571_v9 = vmul.f32 %v1333_v11, %v1333_v11  ;;  %v1573_v40 = vmul.f32 %v2416_v36, %v2416_v36 }
 0x19d   : > { %v1524_v16 = vadd.f32 %v1523_v49, %v1298_v18  ;;  %v1592_v22 = vadd.f32 %v1591_v48, %v1561_v12  ;;  %2344 = vst [vmem:[%s2930_s23 + $0x78] sm:$0xff] %v2268_v43   ;;  %v1566_v18 = vmul.f32 %v1314_v45, %v1314_v45 }
 0x19e   : > { %2343 = vst [vmem:[%s2930_s23 + $0x70] sm:$0xff] %v2263_v51  }
 0x19f   : > { %v1525_v24 = vadd.f32 %v1524_v16, %v1301_v34  ;;  %v1593_v53 = vadd.f32 %v1592_v22, %v1562_v13  ;;  %v1568_v34 = vmul.f32 %v2411_v41, %v2411_v41 }
 0x1a1   : > { %v1526_v5 = vadd.f32 %v2951_v15, %v1525_v24  ;;  %v1594_v17 = vadd.f32 %v1593_v53, %v1563_v23 }
 0x1a3   : > { %v1527_v29 = vadd.f32 %v2954_v27, %v1526_v5  ;;  %v1595_v63 = vadd.f32 %v1594_v17, %v1564_v59  ;;  %v1572_v27 = vmul.f32 %v2415_v0, %v2415_v0 }
 0x1a5   : > { %v1528_v6 = vadd.f32 %v1527_v29, %v1314_v45  ;;  %v1596_v19 = vadd.f32 %v1595_v63, %v1565_v1 }
 0x1a7   : > { %v1597_v28 = vadd.f32 %v1596_v19, %v1566_v18  ;;  %v1529_v33 = vadd.f32 %v1528_v6, %v1317_v39 }
 0x1a9   : > { %v1530_v31 = vadd.f32 %v2411_v41, %v1529_v33  ;;  %v1598_v35 = vadd.f32 %v1597_v28, %v1567_v14 }
 0x1ab   : > { %v1599_v37 = vadd.f32 %v1598_v35, %v1568_v34  ;;  %v1531_v3 = vadd.f32 %v2412_v46, %v1530_v31 }
 0x1ad   : > { %v1532_v15 = vadd.f32 %v1531_v3, %v1330_v8  ;;  %v1600_v58 = vadd.f32 %v1599_v37, %v1569_v2 }
 0x1af   : > { %v1601_v30 = vadd.f32 %v1600_v58, %v1570_v57  ;;  %v1533_v38 = vadd.f32 %v1532_v15, %v1333_v11 }
 0x1b1   : > { %v1534_v10 = vadd.f32 %v2415_v0, %v1533_v38  ;;  %v1602_v20 = vadd.f32 %v1601_v30, %v1571_v9 }
 0x1b3   : > { %v1535_v21 = vadd.f32 %v2416_v36, %v1534_v10  ;;  %v1603_v42 = vadd.f32 %v1602_v20, %v1572_v27 }
 0x1b5   : > { %v1536_v44 = vrot.slane %v1535_v21, 4  ;;  %v1604_v45 = vadd.f32 %v1603_v42, %v1573_v40 }
 0x1b7   : > { %v1537_v41 = vadd.f32 %v1536_v44, %v1535_v21  ;;  %v1605_v32 = vrot.slane %v1604_v45, 4 }
 0x1b9   : > { %v1538_v52 = vrot.slane %v1537_v41, 2  ;;  %v1606_v54 = vadd.f32 %v1605_v32, %v1604_v45 }
 0x1bb   : > { %v1539_v46 = vadd.f32 %v1538_v52, %v1537_v41  ;;  %v1607_v60 = vrot.slane %v1606_v54, 2 }
 0x1bd   : > { %v1540_v39 = vrot.slane %v1539_v46, 1  ;;  %v1608_v47 = vadd.f32 %v1607_v60, %v1606_v54 }
 0x1bf   : > { %v1609_v55 = vrot.slane %v1608_v47, 1  ;;  %v1541_v56 = vadd.f32 %v1540_v39, %v1539_v46 }
 0x1c1   : > { %v1610_v61 = vadd.f32 %v1609_v55, %v1608_v47 }
 0x1c3   : > { %v1612_v25 = vsel %vm1611_vm0, %v1541_v56, %v1610_v61 }
 0x1c4   : > { %1613 = vst [vmem:[%s368_s26] sm:$0x3] %v1612_v25 }
 0x1c5 PF: > { %s19_s27 = sadd.s32 1, %s2538_s27  }
 0x1c6   : > { %p16_p4 = scmp.ge.s32.totalorder %s19_s27, 4  }
 0x1c8   :  { %18 = sbr.rel (!%p16_p4) target bundleno = 1 (0x1), region = 104 }

// kernel: sparse_block_series_forward.6
= control target key start
LH: loop header
LB: loop body
LE: loop exit
PB: predicated region body
PF: predicated region fallthrough
CT: control target
= control target key end

     0   :  { %s5657_s21 = smov 0   ;;  %s7565_s0 = inlined_call_operand.vmem [shape: bf16[2,16,16,128], index: 0, kind: input, shape index: {}]   ;;  %s7566_s1 = inlined_call_operand.vmem [shape: f32[1,128], index: 1, kind: input, shape index: {}]   ;;  %s7567_s2 = inlined_call_operand.vmem [shape: f32[1,128], index: 2, kind: input, shape index: {}]   ;;  %s7568_s3 = inlined_call_operand.vmem [shape: bf16[2,16,16,1], index: 3, kind: input, shape index: {}]   ;;  %s7569_s4 = inlined_call_operand.vmem [shape: bf16[1152,128], index: 4, kind: input, shape index: {}]   ;;  %s7570_s5 = inlined_call_operand.vmem [shape: bf16[2,16,16,128], index: 5, kind: output, shape index: {0}]   ;;  %s7571_s6 = inlined_call_operand.vmem [shape: f32[2,2,128], index: 6, kind: output, shape index: {1}]  }
   0x1 LB: > { %s4261_s22 = sadd.s32 4294967295, %s5619_s21   ;;  %p4265_p0 = scmp.ge.s32.totalorder %s5619_s21, 1  ;;  %s5619_s21 = sphi %s5657_s21, %s17_s21  }
   0x2   : > { %p225_p1 = scmp.lt.s32.totalorder %s5619_s21, 3 }
   0x4   : > { %p226_p2 = pnand %p4265_p0, %p225_p1 }
   0x6   : > { %229 = sbr.rel (%p226_p2) target bundleno = 766 (0x2fe), region = 40 }
   0xd   : > { %p5667_p3 = scmp.lt.s32.totalorder %s4261_s22, 1  ;;  %v5621_v0 = vmov 0   ;;  %v5516_v1 = vld [vmem:[%s7569_s4 + $0x40] sm:$0xff]   ;;  %v5518_v28 = vld [vmem:[%s7569_s4 + $0x48] sm:$0xff]   ;;  %v5520_v45 = vld [vmem:[%s7569_s4 + $0x50] sm:$0xff]   ;;  %vm1858_vm3 = vcmask 1042432  }
   0xe   : > { %5440 = vset.pattern.permute.xlu1 %v5621_v0  ;;  %794 = vst [vmem:[#allocation2] sm:$0xf] %v5621_v0  ;;  %795 = vst [vmem:[#allocation2 + $0x4] sm:$0xf] %v5621_v0  ;;  %5429 = vset.pattern.permute.xlu0 %v5621_v0  ;;  %v5517_v2 = vld [vmem:[%s7569_s4] sm:$0xff]   ;;  %v5519_v29 = vld [vmem:[%s7569_s4 + $0x8] sm:$0xff]  }
   0xf   : > { %796 = vst [vmem:[#allocation2 + $0x8] sm:$0x1] %v5621_v0  ;;  %797 = vst [vmem:[#allocation2 + $0xc] sm:$0xf] %v5621_v0  ;;  %s7633_s22 = smov (!%p5667_p3, %s4261_s22), 1  ;;  %4884 = vmatprep.subr.bf16.mxu0 %v5516_v1  ;;  %5404 = vmatprep.subr.bf16.mxu1 %v5516_v1  ;;  %v5521_v49 = vld [vmem:[%s7569_s4 + $0x10] sm:$0xff]  }
  0x10   : > { %798 = vst [vmem:[#allocation2 + $0x10] sm:$0xf] %v5621_v0  ;;  %799 = vst [vmem:[#allocation2 + $0x14] sm:$0x1] %v5621_v0  ;;  %s5684_s28 = sshll.u32 %s7633_s22, 7  ;;  %4885 = vmatpush3.bf16.msra.mxu0 %v5517_v2  ;;  %5412 = vmatpush3.bf16.msra.mxu1 %v5517_v2  ;;  %vm1859_vm4 = vcmask 1046532  }
  0x11   : > { %800 = vst [vmem:[#allocation2 + $0x18] sm:$0xf] %v5621_v0  ;;  %801 = vst [vmem:[#allocation2 + $0x1c] sm:$0xf] %v5621_v0  ;;  %s5690_s7 = scalar_lea.vmem %s7568_s3, %s5684_s28  ;;  %4886 = vmatprep.subr.bf16.mxu0 %v5518_v28  ;;  %5405 = vmatprep.subr.bf16.mxu1 %v5518_v28  ;;  %v5524_v28 = vld [vmem:[%s7569_s4 + $0x60] sm:$0xff]   ;;  %s5900_s13 = scalar_lea.vmem %s7565_s0, %s5684_s28 }
  0x12   : > { %802 = vst [vmem:[#allocation2 + $0x20] sm:$0x1] %v5621_v0  ;;  %803 = vst [vmem:[#allocation2 + $0x24] sm:$0xf] %v5621_v0  ;;  %v5693_v3 = vld [vmem:[%s5690_s7 + $0x60] sm:$0xff]   ;;  %v5696_v4 = vld [vmem:[%s5690_s7 + $0x58] sm:$0xff]   ;;  %s7461_s12 = scalar_lea.vmem %s7570_s5, %s5684_s28 }
  0x13   : > { %804 = vst [vmem:[#allocation2 + $0x28] sm:$0xf] %v5621_v0  ;;  %805 = vst [vmem:[#allocation2 + $0x2c] sm:$0x1] %v5621_v0  ;;  %v5699_v5 = vld [vmem:[%s5690_s7 + $0x8] sm:$0xff]   ;;  %v4666_v6 = vunpack.c.l.bf16 %v5693_v3  ;;  %v4667_v7 = vunpack.c.h.bf16 %v5693_v3  ;;  %v4662_v8 = vunpack.c.l.bf16 %v5696_v4  ;;  %v4663_v9 = vunpack.c.h.bf16 %v5696_v4  ;;  %v4617_v10 = vld [vmem:[%s5690_s7] sm:$0xff]  }
  0x14   : > { %806 = vst [vmem:[#allocation2 + $0x30] sm:$0xf] %v5621_v0  ;;  %807 = vst [vmem:[#allocation2 + $0x34] sm:$0xf] %v5621_v0  ;;  %v5707_v11 = vld [vmem:[%s5690_s7 + $0x10] sm:$0xff]   ;;  %v4622_v12 = vunpack.c.l.bf16 %v5699_v5  ;;  %v4623_v13 = vunpack.c.h.bf16 %v5699_v5  ;;  %v4618_v14 = vunpack.c.l.bf16 %v4617_v10  ;;  %v4619_v15 = vunpack.c.h.bf16 %v4617_v10  ;;  %v5712_v16 = vld [vmem:[%s5690_s7 + $0x68] sm:$0xff]   ;;  %4887 = vmatpush3.bf16.msra.mxu0 %v5519_v29  ;;  %5413 = vmatpush3.bf16.msra.mxu1 %v5519_v29 }
  0x15   : > { %808 = vst [vmem:[#allocation2 + $0x38] sm:$0x1] %v5621_v0  ;;  %809 = vst [vmem:[#allocation2 + $0x3c] sm:$0xf] %v5621_v0  ;;  %v5441_v17 = vpack.i.bf16 %v4667_v7, %v4666_v6  ;;  %v5430_v18 = vpack.i.bf16 %v4663_v9, %v4662_v8  ;;  %v4626_v19 = vunpack.c.l.bf16 %v5707_v11  ;;  %v4627_v20 = vunpack.c.h.bf16 %v5707_v11  ;;  %v5733_v25 = vld [vmem:[%s5690_s7 + $0x18] sm:$0xff]   ;;  %v5736_v26 = vld [vmem:[%s5690_s7 + $0x70] sm:$0xff]   ;;  %4888 = vmatprep.subr.bf16.mxu0 %v5520_v45 }
  0x16   : > { %810 = vst [vmem:[#allocation2 + $0x40] sm:$0xf] %v5621_v0  ;;  %811 = vst [vmem:[#allocation2 + $0x44] sm:$0x1] %v5621_v0  ;;  %v5446_v21 = vpack.i.bf16 %v4623_v13, %v4622_v12  ;;  %v5728_v22 = vpack.i.bf16 %v4619_v15, %v4618_v14  ;;  %v4670_v23 = vunpack.c.l.bf16 %v5712_v16  ;;  %v4671_v24 = vunpack.c.h.bf16 %v5712_v16  ;;  %v5739_v27 = vld [vmem:[%s5690_s7 + $0x28] sm:$0xff]   ;;  %v5753_v32 = vld [vmem:[%s5690_s7 + $0x20] sm:$0xff]   ;;  %5406 = vmatprep.subr.bf16.mxu1 %v5520_v45 }
  0x17   : > { %812 = vst [vmem:[#allocation2 + $0x48] sm:$0xf] %v5621_v0  ;;  %813 = vst [vmem:[#allocation2 + $0x4c] sm:$0xf] %v5621_v0  ;;  %5442 = vperm.xlu1 %5440, %v5441_v17   ;;  %5431 = vperm.xlu0 %5429, %v5430_v18   ;;  %v5456_v30 = vpack.i.bf16 %v4627_v20, %v4626_v19  ;;  %v4630_v31 = vunpack.c.l.bf16 %v5733_v25  ;;  %v4631_v34 = vunpack.c.h.bf16 %v5733_v25  ;;  %v4674_v35 = vunpack.c.l.bf16 %v5736_v26  ;;  %v5764_v37 = vld [vmem:[%s5690_s7 + $0x38] sm:$0xff]   ;;  %v5769_v40 = vld [vmem:[%s5690_s7 + $0x30] sm:$0xff]  }
  0x18   : > { %814 = vst [vmem:[#allocation2 + $0x50] sm:$0x1] %v5621_v0  ;;  %815 = vst [vmem:[#allocation2 + $0x54] sm:$0xf] %v5621_v0  ;;  %v5451_v33 = vpack.i.bf16 %v4671_v24, %v4670_v23  ;;  %v4675_v36 = vunpack.c.h.bf16 %v5736_v26  ;;  %v4638_v38 = vunpack.c.l.bf16 %v5739_v27  ;;  %v4639_v39 = vunpack.c.h.bf16 %v5739_v27  ;;  %v5790_v48 = vld [vmem:[%s5690_s7 + $0x48] sm:$0xff]   ;;  %v5803_v54 = vld [vmem:[%s5690_s7 + $0x40] sm:$0xff]   ;;  %4889 = vmatpush3.bf16.msra.mxu0 %v5521_v49  ;;  %5414 = vmatpush3.bf16.msra.mxu1 %v5521_v49 }
  0x19   : > { %816 = vst [vmem:[#allocation2 + $0x58] sm:$0xf] %v5621_v0  ;;  %817 = vst [vmem:[#allocation2 + $0x5c] sm:$0x1] %v5621_v0  ;;  %v5466_v41 = vpack.i.bf16 %v4631_v34, %v4630_v31  ;;  %v4634_v43 = vunpack.c.l.bf16 %v5753_v32  ;;  %v4635_v44 = vunpack.c.h.bf16 %v5753_v32  ;;  %v4646_v47 = vunpack.c.l.bf16 %v5764_v37  ;;  %v5816_v61 = vld [vmem:[%s5690_s7 + $0x78] sm:$0xff]   ;;  %v5819_v62 = vld [vmem:[%s5690_s7 + $0x50] sm:$0xff]  }
  0x1a   : > { %818 = vst [vmem:[#allocation2 + $0x60] sm:$0xf] %v5621_v0  ;;  %819 = vst [vmem:[#allocation2 + $0x64] sm:$0xf] %v5621_v0  ;;  %v5461_v42 = vpack.i.bf16 %v4675_v36, %v4674_v35  ;;  %v5476_v46 = vpack.i.bf16 %v4639_v39, %v4638_v38  ;;  %v4647_v51 = vunpack.c.h.bf16 %v5764_v37  ;;  %v4642_v52 = vunpack.c.l.bf16 %v5769_v40  ;;  %v5522_v15 = vld [vmem:[%s7569_s4 + $0x58] sm:$0xff]   ;;  %v5525_v29 = vld [vmem:[%s7569_s4 + $0x20] sm:$0xff]  }
  0x1b   : > { %820 = vst [vmem:[#allocation2 + $0x68] sm:$0x1] %v5621_v0  ;;  %821 = vst [vmem:[#allocation2 + $0x6c] sm:$0xf] %v5621_v0  ;;  %5447 = vperm.xlu1 %5440, %v5446_v21   ;;  %5436 = vperm.xlu0 %5429, %v5728_v22   ;;  %v5471_v50 = vpack.i.bf16 %v4635_v44, %v4634_v43  ;;  %v4643_v53 = vunpack.c.h.bf16 %v5769_v40  ;;  %v4654_v55 = vunpack.c.l.bf16 %v5790_v48  ;;  %v4655_v56 = vunpack.c.h.bf16 %v5790_v48  ;;  %v5523_v21 = vld [vmem:[%s7569_s4 + $0x18] sm:$0xff]   ;;  %v5528_v5 = vld [vmem:[%s7569_s4 + $0x70] sm:$0xff]  }
  0x1c   : > { %822 = vst [vmem:[#allocation2 + $0x70] sm:$0xf] %v5621_v0  ;;  %823 = vst [vmem:[#allocation2 + $0x74] sm:$0x1] %v5621_v0  ;;  %v5486_v57 = vpack.i.bf16 %v4647_v51, %v4646_v47  ;;  %v4650_v59 = vunpack.c.l.bf16 %v5803_v54  ;;  %v4651_v60 = vunpack.c.h.bf16 %v5803_v54  ;;  %v4679_v2 = vunpack.c.h.bf16 %v5816_v61  ;;  %4890 = vmatprep.subr.bf16.mxu0 %v5522_v15  ;;  %5407 = vmatprep.subr.bf16.mxu1 %v5522_v15  ;;  %v5529_v11 = vld [vmem:[%s7569_s4 + $0x30] sm:$0xff]   ;;  %v4835_v48 = vld [vmem:[%s5900_s13 + $0x60] sm:$0xff]  }
  0x1d   : > { %824 = vst [vmem:[#allocation2 + $0x78] sm:$0xf] %v5621_v0  ;;  %825 = vst [vmem:[#allocation2 + $0x7c] sm:$0xf] %v5621_v0  ;;  %v5481_v58 = vpack.i.bf16 %v4643_v53, %v4642_v52  ;;  %v5496_v63 = vpack.i.bf16 %v4655_v56, %v4654_v55  ;;  %v4658_v10 = vunpack.c.l.bf16 %v5819_v62  ;;  %v4659_v14 = vunpack.c.h.bf16 %v5819_v62  ;;  %4891 = vmatpush3.bf16.msra.mxu0 %v5523_v21  ;;  %v5905_v27 = vld [vmem:[%s7566_s1] ss:$0 sm:$0xff] }
  0x1e   : > { %826 = vst [vmem:[#allocation2 + $0x80] sm:$0x1] %v5621_v0  ;;  %827 = vst [vmem:[#allocation2 + $0x84] sm:$0xf] %v5621_v0  ;;  %v5491_v1 = vpack.i.bf16 %v4651_v60, %v4650_v59  ;;  %5415 = vmatpush3.bf16.msra.mxu1 %v5523_v21  ;;  %4892 = vmatprep.subr.bf16.mxu0 %v5524_v28  ;;  %v4833_v32 = vld [vmem:[%s5900_s13 + $0x50] sm:$0xff]   ;;  %v4553_v4 = vld [vmem:[%s5900_s13] sm:$0xff]  }
  0x1f   : > { %828 = vst [vmem:[#allocation2 + $0x88] sm:$0xf] %v5621_v0  ;;  %829 = vst [vmem:[#allocation2 + $0x8c] sm:$0x1] %v5621_v0  ;;  %5457 = vperm.xlu1 %5440, %v5456_v30   ;;  %5452 = vperm.xlu0 %5429, %v5451_v33   ;;  %v5501_v18 = vpack.i.bf16 %v4659_v14, %v4658_v10  ;;  %v5530_v30 = vld [vmem:[%s7569_s4 + $0x78] sm:$0xff]   ;;  %v4595_v45 = vunpack.c.h.bf16 %v4833_v32  ;;  %v4836_v16 = vld [vmem:[%s5900_s13 + $0x68] sm:$0xff]  }
  0x20   : > { %830 = vst [vmem:[#allocation2 + $0x90] sm:$0xf] %v5621_v0  ;;  %831 = vst [vmem:[#allocation2 + $0x94] sm:$0xf] %v5621_v0  ;;  %5408 = vmatprep.subr.bf16.mxu1 %v5524_v28  ;;  %vm1423_vm0 = vsmask.f32 3328 }
  0x21   : > { %832 = vst [vmem:[#allocation2 + $0x98] sm:$0x1] %v5621_v0  ;;  %833 = vst [vmem:[#allocation2 + $0x9c] sm:$0xf] %v5621_v0  ;;  %4893 = vmatpush3.bf16.msra.mxu0 %v5525_v29  ;;  %vm1424_vm1 = vsmask.f32 7440 }
  0x22   : > { %834 = vst [vmem:[#allocation2 + $0xa0] sm:$0xf] %v5621_v0  ;;  %835 = vst [vmem:[#allocation2 + $0xa4] sm:$0x1] %v5621_v0  ;;  %5416 = vmatpush3.bf16.msra.mxu1 %v5525_v29  ;;  %v5533_v26 = vld [vmem:[%s7569_s4 + $0xc0] sm:$0xff]   ;;  %s4272_s28 = sshll.u32 %s7633_s22, 1 }
  0x23   : > { %836 = vst [vmem:[#allocation2 + $0xa8] sm:$0xf] %v5621_v0  ;;  %837 = vst [vmem:[#allocation2 + $0xac] sm:$0xf] %v5621_v0  ;;  %5467 = vperm.xlu1 %5440, %v5466_v41   ;;  %5462 = vperm.xlu0 %5429, %v5461_v42   ;;  %v5920_v42 = vld [vmem:[#allocation2 + $0x8] sm:$0x1]  ;;  %s282_s15 = scalar_lea.vmem %s7571_s6, %s4272_s28 }
  0x24   : > { %838 = vst [vmem:[#allocation2 + $0xb0] sm:$0x1] %v5621_v0  ;;  %839 = vst [vmem:[#allocation2 + $0xb4] sm:$0xf] %v5621_v0 }
  0x25   : > { %840 = vst [vmem:[#allocation2 + $0xb8] sm:$0xf] %v5621_v0  ;;  %841 = vst [vmem:[#allocation2 + $0xbc] sm:$0x1] %v5621_v0 }
  0x26   : > { %842 = vst [vmem:[#allocation2 + $0xc0] sm:$0xf] %v5621_v0  ;;  %843 = vst [vmem:[#allocation2 + $0xc4] sm:$0xf] %v5621_v0 }
  0x27   : > { %844 = vst [vmem:[#allocation2 + $0xc8] sm:$0x1] %v5621_v0  ;;  %845 = vst [vmem:[#allocation2 + $0xcc] sm:$0xf] %v5621_v0  ;;  %5477 = vperm.xlu1 %5440, %v5476_v46   ;;  %5472 = vperm.xlu0 %5429, %v5471_v50  }
  0x28   : > { %846 = vst [vmem:[#allocation2 + $0xd0] sm:$0xf] %v5621_v0  ;;  %847 = vst [vmem:[#allocation2 + $0xd4] sm:$0x1] %v5621_v0  ;;  %v4678_v0 = vunpack.c.l.bf16 %v5816_v61 }
  0x29   : > { %vm5949_vm2 = vmor %vm1423_vm0, %vm1424_vm1 }
  0x2a   : > { %v5506_v17 = vpack.i.bf16 %v4679_v2, %v4678_v0  ;;  %vm5984_vm5 = vmor %vm1858_vm3, %vm1859_vm4 }
  0x2b   : > { %5487 = vperm.xlu1 %5440, %v5486_v57   ;;  %5482 = vperm.xlu0 %5429, %v5481_v58  }
  0x2f   : > { %5497 = vperm.xlu1 %5440, %v5496_v63   ;;  %5492 = vperm.xlu0 %5429, %v5491_v1  }
  0x33   : > { %5507 = vperm.xlu1 %5440, %v5506_v17   ;;  %5502 = vperm.xlu0 %5429, %v5501_v18  }
  0x37   : > { %3714 = vperm.xlu1 %5440, %v4622_v12   ;;  %5512 = vperm.xlu0 %5429, %v5728_v22   ;;  %v5526_v12 = vld [vmem:[%s7569_s4 + $0x68] sm:$0xff]  }
  0x38   : > { %v5527_v22 = vld [vmem:[%s7569_s4 + $0x28] sm:$0xff]   ;;  %4894 = vmatprep.subr.bf16.mxu0 %v5526_v12  ;;  %5409 = vmatprep.subr.bf16.mxu1 %v5526_v12 }
  0x39   : > { %4895 = vmatpush3.bf16.msra.mxu0 %v5527_v22  ;;  %5417 = vmatpush3.bf16.msra.mxu1 %v5527_v22  ;;  %v4824_v12 = vld [vmem:[%s5900_s13 + $0x8] sm:$0xff]  }
  0x3a   : > { %4896 = vmatprep.subr.bf16.mxu0 %v5528_v5  ;;  %5410 = vmatprep.subr.bf16.mxu1 %v5528_v5  ;;  %v4558_v22 = vunpack.c.l.bf16 %v4824_v12  ;;  %v1866_v5 = vrot.slane %v5920_v42, 5 }
  0x3b   : > { %3724 = vperm.xlu1 %5440, %v4626_v19   ;;  %3719 = vperm.xlu0 %5429, %v4623_v13   ;;  %v5890_v13 = vld [vmem:[#allocation2] sm:$0xf]  ;;  %v5892_v19 = vld [vmem:[#allocation2 + $0x4] sm:$0xf] }
  0x3c   : > { %v1430_v25 = vshll.u32 %v5890_v13, 16  ;;  %v1440_v50 = vshrl.u32 %v5892_v19, 16  ;;  %v4325_v28 = vcombine.low %v5890_v13, %v5892_v19 }
  0x3d   : > { %4897 = vmatpush3.bf16.msra.mxu0 %v5529_v11  ;;  %5418 = vmatpush3.bf16.msra.mxu1 %v5529_v11  ;;  %v4825_v11 = vld [vmem:[%s5900_s13 + $0x10] sm:$0xff]  }
  0x3e   : > { %4898 = vmatprep.subr.bf16.mxu0 %v5530_v30  ;;  %5411 = vmatprep.subr.bf16.mxu1 %v5530_v30  ;;  %v1442_v63 = vrot.slane %v1440_v50, 4 }
  0x3f   : > { %3734 = vperm.xlu1 %5440, %v4630_v31   ;;  %3729 = vperm.xlu0 %5429, %v4627_v20   ;;  %v1427_v20 = vshrl.u32 %v5890_v13, 16  ;;  %v4838_v31 = vld [vmem:[%s5900_s13 + $0x78] sm:$0xff]  }
  0x40   : > { %v4614_v40 = vunpack.c.l.bf16 %v4838_v31  ;;  %v4615_v41 = vunpack.c.h.bf16 %v4838_v31  ;;  %v4559_v31 = vunpack.c.h.bf16 %v4824_v12 }
  0x41   : > { %v1429_v33 = vrot.slane %v1427_v20, 4 }
  0x42   : > { %v386_v49 = vmul.f32 %v4615_v41, %v5905_v27  ;;  %v4563_v41 = vunpack.c.h.bf16 %v4825_v11 }
  0x43   : > { %3744 = vperm.xlu1 %5440, %v4634_v43   ;;  %3739 = vperm.xlu0 %5429, %v4631_v34   ;;  %v1432_v34 = vrot.slane %v1430_v25, 5  ;;  %v5925_v43 = vld [vmem:[%s7567_s2] ss:$0 sm:$0xff] }
  0x44   : > { %v5941_v58 = vadd.f32 %v5925_v43, %v386_v49 }
  0x45   : > { %v1433_v46 = vor.u32 %v1432_v34, %v1429_v33  ;;  %v4554_v34 = vunpack.c.l.bf16 %v4553_v4 }
  0x47   : > { %3754 = vperm.xlu1 %5440, %v4638_v38   ;;  %3749 = vperm.xlu0 %5429, %v4635_v44   ;;  %v1436_v38 = vshll.u32 %v5892_v19, 16  ;;  %v4594_v44 = vunpack.c.l.bf16 %v4833_v32  ;;  %v357_v32 = vmul.f32 %v4558_v22, %v5905_v27 }
  0x49   : > { %v1438_v37 = vrot.slane %v1436_v38, 5  ;;  %v4555_v38 = vunpack.c.h.bf16 %v4553_v4 }
  0x4b   : > { %3764 = vperm.xlu1 %5440, %v4642_v52   ;;  %3759 = vperm.xlu0 %5429, %v4639_v39   ;;  %v5531_v39 = vld [vmem:[%s7569_s4 + $0x38] sm:$0xff]   ;;  %v375_v52 = vmul.f32 %v4594_v44, %v5905_v27  ;;  %v1443_v54 = vor.u32 %v1442_v63, %v1438_v37  ;;  %v358_v44 = vmul.f32 %v4559_v31, %v5905_v27  ;;  %v5537_v63 = vld [vmem:[%s7569_s4 + $0x100] sm:$0xff]  }
  0x4c   : > { %4899 = vmatpush3.bf16.msra.mxu0 %v5531_v39  ;;  %5419 = vmatpush3.bf16.msra.mxu1 %v5531_v39  ;;  %v4562_v39 = vunpack.c.l.bf16 %v4825_v11 }
  0x4d   : > { %v5944_v1 = vadd.f32 %v5925_v43, %v375_v52  ;;  %v1444_v18 = vrot.slane %v1443_v54, 4  ;;  %v360_v52 = vmul.f32 %v4563_v41, %v5905_v27  ;;  %4996 = vmatprep.subr.bf16.mxu1 %v5533_v26  ;;  %v397_v61 = vadd.f32 %v5925_v43, %v358_v44 }
  0x4e   : > { %v359_v49 = vmul.f32 %v4562_v39, %v5905_v27 }
  0x4f   : > { %3774 = vperm.xlu1 %5440, %v4646_v47   ;;  %3769 = vperm.xlu0 %5429, %v4643_v53   ;;  %v385_v47 = vmul.f32 %v4614_v40, %v5905_v27  ;;  %v376_v53 = vmul.f32 %v4595_v45, %v5905_v27  ;;  %v396_v45 = vadd.f32 %v5925_v43, %v357_v32  ;;  %vm429_vm11 = vcmp.gt.f32.partialorder %v397_v61, 0.0 }
  0x50   : > { %v399_v12 = vadd.f32 %v5925_v43, %v360_v52 }
  0x51   : > { %v5938_v57 = vadd.f32 %v5925_v43, %v385_v47  ;;  %v5947_v15 = vadd.f32 %v5925_v43, %v376_v53  ;;  %v4607_v53 = vunpack.c.h.bf16 %v4836_v16  ;;  %vm428_vm10 = vcmp.gt.f32.partialorder %v396_v45, 0.0 }
  0x52   : > { %vm431_vm15 = vcmp.gt.f32.partialorder %v399_v12, 0.0 }
  0x53   : > { %3784 = vperm.xlu1 %5440, %v4650_v59   ;;  %3779 = vperm.xlu0 %5429, %v4647_v51   ;;  %v1446_v51 = vshll.u32 %v5920_v42, 16  ;;  %v1434_v59 = vrot.slane %v1433_v46, 4  ;;  %v355_v46 = vmul.f32 %v4554_v34, %v5905_v27 }
  0x55   : > { %v1439_v17 = vsel %vm5949_vm2, %v1434_v59, %v1438_v37  ;;  %v356_v37 = vmul.f32 %v4555_v38, %v5905_v27  ;;  %v4826_v59 = vld [vmem:[%s5900_s13 + $0x18] sm:$0xff]  }
  0x57   : > { %3794 = vperm.xlu1 %5440, %v4654_v55   ;;  %3789 = vperm.xlu0 %5429, %v4651_v60   ;;  %v1448_v60 = vrot.slane %v1446_v51, 5 }
  0x59   : > { %v1449_v21 = vsel %vm5949_vm2, %v1444_v18, %v1448_v60  ;;  %v394_v60 = vadd.f32 %v5925_v43, %v355_v46 }
  0x5a   : > { %v4341_v29 = vcombine.low %v1439_v17, %v1449_v21  ;;  %v395_v17 = vadd.f32 %v5925_v43, %v356_v37  ;;  %v4837_v21 = vld [vmem:[%s5900_s13 + $0x70] sm:$0xff]  }
  0x5b   : > { %3804 = vperm.xlu1 %5440, %v4658_v10   ;;  %3799 = vperm.xlu0 %5429, %v4655_v56   ;;  %v4602_v56 = vunpack.c.l.bf16 %v4835_v48  ;;  %v4834_v10 = vld [vmem:[%s5900_s13 + $0x58] sm:$0xff]   ;;  %v458_v4 = vmul.f32 0.333, %v394_v60  ;;  %vm426_vm12 = vcmp.gt.f32.partialorder %v394_v60, 0.0  ;;  %v4611_v31 = vunpack.c.h.bf16 %v4837_v21 }
  0x5c   : > { %2865 = vmatprep.mubr.bf16.mxu0 %v4341_v29  ;;  %v4598_v62 = vunpack.c.l.bf16 %v4834_v10  ;;  %v398_v29 = vadd.f32 %v5925_v43, %v359_v49  ;;  %vm427_vm13 = vcmp.gt.f32.partialorder %v395_v17, 0.0 }
  0x5d   : > { %2866 = vmatmul.mubr.bf16.vlgmr.msra.gmra.mrb[0].mxu0 %v4325_v28  ;;  %v6058_v39 = vsel %vm426_vm12, %v394_v60, %v458_v4 }
  0x5e   : > { %vm430_vm14 = vcmp.gt.f32.partialorder %v398_v29, 0.0 }
  0x5f   : > { %3814 = vperm.xlu1 %5440, %v4662_v8   ;;  %3809 = vperm.xlu0 %5429, %v4659_v14   ;;  %v4603_v8 = vunpack.c.h.bf16 %v4835_v48  ;;  %v4599_v14 = vunpack.c.h.bf16 %v4834_v10  ;;  %v4566_v48 = vunpack.c.l.bf16 %v4826_v59 }
  0x61   : > { %v380_v20 = vmul.f32 %v4603_v8, %v5905_v27  ;;  %v382_v8 = vmul.f32 %v4607_v53, %v5905_v27 }
  0x63   : > { %3824 = vperm.xlu1 %5440, %v4666_v6   ;;  %3819 = vperm.xlu0 %5429, %v4663_v9   ;;  %v379_v6 = vmul.f32 %v4602_v56, %v5905_v27  ;;  %v1863_v9 = vrot.slane %v5892_v19, 5 }
  0x65   : > { %v1865_v3 = vrot.slane %v1863_v9, 4  ;;  %v418_v30 = vadd.f32 %v5925_v43, %v379_v6  ;;  %v4610_v6 = vunpack.c.l.bf16 %v4837_v21 }
  0x67   : > { %3834 = vperm.xlu1 %5440, %v4670_v23   ;;  %3829 = vperm.xlu0 %5429, %v4667_v7   ;;  %v377_v7 = vmul.f32 %v4598_v62, %v5905_v27  ;;  %v378_v23 = vmul.f32 %v4599_v14, %v5905_v27  ;;  %v6000_v33 = vsel %vm5984_vm5, %v1865_v3, %v1866_v5  ;;  %v482_v42 = vmul.f32 0.333, %v418_v30 }
  0x68   : > { %vm450_vm6 = vcmp.gt.f32.partialorder %v418_v30, 0.0  ;;  %v461_v62 = vmul.f32 0.333, %v397_v61  ;;  %v4567_v14 = vunpack.c.h.bf16 %v4826_v59  ;;  %v459_v5 = vmul.f32 0.333, %v395_v17 }
  0x69   : > { %v417_v40 = vadd.f32 %v5925_v43, %v378_v23  ;;  %v6029_v54 = vsel %vm450_vm6, %v418_v30, %v482_v42  ;;  %v361_v3 = vmul.f32 %v4566_v48, %v5905_v27  ;;  %v463_v23 = vmul.f32 0.333, %v399_v12  ;;  %v5548_v48 = vld [vmem:[%s7569_s4 + $0x108] sm:$0xff]  }
  0x6a   : > { %v421_v30 = vadd.f32 %v5925_v43, %v382_v8  ;;  %v6053_v32 = vsel %vm429_vm11, %v397_v61, %v461_v62  ;;  %v362_v34 = vmul.f32 %v4567_v14, %v5905_v27  ;;  %v383_v38 = vmul.f32 %v4610_v6, %v5905_v27  ;;  %v4832_v62 = vld [vmem:[%s5900_s13 + $0x48] sm:$0xff]  }
  0x6b   : > { %3844 = vperm.xlu1 %5440, %v4674_v35   ;;  %3839 = vperm.xlu0 %5429, %v4671_v24   ;;  %v419_v35 = vadd.f32 %v5925_v43, %v380_v20  ;;  %v416_v24 = vadd.f32 %v5925_v43, %v377_v7  ;;  %v481_v51 = vmul.f32 0.333, %v417_v40  ;;  %vm449_vm9 = vcmp.gt.f32.partialorder %v417_v40, 0.0  ;;  %v4828_v7 = vld [vmem:[%s5900_s13 + $0x28] sm:$0xff]  }
  0x6c   : > { %v462_v20 = vmul.f32 0.333, %v398_v29  ;;  %v400_v42 = vadd.f32 %v5925_v43, %v361_v3  ;;  %v4575_v44 = vunpack.c.h.bf16 %v4828_v7  ;;  %v6066_v46 = vsel %vm431_vm15, %v399_v12, %v463_v23 }
  0x6d   : > { %vm451_vm7 = vcmp.gt.f32.partialorder %v419_v35, 0.0  ;;  %v483_v47 = vmul.f32 0.333, %v419_v35  ;;  %v480_v50 = vmul.f32 0.333, %v416_v24  ;;  %vm448_vm8 = vcmp.gt.f32.partialorder %v416_v24, 0.0 }
  0x6e   : > { %v6042_v10 = vsel %vm449_vm9, %v417_v40, %v481_v51  ;;  %v4574_v40 = vunpack.c.l.bf16 %v4828_v7  ;;  %v6062_v41 = vsel %vm430_vm14, %v398_v29, %v462_v20  ;;  %v485_v37 = vmul.f32 0.333, %v421_v30 }
  0x6f   : > { %3854 = vperm.xlu1 %5440, %v4678_v0   ;;  %3849 = vperm.xlu0 %5429, %v4675_v36   ;;  %v4606_v0 = vunpack.c.l.bf16 %v4836_v16  ;;  %v5534_v36 = vld [vmem:[%s7569_s4 + $0x140] sm:$0xff]   ;;  %v6037_v28 = vsel %vm451_vm7, %v419_v35, %v483_v47  ;;  %v6040_v56 = vsel %vm448_vm8, %v416_v24, %v480_v50  ;;  %v6060_v16 = vsel %vm427_vm13, %v395_v17, %v459_v5  ;;  %v5545_v17 = vld [vmem:[%s7569_s4 + $0x148] sm:$0xff]  }
  0x70   : > { %5108 = vmatprep.subr.bf16.mxu0 %v5534_v36  ;;  %v4827_v35 = vld [vmem:[%s5900_s13 + $0x20] sm:$0xff]   ;;  %v4829_v36 = vld [vmem:[%s5900_s13 + $0x30] sm:$0xff]   ;;  %vm453_vm1 = vcmp.gt.f32.partialorder %v421_v30, 0.0  ;;  %v401_v47 = vadd.f32 %v5925_v43, %v362_v34  ;;  %v422_v49 = vadd.f32 %v5925_v43, %v383_v38  ;;  %v365_v52 = vmul.f32 %v4574_v40, %v5905_v27 }
  0x71   : > { %v381_v18 = vmul.f32 %v4606_v0, %v5905_v27  ;;  %5109 = vmatpush3.bf16.msra.mxu0 %v5537_v63  ;;  %v384_v0 = vmul.f32 %v4611_v31, %v5905_v27  ;;  %v4570_v26 = vunpack.c.l.bf16 %v4827_v35  ;;  %v4571_v50 = vunpack.c.h.bf16 %v4827_v35 }
  0x72   : > { %v464_v63 = vmul.f32 0.333, %v400_v42  ;;  %v366_v61 = vmul.f32 %v4575_v44, %v5905_v27  ;;  %v4579_v60 = vunpack.c.h.bf16 %v4829_v36  ;;  %vm432_vm3 = vcmp.gt.f32.partialorder %v400_v42, 0.0  ;;  %5110 = vmatprep.subr.bf16.mxu0 %v5545_v17 }
  0x73   : > { %3859 = vperm.xlu0 %5429, %v4679_v2   ;;  %v460_v2 = vmul.f32 0.333, %v396_v45  ;;  %v420_v11 = vadd.f32 %v5925_v43, %v381_v18  ;;  %v6079_v18 = vsel %vm453_vm1, %v421_v30, %v485_v37  ;;  %v423_v21 = vadd.f32 %v5925_v43, %v384_v0 }
  0x74   : > { %v363_v29 = vmul.f32 %v4570_v26, %v5905_v27  ;;  %vm433_vm4 = vcmp.gt.f32.partialorder %v401_v47, 0.0  ;;  %v465_v12 = vmul.f32 0.333, %v401_v47  ;;  %vm454_vm6 = vcmp.gt.f32.partialorder %v422_v49, 0.0 }
  0x75   : > { %v6046_v22 = vsel %vm428_vm10, %v396_v45, %v460_v2  ;;  %v484_v24 = vmul.f32 0.333, %v420_v11  ;;  %vm452_vm0 = vcmp.gt.f32.partialorder %v420_v11, 0.0  ;;  %v4830_v45 = vld [vmem:[%s5900_s13 + $0x38] sm:$0xff]   ;;  %v4578_v2 = vunpack.c.l.bf16 %v4829_v36  ;;  %5111 = vmatpush3.bf16.msra.mxu0 %v5548_v48 }
  0x76   : > { %v4582_v53 = vunpack.c.l.bf16 %v4830_v45  ;;  %v4583_v59 = vunpack.c.h.bf16 %v4830_v45  ;;  %v364_v8 = vmul.f32 %v4571_v50, %v5905_v27  ;;  %v486_v14 = vmul.f32 0.333, %v422_v49 }
  0x77   : > { %v6072_v51 = vsel %vm452_vm0, %v420_v11, %v484_v24  ;;  %v404_v6 = vadd.f32 %v5925_v43, %v365_v52  ;;  %v4831_v11 = vld [vmem:[%s5900_s13 + $0x40] sm:$0xff]   ;;  %v6093_v20 = vsel %vm432_vm3, %v400_v42, %v464_v63  ;;  %v405_v3 = vadd.f32 %v5925_v43, %v366_v61 }
  0x78   : > { %v369_v4 = vmul.f32 %v4582_v53, %v5905_v27  ;;  %v370_v5 = vmul.f32 %v4583_v59, %v5905_v27  ;;  %v367_v7 = vmul.f32 %v4578_v2, %v5905_v27  ;;  %v368_v23 = vmul.f32 %v4579_v60, %v5905_v27 }
  0x79   : > { %vm455_vm7 = vcmp.gt.f32.partialorder %v423_v21, 0.0  ;;  %v402_v30 = vadd.f32 %v5925_v43, %v363_v29  ;;  %v4590_v31 = vunpack.c.l.bf16 %v4832_v62  ;;  %v4591_v34 = vunpack.c.h.bf16 %v4832_v62 }
  0x7a   : > { %v487_v38 = vmul.f32 0.333, %v423_v21  ;;  %v403_v35 = vadd.f32 %v5925_v43, %v364_v8  ;;  %v4586_v24 = vunpack.c.l.bf16 %v4831_v11  ;;  %v4587_v40 = vunpack.c.h.bf16 %v4831_v11 }
  0x7b   : > { %v6101_v44 = vsel %vm433_vm4, %v401_v47, %v465_v12  ;;  %vm436_vm8 = vcmp.gt.f32.partialorder %v404_v6, 0.0  ;;  %v408_v42 = vadd.f32 %v5925_v43, %v369_v4  ;;  %v409_v45 = vadd.f32 %v5925_v43, %v370_v5 }
  0x7c   : > { %vm437_vm9 = vcmp.gt.f32.partialorder %v405_v3, 0.0  ;;  %v468_v37 = vmul.f32 0.333, %v404_v6  ;;  %v406_v0 = vadd.f32 %v5925_v43, %v367_v7  ;;  %v407_v26 = vadd.f32 %v5925_v43, %v368_v23 }
  0x7d   : > { %v469_v36 = vmul.f32 0.333, %v405_v3  ;;  %vm434_vm10 = vcmp.gt.f32.partialorder %v402_v30, 0.0  ;;  %v373_v50 = vmul.f32 %v4590_v31, %v5905_v27  ;;  %v374_v52 = vmul.f32 %v4591_v34, %v5905_v27 }
  0x7e   : > { %vm435_vm11 = vcmp.gt.f32.partialorder %v403_v35, 0.0  ;;  %v466_v47 = vmul.f32 0.333, %v402_v30  ;;  %v371_v53 = vmul.f32 %v4586_v24, %v5905_v27  ;;  %v372_v59 = vmul.f32 %v4587_v40, %v5905_v27  ;;  %v5565_v40 = vld [vmem:[%s7569_s4 + $0x158] sm:$0xff]  }
  0x7f   : > { %v467_v63 = vmul.f32 0.333, %v403_v35  ;;  %vm440_vm12 = vcmp.gt.f32.partialorder %v408_v42, 0.0  ;;  %vm441_vm13 = vcmp.gt.f32.partialorder %v409_v45, 0.0  ;;  %v472_v61 = vmul.f32 0.333, %v408_v42 }
  0x80   : > { %v6112_v2 = vsel %vm454_vm6, %v422_v49, %v486_v14  ;;  %v473_v60 = vmul.f32 0.333, %v409_v45  ;;  %v470_v17 = vmul.f32 0.333, %v406_v0  ;;  %v471_v29 = vmul.f32 0.333, %v407_v26 }
  0x81   : > { %vm438_vm14 = vcmp.gt.f32.partialorder %v406_v0, 0.0  ;;  %vm439_vm15 = vcmp.gt.f32.partialorder %v407_v26, 0.0  ;;  %v412_v48 = vadd.f32 %v5925_v43, %v373_v50  ;;  %v413_v12 = vadd.f32 %v5925_v43, %v374_v52  ;;  %v5556_v49 = vld [vmem:[%s7569_s4 + $0x150] sm:$0xff]  }
  0x82   : > { %v6117_v8 = vsel %vm455_vm7, %v423_v21, %v487_v38  ;;  %v410_v27 = vadd.f32 %v5925_v43, %v371_v53  ;;  %v411_v62 = vadd.f32 %v5925_v43, %v372_v59  ;;  %v4307_v4 = vrot.slane %v5890_v13, 9  ;;  %v5559_v13 = vld [vmem:[%s7569_s4 + $0x110] sm:$0xff]   ;;  %5112 = vmatprep.subr.bf16.mxu0 %v5556_v49 }
  0x83   : > { %v6126_v14 = vsel %vm436_vm8, %v404_v6, %v468_v37  ;;  %v6129_v5 = vsel %vm437_vm9, %v405_v3, %v469_v36  ;;  %v6132_v11 = vsel %vm434_vm10, %v402_v30, %v466_v47  ;;  %v6135_v21 = vsel %vm435_vm11, %v403_v35, %v467_v63  ;;  %5113 = vmatpush3.bf16.msra.mxu0 %v5559_v13 }
  0x84   : > { %v6141_v43 = vsel %vm440_vm12, %v408_v42, %v472_v61  ;;  %v6144_v7 = vsel %vm441_vm13, %v409_v45, %v473_v60  ;;  %v6147_v6 = vsel %vm438_vm14, %v406_v0, %v470_v17  ;;  %v6150_v3 = vsel %vm439_vm15, %v407_v26, %v471_v29  ;;  %5114 = vmatprep.subr.bf16.mxu0 %v5565_v40  ;;  %v5567_v17 = vld [vmem:[%s7569_s4 + $0x118] sm:$0xff]  }
  0x85   : > { %vm444_vm0 = vcmp.gt.f32.partialorder %v412_v48, 0.0  ;;  %vm445_vm1 = vcmp.gt.f32.partialorder %v413_v12, 0.0  ;;  %v476_v23 = vmul.f32 0.333, %v412_v48  ;;  %v477_v30 = vmul.f32 0.333, %v413_v12 }
  0x86   : > { %vm928_vm3 = vsmask.f32 256  ;;  %vm929_vm4 = vsmask.f32 4368  ;;  %vm442_vm6 = vcmp.gt.f32.partialorder %v410_v27, 0.0  ;;  %v6156_v38 = vsel %vm5984_vm5, %v4307_v4, %v1863_v9 }
  0x87   : > { %v474_v31 = vmul.f32 0.333, %v410_v27  ;;  %v475_v34 = vmul.f32 0.333, %v411_v62  ;;  %vm1252_vm7 = vcmask 1043456   ;;  %vm443_vm9 = vcmp.gt.f32.partialorder %v411_v62, 0.0  ;;  %5115 = vmatpush3.bf16.msra.mxu0 %v5567_v17  ;;  %vm6208_vm14 = vmor %vm928_vm3, %vm929_vm4 }
  0x88   : > { %vm1253_vm8 = vsmask.f32 7938  ;;  %vm456_vm10 = vcmp.gt.f32.partialorder %v5938_v57, 0.0  ;;  %v488_v35 = vmul.f32 0.333, %v5938_v57  ;;  %vm1259_vm11 = vcmask 1040384  }
  0x89   : > { %vm457_vm12 = vcmp.gt.f32.partialorder %v5941_v58, 0.0  ;;  %v489_v9 = vmul.f32 0.333, %v5941_v58  ;;  %vm446_vm13 = vcmp.gt.f32.partialorder %v5944_v1, 0.0  ;;  %v478_v45 = vmul.f32 0.333, %v5944_v1  ;;  %vm6216_vm15 = vmand %vm1252_vm7, %vm1253_vm8 }
  0x8a   : > { %v6170_v50 = vsel %vm444_vm0, %v412_v48, %v476_v23  ;;  %v6173_v52 = vsel %vm445_vm1, %v413_v12, %v477_v30  ;;  %v6176_v47 = vsel %vm442_vm6, %v410_v27, %v474_v31  ;;  %v6179_v53 = vsel %vm443_vm9, %v411_v62, %v475_v34  ;;  %vm6224_vm0 = vmand %vm1259_vm11, %vm928_vm3 }
  0x8b   : > { %v6191_v12 = vsel %vm456_vm10, %v5938_v57, %v488_v35  ;;  %vm447_vm1 = vcmp.gt.f32.partialorder %v5947_v15, 0.0 }
  0x96   : > { %v5443_v19 = vpop.permute.xlu1 %5442  ;;  %v5432_v42 = vpop.permute.xlu0 %5431 }
  0x97   : > { %v5445_v37 = vunpack.i.h.bf16 %v5443_v19  ;;  %v5444_v0 = vunpack.i.l.bf16 %v5443_v19  ;;  %v5434_v26 = vunpack.i.h.bf16 %v5432_v42  ;;  %v5433_v36 = vunpack.i.l.bf16 %v5432_v42 }
  0x99   : > { %v770_v59 = vmul.f32 %v5444_v0, %v6029_v54  ;;  %v771_v63 = vmul.f32 %v5445_v37, %v6037_v28  ;;  %v768_v61 = vmul.f32 %v5433_v36, %v6040_v56  ;;  %v769_v60 = vmul.f32 %v5434_v26, %v6042_v10  ;;  %v1341_v36 = vld [vmem:[#allocation2 + $0x9c] sm:$0xf] }
  0x9a   : > { %v5448_v29 = vpop.permute.xlu1 %5447  ;;  %v5437_v48 = vpop.permute.xlu0 %5436  ;;  %v6196_v54 = vsel %vm457_vm12, %v5941_v58, %v489_v9  ;;  %v6199_v28 = vmul.f32 0.333, %v5947_v15  ;;  %v6204_v56 = vsel %vm446_vm13, %v5944_v1, %v478_v45 }
  0x9b   : > { %v4512_v10 = vpack.c.bf16 %v770_v59, %v770_v59  ;;  %v4513_v27 = vpack.c.bf16 %v771_v63, %v771_v63  ;;  %v4510_v62 = vpack.c.bf16 %v768_v61, %v768_v61  ;;  %v4511_v4 = vpack.c.bf16 %v769_v60, %v769_v60  ;;  %v1345_v59 = vld [vmem:[#allocation2 + $0xa4] sm:$0x1] }
  0x9c   : > { %v5450_v57 = vunpack.i.h.bf16 %v5448_v29  ;;  %v5449_v49 = vunpack.i.l.bf16 %v5448_v29  ;;  %v5439_v13 = vunpack.i.h.bf16 %v5437_v48  ;;  %v5438_v23 = vunpack.i.l.bf16 %v5437_v48 }
  0x9d   : > { %v1136_v30 = vshrl.u32 %v4512_v10, 16  ;;  %v1139_v58 = vshll.u32 %v4512_v10, 16  ;;  %v1144_v31 = vshrl.u32 %v4513_v27, 16  ;;  %v1147_v34 = vshll.u32 %v4513_v27, 16  ;;  %v1334_v27 = vld [vmem:[#allocation2 + $0x90] sm:$0xf] }
  0x9e   : > { %v1119_v35 = vshrl.u32 %v4510_v62, 16  ;;  %v1122_v40 = vshll.u32 %v4510_v62, 16  ;;  %v1127_v19 = vshrl.u32 %v4511_v4, 16  ;;  %v1130_v42 = vshll.u32 %v4511_v4, 16  ;;  %v1338_v62 = vld [vmem:[#allocation2 + $0x98] sm:$0x1] }
  0x9f   : > { %v1138_v9 = vrot.slane %v1136_v30, 7  ;;  %v1146_v45 = vrot.slane %v1144_v31, 7  ;;  %v748_v37 = vmul.f32 %v5449_v49, %v6046_v22  ;;  %v749_v0 = vmul.f32 %v5450_v57, %v6053_v32  ;;  %v5458_v31 = vpop.permute.xlu1 %5457 }
  0xa0   : > { %v1121_v63 = vrot.slane %v1119_v35, 7  ;;  %v1129_v61 = vrot.slane %v1127_v19, 7  ;;  %v746_v60 = vmul.f32 %v5438_v23, %v6058_v39  ;;  %v747_v17 = vmul.f32 %v5439_v13, %v6060_v16  ;;  %v5569_v39 = vld [vmem:[%s7569_s4 + $0x160] sm:$0xff]  }
  0xa1   : > { %v1141_v32 = vor.u32 %v1139_v58, %v1138_v9  ;;  %v1142_v29 = vrot.slane %v1138_v9, 4  ;;  %v1149_v48 = vor.u32 %v1147_v34, %v1146_v45  ;;  %v1151_v10 = vrot.slane %v1146_v45, 4  ;;  %v5571_v34 = vld [vmem:[%s7569_s4 + $0x120] sm:$0xff]   ;;  %5116 = vmatprep.subr.bf16.mxu0 %v5569_v39 }
  0xa2   : > { %v1124_v4 = vor.u32 %v1122_v40, %v1121_v63  ;;  %v1125_v57 = vrot.slane %v1121_v63, 4  ;;  %v1132_v49 = vor.u32 %v1130_v42, %v1129_v61  ;;  %v1134_v30 = vrot.slane %v1129_v61, 4  ;;  %5117 = vmatpush3.bf16.msra.mxu0 %v5571_v34  ;;  %v1268_v39 = vld [vmem:[#allocation2 + $0x20] sm:$0x1] }
  0xa3   : > { %v1150_v16 = vsel %vm6208_vm14, %v1142_v29, %v1149_v48  ;;  %v1342_v13 = vsel %vm6216_vm15, %v1141_v32, %v1341_v36  ;;  %v1346_v23 = vsel %vm6224_vm0, %v1151_v10, %v1345_v59  ;;  %v4490_v58 = vpack.c.bf16 %v748_v37, %v748_v37 }
  0xa4   : > { %1343 = vst [vmem:[#allocation2 + $0x9c] sm:$0xf] %v1342_v13  ;;  %1344 = vst [vmem:[#allocation2 + $0xa0] sm:$0xf] %v1150_v16  ;;  %v1133_v35 = vsel %vm6208_vm14, %v1125_v57, %v1132_v49  ;;  %v1335_v40 = vsel %vm6216_vm15, %v1124_v4, %v1334_v27  ;;  %v1339_v19 = vsel %vm6224_vm0, %v1134_v30, %v1338_v62  ;;  %v5460_v61 = vunpack.i.h.bf16 %v5458_v31  ;;  %v5453_v4 = vpop.permute.xlu0 %5452  ;;  %v1264_v62 = vld [vmem:[#allocation2 + $0x18] sm:$0xf] }
  0xa5   : > { %1347 = vst [vmem:[#allocation2 + $0xa4] sm:$0x1] %v1346_v23  ;;  %v4491_v42 = vpack.c.bf16 %v749_v0, %v749_v0  ;;  %1336 = vst [vmem:[#allocation2 + $0x90] sm:$0xf] %v1335_v40  ;;  %v949_v9 = vshrl.u32 %v4490_v58, 16  ;;  %v952_v45 = vshll.u32 %v4490_v58, 16  ;;  %v4488_v37 = vpack.c.bf16 %v746_v60, %v746_v60 }
  0xa6   : > { %1337 = vst [vmem:[#allocation2 + $0x94] sm:$0xf] %v1133_v35  ;;  %1340 = vst [vmem:[#allocation2 + $0x98] sm:$0x1] %v1339_v19  ;;  %v4489_v36 = vpack.c.bf16 %v747_v17, %v747_v17  ;;  %v5459_v32 = vunpack.i.l.bf16 %v5458_v31  ;;  %v751_v30 = vmul.f32 %v5460_v61, %v6066_v46  ;;  %v1255_v31 = vld [vmem:[#allocation2 + $0xc] sm:$0xf] }
  0xa7   : > { %v957_v59 = vshrl.u32 %v4491_v42, 16  ;;  %v960_v63 = vshll.u32 %v4491_v42, 16  ;;  %v951_v29 = vrot.slane %v949_v9, 7  ;;  %v932_v48 = vshrl.u32 %v4488_v37, 16  ;;  %v1261_v19 = vld [vmem:[#allocation2 + $0x14] sm:$0x1] }
  0xa8   : > { %v935_v10 = vshll.u32 %v4488_v37, 16  ;;  %v940_v27 = vshrl.u32 %v4489_v36, 16  ;;  %v943_v57 = vshll.u32 %v4489_v36, 16  ;;  %v750_v49 = vmul.f32 %v5459_v32, %v6062_v41 }
  0xa9   : > { %v959_v0 = vrot.slane %v957_v59, 7  ;;  %v954_v60 = vor.u32 %v952_v45, %v951_v29  ;;  %v955_v17 = vrot.slane %v951_v29, 4  ;;  %v934_v16 = vrot.slane %v932_v48, 7  ;;  %v5468_v59 = vpop.permute.xlu1 %5467  ;;  %v5463_v48 = vpop.permute.xlu0 %5462 }
  0xaa   : > { %v942_v13 = vrot.slane %v940_v27, 7  ;;  %v4492_v34 = vpack.c.bf16 %v750_v49, %v750_v49  ;;  %v4493_v35 = vpack.c.bf16 %v751_v30, %v751_v30  ;;  %v1271_v49 = vld [vmem:[#allocation2 + $0x24] sm:$0xf] }
  0xab   : > { %v962_v23 = vor.u32 %v960_v63, %v959_v0  ;;  %v964_v58 = vrot.slane %v959_v0, 4  ;;  %v1265_v40 = vsel %vm6216_vm15, %v954_v60, %v1264_v62  ;;  %v937_v42 = vor.u32 %v935_v10, %v934_v16 }
  0xac   : > { %v938_v9 = vrot.slane %v934_v16, 4  ;;  %v945_v37 = vor.u32 %v943_v57, %v942_v13  ;;  %1266 = vst [vmem:[#allocation2 + $0x18] sm:$0xf] %v1265_v40  ;;  %v947_v45 = vrot.slane %v942_v13, 4  ;;  %v966_v36 = vshrl.u32 %v4492_v34, 16  ;;  %v5574_v57 = vld [vmem:[%s7569_s4 + $0x168] sm:$0xff]  }
  0xad   : > { %v963_v41 = vsel %vm6208_vm14, %v955_v17, %v962_v23  ;;  %v1269_v46 = vsel %vm6224_vm0, %v964_v58, %v1268_v39  ;;  %v1256_v61 = vsel %vm6216_vm15, %v937_v42, %v1255_v31  ;;  %v969_v32 = vshll.u32 %v4492_v34, 16  ;;  %v1275_v16 = vld [vmem:[#allocation2 + $0x2c] sm:$0x1]  ;;  %5118 = vmatprep.subr.bf16.mxu0 %v5574_v57  ;;  %v1352_v57 = vld [vmem:[#allocation2 + $0xb0] sm:$0x1] }
  0xae   : > { %1267 = vst [vmem:[#allocation2 + $0x1c] sm:$0xf] %v963_v41  ;;  %1270 = vst [vmem:[#allocation2 + $0x20] sm:$0x1] %v1269_v46  ;;  %v946_v63 = vsel %vm6208_vm14, %v938_v9, %v945_v37  ;;  %v974_v29 = vshrl.u32 %v4493_v35, 16  ;;  %v1262_v10 = vsel %vm6224_vm0, %v947_v45, %v1261_v19  ;;  %v968_v27 = vrot.slane %v966_v36, 7 }
  0xaf   : > { %1257 = vst [vmem:[#allocation2 + $0xc] sm:$0xf] %v1256_v61  ;;  %1258 = vst [vmem:[#allocation2 + $0x10] sm:$0xf] %v946_v63  ;;  %v977_v62 = vshll.u32 %v4493_v35, 16  ;;  %v5455_v0 = vunpack.i.h.bf16 %v5453_v4  ;;  %v5454_v39 = vunpack.i.l.bf16 %v5453_v4  ;;  %v5470_v60 = vunpack.i.h.bf16 %v5468_v59  ;;  %v5576_v42 = vld [vmem:[%s7569_s4 + $0x128] sm:$0xff]   ;;  %v5478_v61 = vpop.permute.xlu1 %5477 }
  0xb0   : > { %1263 = vst [vmem:[#allocation2 + $0x14] sm:$0x1] %v1262_v10  ;;  %v976_v30 = vrot.slane %v974_v29, 7  ;;  %v5469_v17 = vunpack.i.l.bf16 %v5468_v59  ;;  %v971_v13 = vor.u32 %v969_v32, %v968_v27  ;;  %v972_v23 = vrot.slane %v968_v27, 4  ;;  %5119 = vmatpush3.bf16.msra.mxu0 %v5576_v42 }
  0xb1   : > { %v773_v58 = vmul.f32 %v5455_v0, %v6079_v18  ;;  %v5465_v31 = vunpack.i.h.bf16 %v5463_v48  ;;  %v772_v40 = vmul.f32 %v5454_v39, %v6072_v51  ;;  %v753_v37 = vmul.f32 %v5470_v60, %v6101_v44 }
  0xb2   : > { %v979_v34 = vor.u32 %v977_v62, %v976_v30  ;;  %v981_v35 = vrot.slane %v976_v30, 4  ;;  %v752_v19 = vmul.f32 %v5469_v17, %v6093_v20  ;;  %v1272_v4 = vsel %vm6216_vm15, %v971_v13, %v1271_v49  ;;  %v1348_v17 = vld [vmem:[#allocation2 + $0xa8] sm:$0xf] }
  0xb3   : > { %v4515_v9 = vpack.c.bf16 %v773_v58, %v773_v58  ;;  %v5464_v41 = vunpack.i.l.bf16 %v5463_v48  ;;  %1273 = vst [vmem:[#allocation2 + $0x24] sm:$0xf] %v1272_v4  ;;  %v4514_v46 = vpack.c.bf16 %v772_v40, %v772_v40  ;;  %v4495_v59 = vpack.c.bf16 %v753_v37, %v753_v37  ;;  %v1282_v40 = vld [vmem:[#allocation2 + $0x38] sm:$0x1]  ;;  %v5473_v37 = vpop.permute.xlu0 %5472 }
  0xb4   : > { %v980_v18 = vsel %vm6208_vm14, %v972_v23, %v979_v34  ;;  %v1276_v51 = vsel %vm6224_vm0, %v981_v35, %v1275_v16  ;;  %v4494_v20 = vpack.c.bf16 %v752_v19, %v752_v19  ;;  %v775_v0 = vmul.f32 %v5465_v31, %v6117_v8  ;;  %v1278_v23 = vld [vmem:[#allocation2 + $0x30] sm:$0xf] }
  0xb5   : > { %1274 = vst [vmem:[#allocation2 + $0x28] sm:$0xf] %v980_v18  ;;  %1277 = vst [vmem:[#allocation2 + $0x2c] sm:$0x1] %v1276_v51  ;;  %v1161_v45 = vshrl.u32 %v4515_v9, 16  ;;  %v1164_v36 = vshll.u32 %v4515_v9, 16  ;;  %v774_v63 = vmul.f32 %v5464_v41, %v6112_v2  ;;  %v5480_v60 = vunpack.i.h.bf16 %v5478_v61 }
  0xb6   : > { %v1153_v44 = vshrl.u32 %v4514_v46, 16  ;;  %v1156_v32 = vshll.u32 %v4514_v46, 16  ;;  %v983_v29 = vshrl.u32 %v4494_v20, 16  ;;  %v986_v48 = vshll.u32 %v4494_v20, 16  ;;  %v5580_v41 = vld [vmem:[%s7569_s4 + $0x170] sm:$0xff]  }
  0xb7   : > { %v1163_v10 = vrot.slane %v1161_v45, 7  ;;  %v991_v27 = vshrl.u32 %v4495_v59, 16  ;;  %v994_v62 = vshll.u32 %v4495_v59, 16  ;;  %v4516_v39 = vpack.c.bf16 %v774_v63, %v774_v63  ;;  %v5581_v45 = vld [vmem:[%s7569_s4 + $0x130] sm:$0xff]   ;;  %5120 = vmatprep.subr.bf16.mxu0 %v5580_v41 }
  0xb8   : > { %v1155_v49 = vrot.slane %v1153_v44, 7  ;;  %v985_v30 = vrot.slane %v983_v29, 7  ;;  %v4517_v58 = vpack.c.bf16 %v775_v0, %v775_v0  ;;  %v1355_v29 = vld [vmem:[#allocation2 + $0xb4] sm:$0xf]  ;;  %5121 = vmatpush3.bf16.msra.mxu0 %v5581_v45 }
  0xb9   : > { %v1166_v16 = vor.u32 %v1164_v36, %v1163_v10  ;;  %v1168_v13 = vrot.slane %v1163_v10, 4  ;;  %v993_v2 = vrot.slane %v991_v27, 7  ;;  %v1170_v9 = vshrl.u32 %v4516_v39, 16 }
  0xba   : > { %v1158_v34 = vor.u32 %v1156_v32, %v1155_v49  ;;  %v1159_v35 = vrot.slane %v1155_v49, 4  ;;  %v988_v19 = vor.u32 %v986_v48, %v985_v30  ;;  %v989_v42 = vrot.slane %v985_v30, 4  ;;  %v5488_v32 = vpop.permute.xlu1 %5487 }
  0xbb   : > { %v1353_v4 = vsel %vm6224_vm0, %v1168_v13, %v1352_v57  ;;  %v996_v8 = vor.u32 %v994_v62, %v993_v2  ;;  %v998_v31 = vrot.slane %v993_v2, 4  ;;  %v1173_v20 = vshll.u32 %v4516_v39, 16  ;;  %v1359_v39 = vld [vmem:[#allocation2 + $0xbc] sm:$0x1] }
  0xbc   : > { %v1167_v18 = vsel %vm6208_vm14, %v1159_v35, %v1166_v16  ;;  %v1349_v51 = vsel %vm6216_vm15, %v1158_v34, %v1348_v17  ;;  %1354 = vst [vmem:[#allocation2 + $0xb0] sm:$0x1] %v1353_v4  ;;  %v1279_v46 = vsel %vm6216_vm15, %v988_v19, %v1278_v23  ;;  %v1172_v63 = vrot.slane %v1170_v9, 7 }
  0xbd   : > { %1350 = vst [vmem:[#allocation2 + $0xa8] sm:$0xf] %v1349_v51  ;;  %1351 = vst [vmem:[#allocation2 + $0xac] sm:$0xf] %v1167_v18  ;;  %v997_v36 = vsel %vm6208_vm14, %v989_v42, %v996_v8  ;;  %v1283_v59 = vsel %vm6224_vm0, %v998_v31, %v1282_v40  ;;  %v1178_v44 = vshrl.u32 %v4517_v58, 16  ;;  %v1181_v48 = vshll.u32 %v4517_v58, 16 }
  0xbe   : > { %1280 = vst [vmem:[#allocation2 + $0x30] sm:$0xf] %v1279_v46  ;;  %1281 = vst [vmem:[#allocation2 + $0x34] sm:$0xf] %v997_v36  ;;  %v5479_v10 = vunpack.i.l.bf16 %v5478_v61  ;;  %v757_v27 = vmul.f32 %v5480_v60, %v6129_v5  ;;  %v5475_v62 = vunpack.i.h.bf16 %v5473_v37  ;;  %v1175_v0 = vor.u32 %v1173_v20, %v1172_v63 }
  0xbf   : > { %1284 = vst [vmem:[#allocation2 + $0x38] sm:$0x1] %v1283_v59  ;;  %v1176_v57 = vrot.slane %v1172_v63, 4  ;;  %v1180_v49 = vrot.slane %v1178_v44, 7  ;;  %v5474_v30 = vunpack.i.l.bf16 %v5473_v37  ;;  %v5490_v23 = vunpack.i.h.bf16 %v5488_v32  ;;  %v1296_v37 = vld [vmem:[#allocation2 + $0x50] sm:$0x1] }
  0xc0   : > { %v756_v17 = vmul.f32 %v5479_v10, %v6126_v14  ;;  %v4499_v16 = vpack.c.bf16 %v757_v27, %v757_v27  ;;  %v755_v13 = vmul.f32 %v5475_v62, %v6135_v21  ;;  %v1356_v61 = vsel %vm6216_vm15, %v1175_v0, %v1355_v29  ;;  %v5585_v63 = vld [vmem:[%s7569_s4 + $0x178] sm:$0xff]   ;;  %v1292_v44 = vld [vmem:[#allocation2 + $0x48] sm:$0xf] }
  0xc1   : > { %v1183_v2 = vor.u32 %v1181_v48, %v1180_v49  ;;  %v1185_v34 = vrot.slane %v1180_v49, 4  ;;  %v754_v5 = vmul.f32 %v5474_v30, %v6132_v11  ;;  %1357 = vst [vmem:[#allocation2 + $0xb4] sm:$0xf] %v1356_v61  ;;  %v5489_v42 = vunpack.i.l.bf16 %v5488_v32  ;;  %v5483_v11 = vpop.permute.xlu0 %5482  ;;  %5122 = vmatprep.subr.bf16.mxu0 %v5585_v63 }
  0xc2   : > { %v4498_v60 = vpack.c.bf16 %v756_v17, %v756_v17  ;;  %v1025_v58 = vshrl.u32 %v4499_v16, 16  ;;  %v1028_v35 = vshll.u32 %v4499_v16, 16  ;;  %v4497_v40 = vpack.c.bf16 %v755_v13, %v755_v13 }
  0xc3   : > { %v1184_v19 = vsel %vm6208_vm14, %v1176_v57, %v1183_v2  ;;  %v1360_v14 = vsel %vm6224_vm0, %v1185_v34, %v1359_v39  ;;  %v4496_v21 = vpack.c.bf16 %v754_v5, %v754_v5  ;;  %v760_v46 = vmul.f32 %v5489_v42, %v6141_v43  ;;  %v1285_v43 = vld [vmem:[#allocation2 + $0x3c] sm:$0xf]  ;;  %v1289_v57 = vld [vmem:[#allocation2 + $0x44] sm:$0x1]  ;;  %v5498_v34 = vpop.permute.xlu1 %5497 }
  0xc4   : > { %1358 = vst [vmem:[#allocation2 + $0xb8] sm:$0xf] %v1184_v19  ;;  %1361 = vst [vmem:[#allocation2 + $0xbc] sm:$0x1] %v1360_v14  ;;  %v1017_v4 = vshrl.u32 %v4498_v60, 16  ;;  %v1020_v8 = vshll.u32 %v4498_v60, 16  ;;  %v761_v29 = vmul.f32 %v5490_v23, %v6144_v7  ;;  %v5485_v10 = vunpack.i.h.bf16 %v5483_v11 }
  0xc5   : > { %v1027_v31 = vrot.slane %v1025_v58, 7  ;;  %v1008_v9 = vshrl.u32 %v4497_v40, 16  ;;  %v1000_v41 = vshrl.u32 %v4496_v21, 16  ;;  %v1003_v18 = vshll.u32 %v4496_v21, 16  ;;  %v5493_v61 = vpop.permute.xlu0 %5492  ;;  %v5587_v5 = vld [vmem:[%s7569_s4 + $0x138] sm:$0xff]  }
  0xc6   : > { %v1011_v51 = vshll.u32 %v4497_v40, 16  ;;  %v1019_v20 = vrot.slane %v1017_v4, 7  ;;  %v4502_v48 = vpack.c.bf16 %v760_v46, %v760_v46  ;;  %v4503_v16 = vpack.c.bf16 %v761_v29, %v761_v29  ;;  %5123 = vmatpush3.bf16.msra.mxu0 %v5587_v5  ;;  %v1306_v4 = vld [vmem:[#allocation2 + $0x60] sm:$0xf] }
  0xc7   : > { %v1030_v45 = vor.u32 %v1028_v35, %v1027_v31  ;;  %v1032_v36 = vrot.slane %v1027_v31, 4  ;;  %v1010_v59 = vrot.slane %v1008_v9, 7  ;;  %v1002_v32 = vrot.slane %v1000_v41, 7  ;;  %v1310_v41 = vld [vmem:[#allocation2 + $0x68] sm:$0x1] }
  0xc8   : > { %v1022_v27 = vor.u32 %v1020_v8, %v1019_v20  ;;  %v1023_v62 = vrot.slane %v1019_v20, 4  ;;  %v1051_v23 = vshrl.u32 %v4502_v48, 16  ;;  %v1054_v2 = vshll.u32 %v4502_v48, 16 }
  0xc9   : > { %v1297_v0 = vsel %vm6224_vm0, %v1032_v36, %v1296_v37  ;;  %v1013_v49 = vor.u32 %v1011_v51, %v1010_v59  ;;  %v1005_v30 = vor.u32 %v1003_v18, %v1002_v32  ;;  %v1006_v39 = vrot.slane %v1002_v32, 4 }
  0xca   : > { %1298 = vst [vmem:[#allocation2 + $0x50] sm:$0x1] %v1297_v0  ;;  %v1015_v17 = vrot.slane %v1010_v59, 4  ;;  %v1031_v13 = vsel %vm6208_vm14, %v1023_v62, %v1030_v45  ;;  %v1293_v7 = vsel %vm6216_vm15, %v1022_v27, %v1292_v44  ;;  %v1059_v40 = vshrl.u32 %v4503_v16, 16  ;;  %v5508_v0 = vpop.permute.xlu1 %5507 }
  0xcb   : > { %1294 = vst [vmem:[#allocation2 + $0x48] sm:$0xf] %v1293_v7  ;;  %1295 = vst [vmem:[#allocation2 + $0x4c] sm:$0xf] %v1031_v13  ;;  %v1014_v60 = vsel %vm6208_vm14, %v1006_v39, %v1013_v49  ;;  %v1286_v58 = vsel %vm6216_vm15, %v1005_v30, %v1285_v43  ;;  %v1053_v19 = vrot.slane %v1051_v23, 7  ;;  %v1062_v14 = vshll.u32 %v4503_v16, 16 }
  0xcc   : > { %v1290_v35 = vsel %vm6224_vm0, %v1015_v17, %v1289_v57  ;;  %1287 = vst [vmem:[#allocation2 + $0x3c] sm:$0xf] %v1286_v58  ;;  %1288 = vst [vmem:[#allocation2 + $0x40] sm:$0xf] %v1014_v60  ;;  %v5484_v21 = vunpack.i.l.bf16 %v5483_v11  ;;  %v759_v42 = vmul.f32 %v5485_v10, %v6150_v3  ;;  %v1061_v8 = vrot.slane %v1059_v40, 7 }
  0xcd   : > { %1291 = vst [vmem:[#allocation2 + $0x44] sm:$0x1] %v1290_v35  ;;  %v5500_v31 = vunpack.i.h.bf16 %v5498_v34  ;;  %v5499_v9 = vunpack.i.l.bf16 %v5498_v34  ;;  %v5495_v37 = vunpack.i.h.bf16 %v5493_v61  ;;  %v1056_v18 = vor.u32 %v1054_v2, %v1053_v19  ;;  %v1303_v43 = vld [vmem:[#allocation2 + $0x5c] sm:$0x1]  ;;  %v1299_v23 = vld [vmem:[#allocation2 + $0x54] sm:$0xf] }
  0xce   : > { %v1057_v51 = vrot.slane %v1053_v19, 4  ;;  %v758_v46 = vmul.f32 %v5484_v21, %v6147_v6  ;;  %v4501_v20 = vpack.c.bf16 %v759_v42, %v759_v42  ;;  %v1064_v45 = vor.u32 %v1062_v14, %v1061_v8  ;;  %v1320_v19 = vld [vmem:[#allocation2 + $0x78] sm:$0xf]  ;;  %v1324_v14 = vld [vmem:[#allocation2 + $0x80] sm:$0x1] }
  0xcf   : > { %v1066_v36 = vrot.slane %v1061_v8, 4  ;;  %v764_v11 = vmul.f32 %v5499_v9, %v6170_v50  ;;  %v765_v3 = vmul.f32 %v5500_v31, %v6173_v52  ;;  %v1307_v59 = vsel %vm6216_vm15, %v1056_v18, %v1306_v4 }
  0xd0   : > { %v4500_v63 = vpack.c.bf16 %v758_v46, %v758_v46  ;;  %v1042_v44 = vshrl.u32 %v4501_v20, 16  ;;  %v1045_v32 = vshll.u32 %v4501_v20, 16  ;;  %v1065_v29 = vsel %vm6208_vm14, %v1057_v51, %v1064_v45  ;;  %1308 = vst [vmem:[#allocation2 + $0x60] sm:$0xf] %v1307_v59  ;;  %v1313_v59 = vld [vmem:[#allocation2 + $0x6c] sm:$0xf] }
  0xd1   : > { %v1311_v6 = vsel %vm6224_vm0, %v1066_v36, %v1310_v41  ;;  %v4506_v48 = vpack.c.bf16 %v764_v11, %v764_v11  ;;  %v4507_v10 = vpack.c.bf16 %v765_v3, %v765_v3  ;;  %1309 = vst [vmem:[#allocation2 + $0x64] sm:$0xf] %v1065_v29  ;;  %v5494_v62 = vunpack.i.l.bf16 %v5493_v61  ;;  %v5589_v61 = vld [vmem:[%s7569_s4 + $0x200] sm:$0xff]   ;;  %v5503_v41 = vpop.permute.xlu0 %5502 }
  0xd2   : > { %1312 = vst [vmem:[#allocation2 + $0x68] sm:$0x1] %v1311_v6  ;;  %v1034_v50 = vshrl.u32 %v4500_v63, 16  ;;  %v1037_v27 = vshll.u32 %v4500_v63, 16  ;;  %v1044_v52 = vrot.slane %v1042_v44, 7  ;;  %v763_v5 = vmul.f32 %v5495_v37, %v6179_v53  ;;  %5356 = vmatprep.subr.bf16.mxu0 %v5589_v61 }
  0xd3   : > { %v1085_v57 = vshrl.u32 %v4506_v48, 16  ;;  %v1088_v49 = vshll.u32 %v4506_v48, 16  ;;  %v1093_v30 = vshrl.u32 %v4507_v10, 16  ;;  %v1096_v39 = vshll.u32 %v4507_v10, 16 }
  0xd4   : > { %v1036_v17 = vrot.slane %v1034_v50, 7  ;;  %v1047_v16 = vor.u32 %v1045_v32, %v1044_v52  ;;  %v1049_v13 = vrot.slane %v1044_v52, 4  ;;  %v762_v7 = vmul.f32 %v5494_v62, %v6176_v47 }
  0xd5   : > { %v1087_v2 = vrot.slane %v1085_v57, 7  ;;  %v1095_v34 = vrot.slane %v1093_v30, 7  ;;  %v5510_v60 = vunpack.i.h.bf16 %v5508_v0  ;;  %v4505_v9 = vpack.c.bf16 %v763_v5, %v763_v5 }
  0xd6   : > { %v1039_v58 = vor.u32 %v1037_v27, %v1036_v17  ;;  %v1040_v35 = vrot.slane %v1036_v17, 4  ;;  %v1304_v40 = vsel %vm6224_vm0, %v1049_v13, %v1303_v43  ;;  %v4504_v21 = vpack.c.bf16 %v762_v7, %v762_v7  ;;  %v1317_v27 = vld [vmem:[#allocation2 + $0x74] sm:$0x1]  ;;  %v6363_v17 = vld [vmem:[#allocation2 + $0x90] sm:$0xf] }
  0xd7   : > { %1305 = vst [vmem:[#allocation2 + $0x5c] sm:$0x1] %v1304_v40  ;;  %v1090_v47 = vor.u32 %v1088_v49, %v1087_v2  ;;  %v1091_v42 = vrot.slane %v1087_v2, 4  ;;  %v1098_v4 = vor.u32 %v1096_v39, %v1095_v34  ;;  %v1100_v8 = vrot.slane %v1095_v34, 4  ;;  %v1362_v7 = vld [vmem:[#allocation2 + $0xc0] sm:$0xf] }
  0xd8   : > { %v1048_v53 = vsel %vm6208_vm14, %v1040_v35, %v1047_v16  ;;  %v1300_v31 = vsel %vm6216_vm15, %v1039_v58, %v1299_v23  ;;  %v1068_v37 = vshrl.u32 %v4504_v21, 16  ;;  %v511_v20 = vsel %vm447_vm1, %v5947_v15, %v6199_v28 }
  0xd9   : > { %1301 = vst [vmem:[#allocation2 + $0x54] sm:$0xf] %v1300_v31  ;;  %1302 = vst [vmem:[#allocation2 + $0x58] sm:$0xf] %v1048_v53  ;;  %v1099_v18 = vsel %vm6208_vm14, %v1091_v42, %v1098_v4  ;;  %v1321_v51 = vsel %vm6216_vm15, %v1090_v47, %v1320_v19  ;;  %v1325_v46 = vsel %vm6224_vm0, %v1100_v8, %v1324_v14  ;;  %v1071_v36 = vshll.u32 %v4504_v21, 16 }
  0xda   : > { %1322 = vst [vmem:[#allocation2 + $0x78] sm:$0xf] %v1321_v51  ;;  %1323 = vst [vmem:[#allocation2 + $0x7c] sm:$0xf] %v1099_v18  ;;  %v1070_v45 = vrot.slane %v1068_v37, 7  ;;  %v1076_v11 = vshrl.u32 %v4505_v9, 16  ;;  %v5509_v3 = vunpack.i.l.bf16 %v5508_v0  ;;  %v777_v44 = vmul.f32 %v5510_v60, %v6196_v54 }
  0xdb   : > { %1326 = vst [vmem:[#allocation2 + $0x80] sm:$0x1] %v1325_v46  ;;  %v1079_v63 = vshll.u32 %v4505_v9, 16  ;;  %v5505_v32 = vunpack.i.h.bf16 %v5503_v41  ;;  %v5504_v29 = vunpack.i.l.bf16 %v5503_v41  ;;  %v1366_v60 = vld [vmem:[#allocation2 + $0xc8] sm:$0x1]  ;;  %v1715_v35 = vshrl.u32 %v6363_v17, 16 }
  0xdc   : > { %v1073_v6 = vor.u32 %v1071_v36, %v1070_v45  ;;  %v1074_v48 = vrot.slane %v1070_v45, 4  ;;  %v1078_v10 = vrot.slane %v1076_v11, 7  ;;  %v776_v50 = vmul.f32 %v5509_v3, %v6191_v12  ;;  %v1327_v21 = vld [vmem:[#allocation2 + $0x84] sm:$0xf]  ;;  %v6371_v53 = vld [vmem:[#allocation2 + $0x94] sm:$0xf] }
  0xdd   : > { %v4519_v15 = vpack.c.bf16 %v777_v44, %v777_v44  ;;  %v766_v28 = vmul.f32 %v5504_v29, %v6204_v56  ;;  %v767_v52 = vmul.f32 %v5505_v32, %v511_v20  ;;  %v1718_v40 = vshll.u32 %v6363_v17, 16  ;;  %v1331_v41 = vld [vmem:[#allocation2 + $0x8c] sm:$0x1]  ;;  %v1407_v20 = vld [vmem:[#allocation2 + $0x98] sm:$0x1] }
  0xde   : > { %v1081_v62 = vor.u32 %v1079_v63, %v1078_v10  ;;  %v1083_v43 = vrot.slane %v1078_v10, 4  ;;  %v1314_v0 = vsel %vm6216_vm15, %v1073_v6, %v1313_v59  ;;  %v4518_v57 = vpack.c.bf16 %v776_v50, %v776_v50  ;;  %v6379_v59 = vld [vmem:[#allocation2 + $0x9c] sm:$0xf]  ;;  %v6387_v6 = vld [vmem:[#allocation2 + $0xa0] sm:$0xf] }
  0xdf   : > { %1315 = vst [vmem:[#allocation2 + $0x6c] sm:$0xf] %v1314_v0  ;;  %v1195_v54 = vshrl.u32 %v4519_v15, 16  ;;  %v1198_v49 = vshll.u32 %v4519_v15, 16  ;;  %v4508_v30 = vpack.c.bf16 %v766_v28, %v766_v28  ;;  %v4509_v39 = vpack.c.bf16 %v767_v52, %v767_v52  ;;  %v6393_v52 = vld [vmem:[#allocation2 + $0xc] sm:$0xf] }
  0xe0   : > { %v1082_v12 = vsel %vm6208_vm14, %v1074_v48, %v1081_v62  ;;  %v1318_v56 = vsel %vm6224_vm0, %v1083_v43, %v1317_v27  ;;  %v1187_v16 = vshrl.u32 %v4518_v57, 16  ;;  %v1190_v13 = vshll.u32 %v4518_v57, 16  ;;  %v1410_v48 = vld [vmem:[#allocation2 + $0xa4] sm:$0x1]  ;;  %v6622_v24 = vld [vmem:[#allocation2 + $0x54] sm:$0xf] }
  0xe1   : > { %1316 = vst [vmem:[#allocation2 + $0x70] sm:$0xf] %v1082_v12  ;;  %1319 = vst [vmem:[#allocation2 + $0x74] sm:$0x1] %v1318_v56  ;;  %v1197_v23 = vrot.slane %v1195_v54, 7  ;;  %v1102_v2 = vshrl.u32 %v4508_v30, 16 }
  0xe2   : > { %v1105_v34 = vshll.u32 %v4508_v30, 16  ;;  %v1110_v5 = vshrl.u32 %v4509_v39, 16  ;;  %v1189_v61 = vrot.slane %v1187_v16, 7  ;;  %v1113_v58 = vshll.u32 %v4509_v39, 16  ;;  %v6397_v54 = vld [vmem:[#allocation2 + $0x10] sm:$0xf] }
  0xe3   : > { %v1200_v19 = vor.u32 %v1198_v49, %v1197_v23  ;;  %v1202_v14 = vrot.slane %v1197_v23, 4  ;;  %v1104_v47 = vrot.slane %v1102_v2, 7  ;;  %v1717_v31 = vrot.slane %v1715_v35, 4  ;;  %v6401_v12 = vld [vmem:[#allocation2 + $0x14] sm:$0x1] }
  0xe4   : > { %v1112_v42 = vrot.slane %v1110_v5, 7  ;;  %v1192_v4 = vor.u32 %v1190_v13, %v1189_v61  ;;  %v1193_v8 = vrot.slane %v1189_v61, 4  ;;  %v1720_v9 = vrot.slane %v1718_v40, 5  ;;  %v6408_v40 = vld [vmem:[#allocation2 + $0x18] sm:$0xf] }
  0xe5   : > { %v1367_v37 = vsel %vm6224_vm0, %v1202_v14, %v1366_v60  ;;  %v1107_v18 = vor.u32 %v1105_v34, %v1104_v47  ;;  %v1108_v51 = vrot.slane %v1104_v47, 4  ;;  %v1724_v32 = vshll.u32 %v6371_v53, 16 }
  0xe6   : > { %v1115_v46 = vor.u32 %v1113_v58, %v1112_v42  ;;  %v1201_v45 = vsel %vm6208_vm14, %v1193_v8, %v1200_v19  ;;  %v1363_v36 = vsel %vm6216_vm15, %v1192_v4, %v1362_v7  ;;  %1368 = vst [vmem:[#allocation2 + $0xc8] sm:$0x1] %v1367_v37  ;;  %v1117_v11 = vrot.slane %v1112_v42, 4  ;;  %v6412_v42 = vld [vmem:[#allocation2 + $0x1c] sm:$0xf] }
  0xe7   : > { %v1721_v3 = vor.u32 %v1720_v9, %v1717_v31  ;;  %1364 = vst [vmem:[#allocation2 + $0xc0] sm:$0xf] %v1363_v36  ;;  %1365 = vst [vmem:[#allocation2 + $0xc4] sm:$0xf] %v1201_v45  ;;  %v1328_v44 = vsel %vm6216_vm15, %v1107_v18, %v1327_v21  ;;  %v1728_v29 = vshrl.u32 %v6371_v53, 16  ;;  %v1734_v27 = vshll.u32 %v1407_v20, 16 }
  0xe8   : > { %v1116_v63 = vsel %vm6208_vm14, %v1108_v51, %v1115_v46  ;;  %1329 = vst [vmem:[#allocation2 + $0x84] sm:$0xf] %v1328_v44  ;;  %v1332_v10 = vsel %vm6224_vm0, %v1117_v11, %v1331_v41  ;;  %v1726_v1 = vrot.slane %v1724_v32, 5  ;;  %v1739_v26 = vshrl.u32 %v6379_v59, 16  ;;  %v5536_v31 = vld [vmem:[%s7569_s4 + $0x80] sm:$0xff]   ;;  %v5538_v46 = vld [vmem:[%s7569_s4 + $0xc8] sm:$0xff]  }
  0xe9   : > { %1330 = vst [vmem:[#allocation2 + $0x88] sm:$0xf] %v1116_v63  ;;  %v1722_v50 = vrot.slane %v1721_v3, 4  ;;  %1333 = vst [vmem:[#allocation2 + $0x8c] sm:$0x1] %v1332_v10  ;;  %v1730_v15 = vrot.slane %v1728_v29, 4  ;;  %v6418_v8 = vcombine.low %v6363_v17, %v6371_v53 }
  0xea   : > { %v1742_v28 = vshll.u32 %v6379_v59, 16  ;;  %v1736_v62 = vrot.slane %v1734_v27, 5  ;;  %v1748_v43 = vshll.u32 %v6387_v6, 16  ;;  %v1752_v0 = vshrl.u32 %v6387_v6, 16  ;;  %v6434_v11 = vld [vmem:[#allocation2 + $0xa8] sm:$0xf] }
  0xeb   : > { %v1758_v57 = vshll.u32 %v1410_v48, 16  ;;  %v1727_v22 = vsel %vm5949_vm2, %v1722_v50, %v1726_v1  ;;  %v1731_v49 = vor.u32 %v1730_v15, %v1726_v1  ;;  %v1741_v30 = vrot.slane %v1739_v26, 4  ;;  %v5540_v44 = vld [vmem:[%s7569_s4 + $0x88] sm:$0xff]   ;;  %v6442_v32 = vld [vmem:[#allocation2 + $0x20] sm:$0x1] }
  0xec   : > { %v1744_v39 = vrot.slane %v1742_v28, 5  ;;  %v1750_v56 = vrot.slane %v1748_v43, 5  ;;  %v1754_v16 = vrot.slane %v1752_v0, 4  ;;  %v1451_v7 = vshrl.u32 %v6393_v52, 16  ;;  %v6446_v15 = vld [vmem:[#allocation2 + $0xac] sm:$0xf] }
  0xed   : > { %v1760_v13 = vrot.slane %v1758_v57, 5  ;;  %v1732_v23 = vrot.slane %v1731_v49, 4  ;;  %v1454_v34 = vshll.u32 %v6393_v52, 16  ;;  %v1460_v5 = vshll.u32 %v6397_v54, 16  ;;  %v5541_v43 = vld [vmem:[%s7569_s4 + $0xd0] sm:$0xff]  }
  0xee   : > { %v1745_v2 = vor.u32 %v1744_v39, %v1741_v30  ;;  %v1755_v60 = vor.u32 %v1754_v16, %v1750_v56  ;;  %v1453_v61 = vrot.slane %v1451_v7, 4  ;;  %v1464_v58 = vshrl.u32 %v6397_v54, 16  ;;  %v6461_v30 = vld [vmem:[#allocation2 + $0xb0] sm:$0x1] }
  0xef   : > { %v1470_v35 = vshll.u32 %v6401_v12, 16  ;;  %v1737_v19 = vsel %vm5949_vm2, %v1732_v23, %v1736_v62  ;;  %v1456_v21 = vrot.slane %v1454_v34, 5  ;;  %v1462_v47 = vrot.slane %v1460_v5, 5  ;;  %7605 = vst [vmem:[#allocation5_spill] sm:$0xff] %v6461_v30  ;;  %v5543_v5 = vld [vmem:[%s7569_s4 + $0x90] sm:$0xff]  }
  0xf0   : > { %v1746_v14 = vrot.slane %v1745_v2, 4  ;;  %v6414_v4 = vcombine.low %v1727_v22, %v1737_v19  ;;  %v1756_v9 = vrot.slane %v1755_v60, 4  ;;  %v1466_v37 = vrot.slane %v1464_v58, 4  ;;  %v6477_v58 = vld [vmem:[#allocation2 + $0x28] sm:$0xf] }
  0xf1   : > { %v1457_v18 = vor.u32 %v1456_v21, %v1453_v61  ;;  %v1472_v51 = vrot.slane %v1470_v35, 5  ;;  %v1475_v20 = vshrl.u32 %v6408_v40, 16  ;;  %v1478_v45 = vshll.u32 %v6408_v40, 16 }
  0xf2   : > { %7603 = vst [vmem:[#allocation3_spill] sm:$0xff] %v6414_v4  ;;  %v1751_v41 = vsel %vm5949_vm2, %v1746_v14, %v1750_v56  ;;  %2961 = vmatprep.mubr.bf16.mxu1 %v6414_v4  ;;  %v1761_v17 = vsel %vm5949_vm2, %v1756_v9, %v1760_v13  ;;  %v1467_v53 = vor.u32 %v1466_v37, %v1462_v47  ;;  %v1484_v36 = vshll.u32 %v6412_v42, 16  ;;  %v6464_v56 = vld [vmem:[#allocation2 + $0x24] sm:$0xf]  ;;  %v6492_v37 = vld [vmem:[#allocation2 + $0x2c] sm:$0x1] }
  0xf3   : > { %2962 = vmatmul.mubr.bf16.vlgmr.msra.gmra.mrb[0].mxu1 %v6418_v8  ;;  %v6437_v3 = vcombine.low %v1751_v41, %v1761_v17  ;;  %v1458_v63 = vrot.slane %v1457_v18, 4  ;;  %v1477_v29 = vrot.slane %v1475_v20, 4  ;;  %v1488_v48 = vshrl.u32 %v6412_v42, 16  ;;  %v6499_v20 = vld [vmem:[#allocation2 + $0xb4] sm:$0xf] }
  0xf4   : > { %4997 = vmatpush3.bf16.msra.mxu1 %v5536_v31  ;;  %v1468_v10 = vrot.slane %v1467_v53, 4  ;;  %v1480_v50 = vrot.slane %v1478_v45, 5  ;;  %v1486_v27 = vrot.slane %v1484_v36, 5  ;;  %v1494_v1 = vshll.u32 %v6442_v32, 16  ;;  %7607 = vst [vmem:[#allocation7_spill] sm:$0xff] %v6499_v20  ;;  %v5547_v36 = vld [vmem:[%s7569_s4 + $0x98] sm:$0xff]  }
  0xf5   : > { %7604 = vst [vmem:[#allocation4_spill] sm:$0xff] %v6437_v3  ;;  %2969 = vmatprep.mubr.bf16.mxu1 %v6437_v3  ;;  %v1463_v26 = vsel %vm5949_vm2, %v1458_v63, %v1462_v47  ;;  %4998 = vmatprep.subr.bf16.mxu1 %v5538_v46  ;;  %v6453_v28 = vcombine.low %v6393_v52, %v6397_v54  ;;  %v1490_v62 = vrot.slane %v1488_v48, 4  ;;  %v1763_v0 = vshrl.u32 %v6434_v11, 16 }
  0xf6   : > { %v1473_v57 = vsel %vm5949_vm2, %v1468_v10, %v1472_v51  ;;  %v1481_v22 = vor.u32 %v1480_v50, %v1477_v29  ;;  %v1496_v49 = vrot.slane %v1494_v1, 5  ;;  %v1766_v39 = vshll.u32 %v6434_v11, 16 }
  0xf7   : > { %v6466_v16 = vcombine.low %v1463_v26, %v1473_v57  ;;  %v1491_v13 = vor.u32 %v1490_v62, %v1486_v27  ;;  %v1765_v7 = vrot.slane %v1763_v0, 4  ;;  %v1772_v23 = vshll.u32 %v6446_v15, 16 }
  0xf8   : > { %4999 = vmatpush3.bf16.msra.mxu1 %v5540_v44  ;;  %v1482_v2 = vrot.slane %v1481_v22, 4  ;;  %v6471_v34 = vcombine.low %v6379_v59, %v6387_v6  ;;  %v1768_v60 = vrot.slane %v1766_v39, 5  ;;  %v1776_v61 = vshrl.u32 %v6446_v15, 16  ;;  %v5544_v59 = vld [vmem:[%s7569_s4 + $0xd8] sm:$0xff]  }
  0xf9   : > { %2873 = vmatprep.mubr.bf16.mxu0 %v6466_v16  ;;  %v1492_v35 = vrot.slane %v1491_v13, 4  ;;  %5000 = vmatprep.subr.bf16.mxu1 %v5541_v43  ;;  %v1774_v19 = vrot.slane %v1772_v23, 5  ;;  %v1782_v14 = vshll.u32 %v6461_v30, 16  ;;  %v1499_v6 = vshrl.u32 %v6464_v56, 16  ;;  %v6507_v44 = vld [vmem:[#allocation2 + $0xb8] sm:$0xf] }
  0xfa   : > { %2874 = vmatmul.mubr.bf16.gmra.mrb[4].mxu0 %v6453_v28  ;;  %v1487_v21 = vsel %vm5949_vm2, %v1482_v2, %v1486_v27  ;;  %v1769_v47 = vor.u32 %v1768_v60, %v1765_v7  ;;  %v1778_v31 = vrot.slane %v1776_v61, 4  ;;  %v6490_v9 = vcombine.low %v6408_v40, %v6412_v42  ;;  %7608 = vst [vmem:[#allocation8_spill] sm:$0xff] %v6507_v44  ;;  %v5549_v27 = vld [vmem:[%s7569_s4 + $0xe0] sm:$0xff]   ;;  %v6521_v22 = vld [vmem:[#allocation2 + $0xbc] sm:$0x1] }
  0xfb   : > { %v1497_v41 = vsel %vm5949_vm2, %v1492_v35, %v1496_v49  ;;  %2970 = vmatmul.mubr.bf16.gmra.mrb[4].mxu1 %v6471_v34  ;;  %v1501_v18 = vrot.slane %v1499_v6, 4  ;;  %v1502_v51 = vshll.u32 %v6464_v56, 16  ;;  %v1508_v46 = vshll.u32 %v6477_v58, 16  ;;  %7609 = vst [vmem:[#allocation9_spill] sm:$0xff] %v6521_v22  ;;  %v5551_v35 = vld [vmem:[%s7569_s4 + $0xa0] sm:$0xff]  }
  0xfc   : > { %7606 = vst [vmem:[#allocation6_spill] sm:$0xff] %v6490_v9  ;;  %v6501_v17 = vcombine.low %v1487_v21, %v1497_v41  ;;  %5001 = vmatpush3.bf16.msra.mxu1 %v5543_v5  ;;  %v1770_v53 = vrot.slane %v1769_v47, 4  ;;  %v1779_v45 = vor.u32 %v1778_v31, %v1774_v19  ;;  %v1512_v63 = vshrl.u32 %v6477_v58, 16  ;;  %v6528_v5 = vld [vmem:[#allocation2 + $0x30] sm:$0xf]  ;;  %v5552_v41 = vld [vmem:[%s7569_s4 + $0xe8] sm:$0xff]  }
  0xfd   : > { %v1784_v29 = vrot.slane %v1782_v14, 5  ;;  %5002 = vmatprep.subr.bf16.mxu1 %v5544_v59  ;;  %v1504_v48 = vrot.slane %v1502_v51, 5  ;;  %v1510_v10 = vrot.slane %v1508_v46, 5  ;;  %v1518_v50 = vshll.u32 %v6492_v37, 16  ;;  %v6535_v59 = vld [vmem:[#allocation2 + $0x34] sm:$0xf] }
  0xfe   : > { %2881 = vmatprep.mubr.bf16.mxu0 %v6501_v17  ;;  %v1775_v1 = vsel %vm5949_vm2, %v1770_v53, %v1774_v19  ;;  %v1780_v26 = vrot.slane %v1779_v45, 4  ;;  %v1514_v62 = vrot.slane %v1512_v63, 4  ;;  %v1787_v43 = vshrl.u32 %v6499_v20, 16  ;;  %v5554_v63 = vld [vmem:[%s7569_s4 + $0xa8] sm:$0xff]  }
  0xff   : > { %v1505_v0 = vor.u32 %v1504_v48, %v1501_v18  ;;  %v6519_v57 = vcombine.low %v6434_v11, %v6446_v15  ;;  %v1790_v49 = vshll.u32 %v6499_v20, 16  ;;  %v1796_v39 = vshll.u32 %v6507_v44, 16 }
 0x100   : > { %v1785_v13 = vsel %vm5949_vm2, %v1780_v26, %v1784_v29  ;;  %5003 = vmatpush3.bf16.msra.mxu1 %v5547_v36  ;;  %v1515_v7 = vor.u32 %v1514_v62, %v1510_v10  ;;  %v1789_v23 = vrot.slane %v1787_v43, 4  ;;  %v1800_v2 = vshrl.u32 %v6507_v44, 16  ;;  %v6553_v29 = vld [vmem:[#allocation2 + $0x38] sm:$0x1]  ;;  %v5555_v26 = vld [vmem:[%s7569_s4 + $0xf0] sm:$0xff]  }
 0x101   : > { %v6530_v60 = vcombine.low %v1775_v1, %v1785_v13  ;;  %v1506_v61 = vrot.slane %v1505_v0, 4  ;;  %5004 = vmatprep.subr.bf16.mxu1 %v5549_v27  ;;  %v1792_v19 = vrot.slane %v1790_v49, 5  ;;  %v1798_v14 = vrot.slane %v1796_v39, 5  ;;  %v6561_v62 = vld [vmem:[#allocation2 + $0x3c] sm:$0xf] }
 0x102   : > { %2882 = vmatmul.mubr.bf16.gmra.mrb[8].mxu0 %v6490_v9  ;;  %v1516_v6 = vrot.slane %v1515_v7, 4  ;;  %v1520_v21 = vrot.slane %v1518_v50, 5  ;;  %v1802_v47 = vrot.slane %v1800_v2, 4  ;;  %v1806_v31 = vshll.u32 %v6521_v22, 16  ;;  %v6564_v13 = vld [vmem:[#allocation2 + $0x40] sm:$0xf] }
 0x103   : > { %7610 = vst [vmem:[#allocation10_spill] sm:$0xff] %v6530_v60  ;;  %2977 = vmatprep.mubr.bf16.mxu1 %v6530_v60  ;;  %v1511_v18 = vsel %vm5949_vm2, %v1506_v61, %v1510_v10  ;;  %v1793_v51 = vor.u32 %v1792_v19, %v1789_v23  ;;  %v1523_v46 = vshrl.u32 %v6528_v5, 16  ;;  %v1526_v53 = vshll.u32 %v6528_v5, 16 }
 0x104   : > { %v1521_v45 = vsel %vm5949_vm2, %v1516_v6, %v1520_v21  ;;  %2978 = vmatmul.mubr.bf16.gmra.mrb[8].mxu1 %v6519_v57  ;;  %v1803_v36 = vor.u32 %v1802_v47, %v1798_v14  ;;  %v1532_v48 = vshll.u32 %v6535_v59, 16  ;;  %v1808_v0 = vrot.slane %v1806_v31, 5  ;;  %v6576_v6 = vld [vmem:[#allocation2 + $0x44] sm:$0x1] }
 0x105   : > { %v6556_v10 = vcombine.low %v1511_v18, %v1521_v45  ;;  %5005 = vmatpush3.bf16.msra.mxu1 %v5551_v35  ;;  %v1794_v50 = vrot.slane %v1793_v51, 4  ;;  %v1525_v27 = vrot.slane %v1523_v46, 4  ;;  %v1528_v1 = vrot.slane %v1526_v53, 5  ;;  %v6586_v51 = vld [vmem:[#allocation2 + $0x48] sm:$0xf]  ;;  %v5560_v45 = vld [vmem:[%s7569_s4 + $0xf8] sm:$0xff]  }
 0x106   : > { %v1804_v43 = vrot.slane %v1803_v36, 4  ;;  %5006 = vmatprep.subr.bf16.mxu1 %v5552_v41  ;;  %v1534_v49 = vrot.slane %v1532_v48, 5  ;;  %v1536_v39 = vshrl.u32 %v6535_v59, 16  ;;  %v1542_v2 = vshll.u32 %v6553_v29, 16  ;;  %v6597_v48 = vld [vmem:[#allocation2 + $0x4c] sm:$0xf] }
 0x107   : > { %2889 = vmatprep.mubr.bf16.mxu0 %v6556_v10  ;;  %v1799_v7 = vsel %vm5949_vm2, %v1794_v50, %v1798_v14  ;;  %v1529_v23 = vor.u32 %v1528_v1, %v1525_v27  ;;  %v6574_v35 = vcombine.low %v6464_v56, %v6477_v58  ;;  %v1547_v21 = vshrl.u32 %v6561_v62, 16  ;;  %v5558_v14 = vld [vmem:[%s7569_s4 + $0xb0] sm:$0xff]  }
 0x108   : > { %v1809_v61 = vsel %vm5949_vm2, %v1804_v43, %v1808_v0  ;;  %v1538_v19 = vrot.slane %v1536_v39, 4  ;;  %v1550_v41 = vshll.u32 %v6561_v62, 16  ;;  %v1556_v18 = vshll.u32 %v6564_v13, 16  ;;  %v6601_v43 = vld [vmem:[#allocation2 + $0x50] sm:$0x1] }
 0x109   : > { %7611 = vst [vmem:[#allocation11_spill] sm:$0xff] %v6574_v35  ;;  %v6579_v47 = vcombine.low %v1799_v7, %v1809_v61  ;;  %5007 = vmatpush3.bf16.msra.mxu1 %v5554_v63  ;;  %v1530_v31 = vrot.slane %v1529_v23, 4  ;;  %v6591_v53 = vcombine.low %v6499_v20, %v6507_v44  ;;  %v1549_v36 = vrot.slane %v1547_v21, 4 }
 0x10a   : > { %2890 = vmatmul.mubr.bf16.gmra.mrb[12].mxu0 %v6574_v35  ;;  %v1539_v46 = vor.u32 %v1538_v19, %v1534_v49  ;;  %5008 = vmatprep.subr.bf16.mxu1 %v5555_v26  ;;  %v1560_v63 = vshrl.u32 %v6564_v13, 16  ;;  %v1544_v50 = vrot.slane %v1542_v2, 5  ;;  %v1552_v27 = vrot.slane %v1550_v41, 5  ;;  %v5562_v2 = vld [vmem:[%s7569_s4 + $0xb8] sm:$0xff]  }
 0x10b   : > { %7612 = vst [vmem:[#allocation12_spill] sm:$0xff] %v6579_v47  ;;  %2985 = vmatprep.mubr.bf16.mxu1 %v6579_v47  ;;  %v1558_v1 = vrot.slane %v1556_v18, 5  ;;  %v1566_v26 = vshll.u32 %v6576_v6, 16  ;;  %v1535_v0 = vsel %vm5949_vm2, %v1530_v31, %v1534_v49  ;;  %v1571_v23 = vshrl.u32 %v6586_v51, 16 }
 0x10c   : > { %v1540_v39 = vrot.slane %v1539_v46, 4  ;;  %2986 = vmatmul.mubr.bf16.gmra.mrb[12].mxu1 %v6591_v53  ;;  %v1562_v7 = vrot.slane %v1560_v63, 4  ;;  %v1553_v61 = vor.u32 %v1552_v27, %v1549_v36  ;;  %v1574_v19 = vshll.u32 %v6586_v51, 16 }
 0x10d   : > { %5009 = vmatpush3.bf16.msra.mxu1 %v5558_v14  ;;  %3026 = vmatprep.mubr.bf16.mxu1 %v6453_v28  ;;  %v1580_v21 = vshll.u32 %v6597_v48, 16  ;;  %v1584_v49 = vshrl.u32 %v6597_v48, 16  ;;  %v5563_v28 = vld [vmem:[%s7569_s4 + $0x1c0] sm:$0xff]   ;;  %v1573_v14 = vrot.slane %v1571_v23, 4  ;;  %v1590_v18 = vshll.u32 %v6601_v43, 16 }
 0x10e   : > { %v1545_v31 = vsel %vm5949_vm2, %v1540_v39, %v1544_v50  ;;  %5010 = vmatprep.subr.bf16.mxu1 %v5560_v45  ;;  %v1563_v41 = vor.u32 %v1562_v7, %v1558_v1  ;;  %v1554_v36 = vrot.slane %v1553_v61, 4  ;;  %v1576_v63 = vrot.slane %v1574_v19, 5 }
 0x10f   : > { %v6620_v46 = vcombine.low %v1535_v0, %v1545_v31  ;;  %v1582_v27 = vrot.slane %v1580_v21, 5  ;;  %v6626_v47 = vcombine.low %v6528_v5, %v6535_v59  ;;  %v1568_v50 = vrot.slane %v1566_v26, 5  ;;  %v5564_v0 = vld [vmem:[%s7569_s4 + $0x180] sm:$0xff]   ;;  %v6635_v21 = vld [vmem:[#allocation2 + $0x58] sm:$0xf] }
 0x110   : > { %v1564_v45 = vrot.slane %v1563_v41, 4  ;;  %v1586_v39 = vrot.slane %v1584_v49, 4  ;;  %v1559_v7 = vsel %vm5949_vm2, %v1554_v36, %v1558_v1  ;;  %v1577_v23 = vor.u32 %v1576_v63, %v1573_v14  ;;  %v6641_v1 = vld [vmem:[#allocation2 + $0x5c] sm:$0x1]  ;;  %v5570_v41 = vld [vmem:[%s7569_s4 + $0x1c8] sm:$0xff]  }
 0x111   : > { %7613 = vst [vmem:[#allocation13_spill] sm:$0xff] %v6626_v47  ;;  %2897 = vmatprep.mubr.bf16.mxu0 %v6620_v46  ;;  %5011 = vmatpush3.bf16.msra.mxu1 %v5562_v2  ;;  %v1592_v61 = vrot.slane %v1590_v18, 5  ;;  %v1870_v19 = vrot.slane %v6397_v54, 5  ;;  %v4308_v49 = vrot.slane %v6393_v52, 9  ;;  %v1595_v31 = vshrl.u32 %v6622_v24, 16 }
 0x112   : > { %2898 = vmatmul.mubr.bf16.gmra.mrb[16].mxu0 %v6626_v47  ;;  %v1569_v26 = vsel %vm5949_vm2, %v1564_v45, %v1568_v50  ;;  %5220 = vmatprep.subr.bf16.mxu1 %v5563_v28  ;;  %v1587_v2 = vor.u32 %v1586_v39, %v1582_v27  ;;  %v1578_v14 = vrot.slane %v1577_v23, 4  ;;  %v1873_v36 = vrot.slane %v6401_v12, 5  ;;  %v5577_v23 = vld [vmem:[%s7569_s4 + $0x1d0] sm:$0xff]  }
 0x113   : > { %v6647_v54 = vcombine.low %v1559_v7, %v1569_v26  ;;  %v1872_v18 = vrot.slane %v1870_v19, 4  ;;  %v7614_v28 = vcombine.low %v6156_v38, %v6000_v33  ;;  %v1597_v52 = vrot.slane %v1595_v31, 4  ;;  %v5572_v38 = vld [vmem:[%s7569_s4 + $0x188] sm:$0xff]   ;;  %v6673_v31 = vld [vmem:[#allocation2 + $0x60] sm:$0xf] }
 0x114   : > { %v1588_v63 = vrot.slane %v1587_v2, 4  ;;  %v1598_v45 = vshll.u32 %v6622_v24, 16  ;;  %v1604_v50 = vshll.u32 %v6635_v21, 16  ;;  %v1583_v39 = vsel %vm5949_vm2, %v1578_v14, %v1582_v27  ;;  %v6675_v14 = vld [vmem:[#allocation2 + $0x64] sm:$0xf] }
 0x115   : > { %3027 = vmatmul.mubr.bf16.vlgmr.msra.gmra.mrb[16].mxu1 %v7614_v28  ;;  %2905 = vmatprep.mubr.bf16.mxu0 %v6647_v54  ;;  %v1874_v7 = vsel %vm5984_vm5, %v1872_v18, %v1873_v36  ;;  %v1608_v12 = vshrl.u32 %v6635_v21, 16  ;;  %v1614_v33 = vshll.u32 %v6641_v1, 16  ;;  %v6679_v18 = vcombine.low %v6561_v62, %v6564_v13 }
 0x116   : > { %5221 = vmatpush3.bf16.msra.mxu1 %v5564_v0  ;;  %3034 = vmatprep.mubr.bf16.mxu1 %v6490_v9  ;;  %v1593_v27 = vsel %vm5949_vm2, %v1588_v63, %v1592_v61  ;;  %v1871_v0 = vsel %vm5984_vm5, %v4308_v49, %v1870_v19  ;;  %v1600_v26 = vrot.slane %v1598_v45, 5  ;;  %v1606_v2 = vrot.slane %v1604_v50, 5 }
 0x117   : > { %5222 = vmatprep.subr.bf16.mxu1 %v5570_v41  ;;  %7615 = vst [vmem:[#allocation14_spill] sm:$0xff] %v6679_v18  ;;  %v6681_v36 = vcombine.low %v1583_v39, %v1593_v27  ;;  %v6683_v28 = vcombine.low %v1871_v0, %v1874_v7  ;;  %v1610_v60 = vrot.slane %v1608_v12, 4  ;;  %v1616_v63 = vrot.slane %v1614_v33, 5  ;;  %v5578_v39 = vld [vmem:[%s7569_s4 + $0x190] sm:$0xff]   ;;  %v6703_v0 = vld [vmem:[#allocation2 + $0x68] sm:$0x1] }
 0x118   : > { %v1601_v61 = vor.u32 %v1600_v26, %v1597_v52  ;;  %v4309_v19 = vrot.slane %v6408_v40, 9  ;;  %v1877_v49 = vrot.slane %v6412_v42, 5  ;;  %v1619_v45 = vshrl.u32 %v6673_v31, 16 }
 0x119   : > { %v1611_v41 = vor.u32 %v1610_v60, %v1606_v2  ;;  %v1622_v50 = vshll.u32 %v6673_v31, 16  ;;  %v1628_v3 = vshll.u32 %v6675_v14, 16  ;;  %v1880_v40 = vrot.slane %v6442_v32, 5  ;;  %v5583_v60 = vld [vmem:[%s7569_s4 + $0x1d8] sm:$0xff]   ;;  %v6705_v32 = vld [vmem:[#allocation2 + $0x6c] sm:$0xf] }
 0x11a   : > { %5223 = vmatpush3.bf16.msra.mxu1 %v5572_v38  ;;  %2906 = vmatmul.mubr.bf16.gmra.mrb[20].mxu0 %v6679_v18  ;;  %v1602_v52 = vrot.slane %v1601_v61, 4  ;;  %v1879_v7 = vrot.slane %v1877_v49, 4  ;;  %v1632_v42 = vshrl.u32 %v6675_v14, 16  ;;  %v1621_v33 = vrot.slane %v1619_v45, 4 }
 0x11b   : > { %5224 = vmatprep.subr.bf16.mxu1 %v5577_v23  ;;  %2913 = vmatprep.mubr.bf16.mxu0 %v6681_v36  ;;  %v1612_v12 = vrot.slane %v1611_v41, 4  ;;  %v1624_v38 = vrot.slane %v1622_v50, 5  ;;  %v6700_v27 = vrot.slane %v1628_v3, 5  ;;  %v5584_v3 = vld [vmem:[%s7569_s4 + $0x198] sm:$0xff]   ;;  %v1878_v45 = vsel %vm5984_vm5, %v4309_v19, %v1877_v49 }
 0x11c   : > { %v1634_v26 = vrot.slane %v1632_v42, 4  ;;  %v1607_v23 = vsel %vm5949_vm2, %v1602_v52, %v1606_v2  ;;  %v6718_v42 = vld [vmem:[#allocation2 + $0x70] sm:$0xf]  ;;  %v5588_v2 = vld [vmem:[%s7569_s4 + $0x1e0] sm:$0xff]   ;;  %v1884_v52 = vrot.slane %v6477_v58, 5  ;;  %v6730_v19 = vcombine.low %v6586_v51, %v6597_v48 }
 0x11d   : > { %3035 = vmatmul.mubr.bf16.gmra.mrb[20].mxu1 %v6683_v28  ;;  %v1617_v61 = vsel %vm5949_vm2, %v1612_v12, %v1616_v63  ;;  %v1625_v41 = vor.u32 %v1624_v38, %v1621_v33  ;;  %v1881_v63 = vsel %vm5984_vm5, %v1879_v7, %v1880_v40  ;;  %v1643_v12 = vshrl.u32 %v6705_v32, 16  ;;  %v5590_v58 = vld [vmem:[%s7569_s4 + $0x1a0] sm:$0xff]  }
 0x11e   : > { %3042 = vmatprep.mubr.bf16.mxu1 %v6574_v35  ;;  %5225 = vmatpush3.bf16.msra.mxu1 %v5578_v39  ;;  %v1635_v50 = vor.u32 %v1634_v26, %v6700_v27  ;;  %v1638_v39 = vshll.u32 %v6703_v0, 16  ;;  %v6732_v49 = vcombine.low %v1607_v23, %v1617_v61  ;;  %v1646_v33 = vshll.u32 %v6705_v32, 16 }
 0x11f   : > { %5226 = vmatprep.subr.bf16.mxu1 %v5583_v60  ;;  %v1626_v60 = vrot.slane %v1625_v41, 4  ;;  %v1645_v26 = vrot.slane %v1643_v12, 4  ;;  %v1652_v4 = vshll.u32 %v6718_v42, 16  ;;  %v1656_v7 = vshrl.u32 %v6718_v42, 16  ;;  %v6744_v41 = vld [vmem:[#allocation2 + $0x78] sm:$0xf] }
 0x120   : > { %7616 = vst [vmem:[#allocation15_spill] sm:$0xff] %v6732_v49  ;;  %v1636_v38 = vrot.slane %v1635_v50, 4  ;;  %v6741_v40 = vcombine.low %v1878_v45, %v1881_v63  ;;  %v4310_v23 = vrot.slane %v6464_v56, 9  ;;  %v1648_v61 = vrot.slane %v1646_v33, 5  ;;  %v5591_v50 = vld [vmem:[%s7569_s4 + $0x1e8] sm:$0xff]  }
 0x121   : > { %v1886_v12 = vrot.slane %v1884_v52, 4  ;;  %v6750_v35 = vrot.slane %v1652_v4, 5  ;;  %v1658_v9 = vrot.slane %v1656_v7, 4  ;;  %v1887_v45 = vrot.slane %v6492_v37, 5  ;;  %v6754_v56 = vld [vmem:[#allocation2 + $0x74] sm:$0x1] }
 0x122   : > { %5227 = vmatpush3.bf16.msra.mxu1 %v5584_v3  ;;  %2914 = vmatmul.mubr.bf16.gmra.mrb[24].mxu0 %v6730_v19  ;;  %v1640_v3 = vrot.slane %v1638_v39, 5  ;;  %v1649_v63 = vor.u32 %v1648_v61, %v1645_v26  ;;  %v6757_v33 = vld [vmem:[#allocation2 + $0x7c] sm:$0xf]  ;;  %v1631_v39 = vsel %vm5949_vm2, %v1626_v60, %v6700_v27  ;;  %v1667_v37 = vshrl.u32 %v6744_v41, 16 }
 0x123   : > { %5228 = vmatprep.subr.bf16.mxu1 %v5588_v2  ;;  %2921 = vmatprep.mubr.bf16.mxu0 %v6732_v49  ;;  %v1891_v2 = vrot.slane %v6535_v59, 5  ;;  %v1659_v7 = vor.u32 %v1658_v9, %v6750_v35  ;;  %v5593_v59 = vld [vmem:[%s7569_s4 + $0x1a8] sm:$0xff]   ;;  %v6772_v26 = vcombine.low %v6622_v24, %v6635_v21  ;;  %v1885_v61 = vsel %vm5984_vm5, %v4310_v23, %v1884_v52  ;;  %v5594_v9 = vld [vmem:[%s7569_s4 + $0x1f0] sm:$0xff]  }
 0x124   : > { %v1641_v4 = vsel %vm5949_vm2, %v1636_v38, %v1640_v3  ;;  %v1670_v27 = vshll.u32 %v6744_v41, 16  ;;  %v1888_v60 = vsel %vm5984_vm5, %v1886_v12, %v1887_v45  ;;  %v1662_v38 = vshll.u32 %v6754_v56, 16  ;;  %v5596_v12 = vld [vmem:[%s7569_s4 + $0x1b0] sm:$0xff]  }
 0x125   : > { %3043 = vmatmul.mubr.bf16.gmra.mrb[24].mxu1 %v6741_v40  ;;  %v1680_v3 = vshrl.u32 %v6757_v33, 16  ;;  %v1650_v22 = vrot.slane %v1649_v63, 4  ;;  %v1660_v52 = vrot.slane %v1659_v7, 4  ;;  %v1893_v23 = vrot.slane %v1891_v2, 4  ;;  %v5597_v63 = vld [vmem:[%s7569_s4 + $0x1f8] sm:$0xff]  }
 0x126   : > { %3050 = vmatprep.mubr.bf16.mxu1 %v6626_v47  ;;  %5229 = vmatpush3.bf16.msra.mxu1 %v5590_v58  ;;  %v1676_v58 = vshll.u32 %v6757_v33, 16  ;;  %v6785_v47 = vcombine.low %v1631_v39, %v1641_v4  ;;  %v1669_v20 = vrot.slane %v1667_v37, 4  ;;  %v6791_v45 = vcombine.low %v1885_v61, %v1888_v60  ;;  %v6798_v4 = vld [vmem:[#allocation2 + $0x84] sm:$0xf]  ;;  %v6800_v7 = vld [vmem:[#allocation2 + $0x88] sm:$0xf] }
 0x127   : > { %5230 = vmatprep.subr.bf16.mxu1 %v5591_v50  ;;  %v1672_v50 = vrot.slane %v1670_v27, 5  ;;  %v1682_v44 = vrot.slane %v1680_v3, 4  ;;  %v1894_v30 = vrot.slane %v6553_v29, 5  ;;  %v1664_v39 = vrot.slane %v1662_v38, 5  ;;  %v6812_v27 = vld [vmem:[#allocation2 + $0x80] sm:$0x1] }
 0x128   : > { %7617 = vst [vmem:[#allocation16_spill] sm:$0xff] %v6785_v47  ;;  %v1678_v49 = vrot.slane %v1676_v58, 5  ;;  %v1655_v37 = vsel %vm5949_vm2, %v1650_v22, %v6750_v35  ;;  %v4311_v29 = vrot.slane %v6528_v5, 9  ;;  %v5599_v38 = vld [vmem:[%s7569_s4 + $0x1b8] sm:$0xff]   ;;  %v1691_v22 = vshrl.u32 %v6798_v4, 16 }
 0x129   : > { %v1665_v61 = vsel %vm5949_vm2, %v1660_v52, %v1664_v39  ;;  %v1694_v5 = vshll.u32 %v6798_v4, 16  ;;  %v1704_v35 = vshrl.u32 %v6800_v7, 16  ;;  %v1898_v58 = vrot.slane %v6564_v13, 5 }
 0x12a   : > { %5231 = vmatpush3.bf16.msra.mxu1 %v5593_v59  ;;  %2922 = vmatmul.mubr.bf16.gmra.mrb[28].mxu0 %v6772_v26  ;;  %v1895_v59 = vsel %vm5984_vm5, %v1893_v23, %v1894_v30  ;;  %v1683_v60 = vor.u32 %v1682_v44, %v1678_v49  ;;  %v1700_v30 = vshll.u32 %v6800_v7, 16  ;;  %v1892_v44 = vsel %vm5984_vm5, %v4311_v29, %v1891_v2 }
 0x12b   : > { %5232 = vmatprep.subr.bf16.mxu1 %v5594_v9  ;;  %2929 = vmatprep.mubr.bf16.mxu0 %v6785_v47  ;;  %v1673_v9 = vor.u32 %v1672_v50, %v1669_v20  ;;  %v6824_v20 = vcombine.low %v6673_v31, %v6675_v14  ;;  %v1686_v3 = vshll.u32 %v6812_v27, 16  ;;  %v6829_v52 = vcombine.low %v1655_v37, %v1665_v61 }
 0x12c   : > { %v6831_v23 = vcombine.low %v1892_v44, %v1895_v59  ;;  %v1696_v13 = vrot.slane %v1694_v5, 5  ;;  %v1702_v39 = vrot.slane %v1700_v30, 5  ;;  %v1900_v47 = vrot.slane %v1898_v58, 4  ;;  %v6839_v59 = vld [vmem:[#allocation2 + $0x8c] sm:$0x1] }
 0x12d   : > { %3051 = vmatmul.mubr.bf16.gmra.mrb[28].mxu1 %v6791_v45  ;;  %v1674_v50 = vrot.slane %v1673_v9, 4  ;;  %v1688_v2 = vrot.slane %v1686_v3, 5  ;;  %v4312_v37 = vrot.slane %v6561_v62, 9  ;;  %v1901_v29 = vrot.slane %v6576_v6, 5 }
 0x12e   : > { %3058 = vmatprep.mubr.bf16.mxu1 %v6679_v18  ;;  %5233 = vmatpush3.bf16.msra.mxu1 %v5596_v12  ;;  %v1684_v12 = vrot.slane %v1683_v60, 4  ;;  %v1706_v18 = vrot.slane %v1704_v35, 4  ;;  %v1905_v5 = vrot.slane %v6597_v48, 5  ;;  %v6850_v62 = vcombine.low %v6705_v32, %v6718_v42 }
 0x12f   : > { %5234 = vmatprep.subr.bf16.mxu1 %v5597_v63  ;;  %v1693_v63 = vrot.slane %v1691_v22, 4  ;;  %v1679_v61 = vsel %vm5949_vm2, %v1674_v50, %v1678_v49  ;;  %v1902_v22 = vsel %vm5984_vm5, %v1900_v47, %v1901_v29  ;;  %v1710_v6 = vshll.u32 %v6839_v59, 16 }
 0x130   : > { %v1689_v9 = vsel %vm5949_vm2, %v1684_v12, %v1688_v2  ;;  %v1899_v49 = vsel %vm5984_vm5, %v4312_v37, %v1898_v58  ;;  %v1907_v47 = vrot.slane %v1905_v5, 4  ;;  %v4313_v3 = vrot.slane %v6586_v51, 9  ;;  %v4900_v29 = vpop.f32.mrb[0].mxu0 }
 0x131   : > { %v1697_v60 = vor.u32 %v1696_v13, %v1693_v63  ;;  %v6853_v30 = vcombine.low %v1679_v61, %v1689_v9  ;;  %v6858_v35 = vcombine.low %v1899_v49, %v1902_v22  ;;  %v1712_v48 = vrot.slane %v1710_v6, 5 }
 0x132   : > { %5235 = vmatpush3.bf16.msra.mxu1 %v5599_v38  ;;  %2930 = vmatmul.mubr.bf16.gmra.mrb[32].mxu0 %v6824_v20  ;;  %v1707_v38 = vor.u32 %v1706_v18, %v1702_v39  ;;  %v1908_v50 = vrot.slane %v6601_v43, 5  ;;  %v1912_v13 = vrot.slane %v6635_v21, 5  ;;  %v6874_v2 = vcombine.low %v6744_v41, %v6757_v33  ;;  %v4901_v21 = vpop.f32.mrb[1].mxu0 }
 0x133   : > { %2937 = vmatprep.mubr.bf16.mxu0 %v6829_v52  ;;  %v1698_v18 = vrot.slane %v1697_v60, 4  ;;  %v1906_v51 = vsel %vm5984_vm5, %v4313_v3, %v1905_v5  ;;  %v4314_v61 = vrot.slane %v6622_v24, 9  ;;  %v1915_v9 = vrot.slane %v6641_v1, 5 }
 0x134   : > { %v1708_v44 = vrot.slane %v1707_v38, 4  ;;  %v1909_v63 = vsel %vm5984_vm5, %v1907_v47, %v1908_v50  ;;  %v6888_v60 = vadd.f32 %v4901_v21, %v4900_v29  ;;  %v4903_v38 = vpop.f32.mrb[2].mxu0  ;;  %v1919_v6 = vrot.slane %v6675_v14, 5  ;;  %v5592_v50 = vld [vmem:[%s7569_s4 + $0x208] sm:$0xff]  }
 0x135   : > { %3059 = vmatmul.mubr.bf16.gmra.mrb[32].mxu1 %v6831_v23  ;;  %v1703_v58 = vsel %vm5949_vm2, %v1698_v18, %v1702_v39  ;;  %v6881_v43 = vcombine.low %v1906_v51, %v1909_v63  ;;  %v1914_v39 = vrot.slane %v1912_v13, 4  ;;  %v4904_v22 = vpop.f32.mrb[3].mxu0  ;;  %v6897_v18 = vcombine.low %v6798_v4, %v6800_v7  ;;  %v5598_v51 = vld [vmem:[%s7569_s4 + $0x218] sm:$0xff]  }
 0x136   : > { %3066 = vmatprep.mubr.bf16.mxu1 %v6730_v19  ;;  %v1713_v12 = vsel %vm5949_vm2, %v1708_v44, %v1712_v48  ;;  %v6893_v49 = vadd.f32 %v4904_v22, %v4903_v38  ;;  %v1913_v24 = vsel %vm5984_vm5, %v4314_v61, %v1912_v13  ;;  %v1921_v44 = vrot.slane %v1919_v6, 4  ;;  %v5602_v38 = vld [vmem:[%s7569_s4 + $0x228] sm:$0xff]  }
 0x137   : > { %v6876_v37 = vcombine.low %v1703_v58, %v1713_v12  ;;  %v1916_v5 = vsel %vm5984_vm5, %v1914_v39, %v1915_v9  ;;  %v4315_v14 = vrot.slane %v6673_v31, 9  ;;  %v1922_v47 = vrot.slane %v6703_v0, 5  ;;  %v5606_v31 = vld [vmem:[%s7569_s4 + $0x200] sm:$0xff]  }
 0x138   : > { %v6902_v1 = vcombine.low %v1913_v24, %v1916_v5  ;;  %v1926_v3 = vrot.slane %v6718_v42, 5  ;;  %v5595_v42 = vld [vmem:[%s7569_s4 + $0x210] sm:$0xff]   ;;  %v1929_v12 = vrot.slane %v6754_v56, 5  ;;  %v1933_v13 = vrot.slane %v6757_v33, 5  ;;  %v5601_v56 = vld [vmem:[%s7569_s4 + $0x220] sm:$0xff]  }
 0x139   : > { %v1923_v48 = vsel %vm5984_vm5, %v1921_v44, %v1922_v47  ;;  %v4317_v33 = vrot.slane %v6744_v41, 9  ;;  %v1936_v21 = vrot.slane %v6812_v27, 5  ;;  %v1940_v9 = vrot.slane %v6800_v7, 5  ;;  %v5603_v7 = vld [vmem:[%s7569_s4 + $0x230] sm:$0xff]   ;;  %v5604_v47 = vld [vmem:[%s7569_s4 + $0x238] sm:$0xff]  }
 0x13a   : > { %2938 = vmatmul.mubr.bf16.gmra.mrb[36].mxu0 %v6850_v62  ;;  %v1928_v0 = vrot.slane %v1926_v3, 4  ;;  %v4318_v27 = vrot.slane %v6798_v4, 9  ;;  %v5607_v44 = vld [vmem:[#allocation2 + $0x94] sm:$0xf] }
 0x13b   : > { %2945 = vmatprep.mubr.bf16.mxu0 %v6853_v30  ;;  %v1934_v22 = vsel %vm5984_vm5, %v4317_v33, %v1933_v13  ;;  %v1942_v41 = vrot.slane %v1940_v9, 4 }
 0x13c   : > { %v1930_v63 = vsel %vm5984_vm5, %v1928_v0, %v1929_v12 }
 0x13d   : > { %3067 = vmatmul.mubr.bf16.gmra.mrb[36].mxu1 %v6858_v35 }
 0x13e   : > { %3074 = vmatprep.mubr.bf16.mxu1 %v6772_v26 }
 0x142   : > { %2946 = vmatmul.mubr.bf16.gmra.mrb[40].mxu0 %v6874_v2 }
 0x143   : > { %2953 = vmatprep.mubr.bf16.mxu0 %v6876_v37 }
 0x145   : > { %3075 = vmatmul.mubr.bf16.gmra.mrb[40].mxu1 %v6881_v43 }
 0x146   : > { %3082 = vmatprep.mubr.bf16.mxu1 %v6824_v20 }
 0x14a   : > { %2954 = vmatmul.mubr.bf16.gmra.mrb[44].mxu0 %v6897_v18 }
 0x14b   : > { %3187 = vmatprep.mubr.bf16.mxu0 %v6683_v28  ;;  %v1920_v28 = vsel %vm5984_vm5, %v4315_v14, %v1919_v6  ;;  %v1943_v6 = vrot.slane %v6839_v59, 5  ;;  %v1947_v14 = vrot.slane %v5607_v44, 5  ;;  %v5608_v59 = vld [vmem:[#allocation2 + $0x90] sm:$0xf]  ;;  %v1418_v44 = vld [vmem:[#allocation2 + $0xc4] sm:$0xf] }
 0x14c   : > { %v6918_v58 = vcombine.low %v1920_v28, %v1923_v48  ;;  %v1941_v48 = vsel %vm5984_vm5, %v4318_v27, %v1940_v9  ;;  %v5609_v28 = vld [vmem:[#allocation2 + $0x98] sm:$0x1] }
 0x14d   : > { %3083 = vmatmul.mubr.bf16.gmra.mrb[44].mxu1 %v6902_v1  ;;  %v1944_v24 = vsel %vm5984_vm5, %v1942_v41, %v1943_v6  ;;  %v1949_v4 = vrot.slane %v1947_v14, 4  ;;  %v7618_v41 = vld [vmem:[#allocation5_spill] sm:$0xff]  ;;  %v7619_v6 = vld [vmem:[#allocation8_spill] sm:$0xff] }
 0x14e   : > { %3090 = vmatprep.mubr.bf16.mxu1 %v6850_v62 }
 0x152   : > { %3188 = vmatmul.mubr.bf16.vlgmr.msra.gmra.mrb[48].mxu0 %v6466_v16  ;;  %v4316_v16 = vrot.slane %v6705_v32, 9  ;;  %v1935_v32 = vrot.slane %v1933_v13, 4  ;;  %v5611_v13 = vld [vmem:[#allocation2 + $0x9c] sm:$0xf] }
 0x153   : > { %3195 = vmatprep.mubr.bf16.mxu0 %v6741_v40  ;;  %5357 = vmatpush3.bf16.msra.mxu0 %v5606_v31  ;;  %v1950_v31 = vrot.slane %v5609_v28, 5  ;;  %v7622_v28 = vld [vmem:[#allocation9_spill] sm:$0xff] }
 0x154   : > { %5358 = vmatprep.subr.bf16.mxu0 %v5592_v50  ;;  %v1927_v39 = vsel %vm5984_vm5, %v4316_v16, %v1926_v3  ;;  %v1937_v61 = vsel %vm5984_vm5, %v1935_v32, %v1936_v21  ;;  %v6977_v3 = vcombine.low %v1941_v48, %v1944_v24  ;;  %v5612_v32 = vld [vmem:[#allocation2 + $0xa4] sm:$0x1]  ;;  %v1417_v24 = vld [vmem:[#allocation2 + $0xc0] sm:$0xf] }
 0x155   : > { %3091 = vmatmul.mubr.bf16.gmra.mrb[48].mxu1 %v6918_v58  ;;  %v6940_v29 = vcombine.low %v1927_v39, %v1930_v63  ;;  %v6959_v5 = vcombine.low %v1934_v22, %v1937_v61  ;;  %v1951_v0 = vsel %vm5984_vm5, %v1949_v4, %v1950_v31  ;;  %v1961_v61 = vrot.slane %v6446_v15, 5 }
 0x156   : > { %3098 = vmatprep.mubr.bf16.mxu1 %v6874_v2  ;;  %v4321_v22 = vrot.slane %v6434_v11, 9  ;;  %v1968_v15 = vrot.slane %v7619_v6, 5  ;;  %v7014_v4 = vcombine.low %v1417_v24, %v1418_v44  ;;  %v1971_v31 = vrot.slane %v7622_v28, 5 }
 0x157   : > { %5359 = vmatpush3.bf16.msra.mxu0 %v5592_v50  ;;  %v4319_v50 = vrot.slane %v5608_v59, 9  ;;  %v7621_v59 = vld [vmem:[#allocation7_spill] sm:$0xff] }
 0x158   : > { %5360 = vmatprep.subr.bf16.mxu0 %v5595_v42  ;;  %v1970_v11 = vrot.slane %v1968_v15, 4 }
 0x159   : > { %v1948_v12 = vsel %vm5984_vm5, %v4319_v50, %v1947_v14  ;;  %v1962_v14 = vsel %vm5984_vm5, %v4321_v22, %v1961_v61  ;;  %v4322_v50 = vrot.slane %v7621_v59, 9 }
 0x15a   : > { %3196 = vmatmul.mubr.bf16.gmra.mrb[52].mxu0 %v6501_v17  ;;  %v6987_v63 = vcombine.low %v1948_v12, %v1951_v0  ;;  %v1972_v0 = vsel %vm5984_vm5, %v1970_v11, %v1971_v31  ;;  %v7631_v31 = vld [vmem:[#allocation12_spill] sm:$0xff] }
 0x15b   : > { %3203 = vmatprep.mubr.bf16.mxu0 %v6791_v45  ;;  %5361 = vmatpush3.bf16.msra.mxu0 %v5595_v42  ;;  %v5610_v42 = vld [vmem:[#allocation2 + $0xa0] sm:$0xf] }
 0x15c   : > { %5362 = vmatprep.subr.bf16.mxu0 %v5598_v51  ;;  %v1954_v16 = vrot.slane %v5610_v42, 5  ;;  %v1969_v42 = vsel %vm5984_vm5, %v4322_v50, %v1968_v15 }
 0x15d   : > { %3099 = vmatmul.mubr.bf16.gmra.mrb[52].mxu1 %v6940_v29  ;;  %v7025_v12 = vcombine.low %v1969_v42, %v1972_v0 }
 0x15e   : > { %3106 = vmatprep.mubr.bf16.mxu1 %v6897_v18  ;;  %v1956_v39 = vrot.slane %v1954_v16, 4 }
 0x15f   : > { %5363 = vmatpush3.bf16.msra.mxu0 %v5598_v51  ;;  %v4320_v51 = vrot.slane %v5611_v13, 9  ;;  %v7624_v13 = vld [vmem:[#allocation6_spill] sm:$0xff] }
 0x160   : > { %5364 = vmatprep.subr.bf16.mxu0 %v5601_v56 }
 0x161   : > { %v1955_v33 = vsel %vm5984_vm5, %v4320_v51, %v1954_v16  ;;  %v7623_v16 = vld [vmem:[#allocation16_spill] sm:$0xff]  ;;  %v7625_v51 = vld [vmem:[#allocation11_spill] sm:$0xff] }
 0x162   : > { %3204 = vmatmul.mubr.bf16.gmra.mrb[56].mxu0 %v6556_v10 }
 0x163   : > { %3211 = vmatprep.mubr.bf16.mxu0 %v6831_v23  ;;  %5365 = vmatpush3.bf16.msra.mxu0 %v5601_v56  ;;  %v1957_v56 = vrot.slane %v5612_v32, 5  ;;  %v7629_v32 = vld [vmem:[#allocation4_spill] sm:$0xff] }
 0x164   : > { %5366 = vmatprep.subr.bf16.mxu0 %v5602_v38 }
 0x165   : > { %3107 = vmatmul.mubr.bf16.gmra.mrb[56].mxu1 %v6959_v5  ;;  %v1958_v21 = vsel %vm5984_vm5, %v1956_v39, %v1957_v56  ;;  %v7627_v39 = vld [vmem:[#allocation3_spill] sm:$0xff]  ;;  %v1977_v56 = vshll.u32 %v1417_v24, 16 }
 0x166   : > { %3114 = vmatprep.mubr.bf16.mxu1 %v6418_v8  ;;  %v6998_v9 = vcombine.low %v1955_v33, %v1958_v21  ;;  %v1987_v33 = vshrl.u32 %v1418_v44, 16  ;;  %v2002_v21 = vrot.slane %v1418_v44, 5 }
 0x167   : > { %5367 = vmatpush3.bf16.msra.mxu0 %v5602_v38  ;;  %v1963_v38 = vrot.slane %v1961_v61, 4  ;;  %v1419_v61 = vld [vmem:[#allocation2 + $0xc8] sm:$0x1]  ;;  %v1979_v22 = vrot.slane %v1977_v56, 5 }
 0x168   : > { %5368 = vmatprep.subr.bf16.mxu0 %v5603_v7  ;;  %v2005_v6 = vrot.slane %v1419_v61, 5 }
 0x16a   : > { %3212 = vmatmul.mubr.bf16.gmra.mrb[60].mxu0 %v6620_v46 }
 0x16b   : > { %3219 = vmatprep.mubr.bf16.mxu0 %v6858_v35  ;;  %5369 = vmatpush3.bf16.msra.mxu0 %v5603_v7  ;;  %v1964_v7 = vrot.slane %v7618_v41, 5 }
 0x16c   : > { %5370 = vmatprep.subr.bf16.mxu0 %v5604_v47 }
 0x16d   : > { %3115 = vmatmul.mubr.bf16.gmra.mrb[60].mxu1 %v6977_v3  ;;  %v1965_v27 = vsel %vm5984_vm5, %v1963_v38, %v1964_v7  ;;  %v1989_v7 = vrot.slane %v1987_v33, 4 }
 0x16e   : > { %3122 = vmatprep.mubr.bf16.mxu1 %v6471_v34  ;;  %v7011_v48 = vcombine.low %v1962_v14, %v1965_v27  ;;  %v7630_v27 = vld [vmem:[#allocation10_spill] sm:$0xff] }
 0x16f   : > { %5371 = vmatpush3.bf16.msra.mxu0 %v5604_v47  ;;  %v7620_v47 = vld [vmem:[#allocation15_spill] sm:$0xff] }
 0x172   : > { %3220 = vmatmul.mubr.bf16.gmra.mrb[64].mxu0 %v6647_v54 }
 0x173   : > { %3227 = vmatprep.mubr.bf16.mxu0 %v6881_v43 }
 0x175   : > { %3123 = vmatmul.mubr.bf16.gmra.mrb[64].mxu1 %v6987_v63 }
 0x176   : > { %3130 = vmatprep.mubr.bf16.mxu1 %v6519_v57 }
 0x17a   : > { %3228 = vmatmul.mubr.bf16.gmra.mrb[68].mxu0 %v6681_v36 }
 0x17b   : > { %3235 = vmatprep.mubr.bf16.mxu0 %v6902_v1 }
 0x17d   : > { %3131 = vmatmul.mubr.bf16.gmra.mrb[68].mxu1 %v6998_v9 }
 0x17e   : > { %3138 = vmatprep.mubr.bf16.mxu1 %v6591_v53 }
 0x182   : > { %3236 = vmatmul.mubr.bf16.gmra.mrb[72].mxu0 %v7620_v47 }
 0x183   : > { %3243 = vmatprep.mubr.bf16.mxu0 %v6918_v58 }
 0x185   : > { %3139 = vmatmul.mubr.bf16.gmra.mrb[72].mxu1 %v7011_v48 }
 0x186   : > { %3146 = vmatprep.mubr.bf16.mxu1 %v7014_v4 }
 0x18a   : > { %3244 = vmatmul.mubr.bf16.gmra.mrb[76].mxu0 %v7623_v16 }
 0x18b   : > { %3251 = vmatprep.mubr.bf16.mxu0 %v6940_v29 }
 0x18d   : > { %3147 = vmatmul.mubr.bf16.gmra.mrb[76].mxu1 %v7025_v12 }
 0x18e   : > { %3348 = vmatprep.mubr.bf16.mxu1 %v6501_v17  ;;  %v7626_v17 = vld [vmem:[#allocation13_spill] sm:$0xff] }
 0x192   : > { %3252 = vmatmul.mubr.bf16.gmra.mrb[80].mxu0 %v6829_v52 }
 0x193   : > { %3259 = vmatprep.mubr.bf16.mxu0 %v6959_v5 }
 0x195   : > { %3349 = vmatmul.mubr.bf16.vlgmr.msra.gmra.mrb[80].mxu1 %v7624_v13 }
 0x196   : > { %3356 = vmatprep.mubr.bf16.mxu1 %v6556_v10  ;;  %v7628_v10 = vld [vmem:[#allocation14_spill] sm:$0xff] }
 0x19a   : > { %3260 = vmatmul.mubr.bf16.gmra.mrb[84].mxu0 %v6853_v30 }
 0x19b   : > { %3267 = vmatprep.mubr.bf16.mxu0 %v6977_v3 }
 0x19d   : > { %3357 = vmatmul.mubr.bf16.gmra.mrb[84].mxu1 %v7625_v51 }
 0x19e   : > { %3364 = vmatprep.mubr.bf16.mxu1 %v6620_v46  ;;  %v1974_v46 = vshrl.u32 %v1417_v24, 16 }
 0x1a0   : > { %v1976_v38 = vrot.slane %v1974_v46, 4 }
 0x1a2   : > { %3268 = vmatmul.mubr.bf16.gmra.mrb[88].mxu0 %v6876_v37  ;;  %v1980_v15 = vor.u32 %v1979_v22, %v1976_v38 }
 0x1a3   : > { %3275 = vmatprep.mubr.bf16.mxu0 %v6987_v63 }
 0x1a4   : > { %v1981_v50 = vrot.slane %v1980_v15, 4 }
 0x1a5   : > { %3365 = vmatmul.mubr.bf16.gmra.mrb[88].mxu1 %v7626_v17 }
 0x1a6   : > { %3372 = vmatprep.mubr.bf16.mxu1 %v6647_v54  ;;  %v1983_v54 = vshll.u32 %v1418_v44, 16 }
 0x1a8   : > { %v1985_v41 = vrot.slane %v1983_v54, 5 }
 0x1aa   : > { %3276 = vmatmul.mubr.bf16.gmra.mrb[92].mxu0 %v7627_v39  ;;  %v1990_v14 = vor.u32 %v1989_v7, %v1985_v41 }
 0x1ab   : > { %3283 = vmatprep.mubr.bf16.mxu0 %v6998_v9 }
 0x1ac   : > { %v1991_v28 = vrot.slane %v1990_v14, 4 }
 0x1ad   : > { %3373 = vmatmul.mubr.bf16.gmra.mrb[92].mxu1 %v7628_v10 }
 0x1ae   : > { %3380 = vmatprep.mubr.bf16.mxu1 %v6681_v36  ;;  %v2004_v36 = vrot.slane %v2002_v21, 4 }
 0x1b0   : > { %v2006_v44 = vsel %vm5984_vm5, %v2004_v36, %v2005_v6 }
 0x1b2   : > { %3284 = vmatmul.mubr.bf16.gmra.mrb[96].mxu0 %v7629_v32 }
 0x1b3   : > { %3291 = vmatprep.mubr.bf16.mxu0 %v7011_v48 }
 0x1b5   : > { %3381 = vmatmul.mubr.bf16.gmra.mrb[96].mxu1 %v6730_v19  ;;  %v4323_v19 = vrot.slane %v1417_v24, 9  ;;  %v1986_v24 = vsel %vm5949_vm2, %v1981_v50, %v1985_v41 }
 0x1b6   : > { %3388 = vmatprep.mubr.bf16.mxu1 %v7620_v47  ;;  %v1993_v47 = vshll.u32 %v1419_v61, 16 }
 0x1b7   : > { %v2003_v11 = vsel %vm5984_vm5, %v4323_v19, %v2002_v21 }
 0x1b8   : > { %v7058_v59 = vcombine.low %v2003_v11, %v2006_v44 }
 0x1ba   : > { %3292 = vmatmul.mubr.bf16.gmra.mrb[100].mxu0 %v7630_v27 }
 0x1bb   : > { %3299 = vmatprep.mubr.bf16.mxu0 %v7025_v12 }
 0x1bd   : > { %3389 = vmatmul.mubr.bf16.gmra.mrb[100].mxu1 %v6772_v26  ;;  %v1995_v26 = vrot.slane %v1993_v47, 5 }
 0x1be   : > { %3396 = vmatprep.mubr.bf16.mxu1 %v7623_v16 }
 0x1bf   : > { %v1996_v0 = vsel %vm5949_vm2, %v1991_v28, %v1995_v26 }
 0x1c0   : > { %v7070_v51 = vcombine.low %v1986_v24, %v1996_v0 }
 0x1c2   : > { %3300 = vmatmul.mubr.bf16.gmra.mrb[104].mxu0 %v7631_v31 }
 0x1c3   : > { %3307 = vmatprep.mubr.bf16.mxu0 %v7058_v59 }
 0x1c5   : > { %3397 = vmatmul.mubr.bf16.gmra.mrb[104].mxu1 %v6824_v20 }
 0x1c6   : > { %3404 = vmatprep.mubr.bf16.mxu1 %v6829_v52  ;;  %v4972_v42 = vpop.f32.mrb[0].mxu1 }
 0x1c7   : > { %v4973_v16 = vpop.f32.mrb[1].mxu1 }
 0x1c8   : > { %v7068_v13 = vadd.f32 %v4973_v16, %v4972_v42  ;;  %v4975_v17 = vpop.f32.mrb[2].mxu1 }
 0x1c9   : > { %v4976_v10 = vpop.f32.mrb[3].mxu1 }
 0x1ca   : > { %3308 = vmatmul.mubr.bf16.gmra.mrb[108].mxu0 %v7070_v51  ;;  %v7073_v46 = vadd.f32 %v4976_v10, %v4975_v17 }
 0x1cb   : > { %5372 = vmatprep.mubr.bf16.mxu0 %v6741_v40 }
 0x1cd   : > { %3405 = vmatmul.mubr.bf16.gmra.mrb[108].mxu1 %v6850_v62  ;;  %v4906_v20 = vpop.f32.mrb[4].mxu0 }
 0x1ce   : > { %3412 = vmatprep.mubr.bf16.mxu1 %v6853_v30  ;;  %v4907_v52 = vpop.f32.mrb[5].mxu0  ;;  %v4978_v56 = vpop.f32.mrb[4].mxu1 }
 0x1cf   : > { %v7078_v33 = vadd.f32 %v4907_v52, %v4906_v20  ;;  %v4909_v54 = vpop.f32.mrb[6].mxu0  ;;  %v4979_v21 = vpop.f32.mrb[5].mxu1 }
 0x1d0   : > { %v4910_v61 = vpop.f32.mrb[7].mxu0  ;;  %v7080_v38 = vadd.f32 %v4979_v21, %v4978_v56  ;;  %v4981_v22 = vpop.f32.mrb[6].mxu1 }
 0x1d1   : > { %v7082_v41 = vadd.f32 %v4910_v61, %v4909_v54  ;;  %v4982_v7 = vpop.f32.mrb[7].mxu1 }
 0x1d2   : > { %5373 = vmatmul.mubr.bf16.vlgmr.msra.gmra.mrb[112].mxu0 %v6791_v45  ;;  %v7085_v40 = vadd.f32 %v4982_v7, %v4981_v22  ;;  %v7125_v7 = vld [vmem:[#allocation2 + $0xd0] sm:$0xf] }
 0x1d3   : > { %5376 = vmatprep.mubr.bf16.mxu0 %v6831_v23 }
 0x1d5   : > { %3413 = vmatmul.mubr.bf16.gmra.mrb[112].mxu1 %v6874_v2  ;;  %v4912_v62 = vpop.f32.mrb[8].mxu0 }
 0x1d6   : > { %3420 = vmatprep.mubr.bf16.mxu1 %v6876_v37  ;;  %v4913_v30 = vpop.f32.mrb[9].mxu0 }
 0x1d7   : > { %v7090_v36 = vadd.f32 %v4913_v30, %v4912_v62  ;;  %v4915_v19 = vpop.f32.mrb[10].mxu0  ;;  %v4984_v6 = vpop.f32.mrb[8].mxu1 }
 0x1d8   : > { %v4916_v15 = vpop.f32.mrb[11].mxu0  ;;  %v4985_v14 = vpop.f32.mrb[9].mxu1 }
 0x1d9   : > { %v7092_v44 = vadd.f32 %v4916_v15, %v4915_v19  ;;  %v7094_v47 = vadd.f32 %v4985_v14, %v4984_v6  ;;  %v4987_v45 = vpop.f32.mrb[10].mxu1  ;;  %v2021_v6 = vshrl.u32 %v7125_v7, 16 }
 0x1da   : > { %5377 = vmatmul.mubr.bf16.gmra.mrb[116].mxu0 %v6858_v35  ;;  %v4988_v23 = vpop.f32.mrb[11].mxu1 }
 0x1db   : > { %5380 = vmatprep.mubr.bf16.mxu0 %v6881_v43  ;;  %v7098_v2 = vadd.f32 %v4988_v23, %v4987_v45 }
 0x1dd   : > { %3421 = vmatmul.mubr.bf16.gmra.mrb[116].mxu1 %v6897_v18  ;;  %v4918_v37 = vpop.f32.mrb[12].mxu0 }
 0x1de   : > { %3428 = vmatprep.mubr.bf16.mxu1 %v7627_v39  ;;  %v4919_v11 = vpop.f32.mrb[13].mxu0 }
 0x1df   : > { %v7102_v50 = vadd.f32 %v4919_v11, %v4918_v37  ;;  %v4921_v28 = vpop.f32.mrb[14].mxu0  ;;  %v4990_v26 = vpop.f32.mrb[12].mxu1 }
 0x1e0   : > { %v4922_v24 = vpop.f32.mrb[15].mxu0  ;;  %v4991_v0 = vpop.f32.mrb[13].mxu1 }
 0x1e1   : > { %v7104_v42 = vadd.f32 %v4922_v24, %v4921_v28  ;;  %v7106_v35 = vadd.f32 %v4991_v0, %v4990_v26  ;;  %v4993_v16 = vpop.f32.mrb[14].mxu1  ;;  %v2023_v0 = vrot.slane %v2021_v6, 4  ;;  %v2036_v6 = vrot.slane %v7125_v7, 5 }
 0x1e2   : > { %5381 = vmatmul.mubr.bf16.gmra.mrb[120].mxu0 %v6902_v1  ;;  %v4994_v43 = vpop.f32.mrb[15].mxu1 }
 0x1e3   : > { %5384 = vmatprep.mubr.bf16.mxu0 %v6918_v58  ;;  %v7110_v18 = vadd.f32 %v4994_v43, %v4993_v16 }
 0x1e5   : > { %3429 = vmatmul.mubr.bf16.gmra.mrb[120].mxu1 %v6418_v8  ;;  %v4924_v39 = vpop.f32.mrb[16].mxu0 }
 0x1e6   : > { %3436 = vmatprep.mubr.bf16.mxu1 %v7629_v32  ;;  %v4925_v17 = vpop.f32.mrb[17].mxu0  ;;  %v7123_v32 = vld [vmem:[#allocation2 + $0xcc] sm:$0xf] }
 0x1e7   : > { %v7114_v10 = vadd.f32 %v4925_v17, %v4924_v39  ;;  %v4927_v20 = vpop.f32.mrb[18].mxu0  ;;  %v2008_v19 = vshrl.u32 %v7123_v32, 16  ;;  %v1422_v39 = vld [vmem:[#allocation2 + $0xd4] sm:$0x1] }
 0x1e8   : > { %v5012_v52 = vpop.f32.mrb[16].mxu1  ;;  %v4928_v56 = vpop.f32.mrb[19].mxu0 }
 0x1e9   : > { %v5013_v54 = vpop.f32.mrb[17].mxu1  ;;  %v7116_v21 = vadd.f32 %v4928_v56, %v4927_v20  ;;  %v2010_v28 = vrot.slane %v2008_v19, 4 }
 0x1ea   : > { %v5014_v1 = vadd.f32 %v5013_v54, %v5012_v52  ;;  %v5015_v61 = vpop.f32.mrb[18].mxu1  ;;  %5385 = vmatmul.mubr.bf16.gmra.mrb[124].mxu0 %v6940_v29  ;;  %v2027_v54 = vshll.u32 %v1422_v39, 16 }
 0x1eb   : > { %v5016_v58 = vpop.f32.mrb[19].mxu1  ;;  %5388 = vmatprep.mubr.bf16.mxu0 %v6959_v5  ;;  %v2017_v5 = vshll.u32 %v7125_v7, 16 }
 0x1ec   : > { %v7120_v22 = vadd.f32 %v5014_v1, %v6888_v60  ;;  %v5017_v8 = vadd.f32 %v5016_v58, %v5015_v61  ;;  %v2011_v60 = vshll.u32 %v7123_v32, 16 }
 0x1ed   : > { %3437 = vmatmul.mubr.bf16.gmra.mrb[124].mxu1 %v6471_v34  ;;  %v4930_v30 = vpop.f32.mrb[20].mxu0  ;;  %v2019_v24 = vrot.slane %v2017_v5, 5 }
 0x1ee   : > { %v7129_v62 = vadd.f32 %v5017_v8, %v6893_v49  ;;  %3444 = vmatprep.mubr.bf16.mxu1 %v7630_v27  ;;  %v4931_v29 = vpop.f32.mrb[21].mxu0  ;;  %v2013_v26 = vrot.slane %v2011_v60, 5 }
 0x1ef   : > { %v7136_v15 = vadd.f32 %v4931_v29, %v4930_v30  ;;  %v4933_v14 = vpop.f32.mrb[22].mxu0  ;;  %v2024_v56 = vor.u32 %v2023_v0, %v2019_v24 }
 0x1f0   : > { %v5018_v45 = vpop.f32.mrb[20].mxu1  ;;  %v4934_v34 = vpop.f32.mrb[23].mxu0  ;;  %v2014_v52 = vor.u32 %v2013_v26, %v2010_v28 }
 0x1f1   : > { %v5019_v23 = vpop.f32.mrb[21].mxu1  ;;  %v7138_v49 = vadd.f32 %v4934_v34, %v4933_v14  ;;  %v2025_v19 = vrot.slane %v2024_v56, 4 }
 0x1f2   : > { %v5020_v37 = vadd.f32 %v5019_v23, %v5018_v45  ;;  %v5021_v11 = vpop.f32.mrb[22].mxu1  ;;  %5389 = vmatmul.mubr.bf16.gmra.mrb[128].mxu0 %v6977_v3  ;;  %v2015_v29 = vrot.slane %v2014_v52, 4 }
 0x1f3   : > { %v5022_v27 = vpop.f32.mrb[23].mxu1  ;;  %5392 = vmatprep.mubr.bf16.mxu0 %v6987_v63 }
 0x1f4   : > { %v7142_v16 = vadd.f32 %v5020_v37, %v7078_v33  ;;  %v5023_v43 = vadd.f32 %v5022_v27, %v5021_v11  ;;  %v2020_v34 = vsel %vm5949_vm2, %v2015_v29, %v2019_v24  ;;  %v4324_v11 = vrot.slane %v7123_v32, 9 }
 0x1f5   : > { %3445 = vmatmul.mubr.bf16.gmra.mrb[128].mxu1 %v6519_v57  ;;  %v4936_v20 = vpop.f32.mrb[24].mxu0  ;;  %v2039_v27 = vrot.slane %v1422_v39, 5 }
 0x1f6   : > { %v7147_v17 = vadd.f32 %v5023_v43, %v7082_v41  ;;  %3452 = vmatprep.mubr.bf16.mxu1 %v7631_v31  ;;  %v4937_v3 = vpop.f32.mrb[25].mxu0  ;;  %v2029_v31 = vrot.slane %v2027_v54, 5 }
 0x1f7   : > { %v7150_v1 = vadd.f32 %v4937_v3, %v4936_v20  ;;  %v4939_v33 = vpop.f32.mrb[26].mxu0  ;;  %v2037_v3 = vsel %vm5984_vm5, %v4324_v11, %v2036_v6 }
 0x1f8   : > { %v5024_v61 = vpop.f32.mrb[24].mxu1  ;;  %v4940_v58 = vpop.f32.mrb[27].mxu0 }
 0x1f9   : > { %v5025_v63 = vpop.f32.mrb[25].mxu1  ;;  %v7152_v8 = vadd.f32 %v4940_v58, %v4939_v33 }
 0x1fa   : > { %v5026_v30 = vadd.f32 %v5025_v63, %v5024_v61  ;;  %v5027_v57 = vpop.f32.mrb[26].mxu1  ;;  %5393 = vmatmul.mubr.bf16.gmra.mrb[132].mxu0 %v6998_v9  ;;  %v4376_v63 = vcombine.low %v7123_v32, %v7125_v7 }
 0x1fb   : > { %v5028_v41 = vpop.f32.mrb[27].mxu1  ;;  %5396 = vmatprep.mubr.bf16.mxu0 %v7011_v48 }
 0x1fc   : > { %v7156_v60 = vadd.f32 %v5026_v30, %v7090_v36  ;;  %v5029_v5 = vadd.f32 %v5028_v41, %v5027_v57  ;;  %v2030_v36 = vsel %vm5949_vm2, %v2025_v19, %v2029_v31 }
 0x1fd   : > { %3453 = vmatmul.mubr.bf16.gmra.mrb[132].mxu1 %v6591_v53  ;;  %v4942_v45 = vpop.f32.mrb[28].mxu0  ;;  %v2038_v53 = vrot.slane %v2036_v6, 4  ;;  %v4377_v43 = vcombine.low %v2020_v34, %v2030_v36 }
 0x1fe   : > { %v7162_v14 = vadd.f32 %v5029_v5, %v7092_v44  ;;  %3460 = vmatprep.mubr.bf16.mxu1 %v7070_v51  ;;  %v4943_v9 = vpop.f32.mrb[29].mxu0 }
 0x1ff   : > { %v7169_v23 = vadd.f32 %v4943_v9, %v4942_v45  ;;  %v4945_v48 = vpop.f32.mrb[30].mxu0  ;;  %v2040_v39 = vsel %vm5984_vm5, %v2038_v53, %v2039_v27 }
 0x200   : > { %v5030_v37 = vpop.f32.mrb[28].mxu1  ;;  %v4946_v44 = vpop.f32.mrb[31].mxu0  ;;  %v4378_v54 = vcombine.low %v2037_v3, %v2040_v39 }
 0x201   : > { %v5031_v28 = vpop.f32.mrb[29].mxu1  ;;  %v7172_v26 = vadd.f32 %v4946_v44, %v4945_v48 }
 0x202   : > { %v5032_v51 = vadd.f32 %v5031_v28, %v5030_v37  ;;  %v5033_v0 = vpop.f32.mrb[30].mxu1  ;;  %5397 = vmatmul.mubr.bf16.gmra.mrb[136].mxu0 %v7025_v12 }
 0x203   : > { %v5034_v24 = vpop.f32.mrb[31].mxu1  ;;  %5400 = vmatprep.mubr.bf16.mxu0 %v7058_v59 }
 0x204   : > { %v7176_v55 = vadd.f32 %v5032_v51, %v7102_v50  ;;  %v5035_v20 = vadd.f32 %v5034_v24, %v5033_v0 }
 0x205   : > { %3461 = vmatmul.mubr.bf16.gmra.mrb[136].mxu1 %v7014_v4  ;;  %v4948_v56 = vpop.f32.mrb[32].mxu0 }
 0x206   : > { %v7185_v52 = vadd.f32 %v5035_v20, %v7104_v42  ;;  %3468 = vmatprep.mubr.bf16.mxu1 %v4377_v43  ;;  %v4949_v12 = vpop.f32.mrb[33].mxu0 }
 0x207   : > { %v7187_v50 = vadd.f32 %v4949_v12, %v4948_v56  ;;  %v4951_v33 = vpop.f32.mrb[34].mxu0 }
 0x208   : > { %v5036_v59 = vpop.f32.mrb[32].mxu1  ;;  %v4952_v61 = vpop.f32.mrb[35].mxu0 }
 0x209   : > { %v5037_v58 = vpop.f32.mrb[33].mxu1  ;;  %v7191_v25 = vadd.f32 %v4952_v61, %v4951_v33 }
 0x20a   : > { %v5038_v30 = vadd.f32 %v5037_v58, %v5036_v59  ;;  %v5039_v4 = vpop.f32.mrb[34].mxu1  ;;  %5401 = vmatmul.mubr.bf16.gmra.mrb[140].mxu0 %v4378_v54 }
 0x20b   : > { %v5040_v42 = vpop.f32.mrb[35].mxu1 }
 0x20c   : > { %v7194_v57 = vadd.f32 %v5038_v30, %v7114_v10  ;;  %v5041_v41 = vadd.f32 %v5040_v42, %v5039_v4 }
 0x20d   : > { %3469 = vmatmul.mubr.bf16.gmra.mrb[140].mxu1 %v4376_v63  ;;  %v4954_v19 = vpop.f32.mrb[36].mxu0 }
 0x20e   : > { %v7197_v29 = vadd.f32 %v5041_v41, %v7116_v21  ;;  %v4955_v31 = vpop.f32.mrb[37].mxu0 }
 0x20f   : > { %v7199_v5 = vadd.f32 %v4955_v31, %v4954_v19  ;;  %v4957_v6 = vpop.f32.mrb[38].mxu0 }
 0x210   : > { %v5042_v32 = vpop.f32.mrb[36].mxu1  ;;  %v4958_v7 = vpop.f32.mrb[39].mxu0 }
 0x211   : > { %v5043_v45 = vpop.f32.mrb[37].mxu1  ;;  %v7201_v9 = vadd.f32 %v4958_v7, %v4957_v6 }
 0x212   : > { %v5044_v34 = vadd.f32 %v5043_v45, %v5042_v32  ;;  %v5045_v36 = vpop.f32.mrb[38].mxu1 }
 0x213   : > { %v5046_v48 = vpop.f32.mrb[39].mxu1 }
 0x214   : > { %v7204_v10 = vadd.f32 %v5044_v34, %v7136_v15  ;;  %v5047_v37 = vadd.f32 %v5046_v48, %v5045_v36 }
 0x215   : > { %v4960_v11 = vpop.f32.mrb[40].mxu0 }
 0x216   : > { %v7207_v21 = vadd.f32 %v5047_v37, %v7138_v49  ;;  %v4961_v53 = vpop.f32.mrb[41].mxu0 }
 0x217   : > { %v7209_v27 = vadd.f32 %v4961_v53, %v4960_v11  ;;  %v4963_v44 = vpop.f32.mrb[42].mxu0 }
 0x218   : > { %v5048_v28 = vpop.f32.mrb[40].mxu1  ;;  %v4964_v51 = vpop.f32.mrb[43].mxu0 }
 0x219   : > { %v5049_v0 = vpop.f32.mrb[41].mxu1  ;;  %v7211_v43 = vadd.f32 %v4964_v51, %v4963_v44 }
 0x21a   : > { %v5050_v24 = vadd.f32 %v5049_v0, %v5048_v28  ;;  %v5051_v20 = vpop.f32.mrb[42].mxu1 }
 0x21b   : > { %v5052_v3 = vpop.f32.mrb[43].mxu1 }
 0x21c   : > { %v7214_v15 = vadd.f32 %v5050_v24, %v7150_v1  ;;  %v5053_v39 = vadd.f32 %v5052_v3, %v5051_v20 }
 0x21d   : > { %v4966_v56 = vpop.f32.mrb[44].mxu0 }
 0x21e   : > { %v7217_v49 = vadd.f32 %v5053_v39, %v7152_v8  ;;  %v4967_v12 = vpop.f32.mrb[45].mxu0 }
 0x21f   : > { %v7219_v54 = vadd.f32 %v4967_v12, %v4966_v56  ;;  %v4969_v33 = vpop.f32.mrb[46].mxu0 }
 0x220   : > { %v5054_v59 = vpop.f32.mrb[44].mxu1  ;;  %v4970_v61 = vpop.f32.mrb[47].mxu0 }
 0x221   : > { %v5055_v58 = vpop.f32.mrb[45].mxu1  ;;  %v7221_v63 = vadd.f32 %v4970_v61, %v4969_v33 }
 0x222   : > { %v5056_v30 = vadd.f32 %v5055_v58, %v5054_v59  ;;  %v5057_v4 = vpop.f32.mrb[46].mxu1 }
 0x223   : > { %v5058_v42 = vpop.f32.mrb[47].mxu1 }
 0x224   : > { %v7224_v1 = vadd.f32 %v5056_v30, %v7169_v23  ;;  %v5059_v41 = vadd.f32 %v5058_v42, %v5057_v4 }
 0x225   : > { %v5124_v19 = vpop.f32.mrb[48].mxu0 }
 0x226   : > { %v7227_v8 = vadd.f32 %v5059_v41, %v7172_v26  ;;  %v5125_v31 = vpop.f32.mrb[49].mxu0 }
 0x227   : > { %v5126_v6 = vadd.f32 %v5125_v31, %v5124_v19  ;;  %v5127_v32 = vpop.f32.mrb[50].mxu0 }
 0x228   : > { %v5060_v7 = vpop.f32.mrb[48].mxu1  ;;  %v5128_v45 = vpop.f32.mrb[51].mxu0 }
 0x229   : > { %v5061_v34 = vpop.f32.mrb[49].mxu1  ;;  %v7230_v36 = vadd.f32 %v5126_v6, %v7120_v22  ;;  %v5129_v48 = vadd.f32 %v5128_v45, %v5127_v32 }
 0x22a   : > { %v5062_v37 = vadd.f32 %v5061_v34, %v5060_v7  ;;  %v5063_v11 = vpop.f32.mrb[50].mxu1 }
 0x22b   : > { %v5064_v53 = vpop.f32.mrb[51].mxu1  ;;  %v7233_v23 = vadd.f32 %v5129_v48, %v7129_v62 }
 0x22c   : > { %v7236_v26 = vadd.f32 %v5062_v37, %v7187_v50  ;;  %v5065_v44 = vadd.f32 %v5064_v53, %v5063_v11 }
 0x22d   : > { %v5130_v51 = vpop.f32.mrb[52].mxu0 }
 0x22e   : > { %v7239_v28 = vadd.f32 %v5065_v44, %v7191_v25  ;;  %v5131_v0 = vpop.f32.mrb[53].mxu0 }
 0x22f   : > { %v5132_v24 = vadd.f32 %v5131_v0, %v5130_v51  ;;  %v5133_v20 = vpop.f32.mrb[54].mxu0 }
 0x230   : > { %v5066_v22 = vpop.f32.mrb[52].mxu1  ;;  %v5134_v3 = vpop.f32.mrb[55].mxu0 }
 0x231   : > { %v5067_v39 = vpop.f32.mrb[53].mxu1  ;;  %v7242_v56 = vadd.f32 %v5132_v24, %v7142_v16  ;;  %v5135_v12 = vadd.f32 %v5134_v3, %v5133_v20 }
 0x232   : > { %v5068_v62 = vadd.f32 %v5067_v39, %v5066_v22  ;;  %v5069_v33 = vpop.f32.mrb[54].mxu1 }
 0x233   : > { %v5070_v59 = vpop.f32.mrb[55].mxu1  ;;  %v7245_v50 = vadd.f32 %v5135_v12, %v7147_v17 }
 0x234   : > { %v7248_v25 = vadd.f32 %v5068_v62, %v7199_v5  ;;  %v5071_v61 = vadd.f32 %v5070_v59, %v5069_v33 }
 0x235   : > { %v5136_v30 = vpop.f32.mrb[56].mxu0 }
 0x236   : > { %v7251_v58 = vadd.f32 %v5071_v61, %v7201_v9  ;;  %v5137_v4 = vpop.f32.mrb[57].mxu0 }
 0x237   : > { %v5138_v42 = vadd.f32 %v5137_v4, %v5136_v30  ;;  %v5139_v41 = vpop.f32.mrb[58].mxu0 }
 0x238   : > { %v5072_v16 = vpop.f32.mrb[56].mxu1  ;;  %v5140_v19 = vpop.f32.mrb[59].mxu0 }
 0x239   : > { %v5073_v31 = vpop.f32.mrb[57].mxu1  ;;  %v7254_v6 = vadd.f32 %v5138_v42, %v7156_v60  ;;  %v5141_v32 = vadd.f32 %v5140_v19, %v5139_v41 }
 0x23a   : > { %v5074_v17 = vadd.f32 %v5073_v31, %v5072_v16  ;;  %v5075_v7 = vpop.f32.mrb[58].mxu1 }
 0x23b   : > { %v5076_v45 = vpop.f32.mrb[59].mxu1  ;;  %v7257_v5 = vadd.f32 %v5141_v32, %v7162_v14 }
 0x23c   : > { %v7260_v9 = vadd.f32 %v5074_v17, %v7209_v27  ;;  %v5077_v34 = vadd.f32 %v5076_v45, %v5075_v7 }
 0x23d   : > { %v5142_v37 = vpop.f32.mrb[60].mxu0 }
 0x23e   : > { %v7263_v48 = vadd.f32 %v5077_v34, %v7211_v43  ;;  %v5143_v11 = vpop.f32.mrb[61].mxu0 }
 0x23f   : > { %v5144_v53 = vadd.f32 %v5143_v11, %v5142_v37  ;;  %v5145_v44 = vpop.f32.mrb[62].mxu0 }
 0x240   : > { %v5078_v60 = vpop.f32.mrb[60].mxu1  ;;  %v5146_v51 = vpop.f32.mrb[63].mxu0 }
 0x241   : > { %v5079_v0 = vpop.f32.mrb[61].mxu1  ;;  %v7266_v24 = vadd.f32 %v5144_v53, %v7176_v55  ;;  %v5147_v20 = vadd.f32 %v5146_v51, %v5145_v44 }
 0x242   : > { %v5080_v14 = vadd.f32 %v5079_v0, %v5078_v60  ;;  %v5081_v22 = vpop.f32.mrb[62].mxu1 }
 0x243   : > { %v5082_v3 = vpop.f32.mrb[63].mxu1  ;;  %v7269_v27 = vadd.f32 %v5147_v20, %v7185_v52 }
 0x244   : > { %v7272_v43 = vadd.f32 %v5080_v14, %v7219_v54  ;;  %v5083_v39 = vadd.f32 %v5082_v3, %v5081_v22 }
 0x245   : > { %v5148_v62 = vpop.f32.mrb[64].mxu0 }
 0x246   : > { %v7275_v12 = vadd.f32 %v5083_v39, %v7221_v63  ;;  %v5149_v33 = vpop.f32.mrb[65].mxu0 }
 0x247   : > { %v5150_v59 = vadd.f32 %v5149_v33, %v5148_v62  ;;  %v5151_v61 = vpop.f32.mrb[66].mxu0 }
 0x248   : > { %v5084_v55 = vpop.f32.mrb[64].mxu1  ;;  %v5152_v30 = vpop.f32.mrb[67].mxu0 }
 0x249   : > { %v5085_v4 = vpop.f32.mrb[65].mxu1  ;;  %v7278_v42 = vadd.f32 %v5150_v59, %v7194_v57  ;;  %v5153_v41 = vadd.f32 %v5152_v30, %v5151_v61 }
 0x24a   : > { %v5086_v52 = vadd.f32 %v5085_v4, %v5084_v55  ;;  %v5087_v16 = vpop.f32.mrb[66].mxu1 }
 0x24b   : > { %v5088_v19 = vpop.f32.mrb[67].mxu1  ;;  %v7281_v54 = vadd.f32 %v5153_v41, %v7197_v29 }
 0x24c   : > { %v7284_v63 = vadd.f32 %v5086_v52, %v7068_v13  ;;  %v5089_v31 = vadd.f32 %v5088_v19, %v5087_v16 }
 0x24d   : > { %v5154_v17 = vpop.f32.mrb[68].mxu0 }
 0x24e   : > { %v7287_v32 = vadd.f32 %v5089_v31, %v7073_v46  ;;  %v5155_v7 = vpop.f32.mrb[69].mxu0 }
 0x24f   : > { %v5156_v45 = vadd.f32 %v5155_v7, %v5154_v17  ;;  %v5157_v34 = vpop.f32.mrb[70].mxu0 }
 0x250   : > { %v5090_v57 = vpop.f32.mrb[68].mxu1  ;;  %v5158_v37 = vpop.f32.mrb[71].mxu0 }
 0x251   : > { %v5091_v11 = vpop.f32.mrb[69].mxu1  ;;  %v7290_v53 = vadd.f32 %v5156_v45, %v7204_v10  ;;  %v5159_v44 = vadd.f32 %v5158_v37, %v5157_v34 }
 0x252   : > { %v5092_v29 = vadd.f32 %v5091_v11, %v5090_v57  ;;  %v5093_v60 = vpop.f32.mrb[70].mxu1 }
 0x253   : > { %v5094_v51 = vpop.f32.mrb[71].mxu1  ;;  %v7293_v13 = vadd.f32 %v5159_v44, %v7207_v21 }
 0x254   : > { %v7296_v46 = vadd.f32 %v5092_v29, %v7080_v38  ;;  %v5095_v0 = vadd.f32 %v5094_v51, %v5093_v60 }
 0x255   : > { %v5160_v14 = vpop.f32.mrb[72].mxu0 }
 0x256   : > { %v7299_v20 = vadd.f32 %v5095_v0, %v7085_v40  ;;  %v5161_v22 = vpop.f32.mrb[73].mxu0 }
 0x257   : > { %v5162_v3 = vadd.f32 %v5161_v22, %v5160_v14  ;;  %v5163_v39 = vpop.f32.mrb[74].mxu0 }
 0x258   : > { %v5096_v10 = vpop.f32.mrb[72].mxu1  ;;  %v5164_v62 = vpop.f32.mrb[75].mxu0 }
 0x259   : > { %v5097_v33 = vpop.f32.mrb[73].mxu1  ;;  %v7302_v59 = vadd.f32 %v5162_v3, %v7214_v15  ;;  %v5165_v61 = vadd.f32 %v5164_v62, %v5163_v39 }
 0x25a   : > { %v5098_v21 = vadd.f32 %v5097_v33, %v5096_v10  ;;  %v5099_v55 = vpop.f32.mrb[74].mxu1 }
 0x25b   : > { %v5100_v30 = vpop.f32.mrb[75].mxu1  ;;  %v7305_v38 = vadd.f32 %v5165_v61, %v7217_v49 }
 0x25c   : > { %v7308_v40 = vadd.f32 %v5098_v21, %v7094_v47  ;;  %v5101_v4 = vadd.f32 %v5100_v30, %v5099_v55 }
 0x25d   : > { %v5166_v52 = vpop.f32.mrb[76].mxu0 }
 0x25e   : > { %v7311_v41 = vadd.f32 %v5101_v4, %v7098_v2  ;;  %v5167_v16 = vpop.f32.mrb[77].mxu0 }
 0x25f   : > { %v5168_v19 = vadd.f32 %v5167_v16, %v5166_v52  ;;  %v5169_v31 = vpop.f32.mrb[78].mxu0 }
 0x260   : > { %v5102_v15 = vpop.f32.mrb[76].mxu1  ;;  %v5170_v17 = vpop.f32.mrb[79].mxu0 }
 0x261   : > { %v5103_v7 = vpop.f32.mrb[77].mxu1  ;;  %v7314_v45 = vadd.f32 %v5168_v19, %v7224_v1  ;;  %v5171_v34 = vadd.f32 %v5170_v17, %v5169_v31 }
 0x262   : > { %v5104_v49 = vadd.f32 %v5103_v7, %v5102_v15  ;;  %v5105_v57 = vpop.f32.mrb[78].mxu1 }
 0x263   : > { %v5106_v37 = vpop.f32.mrb[79].mxu1  ;;  %v7317_v47 = vadd.f32 %v5171_v34, %v7227_v8  ;;  %v7346_v34 = vpop.permute.xlu1 %3714 }
 0x264   : > { %v7320_v2 = vadd.f32 %v5104_v49, %v7106_v35  ;;  %v5107_v11 = vadd.f32 %v5106_v37, %v5105_v57  ;;  %v7351_v37 = vpop.permute.xlu0 %5512 }
 0x265   : > { %v5172_v29 = vpop.f32.mrb[80].mxu0 }
 0x266   : > { %v7323_v44 = vadd.f32 %v5107_v11, %v7110_v18  ;;  %v5173_v60 = vpop.f32.mrb[81].mxu0 }
 0x267   : > { %v5174_v51 = vadd.f32 %v5173_v60, %v5172_v29  ;;  %v5175_v0 = vpop.f32.mrb[82].mxu0 }
 0x268   : > { %v5236_v1 = vpop.f32.mrb[80].mxu1  ;;  %v5176_v14 = vpop.f32.mrb[83].mxu0 }
 0x269   : > { %v5237_v22 = vpop.f32.mrb[81].mxu1  ;;  %v7326_v3 = vadd.f32 %v5174_v51, %v7236_v26  ;;  %v5177_v39 = vadd.f32 %v5176_v14, %v5175_v0 }
 0x26a   : > { %v5238_v8 = vadd.f32 %v5237_v22, %v5236_v1  ;;  %v5239_v10 = vpop.f32.mrb[82].mxu1 }
 0x26b   : > { %v5240_v62 = vpop.f32.mrb[83].mxu1  ;;  %v7329_v35 = vadd.f32 %v5177_v39, %v7239_v28 }
 0x26c   : > { %v5241_v33 = vadd.f32 %v5240_v62, %v5239_v10  ;;  %v7332_v18 = vadd.f32 %v5238_v8, %v7230_v36  ;;  %v7362_v10 = vpop.permute.xlu1 %3724 }
 0x26d   : > { %v5178_v61 = vpop.f32.mrb[84].mxu0 }
 0x26e   : > { %v7335_v21 = vadd.f32 %v5241_v33, %v7233_v23  ;;  %v5179_v55 = vpop.f32.mrb[85].mxu0 }
 0x26f   : > { %v5180_v30 = vadd.f32 %v5179_v55, %v5178_v61  ;;  %v5181_v4 = vpop.f32.mrb[86].mxu0  ;;  %v7367_v61 = vpop.permute.xlu0 %3719 }
 0x270   : > { %v5242_v26 = vpop.f32.mrb[84].mxu1  ;;  %v5182_v52 = vpop.f32.mrb[87].mxu0 }
 0x271   : > { %v5243_v16 = vpop.f32.mrb[85].mxu1  ;;  %v7338_v19 = vadd.f32 %v5180_v30, %v7248_v25  ;;  %v5183_v31 = vadd.f32 %v5182_v52, %v5181_v4 }
 0x272   : > { %v5244_v28 = vadd.f32 %v5243_v16, %v5242_v26  ;;  %v5245_v15 = vpop.f32.mrb[86].mxu1 }
 0x273   : > { %v5246_v17 = vpop.f32.mrb[87].mxu1  ;;  %v7341_v36 = vadd.f32 %v5183_v31, %v7251_v58 }
 0x274   : > { %v5247_v7 = vadd.f32 %v5246_v17, %v5245_v15  ;;  %v7344_v23 = vadd.f32 %v5244_v28, %v7242_v56 }
 0x275   : > { %v5184_v49 = vpop.f32.mrb[88].mxu0 }
 0x276   : > { %v7349_v57 = vadd.f32 %v5247_v7, %v7245_v50  ;;  %v5185_v25 = vpop.f32.mrb[89].mxu0  ;;  %v7378_v7 = vpop.permute.xlu1 %3734 }
 0x277   : > { %v5186_v11 = vadd.f32 %v5185_v25, %v5184_v49  ;;  %v5187_v29 = vpop.f32.mrb[90].mxu0 }
 0x278   : > { %v5248_v60 = vpop.f32.mrb[88].mxu1  ;;  %v5188_v51 = vpop.f32.mrb[91].mxu0 }
 0x279   : > { %v5249_v0 = vpop.f32.mrb[89].mxu1  ;;  %v7354_v58 = vadd.f32 %v5186_v11, %v7260_v9  ;;  %v5189_v1 = vadd.f32 %v5188_v51, %v5187_v29  ;;  %v7383_v11 = vpop.permute.xlu0 %3729 }
 0x27a   : > { %v5250_v56 = vadd.f32 %v5249_v0, %v5248_v60  ;;  %v5251_v14 = vpop.f32.mrb[90].mxu1 }
 0x27b   : > { %v5252_v22 = vpop.f32.mrb[91].mxu1  ;;  %v7357_v39 = vadd.f32 %v5189_v1, %v7263_v48 }
 0x27c   : > { %v5253_v50 = vadd.f32 %v5252_v22, %v5251_v14  ;;  %v7360_v8 = vadd.f32 %v5250_v56, %v7254_v6 }
 0x27d   : > { %v5190_v62 = vpop.f32.mrb[92].mxu0 }
 0x27e   : > { %v7365_v33 = vadd.f32 %v5253_v50, %v7257_v5  ;;  %v5191_v9 = vpop.f32.mrb[93].mxu0 }
 0x27f   : > { %v5192_v55 = vadd.f32 %v5191_v9, %v5190_v62  ;;  %v5193_v30 = vpop.f32.mrb[94].mxu0  ;;  %v7394_v9 = vpop.permute.xlu1 %3744 }
 0x280   : > { %v5254_v4 = vpop.f32.mrb[92].mxu1  ;;  %v5194_v26 = vpop.f32.mrb[95].mxu0 }
 0x281   : > { %v5255_v52 = vpop.f32.mrb[93].mxu1  ;;  %v7370_v48 = vadd.f32 %v5192_v55, %v7272_v43  ;;  %v5195_v16 = vadd.f32 %v5194_v26, %v5193_v30 }
 0x282   : > { %v5256_v6 = vadd.f32 %v5255_v52, %v5254_v4  ;;  %v5257_v31 = vpop.f32.mrb[94].mxu1  ;;  %v7399_v4 = vpop.permute.xlu0 %3739 }
 0x283   : > { %v5258_v28 = vpop.f32.mrb[95].mxu1  ;;  %v7373_v15 = vadd.f32 %v5195_v16, %v7275_v12 }
 0x284   : > { %v5259_v5 = vadd.f32 %v5258_v28, %v5257_v31  ;;  %v7376_v17 = vadd.f32 %v5256_v6, %v7266_v24 }
 0x285   : > { %v5196_v49 = vpop.f32.mrb[96].mxu0 }
 0x286   : > { %v7381_v25 = vadd.f32 %v5259_v5, %v7269_v27  ;;  %v5197_v43 = vpop.f32.mrb[97].mxu0 }
 0x287   : > { %v5198_v29 = vadd.f32 %v5197_v43, %v5196_v49  ;;  %v5199_v60 = vpop.f32.mrb[98].mxu0 }
 0x288   : > { %v5260_v51 = vpop.f32.mrb[96].mxu1  ;;  %v5200_v0 = vpop.f32.mrb[99].mxu0 }
 0x289   : > { %v5261_v1 = vpop.f32.mrb[97].mxu1  ;;  %v7386_v12 = vadd.f32 %v5198_v29, %v7284_v63  ;;  %v5201_v56 = vadd.f32 %v5200_v0, %v5199_v60  ;;  %v7410_v60 = vpop.permute.xlu1 %3754 }
 0x28a   : > { %v5262_v24 = vadd.f32 %v5261_v1, %v5260_v51  ;;  %v5263_v14 = vpop.f32.mrb[98].mxu1  ;;  %v7415_v1 = vpop.permute.xlu0 %3749 }
 0x28b   : > { %v5264_v22 = vpop.f32.mrb[99].mxu1  ;;  %v7389_v50 = vadd.f32 %v5201_v56, %v7287_v32 }
 0x28c   : > { %v5265_v27 = vadd.f32 %v5264_v22, %v5263_v14  ;;  %v7392_v62 = vadd.f32 %v5262_v24, %v7278_v42 }
 0x28d   : > { %v5202_v55 = vpop.f32.mrb[100].mxu0 }
 0x28e   : > { %v7397_v30 = vadd.f32 %v5265_v27, %v7281_v54  ;;  %v5203_v63 = vpop.f32.mrb[101].mxu0 }
 0x28f   : > { %v5204_v26 = vadd.f32 %v5203_v63, %v5202_v55  ;;  %v5205_v52 = vpop.f32.mrb[102].mxu0 }
 0x290   : > { %v5266_v16 = vpop.f32.mrb[100].mxu1  ;;  %v5206_v6 = vpop.f32.mrb[103].mxu0 }
 0x291   : > { %v5267_v31 = vpop.f32.mrb[101].mxu1  ;;  %v7402_v32 = vadd.f32 %v5204_v26, %v7296_v46  ;;  %v5207_v28 = vadd.f32 %v5206_v6, %v5205_v52  ;;  %v7426_v6 = vpop.permute.xlu1 %3764 }
 0x292   : > { %v5268_v42 = vadd.f32 %v5267_v31, %v5266_v16  ;;  %v5269_v5 = vpop.f32.mrb[102].mxu1 }
 0x293   : > { %v5270_v49 = vpop.f32.mrb[103].mxu1  ;;  %v7405_v43 = vadd.f32 %v5207_v28, %v7299_v20 }
 0x294   : > { %v5271_v54 = vadd.f32 %v5270_v49, %v5269_v5  ;;  %v7408_v29 = vadd.f32 %v5268_v42, %v7290_v53  ;;  %v7431_v42 = vpop.permute.xlu0 %3759 }
 0x295   : > { %v5208_v51 = vpop.f32.mrb[104].mxu0 }
 0x296   : > { %v7413_v0 = vadd.f32 %v5271_v54, %v7293_v13  ;;  %v5209_v46 = vpop.f32.mrb[105].mxu0 }
 0x297   : > { %v5210_v56 = vadd.f32 %v5209_v46, %v5208_v51  ;;  %v5211_v24 = vpop.f32.mrb[106].mxu0 }
 0x298   : > { %v5272_v14 = vpop.f32.mrb[104].mxu1  ;;  %v5212_v22 = vpop.f32.mrb[107].mxu0 }
 0x299   : > { %v5273_v27 = vpop.f32.mrb[105].mxu1  ;;  %v7418_v20 = vadd.f32 %v5210_v56, %v7308_v40  ;;  %v5213_v55 = vadd.f32 %v5212_v22, %v5211_v24 }
 0x29a   : > { %v5274_v53 = vadd.f32 %v5273_v27, %v5272_v14  ;;  %v5275_v63 = vpop.f32.mrb[106].mxu1 }
 0x29b   : > { %v5276_v26 = vpop.f32.mrb[107].mxu1  ;;  %v7421_v52 = vadd.f32 %v5213_v55, %v7311_v41  ;;  %v7442_v55 = vpop.permute.xlu1 %3774 }
 0x29c   : > { %v5277_v13 = vadd.f32 %v5276_v26, %v5275_v63  ;;  %v7424_v16 = vadd.f32 %v5274_v53, %v7302_v59  ;;  %v7447_v26 = vpop.permute.xlu0 %3769 }
 0x29d   : > { %v5214_v31 = vpop.f32.mrb[108].mxu0 }
 0x29e   : > { %v7429_v28 = vadd.f32 %v5277_v13, %v7305_v38  ;;  %v5215_v40 = vpop.f32.mrb[109].mxu0 }
 0x29f   : > { %v5216_v5 = vadd.f32 %v5215_v40, %v5214_v31  ;;  %v5217_v49 = vpop.f32.mrb[110].mxu0  ;;  %v5514_v31 = vunpack.i.l.bf16 %v7351_v37 }
 0x2a0   : > { %v5278_v54 = vpop.f32.mrb[108].mxu1  ;;  %v5218_v51 = vpop.f32.mrb[111].mxu0 }
 0x2a1   : > { %v5279_v46 = vpop.f32.mrb[109].mxu1  ;;  %v7434_v41 = vadd.f32 %v5216_v5, %v7320_v2  ;;  %v5219_v56 = vadd.f32 %v5218_v51, %v5217_v49  ;;  %v5515_v51 = vunpack.i.h.bf16 %v7351_v37 }
 0x2a2   : > { %v5280_v59 = vadd.f32 %v5279_v46, %v5278_v54  ;;  %v5281_v24 = vpop.f32.mrb[110].mxu1 }
 0x2a3   : > { %v5282_v14 = vpop.f32.mrb[111].mxu1  ;;  %v7437_v22 = vadd.f32 %v5219_v56, %v7323_v44 }
 0x2a4   : > { %v5283_v38 = vadd.f32 %v5282_v14, %v5281_v24  ;;  %v7440_v27 = vadd.f32 %v5280_v59, %v7314_v45 }
 0x2a5   : > { %v5374_v53 = vpop.f32.mrb[112].mxu0 }
 0x2a6   : > { %v7445_v63 = vadd.f32 %v5283_v38, %v7317_v47  ;;  %v3520_v2 = vadd.f32 %v5374_v53, %v7344_v23  ;;  %v3511_v13 = vpop.f32.mrb[113].mxu0  ;;  %v7466_v53 = vpop.permute.xlu1 %3784 }
 0x2a7   : > { %v3512_v44 = vadd.f32 %v3511_v13, %v7332_v18  ;;  %v5375_v40 = vpop.f32.mrb[114].mxu0 }
 0x2a8   : > { %v5284_v5 = vpop.f32.mrb[112].mxu1  ;;  %v3523_v45 = vadd.f32 %v5375_v40, %v7349_v57  ;;  %v3514_v49 = vpop.f32.mrb[115].mxu0  ;;  %v3864_v23 = vmul.f32 %v7346_v34, %v3520_v2 }
 0x2a9   : > { %v5285_v54 = vpop.f32.mrb[113].mxu1  ;;  %v3862_v47 = vmul.f32 %v5514_v31, %v3512_v44  ;;  %v3515_v46 = vadd.f32 %v3514_v49, %v7335_v21  ;;  %v7471_v44 = vpop.permute.xlu0 %3779 }
 0x2aa   : > { %v5286_v56 = vadd.f32 %v5285_v54, %v5284_v5  ;;  %v5287_v59 = vpop.f32.mrb[114].mxu1  ;;  %v3865_v24 = vmul.f32 %v7367_v61, %v3523_v45  ;;  %v4093_v45 = vmul.f32 %v3864_v23, %v3864_v23 }
 0x2ab   : > { %v5288_v14 = vpop.f32.mrb[115].mxu1  ;;  %v3863_v18 = vmul.f32 %v5515_v51, %v3515_v46  ;;  %v4091_v21 = vmul.f32 %v3862_v47, %v3862_v47 }
 0x2ac   : > { %v5289_v57 = vadd.f32 %v5288_v14, %v5287_v59  ;;  %v7464_v37 = vadd.f32 %v5286_v56, %v7326_v3  ;;  %v4752_v38 = vpack.c.bf16 %v3865_v24, %v3864_v23 }
 0x2ad   : > { %v4747_v34 = vpack.c.bf16 %v3863_v18, %v3862_v47  ;;  %v4054_v2 = vadd.f32 %v3863_v18, %v3862_v47  ;;  %v4092_v61 = vmul.f32 %v3863_v18, %v3863_v18  ;;  %v5378_v13 = vpop.f32.mrb[116].mxu0  ;;  %v4094_v47 = vmul.f32 %v3865_v24, %v3865_v24 }
 0x2ae   : > { %v7469_v31 = vadd.f32 %v5289_v57, %v7329_v35  ;;  %4869 = vst [vmem:[%s7461_s12 + $0x8] sm:$0xff] %v4752_v38   ;;  %v3536_v40 = vadd.f32 %v5378_v13, %v7376_v17  ;;  %v3527_v5 = vpop.f32.mrb[117].mxu0 }
 0x2af   : > { %4748 = vst [vmem:[%s7461_s12] sm:$0xff] %v4747_v34   ;;  %v4055_v3 = vadd.f32 %v4054_v2, %v3864_v23  ;;  %v4123_v49 = vadd.f32 %v4092_v61, %v4091_v21  ;;  %v3528_v54 = vadd.f32 %v3527_v5, %v7360_v8  ;;  %v5379_v51 = vpop.f32.mrb[118].mxu0 }
 0x2b0   : > { %v5290_v46 = vpop.f32.mrb[116].mxu1  ;;  %v3539_v56 = vadd.f32 %v5379_v51, %v7381_v25  ;;  %v3530_v59 = vpop.f32.mrb[119].mxu0  ;;  %v3868_v34 = vmul.f32 %v7378_v7, %v3536_v40 }
 0x2b1   : > { %v5291_v35 = vpop.f32.mrb[117].mxu1  ;;  %v4124_v14 = vadd.f32 %v4123_v49, %v4093_v45  ;;  %v3866_v18 = vmul.f32 %v7362_v10, %v3528_v54  ;;  %v4056_v57 = vadd.f32 %v4055_v3, %v3865_v24  ;;  %v3531_v17 = vadd.f32 %v3530_v59, %v7365_v33  ;;  %v7486_v33 = vpop.permute.xlu1 %3794 }
 0x2b2   : > { %v5293_v38 = vpop.f32.mrb[118].mxu1  ;;  %v3869_v23 = vmul.f32 %v7399_v4, %v3539_v56  ;;  %v5292_v21 = vadd.f32 %v5291_v35, %v5290_v46  ;;  %v7488_v49 = vpop.permute.xlu0 %3789  ;;  %v4097_v46 = vmul.f32 %v3868_v34, %v3868_v34 }
 0x2b3   : > { %v5294_v8 = vpop.f32.mrb[119].mxu1  ;;  %v4057_v2 = vadd.f32 %v4056_v57, %v3866_v18  ;;  %v4095_v61 = vmul.f32 %v3866_v18, %v3866_v18  ;;  %v4125_v13 = vadd.f32 %v4124_v14, %v4094_v47  ;;  %v3867_v25 = vmul.f32 %v7383_v11, %v3531_v17 }
 0x2b4   : > { %v4762_v5 = vpack.c.bf16 %v3869_v23, %v3868_v34  ;;  %v5295_v45 = vadd.f32 %v5294_v8, %v5293_v38  ;;  %v7484_v10 = vadd.f32 %v5292_v21, %v7338_v19  ;;  %v4098_v14 = vmul.f32 %v3869_v23, %v3869_v23 }
 0x2b5   : > { %v4126_v24 = vadd.f32 %v4125_v13, %v4095_v61  ;;  %v4757_v7 = vpack.c.bf16 %v3867_v25, %v3866_v18  ;;  %v4058_v40 = vadd.f32 %v4057_v2, %v3867_v25  ;;  %v4096_v4 = vmul.f32 %v3867_v25, %v3867_v25  ;;  %v5382_v3 = vpop.f32.mrb[120].mxu0 }
 0x2b6   : > { %4871 = vst [vmem:[%s7461_s12 + $0x18] sm:$0xff] %v4762_v5   ;;  %v3552_v54 = vadd.f32 %v5382_v3, %v7408_v29  ;;  %v3543_v51 = vpop.f32.mrb[121].mxu0  ;;  %v7493_v11 = vadd.f32 %v5295_v45, %v7341_v36 }
 0x2b7   : > { %4870 = vst [vmem:[%s7461_s12 + $0x10] sm:$0xff] %v4757_v7   ;;  %v4059_v19 = vadd.f32 %v4058_v40, %v3868_v34  ;;  %v4127_v47 = vadd.f32 %v4126_v24, %v4096_v4  ;;  %v3544_v56 = vadd.f32 %v3543_v51, %v7392_v62  ;;  %v5383_v59 = vpop.f32.mrb[122].mxu0  ;;  %v3800_v4 = vpop.permute.xlu0 %3799 }
 0x2b8   : > { %v5296_v35 = vpop.f32.mrb[120].mxu1  ;;  %v3555_v18 = vadd.f32 %v5383_v59, %v7413_v0  ;;  %v3546_v57 = vpop.f32.mrb[123].mxu0  ;;  %v3872_v2 = vmul.f32 %v7410_v60, %v3552_v54 }
 0x2b9   : > { %v5297_v17 = vpop.f32.mrb[121].mxu1  ;;  %v4128_v38 = vadd.f32 %v4127_v47, %v4097_v46  ;;  %v3870_v29 = vmul.f32 %v7394_v9, %v3544_v56  ;;  %v4060_v21 = vadd.f32 %v4059_v19, %v3869_v23  ;;  %v3547_v36 = vadd.f32 %v3546_v57, %v7397_v30  ;;  %v7506_v30 = vpop.permute.xlu1 %3804 }
 0x2ba   : > { %v5299_v8 = vpop.f32.mrb[122].mxu1  ;;  %v3873_v34 = vmul.f32 %v7431_v42, %v3555_v18  ;;  %v5298_v61 = vadd.f32 %v5297_v17, %v5296_v35  ;;  %v4101_v51 = vmul.f32 %v3872_v2, %v3872_v2 }
 0x2bb   : > { %v5300_v62 = vpop.f32.mrb[123].mxu1  ;;  %v4061_v13 = vadd.f32 %v4060_v21, %v3870_v29  ;;  %v4099_v25 = vmul.f32 %v3870_v29, %v3870_v29  ;;  %v4129_v5 = vadd.f32 %v4128_v38, %v4098_v14  ;;  %v3871_v0 = vmul.f32 %v7415_v1, %v3547_v36 }
 0x2bc   : > { %v4772_v45 = vpack.c.bf16 %v3873_v34, %v3872_v2  ;;  %v5301_v24 = vadd.f32 %v5300_v62, %v5299_v8  ;;  %v7504_v9 = vadd.f32 %v5298_v61, %v7354_v58  ;;  %v4102_v59 = vmul.f32 %v3873_v34, %v3873_v34 }
 0x2bd   : > { %v4130_v23 = vadd.f32 %v4129_v5, %v4099_v25  ;;  %v4767_v60 = vpack.c.bf16 %v3871_v0, %v3870_v29  ;;  %v4062_v7 = vadd.f32 %v4061_v13, %v3871_v0  ;;  %v4100_v42 = vmul.f32 %v3871_v0, %v3871_v0  ;;  %v5386_v40 = vpop.f32.mrb[124].mxu0  ;;  %v7524_v0 = vpop.permute.xlu0 %3809 }
 0x2be   : > { %4873 = vst [vmem:[%s7461_s12 + $0x28] sm:$0xff] %v4772_v45   ;;  %v3568_v3 = vadd.f32 %v5386_v40, %v7440_v27  ;;  %v3559_v54 = vpop.f32.mrb[125].mxu0  ;;  %v7511_v1 = vadd.f32 %v5301_v24, %v7357_v39 }
 0x2bf   : > { %4872 = vst [vmem:[%s7461_s12 + $0x20] sm:$0xff] %v4767_v60   ;;  %v4063_v46 = vadd.f32 %v4062_v7, %v3872_v2  ;;  %v4131_v58 = vadd.f32 %v4130_v23, %v4100_v42  ;;  %v3560_v19 = vadd.f32 %v3559_v54, %v7424_v16  ;;  %v5387_v47 = vpop.f32.mrb[126].mxu0 }
 0x2c0   : > { %v5302_v56 = vpop.f32.mrb[124].mxu1  ;;  %v3571_v35 = vadd.f32 %v5387_v47, %v7445_v63  ;;  %v3562_v14 = vpop.f32.mrb[127].mxu0  ;;  %v3876_v29 = vmul.f32 %v7442_v55, %v3568_v3 }
 0x2c1   : > { %v5303_v18 = vpop.f32.mrb[125].mxu1  ;;  %v4132_v57 = vadd.f32 %v4131_v58, %v4101_v51  ;;  %v3874_v27 = vmul.f32 %v7426_v6, %v3560_v19  ;;  %v4064_v17 = vadd.f32 %v4063_v46, %v3873_v34  ;;  %v3563_v39 = vadd.f32 %v3562_v14, %v7429_v28  ;;  %v7522_v34 = vpop.permute.xlu1 %3814 }
 0x2c2   : > { %v5305_v38 = vpop.f32.mrb[126].mxu1  ;;  %v3877_v21 = vmul.f32 %v7471_v44, %v3571_v35  ;;  %v5304_v36 = vadd.f32 %v5303_v18, %v5302_v56  ;;  %v4105_v23 = vmul.f32 %v3876_v29, %v3876_v29 }
 0x2c3   : > { %v5306_v16 = vpop.f32.mrb[127].mxu1  ;;  %v4065_v8 = vadd.f32 %v4064_v17, %v3874_v27  ;;  %v4103_v2 = vmul.f32 %v3874_v27, %v3874_v27  ;;  %v4133_v61 = vadd.f32 %v4132_v57, %v4102_v59  ;;  %v3875_v63 = vmul.f32 %v7447_v26, %v3563_v39  ;;  %v3820_v39 = vpop.permute.xlu0 %3819 }
 0x2c4   : > { %v4782_v62 = vpack.c.bf16 %v3877_v21, %v3876_v29  ;;  %v5307_v13 = vadd.f32 %v5306_v16, %v5305_v38  ;;  %v3439_v6 = vadd.f32 %v5304_v36, %v7370_v48  ;;  %v4106_v3 = vmul.f32 %v3877_v21, %v3877_v21 }
 0x2c5   : > { %v4134_v28 = vadd.f32 %v4133_v61, %v4103_v2  ;;  %v4777_v25 = vpack.c.bf16 %v3875_v63, %v3874_v27  ;;  %v4066_v55 = vadd.f32 %v4065_v8, %v3875_v63  ;;  %v4104_v5 = vmul.f32 %v3875_v63, %v3875_v63  ;;  %v5390_v44 = vpop.f32.mrb[128].mxu0 }
 0x2c6   : > { %4875 = vst [vmem:[%s7461_s12 + $0x38] sm:$0xff] %v4782_v62   ;;  %v3584_v45 = vadd.f32 %v5390_v44, %v7484_v10  ;;  %v3575_v24 = vpop.f32.mrb[129].mxu0  ;;  %v3442_v26 = vadd.f32 %v5307_v13, %v7373_v15 }
 0x2c7   : > { %4874 = vst [vmem:[%s7461_s12 + $0x30] sm:$0xff] %v4777_v25   ;;  %v4067_v60 = vadd.f32 %v4066_v55, %v3876_v29  ;;  %v4135_v7 = vadd.f32 %v4134_v28, %v4104_v5  ;;  %v3576_v48 = vadd.f32 %v3575_v24, %v7464_v37  ;;  %v5391_v42 = vpop.f32.mrb[130].mxu0 }
 0x2c8   : > { %v5308_v40 = vpop.f32.mrb[128].mxu1  ;;  %v3587_v54 = vadd.f32 %v5391_v42, %v7493_v11  ;;  %v3578_v51 = vpop.f32.mrb[131].mxu0  ;;  %v3880_v56 = vmul.f32 %v7486_v33, %v3584_v45 }
 0x2c9   : > { %v5309_v46 = vpop.f32.mrb[129].mxu1  ;;  %v4136_v58 = vadd.f32 %v4135_v7, %v4105_v23  ;;  %v3878_v19 = vmul.f32 %v7466_v53, %v3576_v48  ;;  %v4068_v10 = vadd.f32 %v4067_v60, %v3877_v21  ;;  %v3579_v47 = vadd.f32 %v3578_v51, %v7469_v31 }
 0x2ca   : > { %v5311_v15 = vpop.f32.mrb[130].mxu1  ;;  %v3881_v59 = vmul.f32 %v3800_v4, %v3587_v54  ;;  %v5310_v35 = vadd.f32 %v5309_v46, %v5308_v40  ;;  %v3825_v4 = vpop.permute.xlu1 %3824  ;;  %v4109_v2 = vmul.f32 %v3880_v56, %v3880_v56 }
 0x2cb   : > { %v5312_v37 = vpop.f32.mrb[131].mxu1  ;;  %v4069_v14 = vadd.f32 %v4068_v10, %v3878_v19  ;;  %v4107_v18 = vmul.f32 %v3878_v19, %v3878_v19  ;;  %v4137_v57 = vadd.f32 %v4136_v58, %v4106_v3  ;;  %v3879_v11 = vmul.f32 %v7488_v49, %v3579_v47 }
 0x2cc   : > { %v4792_v27 = vpack.c.bf16 %v3881_v59, %v3880_v56  ;;  %v5313_v17 = vadd.f32 %v5312_v37, %v5311_v15  ;;  %v3447_v53 = vadd.f32 %v5310_v35, %v7386_v12  ;;  %v4110_v13 = vmul.f32 %v3881_v59, %v3881_v59 }
 0x2cd   : > { %v4138_v38 = vadd.f32 %v4137_v57, %v4107_v18  ;;  %v4787_v31 = vpack.c.bf16 %v3879_v11, %v3878_v19  ;;  %v4070_v29 = vadd.f32 %v4069_v14, %v3879_v11  ;;  %v4108_v21 = vmul.f32 %v3879_v11, %v3879_v11  ;;  %v5394_v33 = vpop.f32.mrb[132].mxu0 }
 0x2ce   : > { %4877 = vst [vmem:[%s7461_s12 + $0x48] sm:$0xff] %v4792_v27   ;;  %v3600_v36 = vadd.f32 %v5394_v33, %v3439_v6  ;;  %v3591_v16 = vpop.f32.mrb[133].mxu0  ;;  %v3450_v8 = vadd.f32 %v5313_v17, %v7389_v50  ;;  %v3835_v19 = vpop.permute.xlu1 %3834 }
 0x2cf   : > { %4876 = vst [vmem:[%s7461_s12 + $0x40] sm:$0xff] %v4787_v31   ;;  %v4071_v49 = vadd.f32 %v4070_v29, %v3880_v56  ;;  %v4139_v61 = vadd.f32 %v4138_v38, %v4108_v21  ;;  %v3592_v63 = vadd.f32 %v3591_v16, %v7504_v9  ;;  %v5395_v62 = vpop.f32.mrb[134].mxu0  ;;  %v3830_v9 = vpop.permute.xlu0 %3829 }
 0x2d0   : > { %v5314_v12 = vpop.f32.mrb[132].mxu1  ;;  %v3603_v28 = vadd.f32 %v5395_v62, %v3442_v26  ;;  %v3594_v25 = vpop.f32.mrb[135].mxu0  ;;  %v3884_v50 = vmul.f32 %v7522_v34, %v3600_v36 }
 0x2d1   : > { %v5315_v55 = vpop.f32.mrb[133].mxu1  ;;  %v4140_v5 = vadd.f32 %v4139_v61, %v4109_v2  ;;  %v3882_v44 = vmul.f32 %v7506_v30, %v3592_v63  ;;  %v4072_v45 = vadd.f32 %v4071_v49, %v3881_v59  ;;  %v3595_v6 = vadd.f32 %v3594_v25, %v7511_v1 }
 0x2d2   : > { %v5317_v24 = vpop.f32.mrb[134].mxu1  ;;  %v3885_v23 = vmul.f32 %v3820_v39, %v3603_v28  ;;  %v5316_v60 = vadd.f32 %v5315_v55, %v5314_v12  ;;  %v4113_v56 = vmul.f32 %v3884_v50, %v3884_v50  ;;  %v3845_v25 = vpop.permute.xlu1 %3844 }
 0x2d3   : > { %v5318_v7 = vpop.f32.mrb[135].mxu1  ;;  %v4073_v48 = vadd.f32 %v4072_v45, %v3882_v44  ;;  %v4111_v42 = vmul.f32 %v3882_v44, %v3882_v44  ;;  %v4141_v40 = vadd.f32 %v4140_v5, %v4110_v13  ;;  %v3883_v26 = vmul.f32 %v7524_v0, %v3595_v6  ;;  %v3840_v27 = vpop.permute.xlu0 %3839 }
 0x2d4   : > { %v4802_v3 = vpack.c.bf16 %v3885_v23, %v3884_v50  ;;  %v5319_v54 = vadd.f32 %v5318_v7, %v5317_v24  ;;  %v3455_v30 = vadd.f32 %v5316_v60, %v7402_v32  ;;  %v4114_v18 = vmul.f32 %v3885_v23, %v3885_v23 }
 0x2d5   : > { %v4142_v51 = vadd.f32 %v4141_v40, %v4111_v42  ;;  %v4797_v1 = vpack.c.bf16 %v3883_v26, %v3882_v44  ;;  %v4074_v46 = vadd.f32 %v4073_v48, %v3883_v26  ;;  %v4112_v58 = vmul.f32 %v3883_v26, %v3883_v26  ;;  %v5398_v34 = vpop.f32.mrb[136].mxu0 }
 0x2d6   : > { %4879 = vst [vmem:[%s7461_s12 + $0x58] sm:$0xff] %v4802_v3   ;;  %v3616_v10 = vadd.f32 %v5398_v34, %v3455_v30  ;;  %v3607_v47 = vpop.f32.mrb[137].mxu0  ;;  %v3458_v15 = vadd.f32 %v5319_v54, %v7405_v43 }
 0x2d7   : > { %4878 = vst [vmem:[%s7461_s12 + $0x50] sm:$0xff] %v4797_v1   ;;  %v4075_v59 = vadd.f32 %v4074_v46, %v3884_v50  ;;  %v4143_v35 = vadd.f32 %v4142_v51, %v4112_v58  ;;  %v3608_v0 = vadd.f32 %v3607_v47, %v3447_v53  ;;  %v5399_v37 = vpop.f32.mrb[138].mxu0  ;;  %v3850_v3 = vpop.permute.xlu0 %3849 }
 0x2d8   : > { %v5320_v14 = vpop.f32.mrb[136].mxu1  ;;  %v3619_v32 = vadd.f32 %v5399_v37, %v3458_v15  ;;  %v3610_v57 = vpop.f32.mrb[139].mxu0  ;;  %v3888_v21 = vmul.f32 %v3835_v19, %v3616_v10 }
 0x2d9   : > { %v5321_v11 = vpop.f32.mrb[137].mxu1  ;;  %v4144_v17 = vadd.f32 %v4143_v35, %v4113_v56  ;;  %v3886_v39 = vmul.f32 %v3825_v4, %v3608_v0  ;;  %v4076_v38 = vadd.f32 %v4075_v59, %v3885_v23  ;;  %v3611_v31 = vadd.f32 %v3610_v57, %v3450_v8  ;;  %v3855_v35 = vpop.permute.xlu1 %3854 }
 0x2da   : > { %v5323_v29 = vpop.f32.mrb[138].mxu1  ;;  %v3889_v33 = vmul.f32 %v3840_v27, %v3619_v32  ;;  %v5322_v43 = vadd.f32 %v5321_v11, %v5320_v14  ;;  %v4117_v44 = vmul.f32 %v3888_v21, %v3888_v21 }
 0x2db   : > { %v5324_v36 = vpop.f32.mrb[139].mxu1  ;;  %v4077_v16 = vadd.f32 %v4076_v38, %v3886_v39  ;;  %v4115_v2 = vmul.f32 %v3886_v39, %v3886_v39  ;;  %v4145_v53 = vadd.f32 %v4144_v17, %v4114_v18  ;;  %v3887_v49 = vmul.f32 %v3830_v9, %v3611_v31  ;;  %v3860_v18 = vpop.permute.xlu0 %3859 }
 0x2dc   : > { %v4812_v61 = vpack.c.bf16 %v3889_v33, %v3888_v21  ;;  %v5325_v63 = vadd.f32 %v5324_v36, %v5323_v29  ;;  %v3463_v62 = vadd.f32 %v5322_v43, %v7418_v20  ;;  %v4118_v60 = vmul.f32 %v3889_v33, %v3889_v33 }
 0x2dd   : > { %v4146_v12 = vadd.f32 %v4145_v53, %v4115_v2  ;;  %v4807_v13 = vpack.c.bf16 %v3887_v49, %v3886_v39  ;;  %v4078_v4 = vadd.f32 %v4077_v16, %v3887_v49  ;;  %v4116_v28 = vmul.f32 %v3887_v49, %v3887_v49  ;;  %v5402_v8 = vpop.f32.mrb[140].mxu0 }
 0x2de   : > { %4881 = vst [vmem:[%s7461_s12 + $0x68] sm:$0xff] %v4812_v61   ;;  %v3623_v55 = vpop.f32.mrb[141].mxu0  ;;  %v3466_v5 = vadd.f32 %v5325_v63, %v7421_v52 }
 0x2df   : > { %4880 = vst [vmem:[%s7461_s12 + $0x60] sm:$0xff] %v4807_v13   ;;  %v4079_v45 = vadd.f32 %v4078_v4, %v3888_v21  ;;  %v4147_v6 = vadd.f32 %v4146_v12, %v4116_v28  ;;  %v3624_v24 = vadd.f32 %v3623_v55, %v3463_v62  ;;  %v5403_v50 = vpop.f32.mrb[142].mxu0 }
 0x2e0   : > { %v5326_v23 = vpop.f32.mrb[140].mxu1  ;;  %v3626_v7 = vpop.f32.mrb[143].mxu0 }
 0x2e1   : > { %v5327_v20 = vpop.f32.mrb[141].mxu1  ;;  %v4148_v9 = vadd.f32 %v4147_v6, %v4117_v44  ;;  %v3890_v48 = vmul.f32 %v3845_v25, %v3624_v24  ;;  %v4080_v42 = vadd.f32 %v4079_v45, %v3889_v33  ;;  %v3627_v40 = vadd.f32 %v3626_v7, %v3466_v5 }
 0x2e2   : > { %v5329_v26 = vpop.f32.mrb[142].mxu1  ;;  %v5328_v54 = vadd.f32 %v5327_v20, %v5326_v23 }
 0x2e3   : > { %v5330_v30 = vpop.f32.mrb[143].mxu1  ;;  %v4081_v52 = vadd.f32 %v4080_v42, %v3890_v48  ;;  %v4119_v51 = vmul.f32 %v3890_v48, %v3890_v48  ;;  %v4149_v1 = vadd.f32 %v4148_v9, %v4118_v60  ;;  %v3891_v46 = vmul.f32 %v3850_v3, %v3627_v40 }
 0x2e4   : > { %v3471_v58 = vadd.f32 %v5328_v54, %v7434_v41  ;;  %v5331_v34 = vadd.f32 %v5330_v30, %v5329_v26 }
 0x2e5   : > { %v4150_v19 = vadd.f32 %v4149_v1, %v4119_v51  ;;  %v4817_v10 = vpack.c.bf16 %v3891_v46, %v3890_v48  ;;  %v4082_v47 = vadd.f32 %v4081_v52, %v3891_v46  ;;  %v4120_v15 = vmul.f32 %v3891_v46, %v3891_v46 }
 0x2e6   : > { %v3632_v56 = vadd.f32 %v5402_v8, %v3471_v58  ;;  %v3474_v59 = vadd.f32 %v5331_v34, %v7437_v22 }
 0x2e7   : > { %4882 = vst [vmem:[%s7461_s12 + $0x70] sm:$0xff] %v4817_v10   ;;  %v4151_v0 = vadd.f32 %v4150_v19, %v4120_v15 }
 0x2e8   : > { %v3892_v37 = vmul.f32 %v3855_v35, %v3632_v56  ;;  %v3635_v14 = vadd.f32 %v5403_v50, %v3474_v59 }
 0x2ea   : > { %v4083_v32 = vadd.f32 %v4082_v47, %v3892_v37  ;;  %v4121_v57 = vmul.f32 %v3892_v37, %v3892_v37  ;;  %v3893_v11 = vmul.f32 %v3860_v18, %v3635_v14 }
 0x2ec   : > { %v4152_v41 = vadd.f32 %v4151_v0, %v4121_v57  ;;  %v4822_v27 = vpack.c.bf16 %v3893_v11, %v3892_v37  ;;  %v4084_v17 = vadd.f32 %v4083_v32, %v3893_v11  ;;  %v4122_v39 = vmul.f32 %v3893_v11, %v3893_v11 }
 0x2ee   : > { %4883 = vst [vmem:[%s7461_s12 + $0x78] sm:$0xff] %v4822_v27   ;;  %v4085_v38 = vrot.slane %v4084_v17, 4  ;;  %v4153_v31 = vadd.f32 %v4152_v41, %v4122_v39 }
 0x2f0   : > { %v4086_v29 = vadd.f32 %v4085_v38, %v4084_v17  ;;  %v4154_v21 = vrot.slane %v4153_v31, 4 }
 0x2f2   : > { %v4087_v22 = vrot.slane %v4086_v29, 2  ;;  %v4155_v33 = vadd.f32 %v4154_v21, %v4153_v31 }
 0x2f4   : > { %v4088_v43 = vadd.f32 %v4087_v22, %v4086_v29  ;;  %v4156_v36 = vrot.slane %v4155_v33, 2 }
 0x2f6   : > { %v4089_v16 = vrot.slane %v4088_v43, 1  ;;  %v4157_v2 = vadd.f32 %v4156_v36, %v4155_v33 }
 0x2f8   : > { %v4158_v53 = vrot.slane %v4157_v2, 1  ;;  %v4090_v49 = vadd.f32 %v4089_v16, %v4088_v43 }
 0x2fa   : > { %v4159_v61 = vadd.f32 %v4158_v53, %v4157_v2 }
 0x2fc   : > { %v4161_v63 = vsel %vm1259_vm11, %v4090_v49, %v4159_v61 }
 0x2fd   : > { %4162 = vst [vmem:[%s282_s15] sm:$0x3] %v4161_v63 }
 0x2fe PF: > { %s17_s21 = sadd.s32 1, %s5619_s21  }
 0x2ff   : > { %p14_p4 = scmp.ge.s32.totalorder %s17_s21, 4  }
 0x301   :  { %16 = sbr.rel (!%p14_p4) target bundleno = 1 (0x1), region = 86 }

</bundles_post_ra>
